<compile_context>
chip_gen: v7x
topology: tpu7x:2x2x1
jax: 0.10.0
libtpu: 0.0.40
codegen_flags: <defaults>
</compile_context>

<pallas_src>
import functools

import jax
import jax.numpy as jnp
from jax.experimental import pallas as pl
from jax.experimental.pallas import tpu as pltpu


# ---------------------------------------------------------------------------
# Fused per-stage Pallas kernel
# ---------------------------------------------------------------------------
def _stage_kernel(xs_ref, mask_ref, wd_ref, bd_ref, wc_ref, bc_ref,
                  o_ref, a_ref, *, Rp, Wp, G, cout):
    """Grid step 0: down conv (space-to-depth matmul).  Steps 1..n: 3x3 convs.

    a_ref is the padded, row-flattened activation (Rp interior rows plus G
    guard rows on each side) that stays resident in VMEM across all layers.
    """
    l = pl.program_id(0)
    last = pl.num_programs(0) - 1
    mask = mask_ref[...]                                  # (Rp, 1) f32; 0 at halo/inactive

    @pl.when(l == 0)
    def _down():
        # Guard rows are never written again; zero them once so shifted tap
        # reads (which only ever reach masked-out halo outputs) stay finite.
        a_ref[0:G, :] = jnp.zeros((G, cout), jnp.float32)
        a_ref[G + Rp:G + Rp + G, :] = jnp.zeros((G, cout), jnp.float32)
        acc = jnp.dot(xs_ref[...], wd_ref[...],
                      preferred_element_type=jnp.float32)
        y = jnp.maximum(acc + bd_ref[...], 0.0) * mask
        a_ref[G:G + Rp, :] = y

    @pl.when(l > 0)
    def _conv3():
        # im2col: tap (dh, dw) of the 3x3 stencil is the row window shifted by
        # dh*Wp + dw in the padded row-flattened image; one deep-K matmul.
        taps = []
        for dh in (-1, 0, 1):
            for dw in (-1, 0, 1):
                off = G + dh * Wp + dw
                taps.append(a_ref[off:off + Rp, :])
        patch = jnp.concatenate(taps, axis=-1).astype(jnp.bfloat16)  # (Rp, 9*cout)
        acc = jnp.dot(patch, wc_ref[0], preferred_element_type=jnp.float32)
        y = jnp.maximum(acc + bc_ref[0], 0.0) * mask
        a_ref[G:G + Rp, :] = y

    @pl.when(l == last)
    def _emit():
        o_ref[...] = a_ref[G:G + Rp, :].astype(o_ref.dtype)


def run_stage(x, mask, stage):
    """One SECOND stage: MinkowskiConvolution(k=2,s=2,expand) + n x (k=3 conv),
    each followed by BN + ReLU + active-set masking, fused in one pallas_call.
    """
    N, H, W, cin = x.shape
    assert H % 2 == 0 and W % 2 == 0
    Ho, Wo = H // 2, W // 2
    Hp, Wp = Ho + 2, Wo + 2
    Rp = N * Hp * Wp                 # padded, row-flattened activation rows
    G = Wp + 1                       # guard rows covering all 9 tap shifts
    k0 = stage["w_down"].shape[0]    # 4 * cin
    cout = stage["w_down"].shape[1]
    n_conv = stage["w_conv"].shape[0]

    # Space-to-depth (the 2x2/stride-2 conv becomes one matmul with K=4*cin),
    # zero-pad the halo, flatten rows, cast to bf16 for the MXU.
    xs = x.reshape(N, Ho, 2, Wo, 2, cin).transpose(0, 1, 3, 2, 4, 5)
    xs = xs.reshape(N, Ho, Wo, 4 * cin)
    xs = jnp.pad(xs, ((0, 0), (1, 1), (1, 1), (0, 0)))
    xs = xs.reshape(Rp, 4 * cin).astype(jnp.bfloat16)

    # Output active set of the expand_coordinates down conv = 2x2 mask max-pool.
    m_out = mask.reshape(N, Ho, 2, Wo, 2).max(axis=(2, 4))          # (N,Ho,Wo)
    m_pad = jnp.pad(m_out, ((0, 0), (1, 1), (1, 1)))
    m_pad = m_pad.reshape(Rp, 1).astype(jnp.float32)

    kern = functools.partial(_stage_kernel, Rp=Rp, Wp=Wp, G=G, cout=cout)
    out = pl.pallas_call(
        kern,
        out_shape=jax.ShapeDtypeStruct((Rp, cout), jnp.float32),
        grid_spec=pltpu.PrefetchScalarGridSpec(
            num_scalar_prefetch=0,
            grid=(n_conv + 1,),
            in_specs=[
                pl.BlockSpec((Rp, k0), lambda l: (0, 0)),
                pl.BlockSpec((Rp, 1), lambda l: (0, 0)),
                pl.BlockSpec((k0, cout), lambda l: (0, 0)),
                pl.BlockSpec((1, cout), lambda l: (0, 0)),
                # per-layer conv weights/bias streamed by grid step (double-buffered DMA)
                pl.BlockSpec((1, 9 * cout, cout),
                             lambda l: (jnp.maximum(l - 1, 0), 0, 0)),
                pl.BlockSpec((1, 1, cout),
                             lambda l: (jnp.maximum(l - 1, 0), 0, 0)),
            ],
            out_specs=pl.BlockSpec((Rp, cout), lambda l: (0, 0)),
            scratch_shapes=[pltpu.VMEM((Rp + 2 * G, cout), jnp.float32)],
        ),
        compiler_params=pltpu.CompilerParams(
            dimension_semantics=("arbitrary",)),   # layer axis is sequential
    )(xs, m_pad, stage["w_down"], stage["b_down"],
      stage["w_conv"], stage["b_conv"])

    out = out.reshape(N, Hp, Wp, cout)[:, 1:-1, 1:-1, :]
    return out, m_out


# ---------------------------------------------------------------------------
# Parameters: raw init (mirrors the PyTorch module) + folding/packing
# ---------------------------------------------------------------------------
def init_params(key, in_channels, out_channels, layer_nums):
    in_filters = [in_channels] + list(out_channels[:-1])
    params = []
    for i, n_layers in enumerate(layer_nums):
        cin, cout = in_filters[i], out_channels[i]
        key, k1, k2, k3 = jax.random.split(key, 4)
        stage = {
            "down_w": jax.random.normal(k1, (4, cin, cout), jnp.float32)
                      * (1.0 / float(jnp.sqrt(4.0 * cin))),
            "down_gamma": 1.0 + 0.1 * jax.random.normal(k2, (cout,), jnp.float32),
            "down_beta": 0.1 * jax.random.normal(k3, (cout,), jnp.float32),
            "convs": [],
        }
        for _ in range(n_layers):
            key, k1, k2, k3 = jax.random.split(key, 4)
            stage["convs"].append({
                "w": jax.random.normal(k1, (9, cout, cout), jnp.float32)
                     * (1.0 / float(jnp.sqrt(9.0 * cout))),
                "gamma": 1.0 + 0.1 * jax.random.normal(k2, (cout,), jnp.float32),
                "beta": 0.1 * jax.random.normal(k3, (cout,), jnp.float32),
            })
        params.append(stage)
    return params


def prepare_params(params, eps=1e-3):
    """Fold BN (fresh-init eval semantics: running_mean=0, running_var=1) into
    the conv weights, cast MXU operands to bf16, and stack each stage's conv
    layers so they can be streamed through a grid-indexed BlockSpec."""
    # TODO(synk): training-mode MinkowskiBatchNorm would normalize over the
    # active coordinates of the batch; here the folded eval affine is used.
    prepped = []
    for stage in params:
        cin = stage["down_w"].shape[1]
        cout = stage["down_w"].shape[2]
        sd = stage["down_gamma"] / jnp.sqrt(1.0 + eps)
        wd = (stage["down_w"].reshape(4 * cin, cout) * sd).astype(jnp.bfloat16)
        bd = stage["down_beta"].reshape(1, cout).astype(jnp.float32)
        wcs, bcs = [], []
        for cv in stage["convs"]:
            sc = cv["gamma"] / jnp.sqrt(1.0 + eps)
            wcs.append((cv["w"].reshape(9 * cout, cout) * sc).astype(jnp.bfloat16))
            bcs.append(cv["beta"].reshape(1, cout).astype(jnp.float32))
        prepped.append({
            "w_down": wd,                 # (4*cin, cout) bf16, BN-scale folded
            "b_down": bd,                 # (1, cout) f32
            "w_conv": jnp.stack(wcs),     # (n_layers, 9*cout, cout) bf16
            "b_conv": jnp.stack(bcs),     # (n_layers, 1, cout) f32
        })
    return prepped


# ---------------------------------------------------------------------------
# Forward
# ---------------------------------------------------------------------------
def sparse_second_forward(x_nchw, mask, params, layer_strides):
    """Returns (input_shape, layer_strides, multi-scale outputs) like the
    PyTorch module; each output is (dense NHWC features, active mask)."""
    input_shape = tuple(x_nchw.shape)
    x = jnp.transpose(x_nchw, (0, 2, 3, 1)) * mask[..., None]   # NCHW -> NHWC
    outs = []
    for stage, stride in zip(params, layer_strides):
        assert stride == 2, "space-to-depth downsample kernel assumes stride 2"
        x, mask = run_stage(x, mask, stage)
        outs.append((x, mask))
    return input_shape, tuple(layer_strides), tuple(outs)


# ---------------------------------------------------------------------------
if __name__ == "__main__":
    key = jax.random.PRNGKey(0)
    N, C, H, W = 2, 64, 16, 16        # module default in_channels=64
    k_vals, k_mask, k_par = jax.random.split(key, 3)

    # Emulated sparse input: dense NCHW values + ~30% active voxel mask
    x = jax.random.normal(k_vals, (N, C, H, W), jnp.float32)
    mask = (jax.random.uniform(k_mask, (N, H, W)) < 0.3).astype(jnp.float32)

    raw = init_params(k_par, in_channels=64,
                      out_channels=[64, 128, 256], layer_nums=[3, 5, 5])
    params = prepare_params(raw)

    fwd = jax.jit(functools.partial(sparse_second_forward,
                                    layer_strides=(2, 2, 2)))
    input_shape, strides, outs = fwd(x, mask, params)
    jax.block_until_ready(outs)

    # expected multi-scale shapes: (2,8,8,64), (2,4,4,128), (2,2,2,256)
    assert outs[0][0].shape == (2, 8, 8, 64)
    assert outs[1][0].shape == (2, 4, 4, 128)
    assert outs[2][0].shape == (2, 2, 2, 256)
    print("KERNEL_OK")
</pallas_src>

<mosaic_0001>
module attributes {stable_mosaic.version = 11 : i64} {
  func.func @_stage_kernel(%arg0: i32, %arg1: memref<200x256xbf16, #tpu.memory_space<vmem>>, %arg2: memref<200x1xf32, #tpu.memory_space<vmem>>, %arg3: memref<256x64xbf16, #tpu.memory_space<vmem>>, %arg4: memref<1x64xf32, #tpu.memory_space<vmem>>, %arg5: memref<1x576x64xbf16, #tpu.memory_space<vmem>>, %arg6: memref<1x1x64xf32, #tpu.memory_space<vmem>>, %arg7: memref<200x64xf32, #tpu.memory_space<vmem>>, %arg8: memref<222x64xf32, #tpu.memory_space<vmem>>) attributes {dimension_semantics = [#tpu.dimension_semantics<arbitrary>], iteration_bounds = array<i64: 4>, scalar_prefetch = 0 : i64, scratch_operands = 1 : i64, tpu.core_type = #tpu.core_type<tc>, window_params = [{pipeline_mode = #tpu.pipeline_mode<synchronous>, transform_indices = @transform_0, window_bounds = array<i64: 200, 256>}, {pipeline_mode = #tpu.pipeline_mode<synchronous>, transform_indices = @transform_1, window_bounds = array<i64: 200, 1>}, {pipeline_mode = #tpu.pipeline_mode<synchronous>, transform_indices = @transform_2, window_bounds = array<i64: 256, 64>}, {pipeline_mode = #tpu.pipeline_mode<synchronous>, transform_indices = @transform_3, window_bounds = array<i64: 1, 64>}, {transform_indices = @transform_4, window_bounds = array<i64: 1, 576, 64>}, {transform_indices = @transform_5, window_bounds = array<i64: 1, 1, 64>}, {pipeline_mode = #tpu.pipeline_mode<synchronous>, transform_indices = @transform_6, window_bounds = array<i64: 200, 64>}]} {
    %c0 = arith.constant 0 : index
    %c0_0 = arith.constant 0 : index
    %0 = vector.load %arg2[%c0, %c0_0] : memref<200x1xf32, #tpu.memory_space<vmem>>, vector<200x1xf32>
    %c0_i32 = arith.constant 0 : i32
    %1 = arith.cmpi eq, %arg0, %c0_i32 : i32
    %2 = arith.extui %1 : i1 to i32
    %c0_i32_1 = arith.constant 0 : i32
    %3 = arith.cmpi ne, %2, %c0_i32_1 : i32
    scf.if %3 {
      %cst = arith.constant 0.000000e+00 : f32
      %10 = vector.broadcast %cst : f32 to vector<11x64xf32>
      %c0_5 = arith.constant 0 : index
      %c0_6 = arith.constant 0 : index
      %11 = vector.load %arg8[%c0_5, %c0_6] : memref<222x64xf32, #tpu.memory_space<vmem>>, vector<11x64xf32>
      tpu.vector_store %arg8[%c0_5, %c0_6], %10 {strides = array<i32>} : memref<222x64xf32, #tpu.memory_space<vmem>>, vector<11x64xf32>,
      %cst_7 = arith.constant 0.000000e+00 : f32
      %12 = vector.broadcast %cst_7 : f32 to vector<11x64xf32>
      %c211 = arith.constant 211 : index
      %c0_8 = arith.constant 0 : index
      %13 = vector.load %arg8[%c211, %c0_8] : memref<222x64xf32, #tpu.memory_space<vmem>>, vector<11x64xf32>
      tpu.vector_store %arg8[%c211, %c0_8], %12 {strides = array<i32>} : memref<222x64xf32, #tpu.memory_space<vmem>>, vector<11x64xf32>,
      %c0_9 = arith.constant 0 : index
      %c0_10 = arith.constant 0 : index
      %14 = vector.load %arg1[%c0_9, %c0_10] : memref<200x256xbf16, #tpu.memory_space<vmem>>, vector<200x256xbf16>
      %c0_11 = arith.constant 0 : index
      %c0_12 = arith.constant 0 : index
      %15 = vector.load %arg3[%c0_11, %c0_12] : memref<256x64xbf16, #tpu.memory_space<vmem>>, vector<256x64xbf16>
      %cst_13 = arith.constant dense<0.000000e+00> : vector<200x64xf32>
      %16 = tpu.matmul %14, %15, %cst_13 {dimension_numbers = #tpu.dot_dimension_numbers<[1], [0], [0], [1], [0, 0, 1, 1], [], []>} : vector<200x256xbf16>, vector<256x64xbf16>, vector<200x64xf32> -> vector<200x64xf32>
      %c0_14 = arith.constant 0 : index
      %c0_15 = arith.constant 0 : index
      %17 = vector.load %arg4[%c0_14, %c0_15] : memref<1x64xf32, #tpu.memory_space<vmem>>, vector<1x64xf32>
      %18 = vector.broadcast %17 : vector<1x64xf32> to vector<200x64xf32>
      %19 = arith.addf %16, %18 : vector<200x64xf32>
      %cst_16 = arith.constant 0.000000e+00 : f32
      %20 = vector.broadcast %cst_16 : f32 to vector<200x64xf32>
      %21 = arith.maximumf %19, %20 : vector<200x64xf32>
      %22 = vector.broadcast %0 : vector<200x1xf32> to vector<200x64xf32>
      %23 = arith.mulf %21, %22 : vector<200x64xf32>
      %c11 = arith.constant 11 : index
      %c0_17 = arith.constant 0 : index
      %24 = vector.load %arg8[%c11, %c0_17] : memref<222x64xf32, #tpu.memory_space<vmem>>, vector<200x64xf32>
      tpu.vector_store %arg8[%c11, %c0_17], %23 {strides = array<i32>} : memref<222x64xf32, #tpu.memory_space<vmem>>, vector<200x64xf32>,
    } else {
    }
    %c0_i32_2 = arith.constant 0 : i32
    %4 = arith.cmpi sgt, %arg0, %c0_i32_2 : i32
    %5 = arith.extui %4 : i1 to i32
    %c0_i32_3 = arith.constant 0 : i32
    %6 = arith.cmpi ne, %5, %c0_i32_3 : i32
    scf.if %6 {
      %c0_5 = arith.constant 0 : index
      %c0_6 = arith.constant 0 : index
      %10 = vector.load %arg8[%c0_5, %c0_6] : memref<222x64xf32, #tpu.memory_space<vmem>>, vector<200x64xf32>
      %c1 = arith.constant 1 : index
      %c0_7 = arith.constant 0 : index
      %11 = vector.load %arg8[%c1, %c0_7] : memref<222x64xf32, #tpu.memory_space<vmem>>, vector<200x64xf32>
      %c2 = arith.constant 2 : index
      %c0_8 = arith.constant 0 : index
      %12 = vector.load %arg8[%c2, %c0_8] : memref<222x64xf32, #tpu.memory_space<vmem>>, vector<200x64xf32>
      %c10 = arith.constant 10 : index
      %c0_9 = arith.constant 0 : index
      %13 = vector.load %arg8[%c10, %c0_9] : memref<222x64xf32, #tpu.memory_space<vmem>>, vector<200x64xf32>
      %c11 = arith.constant 11 : index
      %c0_10 = arith.constant 0 : index
      %14 = vector.load %arg8[%c11, %c0_10] : memref<222x64xf32, #tpu.memory_space<vmem>>, vector<200x64xf32>
      %c12 = arith.constant 12 : index
      %c0_11 = arith.constant 0 : index
      %15 = vector.load %arg8[%c12, %c0_11] : memref<222x64xf32, #tpu.memory_space<vmem>>, vector<200x64xf32>
      %c20 = arith.constant 20 : index
      %c0_12 = arith.constant 0 : index
      %16 = vector.load %arg8[%c20, %c0_12] : memref<222x64xf32, #tpu.memory_space<vmem>>, vector<200x64xf32>
      %c21 = arith.constant 21 : index
      %c0_13 = arith.constant 0 : index
      %17 = vector.load %arg8[%c21, %c0_13] : memref<222x64xf32, #tpu.memory_space<vmem>>, vector<200x64xf32>
      %c22 = arith.constant 22 : index
      %c0_14 = arith.constant 0 : index
      %18 = vector.load %arg8[%c22, %c0_14] : memref<222x64xf32, #tpu.memory_space<vmem>>, vector<200x64xf32>
      %19 = tpu.concatenate %10, %11, %12, %13, %14, %15, %16, %17, %18 in 1 : vector<200x64xf32>, vector<200x64xf32>, vector<200x64xf32>, vector<200x64xf32>, vector<200x64xf32>, vector<200x64xf32>, vector<200x64xf32>, vector<200x64xf32>, vector<200x64xf32> -> vector<200x576xf32>
      %20 = arith.truncf %19 : vector<200x576xf32> to vector<200x576xbf16>
      %c0_15 = arith.constant 0 : index
      %c0_16 = arith.constant 0 : index
      %c0_17 = arith.constant 0 : index
      %21 = vector.load %arg5[%c0_15, %c0_16, %c0_17] : memref<1x576x64xbf16, #tpu.memory_space<vmem>>, vector<1x576x64xbf16>
      %22 = vector.shape_cast %21 : vector<1x576x64xbf16> to vector<576x64xbf16>
      %cst = arith.constant dense<0.000000e+00> : vector<200x64xf32>
      %23 = tpu.matmul %20, %22, %cst {dimension_numbers = #tpu.dot_dimension_numbers<[1], [0], [0], [1], [0, 0, 1, 1], [], []>} : vector<200x576xbf16>, vector<576x64xbf16>, vector<200x64xf32> -> vector<200x64xf32>
      %c0_18 = arith.constant 0 : index
      %c0_19 = arith.constant 0 : index
      %c0_20 = arith.constant 0 : index
      %24 = vector.load %arg6[%c0_18, %c0_19, %c0_20] : memref<1x1x64xf32, #tpu.memory_space<vmem>>, vector<1x1x64xf32>
      %25 = vector.shape_cast %24 : vector<1x1x64xf32> to vector<1x64xf32>
      %26 = vector.broadcast %25 : vector<1x64xf32> to vector<200x64xf32>
      %27 = arith.addf %23, %26 : vector<200x64xf32>
      %cst_21 = arith.constant 0.000000e+00 : f32
      %28 = vector.broadcast %cst_21 : f32 to vector<200x64xf32>
      %29 = arith.maximumf %27, %28 : vector<200x64xf32>
      %30 = vector.broadcast %0 : vector<200x1xf32> to vector<200x64xf32>
      %31 = arith.mulf %29, %30 : vector<200x64xf32>
      %c11_22 = arith.constant 11 : index
      %c0_23 = arith.constant 0 : index
      %32 = vector.load %arg8[%c11_22, %c0_23] : memref<222x64xf32, #tpu.memory_space<vmem>>, vector<200x64xf32>
      tpu.vector_store %arg8[%c11_22, %c0_23], %31 {strides = array<i32>} : memref<222x64xf32, #tpu.memory_space<vmem>>, vector<200x64xf32>,
    } else {
    }
    %c3_i32 = arith.constant 3 : i32
    %7 = arith.cmpi eq, %arg0, %c3_i32 : i32
    %8 = arith.extui %7 : i1 to i32
    %c0_i32_4 = arith.constant 0 : i32
    %9 = arith.cmpi ne, %8, %c0_i32_4 : i32
    scf.if %9 {
      %c11 = arith.constant 11 : index
      %c0_5 = arith.constant 0 : index
      %10 = vector.load %arg8[%c11, %c0_5] : memref<222x64xf32, #tpu.memory_space<vmem>>, vector<200x64xf32>
      %c0_6 = arith.constant 0 : index
      %c0_7 = arith.constant 0 : index
      %11 = vector.load %arg7[%c0_6, %c0_7] : memref<200x64xf32, #tpu.memory_space<vmem>>, vector<200x64xf32>
      tpu.vector_store %arg7[%c0_6, %c0_7], %10 {strides = array<i32>} : memref<200x64xf32, #tpu.memory_space<vmem>>, vector<200x64xf32>,
    } else {
    }
    return
  }
  func.func @transform_0(%arg0: i32) -> (i32, i32) {
    %c0_i32 = arith.constant 0 : i32
    %c0_i32_0 = arith.constant 0 : i32
    %c0_i32_1 = arith.constant 0 : i32
    return %c0_i32, %c0_i32_0 : i32, i32
  }
  func.func @transform_1(%arg0: i32) -> (i32, i32) {
    %c0_i32 = arith.constant 0 : i32
    %c0_i32_0 = arith.constant 0 : i32
    %c0_i32_1 = arith.constant 0 : i32
    return %c0_i32, %c0_i32_0 : i32, i32
  }
  func.func @transform_2(%arg0: i32) -> (i32, i32) {
    %c0_i32 = arith.constant 0 : i32
    %c0_i32_0 = arith.constant 0 : i32
    %c0_i32_1 = arith.constant 0 : i32
    return %c0_i32, %c0_i32_0 : i32, i32
  }
  func.func @transform_3(%arg0: i32) -> (i32, i32) {
    %c0_i32 = arith.constant 0 : i32
    %c0_i32_0 = arith.constant 0 : i32
    %c0_i32_1 = arith.constant 0 : i32
    return %c0_i32, %c0_i32_0 : i32, i32
  }
  func.func @transform_4(%arg0: i32) -> (i32, i32, i32) {
    %c1_i32 = arith.constant 1 : i32
    %0 = arith.subi %arg0, %c1_i32 : i32
    %c0_i32 = arith.constant 0 : i32
    %1 = arith.maxsi %0, %c0_i32 : i32
    %c0_i32_0 = arith.constant 0 : i32
    %c0_i32_1 = arith.constant 0 : i32
    %c0_i32_2 = arith.constant 0 : i32
    return %1, %c0_i32_0, %c0_i32_1 : i32, i32, i32
  }
  func.func @transform_5(%arg0: i32) -> (i32, i32, i32) {
    %c1_i32 = arith.constant 1 : i32
    %0 = arith.subi %arg0, %c1_i32 : i32
    %c0_i32 = arith.constant 0 : i32
    %1 = arith.maxsi %0, %c0_i32 : i32
    %c0_i32_0 = arith.constant 0 : i32
    %c0_i32_1 = arith.constant 0 : i32
    %c0_i32_2 = arith.constant 0 : i32
    return %1, %c0_i32_0, %c0_i32_1 : i32, i32, i32
  }
  func.func @transform_6(%arg0: i32) -> (i32, i32) {
    %c0_i32 = arith.constant 0 : i32
    %c0_i32_0 = arith.constant 0 : i32
    %c0_i32_1 = arith.constant 0 : i32
    return %c0_i32, %c0_i32_0 : i32, i32
  }
}

module attributes {stable_mosaic.version = 11 : i64} {
  func.func @_stage_kernel(%arg0: i32, %arg1: memref<72x256xbf16, #tpu.memory_space<vmem>>, %arg2: memref<72x1xf32, #tpu.memory_space<vmem>>, %arg3: memref<256x128xbf16, #tpu.memory_space<vmem>>, %arg4: memref<1x128xf32, #tpu.memory_space<vmem>>, %arg5: memref<1x1152x128xbf16, #tpu.memory_space<vmem>>, %arg6: memref<1x1x128xf32, #tpu.memory_space<vmem>>, %arg7: memref<72x128xf32, #tpu.memory_space<vmem>>, %arg8: memref<86x128xf32, #tpu.memory_space<vmem>>) attributes {dimension_semantics = [#tpu.dimension_semantics<arbitrary>], iteration_bounds = array<i64: 6>, scalar_prefetch = 0 : i64, scratch_operands = 1 : i64, tpu.core_type = #tpu.core_type<tc>, window_params = [{pipeline_mode = #tpu.pipeline_mode<synchronous>, transform_indices = @transform_0, window_bounds = array<i64: 72, 256>}, {pipeline_mode = #tpu.pipeline_mode<synchronous>, transform_indices = @transform_1, window_bounds = array<i64: 72, 1>}, {pipeline_mode = #tpu.pipeline_mode<synchronous>, transform_indices = @transform_2, window_bounds = array<i64: 256, 128>}, {pipeline_mode = #tpu.pipeline_mode<synchronous>, transform_indices = @transform_3, window_bounds = array<i64: 1, 128>}, {transform_indices = @transform_4, window_bounds = array<i64: 1, 1152, 128>}, {transform_indices = @transform_5, window_bounds = array<i64: 1, 1, 128>}, {pipeline_mode = #tpu.pipeline_mode<synchronous>, transform_indices = @transform_6, window_bounds = array<i64: 72, 128>}]} {
    %c0 = arith.constant 0 : index
    %c0_0 = arith.constant 0 : index
    %0 = vector.load %arg2[%c0, %c0_0] : memref<72x1xf32, #tpu.memory_space<vmem>>, vector<72x1xf32>
    %c0_i32 = arith.constant 0 : i32
    %1 = arith.cmpi eq, %arg0, %c0_i32 : i32
    %2 = arith.extui %1 : i1 to i32
    %c0_i32_1 = arith.constant 0 : i32
    %3 = arith.cmpi ne, %2, %c0_i32_1 : i32
    scf.if %3 {
      %cst = arith.constant 0.000000e+00 : f32
      %10 = vector.broadcast %cst : f32 to vector<7x128xf32>
      %c0_5 = arith.constant 0 : index
      %c0_6 = arith.constant 0 : index
      %11 = vector.load %arg8[%c0_5, %c0_6] : memref<86x128xf32, #tpu.memory_space<vmem>>, vector<7x128xf32>
      tpu.vector_store %arg8[%c0_5, %c0_6], %10 {strides = array<i32>} : memref<86x128xf32, #tpu.memory_space<vmem>>, vector<7x128xf32>,
      %cst_7 = arith.constant 0.000000e+00 : f32
      %12 = vector.broadcast %cst_7 : f32 to vector<7x128xf32>
      %c79 = arith.constant 79 : index
      %c0_8 = arith.constant 0 : index
      %13 = vector.load %arg8[%c79, %c0_8] : memref<86x128xf32, #tpu.memory_space<vmem>>, vector<7x128xf32>
      tpu.vector_store %arg8[%c79, %c0_8], %12 {strides = array<i32>} : memref<86x128xf32, #tpu.memory_space<vmem>>, vector<7x128xf32>,
      %c0_9 = arith.constant 0 : index
      %c0_10 = arith.constant 0 : index
      %14 = vector.load %arg1[%c0_9, %c0_10] : memref<72x256xbf16, #tpu.memory_space<vmem>>, vector<72x256xbf16>
      %c0_11 = arith.constant 0 : index
      %c0_12 = arith.constant 0 : index
      %15 = vector.load %arg3[%c0_11, %c0_12] : memref<256x128xbf16, #tpu.memory_space<vmem>>, vector<256x128xbf16>
      %cst_13 = arith.constant dense<0.000000e+00> : vector<72x128xf32>
      %16 = tpu.matmul %14, %15, %cst_13 {dimension_numbers = #tpu.dot_dimension_numbers<[1], [0], [0], [1], [0, 0, 1, 1], [], []>} : vector<72x256xbf16>, vector<256x128xbf16>, vector<72x128xf32> -> vector<72x128xf32>
      %c0_14 = arith.constant 0 : index
      %c0_15 = arith.constant 0 : index
      %17 = vector.load %arg4[%c0_14, %c0_15] : memref<1x128xf32, #tpu.memory_space<vmem>>, vector<1x128xf32>
      %18 = vector.broadcast %17 : vector<1x128xf32> to vector<72x128xf32>
      %19 = arith.addf %16, %18 : vector<72x128xf32>
      %cst_16 = arith.constant 0.000000e+00 : f32
      %20 = vector.broadcast %cst_16 : f32 to vector<72x128xf32>
      %21 = arith.maximumf %19, %20 : vector<72x128xf32>
      %22 = vector.broadcast %0 : vector<72x1xf32> to vector<72x128xf32>
      %23 = arith.mulf %21, %22 : vector<72x128xf32>
      %c7 = arith.constant 7 : index
      %c0_17 = arith.constant 0 : index
      %24 = vector.load %arg8[%c7, %c0_17] : memref<86x128xf32, #tpu.memory_space<vmem>>, vector<72x128xf32>
      tpu.vector_store %arg8[%c7, %c0_17], %23 {strides = array<i32>} : memref<86x128xf32, #tpu.memory_space<vmem>>, vector<72x128xf32>,
    } else {
    }
    %c0_i32_2 = arith.constant 0 : i32
    %4 = arith.cmpi sgt, %arg0, %c0_i32_2 : i32
    %5 = arith.extui %4 : i1 to i32
    %c0_i32_3 = arith.constant 0 : i32
    %6 = arith.cmpi ne, %5, %c0_i32_3 : i32
    scf.if %6 {
      %c0_5 = arith.constant 0 : index
      %c0_6 = arith.constant 0 : index
      %10 = vector.load %arg8[%c0_5, %c0_6] : memref<86x128xf32, #tpu.memory_space<vmem>>, vector<72x128xf32>
      %c1 = arith.constant 1 : index
      %c0_7 = arith.constant 0 : index
      %11 = vector.load %arg8[%c1, %c0_7] : memref<86x128xf32, #tpu.memory_space<vmem>>, vector<72x128xf32>
      %c2 = arith.constant 2 : index
      %c0_8 = arith.constant 0 : index
      %12 = vector.load %arg8[%c2, %c0_8] : memref<86x128xf32, #tpu.memory_space<vmem>>, vector<72x128xf32>
      %c6 = arith.constant 6 : index
      %c0_9 = arith.constant 0 : index
      %13 = vector.load %arg8[%c6, %c0_9] : memref<86x128xf32, #tpu.memory_space<vmem>>, vector<72x128xf32>
      %c7 = arith.constant 7 : index
      %c0_10 = arith.constant 0 : index
      %14 = vector.load %arg8[%c7, %c0_10] : memref<86x128xf32, #tpu.memory_space<vmem>>, vector<72x128xf32>
      %c8 = arith.constant 8 : index
      %c0_11 = arith.constant 0 : index
      %15 = vector.load %arg8[%c8, %c0_11] : memref<86x128xf32, #tpu.memory_space<vmem>>, vector<72x128xf32>
      %c12 = arith.constant 12 : index
      %c0_12 = arith.constant 0 : index
      %16 = vector.load %arg8[%c12, %c0_12] : memref<86x128xf32, #tpu.memory_space<vmem>>, vector<72x128xf32>
      %c13 = arith.constant 13 : index
      %c0_13 = arith.constant 0 : index
      %17 = vector.load %arg8[%c13, %c0_13] : memref<86x128xf32, #tpu.memory_space<vmem>>, vector<72x128xf32>
      %c14 = arith.constant 14 : index
      %c0_14 = arith.constant 0 : index
      %18 = vector.load %arg8[%c14, %c0_14] : memref<86x128xf32, #tpu.memory_space<vmem>>, vector<72x128xf32>
      %19 = tpu.concatenate %10, %11, %12, %13, %14, %15, %16, %17, %18 in 1 : vector<72x128xf32>, vector<72x128xf32>, vector<72x128xf32>, vector<72x128xf32>, vector<72x128xf32>, vector<72x128xf32>, vector<72x128xf32>, vector<72x128xf32>, vector<72x128xf32> -> vector<72x1152xf32>
      %20 = arith.truncf %19 : vector<72x1152xf32> to vector<72x1152xbf16>
      %c0_15 = arith.constant 0 : index
      %c0_16 = arith.constant 0 : index
      %c0_17 = arith.constant 0 : index
      %21 = vector.load %arg5[%c0_15, %c0_16, %c0_17] : memref<1x1152x128xbf16, #tpu.memory_space<vmem>>, vector<1x1152x128xbf16>
      %22 = vector.shape_cast %21 : vector<1x1152x128xbf16> to vector<1152x128xbf16>
      %cst = arith.constant dense<0.000000e+00> : vector<72x128xf32>
      %23 = tpu.matmul %20, %22, %cst {dimension_numbers = #tpu.dot_dimension_numbers<[1], [0], [0], [1], [0, 0, 1, 1], [], []>} : vector<72x1152xbf16>, vector<1152x128xbf16>, vector<72x128xf32> -> vector<72x128xf32>
      %c0_18 = arith.constant 0 : index
      %c0_19 = arith.constant 0 : index
      %c0_20 = arith.constant 0 : index
      %24 = vector.load %arg6[%c0_18, %c0_19, %c0_20] : memref<1x1x128xf32, #tpu.memory_space<vmem>>, vector<1x1x128xf32>
      %25 = vector.shape_cast %24 : vector<1x1x128xf32> to vector<1x128xf32>
      %26 = vector.broadcast %25 : vector<1x128xf32> to vector<72x128xf32>
      %27 = arith.addf %23, %26 : vector<72x128xf32>
      %cst_21 = arith.constant 0.000000e+00 : f32
      %28 = vector.broadcast %cst_21 : f32 to vector<72x128xf32>
      %29 = arith.maximumf %27, %28 : vector<72x128xf32>
      %30 = vector.broadcast %0 : vector<72x1xf32> to vector<72x128xf32>
      %31 = arith.mulf %29, %30 : vector<72x128xf32>
      %c7_22 = arith.constant 7 : index
      %c0_23 = arith.constant 0 : index
      %32 = vector.load %arg8[%c7_22, %c0_23] : memref<86x128xf32, #tpu.memory_space<vmem>>, vector<72x128xf32>
      tpu.vector_store %arg8[%c7_22, %c0_23], %31 {strides = array<i32>} : memref<86x128xf32, #tpu.memory_space<vmem>>, vector<72x128xf32>,
    } else {
    }
    %c5_i32 = arith.constant 5 : i32
    %7 = arith.cmpi eq, %arg0, %c5_i32 : i32
    %8 = arith.extui %7 : i1 to i32
    %c0_i32_4 = arith.constant 0 : i32
    %9 = arith.cmpi ne, %8, %c0_i32_4 : i32
    scf.if %9 {
      %c7 = arith.constant 7 : index
      %c0_5 = arith.constant 0 : index
      %10 = vector.load %arg8[%c7, %c0_5] : memref<86x128xf32, #tpu.memory_space<vmem>>, vector<72x128xf32>
      %c0_6 = arith.constant 0 : index
      %c0_7 = arith.constant 0 : index
      %11 = vector.load %arg7[%c0_6, %c0_7] : memref<72x128xf32, #tpu.memory_space<vmem>>, vector<72x128xf32>
      tpu.vector_store %arg7[%c0_6, %c0_7], %10 {strides = array<i32>} : memref<72x128xf32, #tpu.memory_space<vmem>>, vector<72x128xf32>,
    } else {
    }
    return
  }
  func.func @transform_0(%arg0: i32) -> (i32, i32) {
    %c0_i32 = arith.constant 0 : i32
    %c0_i32_0 = arith.constant 0 : i32
    %c0_i32_1 = arith.constant 0 : i32
    return %c0_i32, %c0_i32_0 : i32, i32
  }
  func.func @transform_1(%arg0: i32) -> (i32, i32) {
    %c0_i32 = arith.constant 0 : i32
    %c0_i32_0 = arith.constant 0 : i32
    %c0_i32_1 = arith.constant 0 : i32
    return %c0_i32, %c0_i32_0 : i32, i32
  }
  func.func @transform_2(%arg0: i32) -> (i32, i32) {
    %c0_i32 = arith.constant 0 : i32
    %c0_i32_0 = arith.constant 0 : i32
    %c0_i32_1 = arith.constant 0 : i32
    return %c0_i32, %c0_i32_0 : i32, i32
  }
  func.func @transform_3(%arg0: i32) -> (i32, i32) {
    %c0_i32 = arith.constant 0 : i32
    %c0_i32_0 = arith.constant 0 : i32
    %c0_i32_1 = arith.constant 0 : i32
    return %c0_i32, %c0_i32_0 : i32, i32
  }
  func.func @transform_4(%arg0: i32) -> (i32, i32, i32) {
    %c1_i32 = arith.constant 1 : i32
    %0 = arith.subi %arg0, %c1_i32 : i32
    %c0_i32 = arith.constant 0 : i32
    %1 = arith.maxsi %0, %c0_i32 : i32
    %c0_i32_0 = arith.constant 0 : i32
    %c0_i32_1 = arith.constant 0 : i32
    %c0_i32_2 = arith.constant 0 : i32
    return %1, %c0_i32_0, %c0_i32_1 : i32, i32, i32
  }
  func.func @transform_5(%arg0: i32) -> (i32, i32, i32) {
    %c1_i32 = arith.constant 1 : i32
    %0 = arith.subi %arg0, %c1_i32 : i32
    %c0_i32 = arith.constant 0 : i32
    %1 = arith.maxsi %0, %c0_i32 : i32
    %c0_i32_0 = arith.constant 0 : i32
    %c0_i32_1 = arith.constant 0 : i32
    %c0_i32_2 = arith.constant 0 : i32
    return %1, %c0_i32_0, %c0_i32_1 : i32, i32, i32
  }
  func.func @transform_6(%arg0: i32) -> (i32, i32) {
    %c0_i32 = arith.constant 0 : i32
    %c0_i32_0 = arith.constant 0 : i32
    %c0_i32_1 = arith.constant 0 : i32
    return %c0_i32, %c0_i32_0 : i32, i32
  }
}

module attributes {stable_mosaic.version = 11 : i64} {
  func.func @_stage_kernel(%arg0: i32, %arg1: memref<32x512xbf16, #tpu.memory_space<vmem>>, %arg2: memref<32x1xf32, #tpu.memory_space<vmem>>, %arg3: memref<512x256xbf16, #tpu.memory_space<vmem>>, %arg4: memref<1x256xf32, #tpu.memory_space<vmem>>, %arg5: memref<1x2304x256xbf16, #tpu.memory_space<vmem>>, %arg6: memref<1x1x256xf32, #tpu.memory_space<vmem>>, %arg7: memref<32x256xf32, #tpu.memory_space<vmem>>, %arg8: memref<42x256xf32, #tpu.memory_space<vmem>>) attributes {dimension_semantics = [#tpu.dimension_semantics<arbitrary>], iteration_bounds = array<i64: 6>, scalar_prefetch = 0 : i64, scratch_operands = 1 : i64, tpu.core_type = #tpu.core_type<tc>, window_params = [{pipeline_mode = #tpu.pipeline_mode<synchronous>, transform_indices = @transform_0, window_bounds = array<i64: 32, 512>}, {pipeline_mode = #tpu.pipeline_mode<synchronous>, transform_indices = @transform_1, window_bounds = array<i64: 32, 1>}, {pipeline_mode = #tpu.pipeline_mode<synchronous>, transform_indices = @transform_2, window_bounds = array<i64: 512, 256>}, {pipeline_mode = #tpu.pipeline_mode<synchronous>, transform_indices = @transform_3, window_bounds = array<i64: 1, 256>}, {transform_indices = @transform_4, window_bounds = array<i64: 1, 2304, 256>}, {transform_indices = @transform_5, window_bounds = array<i64: 1, 1, 256>}, {pipeline_mode = #tpu.pipeline_mode<synchronous>, transform_indices = @transform_6, window_bounds = array<i64: 32, 256>}]} {
    %c0 = arith.constant 0 : index
    %c0_0 = arith.constant 0 : index
    %0 = vector.load %arg2[%c0, %c0_0] : memref<32x1xf32, #tpu.memory_space<vmem>>, vector<32x1xf32>
    %c0_i32 = arith.constant 0 : i32
    %1 = arith.cmpi eq, %arg0, %c0_i32 : i32
    %2 = arith.extui %1 : i1 to i32
    %c0_i32_1 = arith.constant 0 : i32
    %3 = arith.cmpi ne, %2, %c0_i32_1 : i32
    scf.if %3 {
      %cst = arith.constant 0.000000e+00 : f32
      %10 = vector.broadcast %cst : f32 to vector<5x256xf32>
      %c0_5 = arith.constant 0 : index
      %c0_6 = arith.constant 0 : index
      %11 = vector.load %arg8[%c0_5, %c0_6] : memref<42x256xf32, #tpu.memory_space<vmem>>, vector<5x256xf32>
      tpu.vector_store %arg8[%c0_5, %c0_6], %10 {strides = array<i32>} : memref<42x256xf32, #tpu.memory_space<vmem>>, vector<5x256xf32>,
      %cst_7 = arith.constant 0.000000e+00 : f32
      %12 = vector.broadcast %cst_7 : f32 to vector<5x256xf32>
      %c37 = arith.constant 37 : index
      %c0_8 = arith.constant 0 : index
      %13 = vector.load %arg8[%c37, %c0_8] : memref<42x256xf32, #tpu.memory_space<vmem>>, vector<5x256xf32>
      tpu.vector_store %arg8[%c37, %c0_8], %12 {strides = array<i32>} : memref<42x256xf32, #tpu.memory_space<vmem>>, vector<5x256xf32>,
      %c0_9 = arith.constant 0 : index
      %c0_10 = arith.constant 0 : index
      %14 = vector.load %arg1[%c0_9, %c0_10] : memref<32x512xbf16, #tpu.memory_space<vmem>>, vector<32x512xbf16>
      %c0_11 = arith.constant 0 : index
      %c0_12 = arith.constant 0 : index
      %15 = vector.load %arg3[%c0_11, %c0_12] : memref<512x256xbf16, #tpu.memory_space<vmem>>, vector<512x256xbf16>
      %cst_13 = arith.constant dense<0.000000e+00> : vector<32x256xf32>
      %16 = tpu.matmul %14, %15, %cst_13 {dimension_numbers = #tpu.dot_dimension_numbers<[1], [0], [0], [1], [0, 0, 1, 1], [], []>} : vector<32x512xbf16>, vector<512x256xbf16>, vector<32x256xf32> -> vector<32x256xf32>
      %c0_14 = arith.constant 0 : index
      %c0_15 = arith.constant 0 : index
      %17 = vector.load %arg4[%c0_14, %c0_15] : memref<1x256xf32, #tpu.memory_space<vmem>>, vector<1x256xf32>
      %18 = vector.broadcast %17 : vector<1x256xf32> to vector<32x256xf32>
      %19 = arith.addf %16, %18 : vector<32x256xf32>
      %cst_16 = arith.constant 0.000000e+00 : f32
      %20 = vector.broadcast %cst_16 : f32 to vector<32x256xf32>
      %21 = arith.maximumf %19, %20 : vector<32x256xf32>
      %22 = vector.broadcast %0 : vector<32x1xf32> to vector<32x256xf32>
      %23 = arith.mulf %21, %22 : vector<32x256xf32>
      %c5 = arith.constant 5 : index
      %c0_17 = arith.constant 0 : index
      %24 = vector.load %arg8[%c5, %c0_17] : memref<42x256xf32, #tpu.memory_space<vmem>>, vector<32x256xf32>
      tpu.vector_store %arg8[%c5, %c0_17], %23 {strides = array<i32>} : memref<42x256xf32, #tpu.memory_space<vmem>>, vector<32x256xf32>,
    } else {
    }
    %c0_i32_2 = arith.constant 0 : i32
    %4 = arith.cmpi sgt, %arg0, %c0_i32_2 : i32
    %5 = arith.extui %4 : i1 to i32
    %c0_i32_3 = arith.constant 0 : i32
    %6 = arith.cmpi ne, %5, %c0_i32_3 : i32
    scf.if %6 {
      %c0_5 = arith.constant 0 : index
      %c0_6 = arith.constant 0 : index
      %10 = vector.load %arg8[%c0_5, %c0_6] : memref<42x256xf32, #tpu.memory_space<vmem>>, vector<32x256xf32>
      %c1 = arith.constant 1 : index
      %c0_7 = arith.constant 0 : index
      %11 = vector.load %arg8[%c1, %c0_7] : memref<42x256xf32, #tpu.memory_space<vmem>>, vector<32x256xf32>
      %c2 = arith.constant 2 : index
      %c0_8 = arith.constant 0 : index
      %12 = vector.load %arg8[%c2, %c0_8] : memref<42x256xf32, #tpu.memory_space<vmem>>, vector<32x256xf32>
      %c4 = arith.constant 4 : index
      %c0_9 = arith.constant 0 : index
      %13 = vector.load %arg8[%c4, %c0_9] : memref<42x256xf32, #tpu.memory_space<vmem>>, vector<32x256xf32>
      %c5 = arith.constant 5 : index
      %c0_10 = arith.constant 0 : index
      %14 = vector.load %arg8[%c5, %c0_10] : memref<42x256xf32, #tpu.memory_space<vmem>>, vector<32x256xf32>
      %c6 = arith.constant 6 : index
      %c0_11 = arith.constant 0 : index
      %15 = vector.load %arg8[%c6, %c0_11] : memref<42x256xf32, #tpu.memory_space<vmem>>, vector<32x256xf32>
      %c8 = arith.constant 8 : index
      %c0_12 = arith.constant 0 : index
      %16 = vector.load %arg8[%c8, %c0_12] : memref<42x256xf32, #tpu.memory_space<vmem>>, vector<32x256xf32>
      %c9 = arith.constant 9 : index
      %c0_13 = arith.constant 0 : index
      %17 = vector.load %arg8[%c9, %c0_13] : memref<42x256xf32, #tpu.memory_space<vmem>>, vector<32x256xf32>
      %c10 = arith.constant 10 : index
      %c0_14 = arith.constant 0 : index
      %18 = vector.load %arg8[%c10, %c0_14] : memref<42x256xf32, #tpu.memory_space<vmem>>, vector<32x256xf32>
      %19 = tpu.concatenate %10, %11, %12, %13, %14, %15, %16, %17, %18 in 1 : vector<32x256xf32>, vector<32x256xf32>, vector<32x256xf32>, vector<32x256xf32>, vector<32x256xf32>, vector<32x256xf32>, vector<32x256xf32>, vector<32x256xf32>, vector<32x256xf32> -> vector<32x2304xf32>
      %20 = arith.truncf %19 : vector<32x2304xf32> to vector<32x2304xbf16>
      %c0_15 = arith.constant 0 : index
      %c0_16 = arith.constant 0 : index
      %c0_17 = arith.constant 0 : index
      %21 = vector.load %arg5[%c0_15, %c0_16, %c0_17] : memref<1x2304x256xbf16, #tpu.memory_space<vmem>>, vector<1x2304x256xbf16>
      %22 = vector.shape_cast %21 : vector<1x2304x256xbf16> to vector<2304x256xbf16>
      %cst = arith.constant dense<0.000000e+00> : vector<32x256xf32>
      %23 = tpu.matmul %20, %22, %cst {dimension_numbers = #tpu.dot_dimension_numbers<[1], [0], [0], [1], [0, 0, 1, 1], [], []>} : vector<32x2304xbf16>, vector<2304x256xbf16>, vector<32x256xf32> -> vector<32x256xf32>
      %c0_18 = arith.constant 0 : index
      %c0_19 = arith.constant 0 : index
      %c0_20 = arith.constant 0 : index
      %24 = vector.load %arg6[%c0_18, %c0_19, %c0_20] : memref<1x1x256xf32, #tpu.memory_space<vmem>>, vector<1x1x256xf32>
      %25 = vector.shape_cast %24 : vector<1x1x256xf32> to vector<1x256xf32>
      %26 = vector.broadcast %25 : vector<1x256xf32> to vector<32x256xf32>
      %27 = arith.addf %23, %26 : vector<32x256xf32>
      %cst_21 = arith.constant 0.000000e+00 : f32
      %28 = vector.broadcast %cst_21 : f32 to vector<32x256xf32>
      %29 = arith.maximumf %27, %28 : vector<32x256xf32>
      %30 = vector.broadcast %0 : vector<32x1xf32> to vector<32x256xf32>
      %31 = arith.mulf %29, %30 : vector<32x256xf32>
      %c5_22 = arith.constant 5 : index
      %c0_23 = arith.constant 0 : index
      %32 = vector.load %arg8[%c5_22, %c0_23] : memref<42x256xf32, #tpu.memory_space<vmem>>, vector<32x256xf32>
      tpu.vector_store %arg8[%c5_22, %c0_23], %31 {strides = array<i32>} : memref<42x256xf32, #tpu.memory_space<vmem>>, vector<32x256xf32>,
    } else {
    }
    %c5_i32 = arith.constant 5 : i32
    %7 = arith.cmpi eq, %arg0, %c5_i32 : i32
    %8 = arith.extui %7 : i1 to i32
    %c0_i32_4 = arith.constant 0 : i32
    %9 = arith.cmpi ne, %8, %c0_i32_4 : i32
    scf.if %9 {
      %c5 = arith.constant 5 : index
      %c0_5 = arith.constant 0 : index
      %10 = vector.load %arg8[%c5, %c0_5] : memref<42x256xf32, #tpu.memory_space<vmem>>, vector<32x256xf32>
      %c0_6 = arith.constant 0 : index
      %c0_7 = arith.constant 0 : index
      %11 = vector.load %arg7[%c0_6, %c0_7] : memref<32x256xf32, #tpu.memory_space<vmem>>, vector<32x256xf32>
      tpu.vector_store %arg7[%c0_6, %c0_7], %10 {strides = array<i32>} : memref<32x256xf32, #tpu.memory_space<vmem>>, vector<32x256xf32>,
    } else {
    }
    return
  }
  func.func @transform_0(%arg0: i32) -> (i32, i32) {
    %c0_i32 = arith.constant 0 : i32
    %c0_i32_0 = arith.constant 0 : i32
    %c0_i32_1 = arith.constant 0 : i32
    return %c0_i32, %c0_i32_0 : i32, i32
  }
  func.func @transform_1(%arg0: i32) -> (i32, i32) {
    %c0_i32 = arith.constant 0 : i32
    %c0_i32_0 = arith.constant 0 : i32
    %c0_i32_1 = arith.constant 0 : i32
    return %c0_i32, %c0_i32_0 : i32, i32
  }
  func.func @transform_2(%arg0: i32) -> (i32, i32) {
    %c0_i32 = arith.constant 0 : i32
    %c0_i32_0 = arith.constant 0 : i32
    %c0_i32_1 = arith.constant 0 : i32
    return %c0_i32, %c0_i32_0 : i32, i32
  }
  func.func @transform_3(%arg0: i32) -> (i32, i32) {
    %c0_i32 = arith.constant 0 : i32
    %c0_i32_0 = arith.constant 0 : i32
    %c0_i32_1 = arith.constant 0 : i32
    return %c0_i32, %c0_i32_0 : i32, i32
  }
  func.func @transform_4(%arg0: i32) -> (i32, i32, i32) {
    %c1_i32 = arith.constant 1 : i32
    %0 = arith.subi %arg0, %c1_i32 : i32
    %c0_i32 = arith.constant 0 : i32
    %1 = arith.maxsi %0, %c0_i32 : i32
    %c0_i32_0 = arith.constant 0 : i32
    %c0_i32_1 = arith.constant 0 : i32
    %c0_i32_2 = arith.constant 0 : i32
    return %1, %c0_i32_0, %c0_i32_1 : i32, i32, i32
  }
  func.func @transform_5(%arg0: i32) -> (i32, i32, i32) {
    %c1_i32 = arith.constant 1 : i32
    %0 = arith.subi %arg0, %c1_i32 : i32
    %c0_i32 = arith.constant 0 : i32
    %1 = arith.maxsi %0, %c0_i32 : i32
    %c0_i32_0 = arith.constant 0 : i32
    %c0_i32_1 = arith.constant 0 : i32
    %c0_i32_2 = arith.constant 0 : i32
    return %1, %c0_i32_0, %c0_i32_1 : i32, i32, i32
  }
  func.func @transform_6(%arg0: i32) -> (i32, i32) {
    %c0_i32 = arith.constant 0 : i32
    %c0_i32_0 = arith.constant 0 : i32
    %c0_i32_1 = arith.constant 0 : i32
    return %c0_i32, %c0_i32_0 : i32, i32
  }
}

</mosaic_0001>

<bundles_post_ra>
// kernel: sparse_second_forward.3
= control target key start
LH: loop header
LB: loop body
LE: loop exit
PB: predicated region body
PF: predicated region fallthrough
CT: control target
= control target key end

     0   :  { %11 = vsyncpa [#allocation4], 0  ;;  %s5026_s0 = inlined_call_operand.vmem [shape: bf16[200,256], index: 0, kind: input, shape index: {}]   ;;  %s5027_s1 = inlined_call_operand.vmem [shape: f32[200,1], index: 1, kind: input, shape index: {}]   ;;  %s5028_s2 = inlined_call_operand.vmem [shape: bf16[256,64], index: 2, kind: input, shape index: {}]   ;;  %s5029_s3 = inlined_call_operand.hbm [shape: f32[1,64], index: 3, kind: input, shape index: {}]   ;;  %s5030_s4 = inlined_call_operand.vmem [shape: bf16[3,576,64], index: 4, kind: input, shape index: {}]   ;;  %s5031_s5 = inlined_call_operand.hbm [shape: f32[3,1,64], index: 5, kind: input, shape index: {}]   ;;  %s5032_s6 = inlined_call_operand.vmem [shape: f32[200,64], index: 6, kind: output, shape index: {}]  }
   0x1   :  { %12 = vsyncpa [#allocation6], 0 }
   0x2   :  { %14 = vsyncpa [#allocation6 + $0x1], 0  ;;  %s3832_s21 = smov 0   ;;  %s3834_s22 = smov 0  }
   0x3   :  { %s3836_s23 = smov 0   ;;  %s3838_s24 = smov 0  }
   0x4 LB: > { %s3851_s25 = sadd.s32 4294967295, %s3787_s24   ;;  %p162_p0 = scmp.ne.s32.totalorder %s3779_s22, %s3775_s21  ;;  %s3787_s24 = sphi %s3838_s24, %s5141_s24   ;;  %s3783_s23 = sphi %s3836_s23, %s5140_s23   ;;  %s3779_s22 = sphi %s3834_s22, %s5139_s22   ;;  %s3775_s21 = sphi %s3832_s21, %s5138_s21  }
   0x5   : > { %p5033_p1 = scmp.eq.s32.totalorder %s3851_s25, 0  ;;  %p2785_p2 = scmp.ge.s32.totalorder %s3787_s24, 1 }
   0x6   : > { %p194_p3 = scmp.lt.s32.totalorder %s3787_s24, 5  ;;  %s3789_s28 = smov [#allocation3]  }
   0x7   : > { %p3860_p5 = por %p5033_p1, %p162_p0  ;;  %s216_s29 = sshll.u32 %s3789_s28, 4  ;;  %s217_s29 = int_to_ptr.vmem [resolvable:$true] %s216_s29 }
   0x8   : > { %p3864_p6 = pnand %p2785_p2, %p194_p3  ;;  %s3871_s30 = sadd.s32 1, %s3787_s24  }
   0x9   : > { %s5067_s26 = scalar_select %p3860_p5, 1, 0 }
   0xa   : > { %s5068_s27 = scalar_select %p3864_p6, 1, 0 }
   0xb   : > { %p3297_p7 = pneg %p3864_p6  ;;  %s2784_s8 = sadd.s32 4294967295, %s3871_s30 }
   0xc   : > { %s149_s9 = sadd.s32 1, %s3783_s23  ;;  %p3882_p10 = scmp.gt.s32.totalorder %s2784_s8, 0 }
   0xd   : > { %p3875_p8 = pnand %p3297_p7, %p5033_p1  ;;  %s3691_s13 = scalar_lea.hbm %s5029_s3, 16 }
   0xe   : > { %s5070_s10 = scalar_select %p3882_p10, 1, 0 }
   0xf   : > { %p3692_p11 = scmp.ne.s32.totalorder %s5029_s3, %s3691_s13  ;;  %p3693_p12 = pneg %p3875_p8 }
  0x10   : > { %p3698_p2 = scmp.lt.u32.totalorder %s3691_s13, %s5029_s3 }
  0x11   : > { %p3694_p13 = pnand %p3693_p12, %p3692_p11 }
  0x13   : > { %p3695_p0 = pneg %p3694_p13 }
  0x15   : > { %p3700_p3 = pnand %p3698_p2, %p3695_p0 }
  0x17   : > { %3703 = shalt.err (!%p3700_p3)
}
  0x18   : > { %s3704_s18 = scalar_lea.vmem %s217_s29, 16  ;;  %s3711_s19 = scalar_lea.vmem %s217_s29, 32 }
  0x19   : > { %p3705_p7 = scmp.ne.s32.totalorder %s217_s29, %s3704_s18  ;;  %p3712_p9 = scmp.lt.s32.totalorder %s217_s29, %s217_s29 }
  0x1a   : > { %p3713_p5 = scmp.lt.s32.totalorder %s3711_s19, %s3704_s18 }
  0x1b   : > { %p3707_p4 = pnand %p3705_p7, %p3693_p12 }
  0x1c   : > { %p3714_p6 = por %p3713_p5, %p3712_p9 }
  0x1d   : > { %p3708_p1 = pneg %p3707_p4 }
  0x1f   : > { %p3715_p10 = pnand %p3714_p6, %p3708_p1 }
  0x21   : > { %3718 = shalt.err (!%p3715_p10)
}
  0x22   : > { %3300 = dma.hbm_to_vmem [thread:$0]  (!%p3875_p8), %s5029_s3, 16, %s217_s29, [#allocation4]  }
  0x23   : > { %p5071_p4 = scmp.gt.s32.totalorder %s3851_s25, 0  ;;  %p5072_p1 = scmp.ne.s32.totalorder %s5070_s10, 0 }
  0x24   : > { %p156_p5 = scmp.ne.s32.totalorder %s3783_s23, %s3779_s22  ;;  %p157_p6 = scmp.eq.s32.totalorder %s3787_s24, 0 }
  0x25   : > { %s142_s28 = scalar_select %p5071_p4, %s3851_s25, 0 }
  0x26   : > { %s5143_s8 = smov (!%p5072_p1, %s2784_s8), 0  ;;  %p3306_p9 = scmp.lt.s32.totalorder %s3787_s24, 4 }
  0x27   : > { %s146_s7 = ssub.s32 %s142_s28, %s5143_s8  ;;  %p158_p11 = por %p157_p6, %p156_p5 }
  0x28   : > { %p147_p10 = scmp.eq.s32.totalorder %s146_s7, 0  ;;  %s241_s11 = sand.u32 1, %s3783_s23  }
  0x29   : > { %s2789_s12 = sshll.u32 %s142_s28, 4  ;;  %s244_s29 = scalar_lea.vmem [#allocation5], %s241_s11 }
  0x2a   : > { %s3915_s13 = scalar_select %p147_p10, %s3783_s23, %s149_s9  }
  0x2b   : > { %s3920_s16 = scalar_lea.hbm %s5031_s5, %s2789_s12  ;;  %s254_s10 = sshll.u32 %s244_s29, 4  ;;  %s3922_s10 = int_to_ptr.vmem [resolvable:$true] %s254_s10 }
  0x2c   : > { %p3924_p8 = pnand %p3306_p9, %p158_p11  ;;  %s242_s8 = scalar_lea.sflag [#allocation6], %s241_s11 }
  0x2d   : > { %s3719_s9 = scalar_lea.hbm %s3920_s16, 16  ;;  %s3724_s19 = scalar_lea.hbm %s5031_s5, 48 }
  0x2e   : > { %p3720_p12 = scmp.ne.s32.totalorder %s3920_s16, %s3719_s9  ;;  %p3721_p13 = pneg %p3924_p8 }
  0x2f   : > { %p3725_p3 = scmp.lt.u32.totalorder %s3920_s16, %s5031_s5  ;;  %p3726_p7 = scmp.lt.u32.totalorder %s3724_s19, %s3719_s9 }
  0x30   : > { %p3722_p0 = pnand %p3721_p13, %p3720_p12  ;;  %p3728_p1 = scmp.lt.u32.totalorder %s3719_s9, %s3920_s16 }
  0x31   : > { %p3727_p4 = por %p3726_p7, %p3725_p3 }
  0x32   : > { %p3723_p2 = pneg %p3722_p0 }
  0x33   : > { %p3729_p5 = por %p3728_p1, %p3727_p4 }
  0x35   : > { %p3730_p6 = pnand %p3729_p5, %p3723_p2 }
  0x37   : > { %3733 = shalt.err (!%p3730_p6)
}
  0x38   : > { %s3734_s28 = scalar_lea.vmem %s3922_s10, 16  ;;  %s3790_s7 = smov [#allocation5]  }
  0x39   : > { %p3735_p9 = scmp.ne.s32.totalorder %s3922_s10, %s3734_s28  ;;  %s3739_s11 = sshll.u32 %s3790_s7, 4  ;;  %s3740_s11 = int_to_ptr.vmem [resolvable:$false] %s3739_s11 }
  0x3a   : > { %s3741_s12 = scalar_lea.vmem %s3740_s11, 32  ;;  %p3742_p12 = scmp.lt.s32.totalorder %s3922_s10, %s3740_s11 }
  0x3b   : > { %p3737_p10 = pnand %p3735_p9, %p3721_p13  ;;  %p3743_p0 = scmp.lt.s32.totalorder %s3741_s12, %s3734_s28 }
  0x3d   : > { %p3738_p11 = pneg %p3737_p10  ;;  %p3744_p3 = por %p3743_p0, %p3742_p12 }
  0x3f   : > { %p3745_p7 = pnand %p3744_p3, %p3738_p11 }
  0x41   : > { %3748 = shalt.err (!%p3745_p7)
}
  0x42   : > { %3304 = dma.hbm_to_vmem [thread:$0]  (!%p3924_p8), %s3920_s16, 16, %s3922_s10, %s242_s8  }
  0x43   : > { %p5074_p2 = scmp.ne.s32.totalorder %s5068_s27, 0 }
  0x45   : > { %263 = sbr.rel (%p5074_p2) target bundleno = 920 (0x398), region = 44 }
  0x4c   : > { %p5075_p13 = scmp.eq.s32.totalorder %s3851_s25, 0 }
  0x4e   : > { %3766 = dma.done.wait (%p5075_p13), [#allocation4], 16   ;;  %p5076_p4 = pmov %p5075_p13 }
  0x4f   : > { %s269_s14 = sand.u32 1, %s3779_s22   ;;  %p5077_p1 = scmp.ne.s32.totalorder %s5067_s26, 0 }
  0x50   : > { %3768 = vsyncadd (%p5076_p4), [#allocation4], 4294967280  ;;  %s270_s15 = scalar_lea.sflag [#allocation6], %s269_s14  ;;  %s3960_s29 = scalar_lea.vmem [#allocation5], %s269_s14 }
  0x51   : > { %3770 = dma.done.wait (%p5077_p1), %s270_s15, 16  }
  0x52   : > { %3772 = vsyncadd (%p5077_p1), %s270_s15, 4294967280  ;;  %s2792_s27 = sadd.s32 4294967295, %s3851_s25  ;;  %v3970_v0 = vld [vmem:[%s5027_s1] sm:$0xff]  ;;  %v3975_v1 = vld [vmem:[%s5027_s1 + $0x8] sm:$0xff]  ;;  %p5087_p6 = scmp.ne.s32.totalorder %s3851_s25, 0 }
  0x53   : > { %p304_p8 = scmp.gt.s32.totalorder %s2792_s27, 0  ;;  %p2793_p5 = scmp.lt.s32.totalorder %s2792_s27, 2  ;;  %v3980_v2 = vld [vmem:[%s5027_s1 + $0x10] sm:$0xff]  ;;  %v3985_v3 = vld [vmem:[%s5027_s1 + $0x18] sm:$0xff]  ;;  %v3990_v4 = vld [vmem:[%s5027_s1 + $0x20] sm:$0xff]  ;;  %v3791_v27 = vmov (!%p5087_p6), 0  }
  0x54   : > { %v3995_v5 = vld [vmem:[%s5027_s1 + $0x28] sm:$0xff]  ;;  %v4000_v6 = vld [vmem:[%s5027_s1 + $0x30] sm:$0xff]  ;;  %v4005_v7 = vld [vmem:[%s5027_s1 + $0x38] sm:$0xff]  ;;  %3347 = vset.pattern.permute.xlu0 (!%p5087_p6), %v3791_v27  ;;  %3348 = vset.pattern.permute.xlu1 (!%p5087_p6), %v3791_v27  ;;  %vm347_vm0 = vcmask (!%p5087_p6), 523264   ;;  %vm349_vm1 = vcmask (!%p5087_p6), 518144  }
  0x55   : > { %s5145_s27 = smov (!%p304_p8, %s2792_s27), 0  ;;  %v4010_v8 = vld [vmem:[%s5027_s1 + $0x40] sm:$0xff]  ;;  %v4020_v9 = vld [vmem:[%s5027_s1 + $0x48] sm:$0xff]  ;;  %v4025_v10 = vld [vmem:[%s5027_s1 + $0x50] sm:$0xff]  ;;  %803 = vperm.xlu0 (!%p5087_p6), %3347, %v3970_v0   ;;  %813 = vperm.xlu1 (!%p5087_p6), %3348, %v3980_v2  }
  0x56   : > { %s5147_s27 = smov (!%p2793_p5, %s5145_s27), 2  ;;  %v4030_v11 = vld [vmem:[%s5027_s1 + $0x58] sm:$0xff]  ;;  %v4035_v12 = vld [vmem:[%s5027_s1 + $0x60] sm:$0xff]  ;;  %v4040_v13 = vld [vmem:[%s5027_s1 + $0x68] sm:$0xff]  ;;  %346 = sbr.rel (%p5087_p6) target bundleno = 397 (0x18d), region = 56 }
  0x57   : > { %s3290_s26 = smul.u32 288, %s5147_s27  ;;  %v4045_v14 = vld [vmem:[%s5027_s1 + $0x70] sm:$0xff]  ;;  %v4050_v15 = vld [vmem:[%s5027_s1 + $0x78] sm:$0xff]  ;;  %v4055_v16 = vld [vmem:[%s5027_s1 + $0x80] sm:$0xff] }
  0x58   : > { %5078 = vst [vmem:[#allocation9_spill] sm:$0xff] %v4055_v16  ;;  %v4060_v17 = vld [vmem:[%s5027_s1 + $0x88] sm:$0xff]  ;;  %v4065_v18 = vld [vmem:[%s5027_s1 + $0x90] sm:$0xff]  ;;  %v4070_v19 = vld [vmem:[%s5027_s1 + $0x98] sm:$0xff] }
  0x59   : > { %s4015_s8 = scalar_lea.vmem %s5030_s4, %s3290_s26  ;;  %5079 = vst [vmem:[#allocation10_spill] sm:$0xff] %v4060_v17  ;;  %5080 = vst [vmem:[#allocation11_spill] sm:$0xff] %v4065_v18  ;;  %v4075_v20 = vld [vmem:[%s5027_s1 + $0xa0] sm:$0xff]  ;;  %v4080_v21 = vld [vmem:[%s5027_s1 + $0xa8] sm:$0xff]  ;;  %808 = vperm.xlu0 (!%p5087_p6), %3347, %v3975_v1   ;;  %818 = vperm.xlu1 (!%p5087_p6), %3348, %v3985_v3  }
  0x5a   : > { %5081 = vst [vmem:[#allocation12_spill] sm:$0xff] %v4070_v19  ;;  %5082 = vst [vmem:[#allocation13_spill] sm:$0xff] %v4075_v20  ;;  %v4085_v22 = vld [vmem:[%s5027_s1 + $0xb0] sm:$0xff]  ;;  %v4090_v23 = vld [vmem:[%s5027_s1 + $0xb8] sm:$0xff] }
  0x5b   : > { %5083 = vst [vmem:[#allocation14_spill] sm:$0xff] %v4080_v21  ;;  %5084 = vst [vmem:[#allocation15_spill] sm:$0xff] %v4085_v22  ;;  %v4095_v24 = vld [vmem:[%s5027_s1 + $0xc0] sm:$0xff]  ;;  %v3351_v28 = vld [vmem:[%s5028_s2 + $0x48] sm:$0xff] (!%p5087_p6)  }
  0x5c   : > { %5085 = vst [vmem:[#allocation16_spill] sm:$0xff] %v4090_v23  ;;  %5086 = vst [vmem:[#allocation17_spill] sm:$0xff] %v4095_v24  ;;  %v3349_v25 = vld [vmem:[%s5028_s2 + $0x40] sm:$0xff] (!%p5087_p6)   ;;  %v3352_v29 = vld [vmem:[%s5028_s2 + $0x8] sm:$0xff] (!%p5087_p6)  }
  0x5d   : > { %v3350_v26 = vld [vmem:[%s5028_s2] sm:$0xff]   ;;  %2899 = vmatprep.subr.bf16.mxu0 %v3349_v25  ;;  %3258 = vmatprep.subr.bf16.mxu1 %v3349_v25  ;;  %v3353_v30 = vld [vmem:[%s5028_s2 + $0x50] sm:$0xff]   ;;  %v3355_v32 = vld [vmem:[%s5028_s2 + $0x58] sm:$0xff]  }
  0x5e   : > { %2900 = vmatpush3.bf16.msra.mxu0 %v3350_v26  ;;  %3266 = vmatpush3.bf16.msra.mxu1 %v3350_v26  ;;  %v3354_v31 = vld [vmem:[%s5028_s2 + $0x10] sm:$0xff]   ;;  %v3356_v33 = vld [vmem:[%s5028_s2 + $0x18] sm:$0xff]   ;;  %v3357_v34 = vld [vmem:[%s5028_s2 + $0x60] sm:$0xff]  }
  0x5f   : > { %2901 = vmatprep.subr.bf16.mxu0 %v3351_v28  ;;  %3259 = vmatprep.subr.bf16.mxu1 %v3351_v28  ;;  %v3358_v35 = vld [vmem:[%s5028_s2 + $0x20] sm:$0xff]   ;;  %v3359_v36 = vld [vmem:[%s5028_s2 + $0x68] sm:$0xff]   ;;  %v3370_v38 = vld [vmem:[%s5026_s0 + $0x74] ss:$8 sps:$4 sm:$0xff]  }
  0x60   : > { %823 = vperm.xlu0 %3347, %v3990_v4   ;;  %828 = vperm.xlu1 %3348, %v3995_v5   ;;  %v3367_v37 = vld [vmem:[%s5026_s0 + $0x4] ss:$8 sps:$4 sm:$0xff]   ;;  %v3361_v40 = vld [vmem:[%s5028_s2 + $0x70] sm:$0xff]   ;;  %v3363_v42 = vld [vmem:[%s5028_s2 + $0x78] sm:$0xff]  }
  0x61   : > { %v3360_v39 = vld [vmem:[%s5028_s2 + $0x28] sm:$0xff]   ;;  %672 = vmatprep.mubr.bf16.mxu0 %v3367_v37  ;;  %728 = vmatprep.mubr.bf16.mxu1 %v3370_v38  ;;  %v3362_v41 = vld [vmem:[%s5028_s2 + $0x30] sm:$0xff]   ;;  %v3364_v43 = vld [vmem:[%s5028_s2 + $0x38] sm:$0xff]  }
  0x62   : > { %2902 = vmatpush3.bf16.msra.mxu0 %v3352_v29  ;;  %3267 = vmatpush3.bf16.msra.mxu1 %v3352_v29  ;;  %v3365_v44 = vld [vmem:[%s5026_s0] ss:$8 sps:$4 sm:$0xff]   ;;  %v3368_v45 = vld [vmem:[%s5026_s0 + $0x70] ss:$8 sps:$4 sm:$0xff]   ;;  %v3371_v46 = vld [vmem:[%s5026_s0 + $0x14] ss:$8 sps:$4 sm:$0xff]  }
  0x63   : > { %2903 = vmatprep.subr.bf16.mxu0 %v3353_v30  ;;  %3260 = vmatprep.subr.bf16.mxu1 %v3353_v30  ;;  %v3373_v47 = vld [vmem:[%s5026_s0 + $0x84] ss:$8 sps:$4 sm:$0xff]   ;;  %v3375_v48 = vld [vmem:[%s5026_s0 + $0x10] ss:$8 sps:$4 sm:$0xff]   ;;  %v3376_v49 = vld [vmem:[%s5026_s0 + $0x80] ss:$8 sps:$4 sm:$0xff]  }
  0x64   : > { %833 = vperm.xlu0 %3347, %v4000_v6   ;;  %838 = vperm.xlu1 %3348, %v4005_v7   ;;  %v3377_v50 = vld [vmem:[%s5026_s0 + $0x24] ss:$8 sps:$4 sm:$0xff]   ;;  %v3379_v51 = vld [vmem:[%s5026_s0 + $0x94] ss:$8 sps:$4 sm:$0xff]   ;;  %v3381_v52 = vld [vmem:[%s5026_s0 + $0x20] ss:$8 sps:$4 sm:$0xff]  }
  0x65   : > { %v3382_v53 = vld [vmem:[%s5026_s0 + $0x90] ss:$8 sps:$4 sm:$0xff]   ;;  %v3383_v54 = vld [vmem:[%s5026_s0 + $0x34] ss:$8 sps:$4 sm:$0xff]   ;;  %v3385_v55 = vld [vmem:[%s5026_s0 + $0xa4] ss:$8 sps:$4 sm:$0xff]  }
  0x66   : > { %2904 = vmatpush3.bf16.msra.mxu0 %v3354_v31  ;;  %3268 = vmatpush3.bf16.msra.mxu1 %v3354_v31  ;;  %v3387_v56 = vld [vmem:[%s5026_s0 + $0x30] ss:$8 sps:$4 sm:$0xff]   ;;  %v3388_v57 = vld [vmem:[%s5026_s0 + $0xa0] ss:$8 sps:$4 sm:$0xff]   ;;  %v3389_v58 = vld [vmem:[%s5026_s0 + $0x44] ss:$8 sps:$4 sm:$0xff]  }
  0x67   : > { %2905 = vmatprep.subr.bf16.mxu0 %v3355_v32  ;;  %3261 = vmatprep.subr.bf16.mxu1 %v3355_v32  ;;  %v3391_v59 = vld [vmem:[%s5026_s0 + $0xb4] ss:$8 sps:$4 sm:$0xff]   ;;  %v377_v60 = vld [vmem:[%s5026_s0 + $0xc0] sm:$0xff]  ;;  %v3394_v62 = vld [vmem:[%s5026_s0 + $0xb0] ss:$8 sps:$4 sm:$0xff]   ;;  %v3792_v30 = vmov 0.0  }
  0x68   : > { %843 = vperm.xlu0 %3347, %v4010_v8   ;;  %848 = vperm.xlu1 %3348, %v4020_v9   ;;  %v3393_v61 = vld [vmem:[%s5026_s0 + $0x40] ss:$8 sps:$4 sm:$0xff]   ;;  %v3395_v63 = vld [vmem:[%s5026_s0 + $0x54] ss:$8 sps:$4 sm:$0xff]   ;;  %v2826_v25 = vcombine.high %v377_v60, %v377_v60  ;;  %v3398_v26 = vld [vmem:[%s5026_s0 + $0x50] ss:$8 sps:$4 sm:$0xff]   ;;  %v2825_v27 = vcombine.low %v377_v60, %v377_v60 }
  0x69   : > { %v3400_v28 = vld [vmem:[%s5026_s0 + $0x64] ss:$8 sps:$4 sm:$0xff]   ;;  %v3402_v29 = vld [vmem:[%s5026_s0 + $0x60] ss:$8 sps:$4 sm:$0xff]   ;;  %348 = vst.msk [vmem:[#allocation2] sm:$0xff] %vm347_vm0, %v3792_v30  ;;  %351 = vst.msk [vmem:[#allocation2 + $0xd3] sm:$0xff] %vm347_vm0, %v3792_v30 }
  0x6a   : > { %2906 = vmatpush3.bf16.msra.mxu0 %v3356_v33  ;;  %3269 = vmatpush3.bf16.msra.mxu1 %v3356_v33  ;;  %350 = vst.msk [vmem:[#allocation2 + $0x8] sm:$0x7] %vm349_vm1, %v3792_v30  ;;  %352 = vst.msk [vmem:[#allocation2 + $0xdb] sm:$0x7] %vm349_vm1, %v3792_v30 }
  0x6b   : > { %2907 = vmatprep.subr.bf16.mxu0 %v3357_v34  ;;  %3262 = vmatprep.subr.bf16.mxu1 %v3357_v34 }
  0x6c   : > { %853 = vperm.xlu0 %3347, %v4025_v10   ;;  %858 = vperm.xlu1 %3348, %v4030_v11  }
  0x6e   : > { %2908 = vmatpush3.bf16.msra.mxu0 %v3358_v35  ;;  %3270 = vmatpush3.bf16.msra.mxu1 %v3358_v35 }
  0x6f   : > { %2909 = vmatprep.subr.bf16.mxu0 %v3359_v36  ;;  %3263 = vmatprep.subr.bf16.mxu1 %v3359_v36 }
  0x70   : > { %863 = vperm.xlu0 %3347, %v4035_v12   ;;  %868 = vperm.xlu1 %3348, %v4040_v13  }
  0x72   : > { %2910 = vmatpush3.bf16.msra.mxu0 %v3360_v39  ;;  %3271 = vmatpush3.bf16.msra.mxu1 %v3360_v39 }
  0x73   : > { %2911 = vmatprep.subr.bf16.mxu0 %v3361_v40  ;;  %3264 = vmatprep.subr.bf16.mxu1 %v3361_v40 }
  0x74   : > { %873 = vperm.xlu0 %3347, %v4045_v14   ;;  %878 = vperm.xlu1 %3348, %v4050_v15  }
  0x76   : > { %2912 = vmatpush3.bf16.msra.mxu0 %v3362_v41  ;;  %3272 = vmatpush3.bf16.msra.mxu1 %v3362_v41 }
  0x77   : > { %2913 = vmatprep.subr.bf16.mxu0 %v3363_v42  ;;  %3265 = vmatprep.subr.bf16.mxu1 %v3363_v42 }
  0x78   : > { %883 = vperm.xlu0 %3347, %v4055_v16   ;;  %888 = vperm.xlu1 %3348, %v4060_v17  }
  0x7a   : > { %2914 = vmatpush3.bf16.msra.mxu0 %v3364_v43  ;;  %3273 = vmatpush3.bf16.msra.mxu1 %v3364_v43 }
  0x7c   : > { %893 = vperm.xlu0 %3347, %v4065_v18   ;;  %898 = vperm.xlu1 %3348, %v4070_v19  }
  0x7d   : > { %673 = vmatmul.mubr.bf16.vlgmr.msra.gmra.mrb[0].mxu0 %v3365_v44  ;;  %729 = vmatmul.mubr.bf16.vlgmr.msra.gmra.mrb[0].mxu1 %v3368_v45 }
  0x7e   : > { %680 = vmatprep.mubr.bf16.mxu0 %v3371_v46  ;;  %736 = vmatprep.mubr.bf16.mxu1 %v3373_v47  ;;  %v4273_v47 = vld [vmem:[#allocation3] ss:$0 sm:$0xff] }
  0x80   : > { %903 = vperm.xlu0 %3347, %v4075_v20   ;;  %908 = vperm.xlu1 %3348, %v4080_v21  }
  0x84   : > { %913 = vperm.xlu0 %3347, %v4085_v22   ;;  %918 = vperm.xlu1 %3348, %v4090_v23  }
  0x85   : > { %681 = vmatmul.mubr.bf16.gmra.mrb[4].mxu0 %v3375_v48  ;;  %737 = vmatmul.mubr.bf16.gmra.mrb[4].mxu1 %v3376_v49 }
  0x86   : > { %688 = vmatprep.mubr.bf16.mxu0 %v3377_v50  ;;  %744 = vmatprep.mubr.bf16.mxu1 %v3379_v51 }
  0x88   : > { %923 = vperm.xlu0 %3347, %v4095_v24  }
  0x8d   : > { %689 = vmatmul.mubr.bf16.gmra.mrb[8].mxu0 %v3381_v52  ;;  %745 = vmatmul.mubr.bf16.gmra.mrb[8].mxu1 %v3382_v53 }
  0x8e   : > { %696 = vmatprep.mubr.bf16.mxu0 %v3383_v54  ;;  %752 = vmatprep.mubr.bf16.mxu1 %v3385_v55 }
  0x95   : > { %697 = vmatmul.mubr.bf16.gmra.mrb[12].mxu0 %v3387_v56  ;;  %753 = vmatmul.mubr.bf16.gmra.mrb[12].mxu1 %v3388_v57 }
  0x96   : > { %704 = vmatprep.mubr.bf16.mxu0 %v3389_v58  ;;  %760 = vmatprep.mubr.bf16.mxu1 %v3391_v59 }
  0x9d   : > { %705 = vmatmul.mubr.bf16.gmra.mrb[16].mxu0 %v3393_v61  ;;  %761 = vmatmul.mubr.bf16.gmra.mrb[16].mxu1 %v3394_v62 }
  0x9e   : > { %712 = vmatprep.mubr.bf16.mxu0 %v3395_v63  ;;  %768 = vmatprep.mubr.bf16.mxu1 %v2826_v25 }
  0xa5   : > { %713 = vmatmul.mubr.bf16.gmra.mrb[20].mxu0 %v3398_v26  ;;  %769 = vmatmul.mubr.bf16.gmra.mrb[20].mxu1 %v2825_v27 }
  0xa6   : > { %720 = vmatprep.mubr.bf16.mxu0 %v3400_v28 }
  0xad   : > { %721 = vmatmul.mubr.bf16.gmra.mrb[24].mxu0 %v3402_v29 }
  0xd4   : > { %v804_v31 = vpop.permute.xlu0 %803  ;;  %v4249_v32 = vpop.permute.xlu1 %813 }
  0xd8   : > { %v809_v33 = vpop.permute.xlu0 %808  ;;  %v4251_v34 = vpop.permute.xlu1 %818 }
  0xdf   : > { %v4253_v35 = vpop.permute.xlu0 %823  ;;  %v4255_v36 = vpop.permute.xlu1 %828 }
  0xe3   : > { %v4257_v37 = vpop.permute.xlu0 %833  ;;  %v4259_v38 = vpop.permute.xlu1 %838 }
  0xe7   : > { %v4261_v39 = vpop.permute.xlu0 %843  ;;  %v4263_v40 = vpop.permute.xlu1 %848 }
  0xeb   : > { %v4265_v41 = vpop.permute.xlu0 %853  ;;  %v4267_v42 = vpop.permute.xlu1 %858 }
  0xef   : > { %v4269_v43 = vpop.permute.xlu0 %863  ;;  %v4271_v44 = vpop.permute.xlu1 %868 }
  0xf3   : > { %v874_v25 = vpop.permute.xlu0 %873  ;;  %v879_v26 = vpop.permute.xlu1 %878 }
 0x150   : > { %v2915_v45 = vpop.f32.mrb[0].mxu0  ;;  %v2957_v46 = vpop.f32.mrb[0].mxu1 }
 0x151   : > { %v2916_v48 = vpop.f32.mrb[1].mxu0  ;;  %v2958_v49 = vpop.f32.mrb[1].mxu1 }
 0x152   : > { %v2917_v50 = vadd.f32 %v2916_v48, %v2915_v45  ;;  %v2918_v51 = vpop.f32.mrb[2].mxu0  ;;  %v2959_v52 = vadd.f32 %v2958_v49, %v2957_v46  ;;  %v2960_v53 = vpop.f32.mrb[2].mxu1 }
 0x153   : > { %v2919_v54 = vpop.f32.mrb[3].mxu0  ;;  %v2961_v55 = vpop.f32.mrb[3].mxu1 }
 0x154   : > { %v675_v56 = vadd.f32 %v2917_v50, %v4273_v47  ;;  %v2920_v57 = vadd.f32 %v2919_v54, %v2918_v51  ;;  %v731_v58 = vadd.f32 %v2959_v52, %v4273_v47  ;;  %v2962_v59 = vadd.f32 %v2961_v55, %v2960_v53 }
 0x156   : > { %v776_v60 = vmax.f32 %v675_v56, 0.0  ;;  %v678_v61 = vadd.f32 %v2920_v57, %v4273_v47  ;;  %v790_v62 = vmax.f32 %v731_v58, 0.0  ;;  %v734_v63 = vadd.f32 %v2962_v59, %v4273_v47 }
 0x158   : > { %v926_v27 = vmul.f32 %v804_v31, %v776_v60  ;;  %v777_v28 = vmax.f32 %v678_v61, 0.0  ;;  %v940_v29 = vmul.f32 %v874_v25, %v790_v62  ;;  %v791_v30 = vmax.f32 %v734_v63, 0.0  ;;  %v2921_v45 = vpop.f32.mrb[4].mxu0  ;;  %v2963_v46 = vpop.f32.mrb[4].mxu1 }
 0x159   : > { %v2922_v48 = vpop.f32.mrb[5].mxu0  ;;  %v2964_v49 = vpop.f32.mrb[5].mxu1 }
 0x15a   : > { %951 = vst.msk [vmem:[#allocation2 + $0xb] sm:$0xff] %vm347_vm0, %v926_v27  ;;  %v927_v50 = vmul.f32 %v809_v33, %v777_v28  ;;  %965 = vst.msk [vmem:[#allocation2 + $0x7b] sm:$0xff] %vm347_vm0, %v940_v29  ;;  %v941_v51 = vmul.f32 %v879_v26, %v791_v30  ;;  %v2923_v52 = vadd.f32 %v2922_v48, %v2921_v45  ;;  %v2924_v54 = vpop.f32.mrb[6].mxu0  ;;  %v2966_v55 = vpop.f32.mrb[6].mxu1 }
 0x15b   : > { %v2965_v53 = vadd.f32 %v2964_v49, %v2963_v46  ;;  %v2925_v56 = vpop.f32.mrb[7].mxu0  ;;  %v2967_v57 = vpop.f32.mrb[7].mxu1 }
 0x15c   : > { %952 = vst.msk [vmem:[#allocation2 + $0x13] sm:$0xff] %vm347_vm0, %v927_v50  ;;  %966 = vst.msk [vmem:[#allocation2 + $0x83] sm:$0xff] %vm347_vm0, %v941_v51  ;;  %v683_v31 = vadd.f32 %v2923_v52, %v4273_v47  ;;  %v2926_v59 = vadd.f32 %v2925_v56, %v2924_v54  ;;  %v2968_v60 = vadd.f32 %v2967_v57, %v2966_v55  ;;  %v884_v25 = vpop.permute.xlu0 %883  ;;  %v889_v26 = vpop.permute.xlu1 %888 }
 0x15d   : > { %v739_v58 = vadd.f32 %v2965_v53, %v4273_v47 }
 0x15e   : > { %v778_v33 = vmax.f32 %v683_v31, 0.0  ;;  %v686_v62 = vadd.f32 %v2926_v59, %v4273_v47  ;;  %v742_v63 = vadd.f32 %v2968_v60, %v4273_v47 }
 0x15f   : > { %v792_v61 = vmax.f32 %v739_v58, 0.0 }
 0x160   : > { %v928_v27 = vmul.f32 %v4249_v32, %v778_v33  ;;  %v779_v29 = vmax.f32 %v686_v62, 0.0  ;;  %v793_v30 = vmax.f32 %v742_v63, 0.0  ;;  %v2927_v45 = vpop.f32.mrb[8].mxu0  ;;  %v2969_v46 = vpop.f32.mrb[8].mxu1 }
 0x161   : > { %v942_v28 = vmul.f32 %v884_v25, %v792_v61  ;;  %v2928_v48 = vpop.f32.mrb[9].mxu0  ;;  %v2970_v49 = vpop.f32.mrb[9].mxu1 }
 0x162   : > { %953 = vst.msk [vmem:[#allocation2 + $0x1b] sm:$0xff] %vm347_vm0, %v928_v27  ;;  %v929_v50 = vmul.f32 %v4251_v34, %v779_v29  ;;  %v943_v51 = vmul.f32 %v889_v26, %v793_v30  ;;  %v2929_v52 = vadd.f32 %v2928_v48, %v2927_v45  ;;  %v2971_v53 = vadd.f32 %v2970_v49, %v2969_v46  ;;  %v2930_v54 = vpop.f32.mrb[10].mxu0  ;;  %v2972_v55 = vpop.f32.mrb[10].mxu1 }
 0x163   : > { %967 = vst.msk [vmem:[#allocation2 + $0x8b] sm:$0xff] %vm347_vm0, %v942_v28  ;;  %v2931_v56 = vpop.f32.mrb[11].mxu0  ;;  %v2973_v32 = vpop.f32.mrb[11].mxu1 }
 0x164   : > { %954 = vst.msk [vmem:[#allocation2 + $0x23] sm:$0xff] %vm347_vm0, %v929_v50  ;;  %968 = vst.msk [vmem:[#allocation2 + $0x93] sm:$0xff] %vm347_vm0, %v943_v51  ;;  %v691_v57 = vadd.f32 %v2929_v52, %v4273_v47  ;;  %v747_v31 = vadd.f32 %v2971_v53, %v4273_v47  ;;  %v2932_v58 = vadd.f32 %v2931_v56, %v2930_v54  ;;  %v894_v62 = vpop.permute.xlu0 %893  ;;  %v899_v63 = vpop.permute.xlu1 %898 }
 0x165   : > { %v2974_v59 = vadd.f32 %v2973_v32, %v2972_v55 }
 0x166   : > { %v780_v60 = vmax.f32 %v691_v57, 0.0  ;;  %v794_v33 = vmax.f32 %v747_v31, 0.0  ;;  %v694_v34 = vadd.f32 %v2932_v58, %v4273_v47 }
 0x167   : > { %v750_v61 = vadd.f32 %v2974_v59, %v4273_v47 }
 0x168   : > { %v930_v25 = vmul.f32 %v4253_v35, %v780_v60  ;;  %v944_v26 = vmul.f32 %v894_v62, %v794_v33  ;;  %v781_v27 = vmax.f32 %v694_v34, 0.0  ;;  %v2933_v29 = vpop.f32.mrb[12].mxu0  ;;  %v2975_v30 = vpop.f32.mrb[12].mxu1 }
 0x169   : > { %v795_v28 = vmax.f32 %v750_v61, 0.0  ;;  %v2934_v45 = vpop.f32.mrb[13].mxu0  ;;  %v2976_v46 = vpop.f32.mrb[13].mxu1 }
 0x16a   : > { %955 = vst.msk [vmem:[#allocation2 + $0x2b] sm:$0xff] %vm347_vm0, %v930_v25  ;;  %969 = vst.msk [vmem:[#allocation2 + $0x9b] sm:$0xff] %vm347_vm0, %v944_v26  ;;  %v931_v48 = vmul.f32 %v4255_v36, %v781_v27  ;;  %v2935_v50 = vadd.f32 %v2934_v45, %v2933_v29  ;;  %v2977_v51 = vadd.f32 %v2976_v46, %v2975_v30  ;;  %v2936_v52 = vpop.f32.mrb[14].mxu0  ;;  %v2978_v53 = vpop.f32.mrb[14].mxu1 }
 0x16b   : > { %v945_v49 = vmul.f32 %v899_v63, %v795_v28  ;;  %v2937_v54 = vpop.f32.mrb[15].mxu0  ;;  %v2979_v35 = vpop.f32.mrb[15].mxu1 }
 0x16c   : > { %956 = vst.msk [vmem:[#allocation2 + $0x33] sm:$0xff] %vm347_vm0, %v931_v48  ;;  %v699_v55 = vadd.f32 %v2935_v50, %v4273_v47  ;;  %v755_v56 = vadd.f32 %v2977_v51, %v4273_v47  ;;  %v2938_v32 = vadd.f32 %v2937_v54, %v2936_v52  ;;  %v2980_v57 = vadd.f32 %v2979_v35, %v2978_v53  ;;  %v904_v60 = vpop.permute.xlu0 %903  ;;  %v909_v33 = vpop.permute.xlu1 %908 }
 0x16d   : > { %970 = vst.msk [vmem:[#allocation2 + $0xa3] sm:$0xff] %vm347_vm0, %v945_v49 }
 0x16e   : > { %v782_v31 = vmax.f32 %v699_v55, 0.0  ;;  %v796_v58 = vmax.f32 %v755_v56, 0.0  ;;  %v702_v36 = vadd.f32 %v2938_v32, %v4273_v47  ;;  %v758_v59 = vadd.f32 %v2980_v57, %v4273_v47 }
 0x170   : > { %v932_v34 = vmul.f32 %v4257_v37, %v782_v31  ;;  %v946_v61 = vmul.f32 %v904_v60, %v796_v58  ;;  %v783_v62 = vmax.f32 %v702_v36, 0.0  ;;  %v797_v63 = vmax.f32 %v758_v59, 0.0  ;;  %v2939_v25 = vpop.f32.mrb[16].mxu0  ;;  %v2981_v26 = vpop.f32.mrb[16].mxu1 }
 0x171   : > { %v2940_v27 = vpop.f32.mrb[17].mxu0  ;;  %v2982_v28 = vpop.f32.mrb[17].mxu1 }
 0x172   : > { %957 = vst.msk [vmem:[#allocation2 + $0x3b] sm:$0xff] %vm347_vm0, %v932_v34  ;;  %971 = vst.msk [vmem:[#allocation2 + $0xab] sm:$0xff] %vm347_vm0, %v946_v61  ;;  %v933_v29 = vmul.f32 %v4259_v38, %v783_v62  ;;  %v947_v30 = vmul.f32 %v909_v33, %v797_v63  ;;  %v2941_v45 = vadd.f32 %v2940_v27, %v2939_v25  ;;  %v2942_v48 = vpop.f32.mrb[18].mxu0  ;;  %v2984_v49 = vpop.f32.mrb[18].mxu1 }
 0x173   : > { %v2983_v46 = vadd.f32 %v2982_v28, %v2981_v26  ;;  %v2943_v50 = vpop.f32.mrb[19].mxu0  ;;  %v2985_v37 = vpop.f32.mrb[19].mxu1 }
 0x174   : > { %958 = vst.msk [vmem:[#allocation2 + $0x43] sm:$0xff] %vm347_vm0, %v933_v29  ;;  %972 = vst.msk [vmem:[#allocation2 + $0xb3] sm:$0xff] %vm347_vm0, %v947_v30  ;;  %v707_v51 = vadd.f32 %v2941_v45, %v4273_v47  ;;  %v2944_v53 = vadd.f32 %v2943_v50, %v2942_v48  ;;  %v2986_v54 = vadd.f32 %v2985_v37, %v2984_v49  ;;  %v914_v32 = vpop.permute.xlu0 %913  ;;  %v919_v57 = vpop.permute.xlu1 %918 }
 0x175   : > { %v763_v52 = vadd.f32 %v2983_v46, %v4273_v47 }
 0x176   : > { %v784_v35 = vmax.f32 %v707_v51, 0.0  ;;  %v710_v38 = vadd.f32 %v2944_v53, %v4273_v47  ;;  %v766_v56 = vadd.f32 %v2986_v54, %v4273_v47 }
 0x177   : > { %v798_v55 = vmax.f32 %v763_v52, 0.0 }
 0x178   : > { %v934_v31 = vmul.f32 %v4261_v39, %v784_v35  ;;  %v785_v36 = vmax.f32 %v710_v38, 0.0  ;;  %v799_v59 = vmax.f32 %v766_v56, 0.0  ;;  %v2945_v60 = vpop.f32.mrb[20].mxu0  ;;  %v2987_v33 = vpop.f32.mrb[20].mxu1 }
 0x179   : > { %v948_v58 = vmul.f32 %v914_v32, %v798_v55  ;;  %v2946_v34 = vpop.f32.mrb[21].mxu0  ;;  %v2988_v61 = vpop.f32.mrb[21].mxu1 }
 0x17a   : > { %959 = vst.msk [vmem:[#allocation2 + $0x4b] sm:$0xff] %vm347_vm0, %v934_v31  ;;  %v935_v62 = vmul.f32 %v4263_v40, %v785_v36  ;;  %v949_v63 = vmul.f32 %v919_v57, %v799_v59  ;;  %v2947_v25 = vadd.f32 %v2946_v34, %v2945_v60  ;;  %v2989_v26 = vadd.f32 %v2988_v61, %v2987_v33  ;;  %v2948_v27 = vpop.f32.mrb[22].mxu0  ;;  %v2990_v28 = vpop.f32.mrb[22].mxu1 }
 0x17b   : > { %973 = vst.msk [vmem:[#allocation2 + $0xbb] sm:$0xff] %vm347_vm0, %v948_v58  ;;  %v2949_v29 = vpop.f32.mrb[23].mxu0  ;;  %v2991_v39 = vpop.f32.mrb[23].mxu1 }
 0x17c   : > { %960 = vst.msk [vmem:[#allocation2 + $0x53] sm:$0xff] %vm347_vm0, %v935_v62  ;;  %974 = vst.msk [vmem:[#allocation2 + $0xc3] sm:$0xff] %vm347_vm0, %v949_v63  ;;  %v715_v30 = vadd.f32 %v2947_v25, %v4273_v47  ;;  %v771_v45 = vadd.f32 %v2989_v26, %v4273_v47  ;;  %v2950_v46 = vadd.f32 %v2949_v29, %v2948_v27  ;;  %v924_v50 = vpop.permute.xlu0 %923 }
 0x17e   : > { %v786_v48 = vmax.f32 %v715_v30, 0.0  ;;  %v800_v49 = vmax.f32 %v771_v45, 0.0  ;;  %v718_v40 = vadd.f32 %v2950_v46, %v4273_v47 }
 0x180   : > { %v936_v37 = vmul.f32 %v4265_v41, %v786_v48  ;;  %v950_v51 = vmul.f32 %v924_v50, %v800_v49  ;;  %v787_v52 = vmax.f32 %v718_v40, 0.0  ;;  %v2951_v53 = vpop.f32.mrb[24].mxu0 }
 0x181   : > { %v2952_v54 = vpop.f32.mrb[25].mxu0 }
 0x182   : > { %961 = vst.msk [vmem:[#allocation2 + $0x5b] sm:$0xff] %vm347_vm0, %v936_v37  ;;  %975 = vst.msk [vmem:[#allocation2 + $0xcb] sm:$0xff] %vm347_vm0, %v950_v51  ;;  %v937_v35 = vmul.f32 %v4267_v42, %v787_v52  ;;  %v2953_v55 = vadd.f32 %v2952_v54, %v2951_v53  ;;  %v2954_v38 = vpop.f32.mrb[26].mxu0 }
 0x183   : > { %v2955_v56 = vpop.f32.mrb[27].mxu0 }
 0x184   : > { %962 = vst.msk [vmem:[#allocation2 + $0x63] sm:$0xff] %vm347_vm0, %v937_v35  ;;  %v723_v32 = vadd.f32 %v2953_v55, %v4273_v47  ;;  %v2956_v57 = vadd.f32 %v2955_v56, %v2954_v38 }
 0x186   : > { %v788_v31 = vmax.f32 %v723_v32, 0.0  ;;  %v726_v41 = vadd.f32 %v2956_v57, %v4273_v47 }
 0x188   : > { %v938_v58 = vmul.f32 %v4269_v43, %v788_v31  ;;  %v789_v36 = vmax.f32 %v726_v41, 0.0 }
 0x18a   : > { %963 = vst.msk [vmem:[#allocation2 + $0x6b] sm:$0xff] %vm347_vm0, %v938_v58  ;;  %v939_v59 = vmul.f32 %v4271_v44, %v789_v36 }
 0x18c   : > { %964 = vst.msk [vmem:[#allocation2 + $0x73] sm:$0xff] %vm347_vm0, %v939_v59 }
 0x18d PF: > { %p2843_p9 = scmp.le.s32.totalorder %s3851_s25, 0 }
 0x18f   : > { %979 = sbr.rel (%p2843_p9) target bundleno = 905 (0x389), region = 60 }
 0x196   : > { %v4338_v42 = vld [vmem:[#allocation2 + $0x7a] sm:$0xff]  ;;  %v4340_v60 = vld [vmem:[#allocation2 + $0x82] sm:$0xff]  ;;  %v4342_v33 = vld [vmem:[#allocation2 + $0xa] sm:$0xff]  ;;  %s3793_s15 = smov 64   ;;  %vm1557_vm2 = vcmask 523264   ;;  %vm3796_vm3 = vmmov 0  }
 0x197   : > { %v3413_v43 = vpack.i.bf16 %v4340_v60, %v4338_v42  ;;  %v4346_v47 = vld [vmem:[#allocation2 + $0x12] sm:$0xff]  ;;  %v1005_v62 = vld [vmem:[#allocation2 + $0x1] sm:$0xff]  ;;  %v1006_v63 = vld [vmem:[#allocation2 + $0x9] sm:$0xff] }
 0x198   : > { %v1019_v34 = vld [vmem:[#allocation2 + $0x71] sm:$0xff]  ;;  %v1020_v61 = vld [vmem:[#allocation2 + $0x79] sm:$0xff]  ;;  %v3403_v44 = vpack.i.bf16 %v4346_v47, %v4342_v33  ;;  %v3408_v26 = vpack.i.bf16 %v1006_v63, %v1005_v62  ;;  %v4354_v39 = vld [vmem:[#allocation2 + $0x22] sm:$0xff] }
 0x199   : > { %3414 = vrot.lane.b32.xlu1 %v3413_v43, %s3793_s15  ;;  %v3418_v25 = vpack.i.bf16 %v1020_v61, %v1019_v34  ;;  %v1007_v27 = vld [vmem:[#allocation2 + $0x11] sm:$0xff]  ;;  %v1008_v28 = vld [vmem:[#allocation2 + $0x19] sm:$0xff]  ;;  %v1021_v46 = vld [vmem:[#allocation2 + $0x81] sm:$0xff] }
 0x19a   : > { %3404 = vrot.lane.b32.xlu0 %v3403_v44, %s3793_s15  ;;  %v4352_v29 = vld [vmem:[#allocation2 + $0x1a] sm:$0xff]  ;;  %v3428_v30 = vpack.i.bf16 %v1008_v28, %v1007_v27  ;;  %v1022_v48 = vld [vmem:[#allocation2 + $0x89] sm:$0xff]  ;;  %v4362_v40 = vld [vmem:[#allocation2 + $0x92] sm:$0xff] }
 0x19b   : > { %v3423_v45 = vpack.i.bf16 %v4354_v39, %v4352_v29  ;;  %v4360_v49 = vld [vmem:[#allocation2 + $0x8a] sm:$0xff]  ;;  %v3438_v50 = vpack.i.bf16 %v1022_v48, %v1021_v46  ;;  %v1009_v51 = vld [vmem:[#allocation2 + $0x21] sm:$0xff]  ;;  %v4370_v54 = vld [vmem:[#allocation2 + $0x32] sm:$0xff] }
 0x19c   : > { %v3433_v37 = vpack.i.bf16 %v4362_v40, %v4360_v49  ;;  %v1010_v52 = vld [vmem:[#allocation2 + $0x29] sm:$0xff]  ;;  %v1023_v38 = vld [vmem:[#allocation2 + $0x91] sm:$0xff]  ;;  %v1024_v56 = vld [vmem:[#allocation2 + $0x99] sm:$0xff] }
 0x19d   : > { %3419 = vrot.lane.b32.xlu1 %v3418_v25, %s3793_s15  ;;  %v4368_v53 = vld [vmem:[#allocation2 + $0x2a] sm:$0xff]  ;;  %v3448_v35 = vpack.i.bf16 %v1010_v52, %v1009_v51  ;;  %v4376_v32 = vld [vmem:[#allocation2 + $0x9a] sm:$0xff]  ;;  %v4378_v57 = vld [vmem:[#allocation2 + $0xa2] sm:$0xff]  ;;  %v3458_v31 = vpack.i.bf16 %v1024_v56, %v1023_v38 }
 0x19e   : > { %3409 = vrot.lane.b32.xlu0 %v3408_v26, %s3793_s15  ;;  %v3443_v55 = vpack.i.bf16 %v4370_v54, %v4368_v53  ;;  %v3453_v41 = vpack.i.bf16 %v4378_v57, %v4376_v32  ;;  %v1011_v58 = vld [vmem:[#allocation2 + $0x31] sm:$0xff]  ;;  %v1012_v36 = vld [vmem:[#allocation2 + $0x39] sm:$0xff]  ;;  %v4386_v43 = vld [vmem:[#allocation2 + $0x42] sm:$0xff] }
 0x19f   : > { %v4384_v59 = vld [vmem:[#allocation2 + $0x3a] sm:$0xff]  ;;  %v3468_v61 = vpack.i.bf16 %v1012_v36, %v1011_v58  ;;  %v1026_v44 = vld [vmem:[#allocation2 + $0xa9] sm:$0xff]  ;;  %v4395_v26 = vld [vmem:[#allocation2 + $0xb2] sm:$0xff] }
 0x1a0   : > { %v1025_v34 = vld [vmem:[#allocation2 + $0xa1] sm:$0xff]  ;;  %v3463_v62 = vpack.i.bf16 %v4386_v43, %v4384_v59  ;;  %v4393_v25 = vld [vmem:[#allocation2 + $0xaa] sm:$0xff]  ;;  %v4401_v48 = vld [vmem:[#allocation2 + $0x52] sm:$0xff] }
 0x1a1   : > { %3429 = vrot.lane.b32.xlu1 %v3428_v30, %s3793_s15  ;;  %v3655_v63 = vld [vmem:[%s4015_s8 + $0x40] sm:$0xff]   ;;  %v1014_v30 = vld [vmem:[#allocation2 + $0x49] sm:$0xff]  ;;  %v1027_v56 = vld [vmem:[#allocation2 + $0xb1] sm:$0xff] }
 0x1a2   : > { %3424 = vrot.lane.b32.xlu0 %v3423_v45, %s3793_s15  ;;  %v3656_v27 = vld [vmem:[%s4015_s8] sm:$0xff]   ;;  %2993 = vmatprep.subr.bf16.mxu0 %v3655_v63  ;;  %v3478_v45 = vpack.i.bf16 %v1026_v44, %v1025_v34  ;;  %v4399_v46 = vld [vmem:[#allocation2 + $0x4a] sm:$0xff]  ;;  %v3661_v36 = vld [vmem:[%s4015_s8 + $0x58] sm:$0xff]  }
 0x1a3   : > { %v1013_v28 = vld [vmem:[#allocation2 + $0x41] sm:$0xff]  ;;  %3274 = vmatprep.subr.bf16.mxu1 %v3655_v63  ;;  %2994 = vmatpush3.bf16.msra.mxu0 %v3656_v27  ;;  %v3659_v52 = vld [vmem:[%s4015_s8 + $0x50] sm:$0xff]   ;;  %v1028_v58 = vld [vmem:[#allocation2 + $0xb9] sm:$0xff] }
 0x1a4   : > { %3282 = vmatpush3.bf16.msra.mxu1 %v3656_v27  ;;  %v3658_v51 = vld [vmem:[%s4015_s8 + $0x8] sm:$0xff]   ;;  %v3498_v34 = vpack.i.bf16 %v1028_v58, %v1027_v56  ;;  %v3662_v44 = vld [vmem:[%s4015_s8 + $0x18] sm:$0xff]   ;;  %v3668_v23 = vld [vmem:[%s4015_s8 + $0x30] sm:$0xff]  }
 0x1a5   : > { %3439 = vrot.lane.b32.xlu1 %v3438_v50, %s3793_s15  ;;  %v3657_v50 = vld [vmem:[%s4015_s8 + $0x48] sm:$0xff]   ;;  %v1015_v27 = vld [vmem:[#allocation2 + $0x51] sm:$0xff]  ;;  %v1112_v22 = vld [vmem:[#allocation2 + $0x3d] sm:$0xff] }
 0x1a6   : > { %3434 = vrot.lane.b32.xlu0 %v3433_v37, %s3793_s15  ;;  %v3473_v37 = vpack.i.bf16 %v4395_v26, %v4393_v25  ;;  %2995 = vmatprep.subr.bf16.mxu0 %v3657_v50  ;;  %v4412_v38 = vld [vmem:[#allocation2 + $0xc2] sm:$0xff]  ;;  %v1055_v56 = vld [vmem:[#allocation2 + $0xca] sm:$0xff]  ;;  %v4446_v24 = vld [vmem:[#allocation2 + $0x14] sm:$0xff] }
 0x1a7   : > { %3275 = vmatprep.subr.bf16.mxu1 %v3657_v50  ;;  %2996 = vmatpush3.bf16.msra.mxu0 %v3658_v51  ;;  %v4426_v63 = vld [vmem:[#allocation2 + $0x62] sm:$0xff]  ;;  %v1123_v19 = vld [vmem:[#allocation2 + $0x95] sm:$0xff] }
 0x1a8   : > { %3283 = vmatpush3.bf16.msra.mxu1 %v3658_v51  ;;  %2997 = vmatprep.subr.bf16.mxu0 %v3659_v52  ;;  %v3666_v58 = vld [vmem:[%s4015_s8 + $0x28] sm:$0xff]  }
 0x1a9   : > { %3449 = vrot.lane.b32.xlu1 %v3448_v35, %s3793_s15  ;;  %v3488_v35 = vpack.i.bf16 %v1014_v30, %v1013_v28  ;;  %3276 = vmatprep.subr.bf16.mxu1 %v3659_v52  ;;  %v1016_v28 = vld [vmem:[#allocation2 + $0x59] sm:$0xff]  ;;  %v4491_v21 = vld [vmem:[#allocation2 + $0x64] sm:$0xff] }
 0x1aa   : > { %3444 = vrot.lane.b32.xlu0 %v3443_v55, %s3793_s15  ;;  %v4410_v55 = vld [vmem:[#allocation2 + $0xba] sm:$0xff]  ;;  %v3508_v50 = vpack.i.bf16 %v1016_v28, %v1015_v27  ;;  %v4436_v52 = vld [vmem:[#allocation2 + $0x72] sm:$0xff]  ;;  %v1018_v27 = vld [vmem:[#allocation2 + $0x69] sm:$0xff]  ;;  %5094 = vst [vmem:[#allocation24_spill] sm:$0xff] %v4491_v21 }
 0x1ab   : > { %v3663_v30 = vld [vmem:[%s4015_s8 + $0x60] sm:$0xff]   ;;  %v3667_v28 = vld [vmem:[%s4015_s8 + $0x70] sm:$0xff]  }
 0x1ac   : > { %v1121_v20 = vld [vmem:[#allocation2 + $0x85] sm:$0xff] }
 0x1ad   : > { %3459 = vrot.lane.b32.xlu1 %v3458_v31, %s3793_s15  ;;  %v3660_v31 = vld [vmem:[%s4015_s8 + $0x10] sm:$0xff]  }
 0x1ae   : > { %3454 = vrot.lane.b32.xlu0 %v3453_v41, %s3793_s15  ;;  %v3483_v41 = vpack.i.bf16 %v4401_v48, %v4399_v46  ;;  %2998 = vmatpush3.bf16.msra.mxu0 %v3660_v31 }
 0x1af   : > { %3284 = vmatpush3.bf16.msra.mxu1 %v3660_v31  ;;  %2999 = vmatprep.subr.bf16.mxu0 %v3661_v36  ;;  %v3665_v31 = vld [vmem:[%s4015_s8 + $0x68] sm:$0xff]  }
 0x1b0   : > { %3277 = vmatprep.subr.bf16.mxu1 %v3661_v36 }
 0x1b1   : > { %3469 = vrot.lane.b32.xlu1 %v3468_v61, %s3793_s15  ;;  %v4420_v61 = vld [vmem:[#allocation2 + $0x5a] sm:$0xff] }
 0x1b2   : > { %3464 = vrot.lane.b32.xlu0 %v3463_v62, %s3793_s15  ;;  %v3493_v62 = vpack.i.bf16 %v4412_v38, %v4410_v55  ;;  %3000 = vmatpush3.bf16.msra.mxu0 %v3662_v44  ;;  %v3503_v51 = vpack.i.bf16 %v4426_v63, %v4420_v61 }
 0x1b3   : > { %3285 = vmatpush3.bf16.msra.mxu1 %v3662_v44  ;;  %3001 = vmatprep.subr.bf16.mxu0 %v3663_v30  ;;  %v1017_v44 = vld [vmem:[#allocation2 + $0x61] sm:$0xff] }
 0x1b4   : > { %3278 = vmatprep.subr.bf16.mxu1 %v3663_v30 }
 0x1b5   : > { %3479 = vrot.lane.b32.xlu1 %v3478_v45, %s3793_s15  ;;  %v4429_v45 = vld [vmem:[#allocation2 + $0x6a] sm:$0xff] }
 0x1b6   : > { %3474 = vrot.lane.b32.xlu0 %v3473_v37, %s3793_s15  ;;  %v3664_v37 = vld [vmem:[%s4015_s8 + $0x20] sm:$0xff]  }
 0x1b7   : > { %3002 = vmatpush3.bf16.msra.mxu0 %v3664_v37  ;;  %3286 = vmatpush3.bf16.msra.mxu1 %v3664_v37  ;;  %v1110_v37 = vld [vmem:[#allocation2 + $0x2d] sm:$0xff] }
 0x1b8   : > { %3003 = vmatprep.subr.bf16.mxu0 %v3665_v31  ;;  %3279 = vmatprep.subr.bf16.mxu1 %v3665_v31 }
 0x1b9   : > { %3489 = vrot.lane.b32.xlu1 %v3488_v35, %s3793_s15  ;;  %v1029_v35 = vld [vmem:[#allocation2 + $0xc1] sm:$0xff] }
 0x1ba   : > { %3484 = vrot.lane.b32.xlu0 %v3483_v41, %s3793_s15  ;;  %v3518_v41 = vpack.i.bf16 %v4436_v52, %v4429_v45  ;;  %v3513_v36 = vpack.i.bf16 %v1029_v35, %v1055_v56  ;;  %v1109_v35 = vld [vmem:[#allocation2 + $0x25] sm:$0xff]  ;;  %v3669_v56 = vld [vmem:[%s4015_s8 + $0x78] sm:$0xff]  }
 0x1bb   : > { %3004 = vmatpush3.bf16.msra.mxu0 %v3666_v58  ;;  %3287 = vmatpush3.bf16.msra.mxu1 %v3666_v58  ;;  %v3538_v31 = vpack.i.bf16 %v1110_v37, %v1109_v35  ;;  %v3672_v58 = vld [vmem:[%s4015_s8 + $0xc0] sm:$0xff]   ;;  %v5039_v35 = vmov 0.0  }
 0x1bc   : > { %3005 = vmatprep.subr.bf16.mxu0 %v3667_v28  ;;  %3280 = vmatprep.subr.bf16.mxu1 %v3667_v28  ;;  %v4461_v28 = vld [vmem:[#allocation2 + $0x2c] sm:$0xff] }
 0x1bd   : > { %3499 = vrot.lane.b32.xlu1 %v3498_v34, %s3793_s15  ;;  %v1107_v34 = vld [vmem:[#allocation2 + $0x15] sm:$0xff] }
 0x1be   : > { %3494 = vrot.lane.b32.xlu0 %v3493_v62, %s3793_s15  ;;  %v1108_v62 = vld [vmem:[#allocation2 + $0x1d] sm:$0xff] }
 0x1bf   : > { %v3528_v30 = vpack.i.bf16 %v1108_v62, %v1107_v34  ;;  %3006 = vmatpush3.bf16.msra.mxu0 %v3668_v23  ;;  %v3670_v34 = vld [vmem:[%s4015_s8 + $0x38] sm:$0xff]   ;;  %3288 = vmatpush3.bf16.msra.mxu1 %v3668_v23  ;;  %v1114_v23 = vld [vmem:[#allocation2 + $0x4d] sm:$0xff] }
 0x1c0   : > { %3007 = vmatprep.subr.bf16.mxu0 %v3669_v56  ;;  %3281 = vmatprep.subr.bf16.mxu1 %v3669_v56  ;;  %v4473_v56 = vld [vmem:[#allocation2 + $0x3c] sm:$0xff] }
 0x1c1   : > { %3509 = vrot.lane.b32.xlu1 %v3508_v50, %s3793_s15  ;;  %v1081_v50 = vld [vmem:[#allocation2 + $0xc] sm:$0xff]  ;;  %5089 = vst [vmem:[#allocation19_spill] sm:$0xff] %v4473_v56 }
 0x1c2   : > { %3504 = vrot.lane.b32.xlu0 %v3503_v51, %s3793_s15  ;;  %v3523_v51 = vpack.i.bf16 %v1018_v27, %v1017_v44  ;;  %v3533_v62 = vpack.i.bf16 %v4446_v24, %v1081_v50  ;;  %v4457_v44 = vld [vmem:[#allocation2 + $0x24] sm:$0xff] }
 0x1c3   : > { %3008 = vmatpush3.bf16.msra.mxu0 %v3670_v34  ;;  %3289 = vmatpush3.bf16.msra.mxu1 %v3670_v34 }
 0x1c4   : > { %3198 = vmatprep.subr.bf16.mxu0 %v5039_v35  ;;  %3087 = vmatprep.subr.bf16.mxu1 %v3672_v58 }
 0x1c5   : > { %3519 = vrot.lane.b32.xlu1 %v3518_v41, %s3793_s15  ;;  %v1111_v41 = vld [vmem:[#allocation2 + $0x35] sm:$0xff] }
 0x1c6   : > { %3514 = vrot.lane.b32.xlu0 %v3513_v36, %s3793_s15  ;;  %v4455_v36 = vld [vmem:[#allocation2 + $0x1c] sm:$0xff]  ;;  %v3548_v27 = vpack.i.bf16 %v1112_v22, %v1111_v41 }
 0x1c7   : > { %v3543_v50 = vpack.i.bf16 %v4457_v44, %v4455_v36  ;;  %v1116_v41 = vld [vmem:[#allocation2 + $0x5d] sm:$0xff] }
 0x1c9   : > { %3529 = vrot.lane.b32.xlu1 %v3528_v30, %s3793_s15  ;;  %v1113_v30 = vld [vmem:[#allocation2 + $0x45] sm:$0xff] }
 0x1ca   : > { %3524 = vrot.lane.b32.xlu0 %v3523_v51, %s3793_s15  ;;  %v4466_v51 = vld [vmem:[#allocation2 + $0x34] sm:$0xff]  ;;  %v3558_v22 = vpack.i.bf16 %v1114_v23, %v1113_v30  ;;  %v1117_v30 = vld [vmem:[#allocation2 + $0x65] sm:$0xff] }
 0x1cb   : > { %5088 = vst [vmem:[#allocation18_spill] sm:$0xff] %v4466_v51  ;;  %v3553_v37 = vpack.i.bf16 %v4466_v51, %v4461_v28  ;;  %v4483_v23 = vld [vmem:[#allocation2 + $0x54] sm:$0xff] }
 0x1cc   : > { %5092 = vst [vmem:[#allocation22_spill] sm:$0xff] %v4483_v23 }
 0x1cd   : > { %3539 = vrot.lane.b32.xlu1 %v3538_v31, %s3793_s15  ;;  %v1115_v31 = vld [vmem:[#allocation2 + $0x55] sm:$0xff] }
 0x1ce   : > { %3534 = vrot.lane.b32.xlu0 %v3533_v62, %s3793_s15  ;;  %v4475_v62 = vld [vmem:[#allocation2 + $0x44] sm:$0xff]  ;;  %v3568_v34 = vpack.i.bf16 %v1116_v41, %v1115_v31  ;;  %v1119_v31 = vld [vmem:[#allocation2 + $0x75] sm:$0xff] }
 0x1cf   : > { %5090 = vst [vmem:[#allocation20_spill] sm:$0xff] %v4475_v62  ;;  %v3563_v58 = vpack.i.bf16 %v4475_v62, %v4473_v56  ;;  %v1120_v41 = vld [vmem:[#allocation2 + $0x7d] sm:$0xff] }
 0x1d0   : > { %v3588_v62 = vpack.i.bf16 %v1120_v41, %v1119_v31  ;;  %v4507_v31 = vld [vmem:[#allocation2 + $0x84] sm:$0xff] }
 0x1d1   : > { %3549 = vrot.lane.b32.xlu1 %v3548_v27, %s3793_s15  ;;  %v4481_v27 = vld [vmem:[#allocation2 + $0x4c] sm:$0xff]  ;;  %5098 = vst [vmem:[#allocation28_spill] sm:$0xff] %v4507_v31 }
 0x1d2   : > { %3544 = vrot.lane.b32.xlu0 %v3543_v50, %s3793_s15  ;;  %5091 = vst [vmem:[#allocation21_spill] sm:$0xff] %v4481_v27  ;;  %v1118_v50 = vld [vmem:[#allocation2 + $0x6d] sm:$0xff] }
 0x1d3   : > { %v3578_v35 = vpack.i.bf16 %v1118_v50, %v1117_v30  ;;  %v1122_v30 = vld [vmem:[#allocation2 + $0x8d] sm:$0xff] }
 0x1d4   : > { %v4499_v50 = vld [vmem:[#allocation2 + $0x74] sm:$0xff] }
 0x1d5   : > { %3559 = vrot.lane.b32.xlu1 %v3558_v22, %s3793_s15  ;;  %v3573_v22 = vpack.i.bf16 %v4483_v23, %v4481_v27  ;;  %5096 = vst [vmem:[#allocation26_spill] sm:$0xff] %v4499_v50  ;;  %v3598_v23 = vpack.i.bf16 %v1122_v30, %v1121_v20  ;;  %v4502_v27 = vld [vmem:[#allocation2 + $0x7c] sm:$0xff]  ;;  %v1125_v20 = vld [vmem:[#allocation2 + $0xa5] sm:$0xff]  ;;  %v1126_v30 = vld [vmem:[#allocation2 + $0xad] sm:$0xff] }
 0x1d6   : > { %3554 = vrot.lane.b32.xlu0 %v3553_v37, %s3793_s15  ;;  %v4489_v37 = vld [vmem:[#allocation2 + $0x5c] sm:$0xff]  ;;  %5097 = vst [vmem:[#allocation27_spill] sm:$0xff] %v4502_v27 }
 0x1d7   : > { %5093 = vst [vmem:[#allocation23_spill] sm:$0xff] %v4489_v37 }
 0x1d9   : > { %3569 = vrot.lane.b32.xlu1 %v3568_v34, %s3793_s15  ;;  %v3583_v34 = vpack.i.bf16 %v4491_v21, %v4489_v37  ;;  %v4513_v21 = vld [vmem:[#allocation2 + $0x8c] sm:$0xff]  ;;  %v4515_v37 = vld [vmem:[#allocation2 + $0x94] sm:$0xff] }
 0x1da   : > { %3564 = vrot.lane.b32.xlu0 %v3563_v58, %s3793_s15  ;;  %v4497_v58 = vld [vmem:[#allocation2 + $0x6c] sm:$0xff]  ;;  %5099 = vst [vmem:[#allocation29_spill] sm:$0xff] %v4513_v21  ;;  %5100 = vst [vmem:[#allocation30_spill] sm:$0xff] %v4515_v37 }
 0x1db   : > { %5095 = vst [vmem:[#allocation25_spill] sm:$0xff] %v4497_v58 }
 0x1dd   : > { %3579 = vrot.lane.b32.xlu1 %v3578_v35, %s3793_s15  ;;  %v3593_v35 = vpack.i.bf16 %v4499_v50, %v4497_v58  ;;  %v4523_v50 = vld [vmem:[#allocation2 + $0xa4] sm:$0xff] }
 0x1de   : > { %3574 = vrot.lane.b32.xlu0 %v3573_v22, %s3793_s15  ;;  %v1124_v22 = vld [vmem:[#allocation2 + $0x9d] sm:$0xff]  ;;  %5102 = vst [vmem:[#allocation32_spill] sm:$0xff] %v4523_v50 }
 0x1df   : > { %v3608_v41 = vpack.i.bf16 %v1124_v22, %v1123_v19  ;;  %v1127_v19 = vld [vmem:[#allocation2 + $0xb5] sm:$0xff]  ;;  %v1128_v22 = vld [vmem:[#allocation2 + $0xbd] sm:$0xff] }
 0x1e1   : > { %3589 = vrot.lane.b32.xlu1 %v3588_v62, %s3793_s15  ;;  %v3603_v62 = vpack.i.bf16 %v4507_v31, %v4502_v27  ;;  %v3628_v31 = vpack.i.bf16 %v1128_v22, %v1127_v19  ;;  %v4531_v27 = vld [vmem:[#allocation2 + $0xb4] sm:$0xff]  ;;  %v4537_v19 = vld [vmem:[#allocation2 + $0xcc] sm:$0xff]  ;;  %v4539_v22 = vld [vmem:[#allocation2 + $0xbc] sm:$0xff] }
 0x1e2   : > { %3584 = vrot.lane.b32.xlu0 %v3583_v34, %s3793_s15  ;;  %v3618_v34 = vpack.i.bf16 %v1126_v30, %v1125_v20  ;;  %v1129_v20 = vld [vmem:[#allocation2 + $0xc5] sm:$0xff]  ;;  %v1130_v30 = vld [vmem:[#allocation2 + $0xcd] sm:$0xff]  ;;  %5104 = vst [vmem:[#allocation34_spill] sm:$0xff] %v4531_v27  ;;  %5105 = vst [vmem:[#allocation35_spill] sm:$0xff] %v4537_v19 }
 0x1e3   : > { %5106 = vst [vmem:[#allocation36_spill] sm:$0xff] %v4539_v22 }
 0x1e5   : > { %3599 = vrot.lane.b32.xlu1 %v3598_v23, %s3793_s15  ;;  %v3613_v23 = vpack.i.bf16 %v4515_v37, %v4513_v21  ;;  %v3638_v37 = vpack.i.bf16 %v1130_v30, %v1129_v20 }
 0x1e6   : > { %3594 = vrot.lane.b32.xlu0 %v3593_v35, %s3793_s15  ;;  %v4521_v35 = vld [vmem:[#allocation2 + $0x9c] sm:$0xff] }
 0x1e7   : > { %5101 = vst [vmem:[#allocation31_spill] sm:$0xff] %v4521_v35 }
 0x1e9   : > { %3609 = vrot.lane.b32.xlu1 %v3608_v41, %s3793_s15  ;;  %v3623_v41 = vpack.i.bf16 %v4523_v50, %v4521_v35  ;;  %v4541_v50 = vld [vmem:[#allocation2 + $0xc4] sm:$0xff] }
 0x1ea   : > { %3604 = vrot.lane.b32.xlu0 %v3603_v62, %s3793_s15  ;;  %v4529_v62 = vld [vmem:[#allocation2 + $0xac] sm:$0xff]  ;;  %5107 = vst [vmem:[#allocation37_spill] sm:$0xff] %v4541_v50 }
 0x1eb   : > { %5103 = vst [vmem:[#allocation33_spill] sm:$0xff] %v4529_v62 }
 0x1ed   : > { %3619 = vrot.lane.b32.xlu1 %v3618_v34, %s3793_s15  ;;  %v3633_v34 = vpack.i.bf16 %v4531_v27, %v4529_v62  ;;  %v1030_v62 = vld [vmem:[#allocation2 + $0x2] sm:$0xff] }
 0x1ee   : > { %3614 = vrot.lane.b32.xlu0 %v3613_v23, %s3793_s15  ;;  %v1131_v23 = vld [vmem:[#allocation2 + $0xd5] sm:$0xff] }
 0x1ef   : > { %v3648_v35 = vpack.i.bf16 %v4537_v19, %v1131_v23 }
 0x1f1   : > { %3629 = vrot.lane.b32.xlu1 %v3628_v31, %s3793_s15  ;;  %v3643_v31 = vpack.i.bf16 %v4541_v50, %v4539_v22  ;;  %v995_v50 = vld [vmem:[#allocation2 + $0x78] sm:$0xff] }
 0x1f2   : > { %3624 = vrot.lane.b32.xlu0 %v3623_v41, %s3793_s15 }
 0x1f5   : > { %3639 = vrot.lane.b32.xlu1 %v3638_v37, %s3793_s15 }
 0x1f6   : > { %3634 = vrot.lane.b32.xlu0 %v3633_v34, %s3793_s15 }
 0x1f9   : > { %3649 = vrot.lane.b32.xlu1 %v3648_v35, %s3793_s15 }
 0x1fa   : > { %3644 = vrot.lane.b32.xlu0 %v3643_v31, %s3793_s15 }
 0x20b   : > { %v3415_v41 = vpop.permute.xlu1 %3414 }
 0x20c   : > { %v3417_v20 = vunpack.i.h.bf16 %v3415_v41  ;;  %v3416_v30 = vunpack.i.l.bf16 %v3415_v41  ;;  %v3405_v27 = vpop.permute.xlu0 %3404  ;;  %v994_v41 = vld [vmem:[#allocation2 + $0x70] sm:$0xff] }
 0x20d   : > { %v3407_v21 = vunpack.i.h.bf16 %v3405_v27  ;;  %v3406_v58 = vunpack.i.l.bf16 %v3405_v27 }
 0x20e   : > { %v1597_v37 = vsel %vm1557_vm2, %v4436_v52, %v3416_v30  ;;  %v1598_v34 = vsel %vm1557_vm2, %v4338_v42, %v3417_v20  ;;  %v980_v52 = vld [vmem:[#allocation2] sm:$0xff]  ;;  %v981_v30 = vld [vmem:[#allocation2 + $0x8] sm:$0xff] }
 0x20f   : > { %v3420_v23 = vpop.permute.xlu1 %3419  ;;  %v1583_v19 = vsel %vm1557_vm2, %v1030_v62, %v3406_v58  ;;  %v1584_v35 = vsel %vm1557_vm2, %v4342_v33, %v3407_v21  ;;  %v1694_v31 = vpack.c.bf16 %v1598_v34, %v1597_v37  ;;  %v3673_v33 = vld [vmem:[%s4015_s8 + $0x80] sm:$0xff]  }
 0x210   : > { %v3422_v22 = vunpack.i.h.bf16 %v3420_v23  ;;  %v3421_v56 = vunpack.i.l.bf16 %v3420_v23  ;;  %v3410_v27 = vpop.permute.xlu0 %3409  ;;  %v1659_v51 = vpack.c.bf16 %v1584_v35, %v1583_v19  ;;  %v3671_v19 = vld [vmem:[%s4015_s8 + $0x100] sm:$0xff]   ;;  %v982_v23 = vld [vmem:[#allocation2 + $0x10] sm:$0xff]  ;;  %v3674_v35 = vld [vmem:[%s4015_s8 + $0xc8] sm:$0xff]  }
 0x211   : > { %v3412_v18 = vunpack.i.h.bf16 %v3410_v27  ;;  %v3411_v42 = vunpack.i.l.bf16 %v3410_v27  ;;  %2145 = vmatprep.mubr.bf16.mxu1 %v1694_v31 }
 0x212   : > { %2089 = vmatprep.mubr.bf16.mxu0 %v1659_v51  ;;  %v1572_v58 = vsel %vm1557_vm2, %v994_v41, %v3421_v56  ;;  %v1573_v21 = vsel %vm1557_vm2, %v995_v50, %v3422_v22  ;;  %v983_v51 = vld [vmem:[#allocation2 + $0x18] sm:$0xff]  ;;  %v3675_v41 = vld [vmem:[%s4015_s8 + $0x88] sm:$0xff]  }
 0x213   : > { %v3430_v62 = vpop.permute.xlu1 %3429  ;;  %v1558_v20 = vsel %vm1557_vm2, %v980_v52, %v3411_v42  ;;  %v1559_v37 = vsel %vm1557_vm2, %v981_v30, %v3412_v18  ;;  %v1693_v34 = vpack.c.bf16 %v1573_v21, %v1572_v58  ;;  %v996_v18 = vld [vmem:[#allocation2 + $0x80] sm:$0xff]  ;;  %v997_v21 = vld [vmem:[#allocation2 + $0x88] sm:$0xff] }
 0x214   : > { %v3425_v17 = vpop.permute.xlu0 %3424  ;;  %v3432_v16 = vunpack.i.h.bf16 %v3430_v62  ;;  %v3431_v27 = vunpack.i.l.bf16 %v3430_v62  ;;  %v1658_v31 = vpack.c.bf16 %v1559_v37, %v1558_v20  ;;  %v3677_v62 = vld [vmem:[%s4015_s8 + $0x108] sm:$0xff]  }
 0x215   : > { %v3427_v56 = vunpack.i.h.bf16 %v3425_v17  ;;  %v3426_v50 = vunpack.i.l.bf16 %v3425_v17  ;;  %2146 = vmatmul.mubr.bf16.vlgmr.msra.gmra.mrb[0].mxu1 %v1693_v34  ;;  %v3676_v17 = vld [vmem:[%s4015_s8 + $0xd0] sm:$0xff]  }
 0x216   : > { %2090 = vmatmul.mubr.bf16.vlgmr.msra.gmra.mrb[0].mxu0 %v1658_v31  ;;  %3088 = vmatpush3.bf16.msra.mxu1 %v3673_v33  ;;  %v1560_v22 = vsel %vm1557_vm2, %v982_v23, %v3431_v27  ;;  %v1561_v58 = vsel %vm1557_vm2, %v983_v51, %v3432_v16  ;;  %v5108_v23 = vmov 0.0  }
 0x217   : > { %3199 = vmatpush3.bf16.msra.mxu0 %v3671_v19  ;;  %v3440_v52 = vpop.permute.xlu1 %3439  ;;  %v1585_v30 = vsel %vm1557_vm2, %v4346_v47, %v3426_v50  ;;  %v1586_v42 = vsel %vm1557_vm2, %v4352_v29, %v3427_v56  ;;  %3089 = vmatprep.subr.bf16.mxu1 %v3674_v35  ;;  %v1663_v47 = vpack.c.bf16 %v1561_v58, %v1560_v22  ;;  %v984_v50 = vld [vmem:[#allocation2 + $0x20] sm:$0xff]  ;;  %v3678_v58 = vld [vmem:[%s4015_s8 + $0x90] sm:$0xff]  }
 0x218   : > { %v3435_v20 = vpop.permute.xlu0 %3434  ;;  %v3442_v33 = vunpack.i.h.bf16 %v3440_v52  ;;  %v3441_v37 = vunpack.i.l.bf16 %v3440_v52  ;;  %v1664_v34 = vpack.c.bf16 %v1586_v42, %v1585_v30  ;;  %3200 = vmatprep.subr.bf16.mxu0 %v5108_v23  ;;  %v3683_v52 = vld [vmem:[%s4015_s8 + $0x110] sm:$0xff]  }
 0x219   : > { %v3437_v19 = vunpack.i.h.bf16 %v3435_v20  ;;  %v3436_v27 = vunpack.i.l.bf16 %v3435_v20  ;;  %v3679_v20 = vld [vmem:[%s4015_s8 + $0xd8] sm:$0xff]  }
 0x21a   : > { %2097 = vmatprep.mubr.bf16.mxu0 %v1664_v34  ;;  %v1574_v29 = vsel %vm1557_vm2, %v996_v18, %v3441_v37  ;;  %v1575_v16 = vsel %vm1557_vm2, %v997_v21, %v3442_v33  ;;  %3090 = vmatpush3.bf16.msra.mxu1 %v3675_v41  ;;  %v985_v21 = vld [vmem:[#allocation2 + $0x28] sm:$0xff]  ;;  %v998_v34 = vld [vmem:[#allocation2 + $0x90] sm:$0xff] }
 0x21b   : > { %v3450_v35 = vpop.permute.xlu1 %3449  ;;  %v1599_v31 = vsel %vm1557_vm2, %v4340_v60, %v3436_v27  ;;  %v1600_v51 = vsel %vm1557_vm2, %v4360_v49, %v3437_v19  ;;  %v1698_v56 = vpack.c.bf16 %v1575_v16, %v1574_v29  ;;  %3091 = vmatprep.subr.bf16.mxu1 %v3676_v17  ;;  %3201 = vmatpush3.bf16.msra.mxu0 %v3677_v62  ;;  %v999_v19 = vld [vmem:[#allocation2 + $0x98] sm:$0xff] }
 0x21c   : > { %v3445_v22 = vpop.permute.xlu0 %3444  ;;  %v3452_v30 = vunpack.i.h.bf16 %v3450_v35  ;;  %v3451_v42 = vunpack.i.l.bf16 %v3450_v35  ;;  %v1699_v18 = vpack.c.bf16 %v1600_v51, %v1599_v31  ;;  %3202 = vmatprep.subr.bf16.mxu0 %v5108_v23  ;;  %v3688_v27 = vld [vmem:[%s4015_s8 + $0x118] sm:$0xff]  }
 0x21d   : > { %v3447_v41 = vunpack.i.h.bf16 %v3445_v22  ;;  %v3446_v60 = vunpack.i.l.bf16 %v3445_v22  ;;  %v3680_v31 = vld [vmem:[%s4015_s8 + $0x98] sm:$0xff]  }
 0x21e   : > { %2098 = vmatmul.mubr.bf16.gmra.mrb[4].mxu0 %v1663_v47  ;;  %2153 = vmatprep.mubr.bf16.mxu1 %v1699_v18  ;;  %v1562_v49 = vsel %vm1557_vm2, %v984_v50, %v3451_v42  ;;  %v1563_v37 = vsel %vm1557_vm2, %v985_v21, %v3452_v30  ;;  %v986_v21 = vld [vmem:[#allocation2 + $0x30] sm:$0xff] }
 0x21f   : > { %2154 = vmatmul.mubr.bf16.gmra.mrb[4].mxu1 %v1698_v56  ;;  %v3460_v17 = vpop.permute.xlu1 %3459  ;;  %v1587_v62 = vsel %vm1557_vm2, %v4354_v39, %v3446_v60  ;;  %v1588_v33 = vsel %vm1557_vm2, %v4368_v53, %v3447_v41  ;;  %3203 = vmatpush3.bf16.msra.mxu0 %v3683_v52  ;;  %v3681_v56 = vld [vmem:[%s4015_s8 + $0xe0] sm:$0xff]   ;;  %v3795_v53 = vmov 0   ;;  %v1668_v50 = vpack.c.bf16 %v1563_v37, %v1562_v49  ;;  %v3684_v37 = vld [vmem:[%s4015_s8 + $0xe8] sm:$0xff]  }
 0x220   : > { %v3455_v47 = vpop.permute.xlu0 %3454  ;;  %v3462_v29 = vunpack.i.h.bf16 %v3460_v17  ;;  %v3461_v16 = vunpack.i.l.bf16 %v3460_v17  ;;  %v1669_v35 = vpack.c.bf16 %v1588_v33, %v1587_v62  ;;  %3092 = vmatpush3.bf16.msra.mxu1 %v3678_v58  ;;  %3204 = vmatprep.subr.bf16.mxu0 %v5108_v23  ;;  %v987_v17 = vld [vmem:[#allocation2 + $0x38] sm:$0xff]  ;;  %v3682_v62 = vld [vmem:[%s4015_s8 + $0xa0] sm:$0xff]  }
 0x221   : > { %v3457_v51 = vunpack.i.h.bf16 %v3455_v47  ;;  %v3456_v39 = vunpack.i.l.bf16 %v3455_v47  ;;  %3093 = vmatprep.subr.bf16.mxu1 %v3679_v20  ;;  %3654 = vset.pattern.permute.xlu1 %v3795_v53  ;;  %v1001_v47 = vld [vmem:[#allocation2 + $0xa8] sm:$0xff] }
 0x222   : > { %2105 = vmatprep.mubr.bf16.mxu0 %v1669_v35  ;;  %v1576_v22 = vsel %vm1557_vm2, %v998_v34, %v3461_v16  ;;  %v1577_v52 = vsel %vm1557_vm2, %v999_v19, %v3462_v29  ;;  %3653 = vset.pattern.permute.xlu0 %v3795_v53 }
 0x223   : > { %v3470_v30 = vpop.permute.xlu1 %3469  ;;  %v1601_v42 = vsel %vm1557_vm2, %v4362_v40, %v3456_v39  ;;  %v1602_v18 = vsel %vm1557_vm2, %v4376_v32, %v3457_v51  ;;  %v1703_v58 = vpack.c.bf16 %v1577_v52, %v1576_v22  ;;  %3205 = vmatpush3.bf16.msra.mxu0 %v3688_v27  ;;  %2497 = vperm.xlu1 %3654, %v3975_v1   ;;  %v1000_v27 = vld [vmem:[#allocation2 + $0xa0] sm:$0xff]  ;;  %v3685_v51 = vld [vmem:[%s4015_s8 + $0xa8] sm:$0xff]  }
 0x224   : > { %v3465_v41 = vpop.permute.xlu0 %3464  ;;  %v3472_v60 = vunpack.i.h.bf16 %v3470_v30  ;;  %v3471_v20 = vunpack.i.l.bf16 %v3470_v30  ;;  %v1704_v49 = vpack.c.bf16 %v1602_v18, %v1601_v42  ;;  %3094 = vmatpush3.bf16.msra.mxu1 %v3680_v31  ;;  %2492 = vperm.xlu0 %3653, %v3970_v0   ;;  %v988_v30 = vld [vmem:[#allocation2 + $0x40] sm:$0xff] }
 0x225   : > { %v3467_v33 = vunpack.i.h.bf16 %v3465_v41  ;;  %v3466_v40 = vunpack.i.l.bf16 %v3465_v41  ;;  %3095 = vmatprep.subr.bf16.mxu1 %v3681_v56  ;;  %v3686_v56 = vld [vmem:[%s4015_s8 + $0xf0] sm:$0xff]   ;;  %v989_v41 = vld [vmem:[#allocation2 + $0x48] sm:$0xff] }
 0x226   : > { %2106 = vmatmul.mubr.bf16.gmra.mrb[8].mxu0 %v1668_v50  ;;  %2161 = vmatprep.mubr.bf16.mxu1 %v1704_v49  ;;  %v1564_v32 = vsel %vm1557_vm2, %v986_v21, %v3471_v20  ;;  %v1565_v0 = vsel %vm1557_vm2, %v987_v17, %v3472_v60  ;;  %v3687_v60 = vld [vmem:[%s4015_s8 + $0xb0] sm:$0xff]  }
 0x227   : > { %2162 = vmatmul.mubr.bf16.gmra.mrb[8].mxu1 %v1703_v58  ;;  %v3480_v1 = vpop.permute.xlu1 %3479  ;;  %v1589_v34 = vsel %vm1557_vm2, %v4370_v54, %v3466_v40  ;;  %v1590_v19 = vsel %vm1557_vm2, %v4384_v59, %v3467_v33  ;;  %2502 = vperm.xlu1 %3654, %v3980_v2   ;;  %v1673_v59 = vpack.c.bf16 %v1565_v0, %v1564_v32  ;;  %v1003_v40 = vld [vmem:[#allocation2 + $0xb8] sm:$0xff] }
 0x228   : > { %v3475_v29 = vpop.permute.xlu0 %3474  ;;  %v3482_v16 = vunpack.i.h.bf16 %v3480_v1  ;;  %v3481_v35 = vunpack.i.l.bf16 %v3480_v1  ;;  %v1674_v31 = vpack.c.bf16 %v1590_v19, %v1589_v34  ;;  %3096 = vmatpush3.bf16.msra.mxu1 %v3682_v62  ;;  %2507 = vperm.xlu0 %3653, %v3985_v3   ;;  %v3690_v19 = vld [vmem:[%s4015_s8 + $0xb8] sm:$0xff]  }
 0x229   : > { %v3477_v39 = vunpack.i.h.bf16 %v3475_v29  ;;  %v3476_v54 = vunpack.i.l.bf16 %v3475_v29  ;;  %3097 = vmatprep.subr.bf16.mxu1 %v3684_v37 }
 0x22a   : > { %2113 = vmatprep.mubr.bf16.mxu0 %v1674_v31  ;;  %v1578_v53 = vsel %vm1557_vm2, %v1000_v27, %v3481_v35  ;;  %v1579_v50 = vsel %vm1557_vm2, %v1001_v47, %v3482_v16  ;;  %v990_v31 = vld [vmem:[#allocation2 + $0x50] sm:$0xff] }
 0x22b   : > { %v3490_v2 = vpop.permute.xlu1 %3489  ;;  %v1603_v22 = vsel %vm1557_vm2, %v4378_v57, %v3476_v54  ;;  %v1604_v52 = vsel %vm1557_vm2, %v4393_v25, %v3477_v39  ;;  %v1708_v3 = vpack.c.bf16 %v1579_v50, %v1578_v53  ;;  %2512 = vperm.xlu1 %3654, %v3990_v4   ;;  %v3689_v57 = vld [vmem:[%s4015_s8 + $0xf8] sm:$0xff]  }
 0x22c   : > { %v3485_v42 = vpop.permute.xlu0 %3484  ;;  %v3492_v18 = vunpack.i.h.bf16 %v3490_v2  ;;  %v3491_v58 = vunpack.i.l.bf16 %v3490_v2  ;;  %v1709_v21 = vpack.c.bf16 %v1604_v52, %v1603_v22  ;;  %3098 = vmatpush3.bf16.msra.mxu1 %v3685_v51  ;;  %2517 = vperm.xlu0 %3653, %v3995_v5   ;;  %v1002_v5 = vld [vmem:[#allocation2 + $0xb0] sm:$0xff] }
 0x22d   : > { %v3487_v20 = vunpack.i.h.bf16 %v3485_v42  ;;  %v3486_v49 = vunpack.i.l.bf16 %v3485_v42  ;;  %3099 = vmatprep.subr.bf16.mxu1 %v3686_v56  ;;  %v991_v56 = vld [vmem:[#allocation2 + $0x58] sm:$0xff] }
 0x22e   : > { %2114 = vmatmul.mubr.bf16.gmra.mrb[12].mxu0 %v1673_v59  ;;  %2169 = vmatprep.mubr.bf16.mxu1 %v1709_v21  ;;  %v1566_v25 = vsel %vm1557_vm2, %v988_v30, %v3491_v58  ;;  %v1567_v33 = vsel %vm1557_vm2, %v989_v41, %v3492_v18  ;;  %v1004_v30 = vld [vmem:[#allocation2 + $0xc0] sm:$0xff] }
 0x22f   : > { %2170 = vmatmul.mubr.bf16.gmra.mrb[12].mxu1 %v1708_v3  ;;  %v3500_v4 = vpop.permute.xlu1 %3499  ;;  %v1591_v17 = vsel %vm1557_vm2, %v4386_v43, %v3486_v49  ;;  %v1592_v62 = vsel %vm1557_vm2, %v4399_v46, %v3487_v20  ;;  %2522 = vperm.xlu1 %3654, %v4000_v6   ;;  %v1678_v43 = vpack.c.bf16 %v1567_v33, %v1566_v25 }
 0x230   : > { %v3495_v37 = vpop.permute.xlu0 %3494  ;;  %v3502_v32 = vunpack.i.h.bf16 %v3500_v4  ;;  %v3501_v1 = vunpack.i.l.bf16 %v3500_v4  ;;  %v1679_v34 = vpack.c.bf16 %v1592_v62, %v1591_v17  ;;  %3100 = vmatpush3.bf16.msra.mxu1 %v3687_v60  ;;  %2527 = vperm.xlu0 %3653, %v4005_v7   ;;  %v992_v4 = vld [vmem:[#allocation2 + $0x60] sm:$0xff]  ;;  %v993_v17 = vld [vmem:[#allocation2 + $0x68] sm:$0xff] }
 0x231   : > { %v3497_v0 = vunpack.i.h.bf16 %v3495_v37  ;;  %v3496_v27 = vunpack.i.l.bf16 %v3495_v37  ;;  %3101 = vmatprep.subr.bf16.mxu1 %v3689_v57  ;;  %v1056_v37 = vld [vmem:[#allocation2 + $0xb] sm:$0xff] }
 0x232   : > { %2121 = vmatprep.mubr.bf16.mxu0 %v1679_v34  ;;  %v1580_v46 = vsel %vm1557_vm2, %v1002_v5, %v3501_v1  ;;  %v1581_v47 = vsel %vm1557_vm2, %v1003_v40, %v3502_v32 }
 0x233   : > { %v1605_v6 = vsel %vm1557_vm2, %v4395_v26, %v3496_v27  ;;  %v1606_v29 = vsel %vm1557_vm2, %v4410_v55, %v3497_v0  ;;  %v1713_v16 = vpack.c.bf16 %v1581_v47, %v1580_v46  ;;  %v3510_v35 = vpop.permute.xlu1 %3509  ;;  %2532 = vperm.xlu1 %3654, %v4010_v8  }
 0x234   : > { %v3505_v7 = vpop.permute.xlu0 %3504  ;;  %v1714_v51 = vpack.c.bf16 %v1606_v29, %v1605_v6  ;;  %v3512_v39 = vunpack.i.h.bf16 %v3510_v35  ;;  %v3511_v54 = vunpack.i.l.bf16 %v3510_v35  ;;  %3102 = vmatpush3.bf16.msra.mxu1 %v3690_v19  ;;  %2537 = vperm.xlu0 %3653, %v4020_v9  }
 0x235   : > { %v3507_v59 = vunpack.i.h.bf16 %v3505_v7  ;;  %v3506_v53 = vunpack.i.l.bf16 %v3505_v7  ;;  %v1058_v7 = vld [vmem:[#allocation2 + $0x1b] sm:$0xff] }
 0x236   : > { %2122 = vmatmul.mubr.bf16.gmra.mrb[16].mxu0 %v1678_v43  ;;  %2177 = vmatprep.mubr.bf16.mxu1 %v1714_v51  ;;  %v1568_v26 = vsel %vm1557_vm2, %v990_v31, %v3511_v54  ;;  %v1569_v2 = vsel %vm1557_vm2, %v991_v56, %v3512_v39  ;;  %v1059_v51 = vld [vmem:[#allocation2 + $0x23] sm:$0xff] }
 0x237   : > { %2178 = vmatmul.mubr.bf16.gmra.mrb[16].mxu1 %v1713_v16  ;;  %v3520_v55 = vpop.permute.xlu1 %3519  ;;  %v1593_v50 = vsel %vm1557_vm2, %v4401_v48, %v3506_v53  ;;  %v1594_v8 = vsel %vm1557_vm2, %v4420_v61, %v3507_v59  ;;  %2542 = vperm.xlu1 %3654, %v4025_v10   ;;  %v1683_v58 = vpack.c.bf16 %v1569_v2, %v1568_v26  ;;  %v5109_v16 = vld [vmem:[#allocation9_spill] sm:$0xff]  ;;  %v5111_v53 = vld [vmem:[#allocation11_spill] sm:$0xff] }
 0x238   : > { %v3515_v22 = vpop.permute.xlu0 %3514  ;;  %v3522_v9 = vunpack.i.h.bf16 %v3520_v55  ;;  %v3521_v52 = vunpack.i.l.bf16 %v3520_v55  ;;  %v1684_v3 = vpack.c.bf16 %v1594_v8, %v1593_v50  ;;  %2547 = vperm.xlu0 %3653, %v4030_v11   ;;  %v1133_v54 = vld [vmem:[#allocation2 + $0x1e] sm:$0xff]  ;;  %v5112_v55 = vld [vmem:[#allocation18_spill] sm:$0xff]  ;;  %v5113_v8 = vld [vmem:[#allocation19_spill] sm:$0xff] }
 0x239   : > { %v3517_v42 = vunpack.i.h.bf16 %v3515_v22  ;;  %v3516_v18 = vunpack.i.l.bf16 %v3515_v22  ;;  %v5114_v22 = vld [vmem:[#allocation12_spill] sm:$0xff] }
 0x23a   : > { %2129 = vmatprep.mubr.bf16.mxu0 %v1684_v3  ;;  %v1595_v48 = vsel %vm1557_vm2, %v4426_v63, %v3521_v52  ;;  %v1596_v61 = vsel %vm1557_vm2, %v4429_v45, %v3522_v9 }
 0x23b   : > { %v1607_v10 = vsel %vm1557_vm2, %v4412_v38, %v3516_v18  ;;  %v1582_v21 = vsel %vm1557_vm2, %v1004_v30, %v3517_v42  ;;  %v3530_v41 = vpop.permute.xlu1 %3529  ;;  %v1689_v60 = vpack.c.bf16 %v1596_v61, %v1595_v48  ;;  %2552 = vperm.xlu1 %3654, %v4035_v12   ;;  %v1060_v48 = vld [vmem:[#allocation2 + $0x2b] sm:$0xff]  ;;  %v1061_v61 = vld [vmem:[#allocation2 + $0x33] sm:$0xff] }
 0x23c   : > { %v3525_v11 = vpop.permute.xlu0 %3524  ;;  %v1719_v20 = vpack.c.bf16 %v1607_v10, %v1607_v10  ;;  %v1718_v49 = vpack.c.bf16 %v1582_v21, %v1582_v21  ;;  %v3532_v57 = vunpack.i.h.bf16 %v3530_v41  ;;  %v3531_v25 = vunpack.i.l.bf16 %v3530_v41  ;;  %2557 = vperm.xlu0 %3653, %v4040_v13   ;;  %v1057_v13 = vld [vmem:[#allocation2 + $0x13] sm:$0xff] }
 0x23d   : > { %v3527_v63 = vunpack.i.h.bf16 %v3525_v11  ;;  %v3526_v45 = vunpack.i.l.bf16 %v3525_v11  ;;  %v5116_v41 = vld [vmem:[#allocation14_spill] sm:$0xff] }
 0x23e   : > { %2130 = vmatmul.mubr.bf16.gmra.mrb[20].mxu0 %v1683_v58  ;;  %2185 = vmatprep.mubr.bf16.mxu1 %v1719_v20  ;;  %v1633_v38 = vsel %vm1557_vm2, %v4446_v24, %v3531_v25  ;;  %v1634_v62 = vsel %vm1557_vm2, %v4455_v36, %v3532_v57  ;;  %v5115_v58 = vld [vmem:[#allocation13_spill] sm:$0xff]  ;;  %v1135_v11 = vld [vmem:[#allocation2 + $0x2e] sm:$0xff] }
 0x23f   : > { %2186 = vmatmul.mubr.bf16.gmra.mrb[20].mxu1 %v1718_v49  ;;  %2137 = vmatprep.mubr.bf16.mxu0 %v1689_v60  ;;  %v1570_v12 = vsel %vm1557_vm2, %v992_v4, %v3526_v45  ;;  %v1571_v33 = vsel %vm1557_vm2, %v993_v17, %v3527_v63  ;;  %v1661_v5 = vpack.c.bf16 %v1634_v62, %v1633_v38  ;;  %v3540_v40 = vpop.permute.xlu1 %3539  ;;  %v1134_v60 = vld [vmem:[#allocation2 + $0x26] sm:$0xff]  ;;  %v5117_v57 = vld [vmem:[#allocation15_spill] sm:$0xff]  ;;  %v5118_v4 = vld [vmem:[#allocation20_spill] sm:$0xff] }
 0x240   : > { %v3535_v32 = vpop.permute.xlu0 %3534  ;;  %v3542_v1 = vunpack.i.h.bf16 %v3540_v40  ;;  %v3541_v34 = vunpack.i.l.bf16 %v3540_v40  ;;  %2562 = vperm.xlu1 %3654, %v4045_v14   ;;  %2567 = vperm.xlu0 %3653, %v4050_v15   ;;  %v1688_v36 = vpack.c.bf16 %v1571_v33, %v1570_v12  ;;  %v5110_v15 = vld [vmem:[#allocation10_spill] sm:$0xff]  ;;  %v5119_v63 = vld [vmem:[#allocation21_spill] sm:$0xff]  ;;  %v5120_v38 = vld [vmem:[#allocation16_spill] sm:$0xff]  ;;  %v1667_v62 = vpack.c.bf16 %v1135_v11, %v1134_v60 }
 0x241   : > { %v3537_v24 = vunpack.i.h.bf16 %v3535_v32  ;;  %v3536_v19 = vunpack.i.l.bf16 %v3535_v32  ;;  %2225 = vmatprep.mubr.bf16.mxu1 %v1661_v5  ;;  %v1062_v32 = vld [vmem:[#allocation2 + $0x3b] sm:$0xff] }
 0x242   : > { %v1635_v0 = vsel %vm1557_vm2, %v4457_v44, %v3541_v34  ;;  %v1636_v27 = vsel %vm1557_vm2, %v4461_v28, %v3542_v1  ;;  %v1132_v28 = vld [vmem:[#allocation2 + $0x16] sm:$0xff]  ;;  %v1063_v1 = vld [vmem:[#allocation2 + $0x43] sm:$0xff] }
 0x243   : > { %v1609_v43 = vsel %vm1557_vm2, %v1057_v13, %v3537_v24  ;;  %v1608_v46 = vsel %vm1557_vm2, %v1056_v37, %v3536_v19  ;;  %v3550_v47 = vpop.permute.xlu1 %3549  ;;  %v1666_v14 = vpack.c.bf16 %v1636_v27, %v1635_v0  ;;  %v1662_v9 = vpack.c.bf16 %v1133_v54, %v1132_v28  ;;  %v5121_v13 = vld [vmem:[#allocation17_spill] sm:$0xff]  ;;  %v1136_v19 = vld [vmem:[#allocation2 + $0x36] sm:$0xff] }
 0x244   : > { %v1660_v6 = vpack.c.bf16 %v1609_v43, %v1608_v46  ;;  %v3545_v29 = vpop.permute.xlu0 %3544  ;;  %2572 = vperm.xlu1 %3654, %v5109_v16   ;;  %2577 = vperm.xlu0 %3653, %v5110_v15   ;;  %v3552_v44 = vunpack.i.h.bf16 %v3550_v47  ;;  %v3551_v39 = vunpack.i.l.bf16 %v3550_v47  ;;  %v5122_v46 = vld [vmem:[#allocation22_spill] sm:$0xff] }
 0x245   : > { %v3547_v35 = vunpack.i.h.bf16 %v3545_v29  ;;  %v3546_v31 = vunpack.i.l.bf16 %v3545_v29  ;;  %v1138_v54 = vld [vmem:[#allocation2 + $0x46] sm:$0xff] }
 0x246   : > { %2138 = vmatmul.mubr.bf16.gmra.mrb[24].mxu0 %v1688_v36  ;;  %v1637_v50 = vsel %vm1557_vm2, %v5112_v55, %v3551_v39  ;;  %v1638_v2 = vsel %vm1557_vm2, %v5113_v8, %v3552_v44  ;;  %v1137_v36 = vld [vmem:[#allocation2 + $0x3e] sm:$0xff]  ;;  %v1065_v44 = vld [vmem:[#allocation2 + $0x53] sm:$0xff] }
 0x247   : > { %2226 = vmatmul.mubr.bf16.vlgmr.msra.gmra.mrb[24].mxu1 %v1660_v6  ;;  %3206 = vmatprep.mubr.msk.bf16.mxu0 %vm3796_vm3, %v5108_v23  ;;  %v1610_v56 = vsel %vm1557_vm2, %v1058_v7, %v3546_v31  ;;  %v1611_v59 = vsel %vm1557_vm2, %v1059_v51, %v3547_v35  ;;  %v3560_v52 = vpop.permute.xlu1 %3559  ;;  %v1671_v18 = vpack.c.bf16 %v1638_v2, %v1637_v50  ;;  %v5123_v6 = vld [vmem:[#allocation23_spill] sm:$0xff]  ;;  %v1064_v51 = vld [vmem:[#allocation2 + $0x4b] sm:$0xff]  ;;  %v5124_v55 = vld [vmem:[#allocation24_spill] sm:$0xff] }
 0x248   : > { %2233 = vmatprep.mubr.bf16.mxu1 %v1666_v14  ;;  %2582 = vperm.xlu1 %3654, %v5111_v53   ;;  %v3555_v26 = vpop.permute.xlu0 %3554  ;;  %v1665_v3 = vpack.c.bf16 %v1611_v59, %v1610_v56  ;;  %v3562_v10 = vunpack.i.h.bf16 %v3560_v52  ;;  %v3561_v21 = vunpack.i.l.bf16 %v3560_v52  ;;  %v1672_v14 = vpack.c.bf16 %v1137_v36, %v1136_v19  ;;  %v1139_v56 = vld [vmem:[#allocation2 + $0x4e] sm:$0xff]  ;;  %v5125_v8 = vld [vmem:[#allocation25_spill] sm:$0xff] }
 0x249   : > { %2587 = vperm.xlu0 %3653, %v5114_v22   ;;  %v3557_v30 = vunpack.i.h.bf16 %v3555_v26  ;;  %v3556_v42 = vunpack.i.l.bf16 %v3555_v26  ;;  %v1677_v22 = vpack.c.bf16 %v1139_v56, %v1138_v54  ;;  %v5129_v36 = vld [vmem:[#allocation29_spill] sm:$0xff]  ;;  %v5131_v56 = vld [vmem:[#allocation31_spill] sm:$0xff] }
 0x24a   : > { %v1639_v17 = vsel %vm1557_vm2, %v5118_v4, %v3561_v21  ;;  %v1640_v45 = vsel %vm1557_vm2, %v5119_v63, %v3562_v10  ;;  %v1140_v10 = vld [vmem:[#allocation2 + $0x56] sm:$0xff]  ;;  %v1141_v21 = vld [vmem:[#allocation2 + $0x5e] sm:$0xff] }
 0x24b   : > { %v1612_v20 = vsel %vm1557_vm2, %v1060_v48, %v3556_v42  ;;  %v1613_v49 = vsel %vm1557_vm2, %v1061_v61, %v3557_v30  ;;  %v3570_v12 = vpop.permute.xlu1 %3569  ;;  %v1676_v37 = vpack.c.bf16 %v1640_v45, %v1639_v17  ;;  %v1682_v4 = vpack.c.bf16 %v1141_v21, %v1140_v10  ;;  %v5133_v21 = vld [vmem:[#allocation33_spill] sm:$0xff] }
 0x24c   : > { %2592 = vperm.xlu1 %3654, %v5115_v58   ;;  %v3565_v25 = vpop.permute.xlu0 %3564  ;;  %v1670_v33 = vpack.c.bf16 %v1613_v49, %v1612_v20  ;;  %v3572_v34 = vunpack.i.h.bf16 %v3570_v12  ;;  %v3571_v24 = vunpack.i.l.bf16 %v3570_v12  ;;  %v1067_v58 = vld [vmem:[#allocation2 + $0x63] sm:$0xff]  ;;  %v5126_v20 = vld [vmem:[#allocation26_spill] sm:$0xff] }
 0x24d   : > { %2597 = vperm.xlu0 %3653, %v5116_v41   ;;  %v3567_v5 = vunpack.i.h.bf16 %v3565_v25  ;;  %v3566_v40 = vunpack.i.l.bf16 %v3565_v25  ;;  %v1068_v12 = vld [vmem:[#allocation2 + $0x6b] sm:$0xff] }
 0x24e   : > { %3207 = vmatmul.mubr.msk.bf16.vlgmr.msra.gmra.mrb[28].mxu0 %vm1557_vm2, %v1662_v9  ;;  %v1641_v47 = vsel %vm1557_vm2, %v5122_v46, %v3571_v24  ;;  %v1642_v29 = vsel %vm1557_vm2, %v5123_v6, %v3572_v34  ;;  %v5128_v24 = vld [vmem:[#allocation28_spill] sm:$0xff] }
 0x24f   : > { %2234 = vmatmul.mubr.bf16.gmra.mrb[28].mxu1 %v1665_v3  ;;  %3210 = vmatprep.mubr.msk.bf16.mxu0 %vm3796_vm3, %v5108_v23  ;;  %v1614_v0 = vsel %vm1557_vm2, %v1062_v32, %v3566_v40  ;;  %v1615_v27 = vsel %vm1557_vm2, %v1063_v1, %v3567_v5  ;;  %v3580_v16 = vpop.permute.xlu1 %3579  ;;  %v1681_v7 = vpack.c.bf16 %v1642_v29, %v1641_v47 }
 0x250   : > { %2241 = vmatprep.mubr.bf16.mxu1 %v1671_v18  ;;  %2602 = vperm.xlu1 %3654, %v5117_v57   ;;  %v3575_v43 = vpop.permute.xlu0 %3574  ;;  %v1675_v15 = vpack.c.bf16 %v1615_v27, %v1614_v0  ;;  %v3582_v39 = vunpack.i.h.bf16 %v3580_v16  ;;  %v3581_v28 = vunpack.i.l.bf16 %v3580_v16  ;;  %v1066_v18 = vld [vmem:[#allocation2 + $0x5b] sm:$0xff]  ;;  %v1071_v16 = vld [vmem:[#allocation2 + $0x83] sm:$0xff] }
 0x251   : > { %2607 = vperm.xlu0 %3653, %v5120_v38   ;;  %v3577_v35 = vunpack.i.h.bf16 %v3575_v43  ;;  %v3576_v31 = vunpack.i.l.bf16 %v3575_v43  ;;  %v5127_v57 = vld [vmem:[#allocation27_spill] sm:$0xff] }
 0x252   : > { %v1643_v50 = vsel %vm1557_vm2, %v5124_v55, %v3581_v28  ;;  %v1644_v2 = vsel %vm1557_vm2, %v5125_v8, %v3582_v39  ;;  %v5130_v28 = vld [vmem:[#allocation30_spill] sm:$0xff] }
 0x253   : > { %v1616_v59 = vsel %vm1557_vm2, %v1064_v51, %v3576_v31  ;;  %v1617_v53 = vsel %vm1557_vm2, %v1065_v44, %v3577_v35  ;;  %v3590_v9 = vpop.permute.xlu1 %3589  ;;  %v1686_v42 = vpack.c.bf16 %v1644_v2, %v1643_v50  ;;  %v1144_v31 = vld [vmem:[#allocation2 + $0x76] sm:$0xff] }
 0x254   : > { %2612 = vperm.xlu1 %3654, %v5121_v13   ;;  %v3585_v26 = vpop.permute.xlu0 %3584  ;;  %v1680_v52 = vpack.c.bf16 %v1617_v53, %v1616_v59  ;;  %v3592_v48 = vunpack.i.h.bf16 %v3590_v9  ;;  %v3591_v61 = vunpack.i.l.bf16 %v3590_v9  ;;  %v1143_v13 = vld [vmem:[#allocation2 + $0x6e] sm:$0xff] }
 0x255   : > { %v3587_v3 = vunpack.i.h.bf16 %v3585_v26  ;;  %v3586_v30 = vunpack.i.l.bf16 %v3585_v26  ;;  %v1073_v9 = vld [vmem:[#allocation2 + $0x93] sm:$0xff] }
 0x256   : > { %3211 = vmatmul.mubr.msk.bf16.gmra.mrb[32].mxu0 %vm1557_vm2, %v1667_v62  ;;  %v1645_v49 = vsel %vm1557_vm2, %v5126_v20, %v3591_v61  ;;  %v1646_v25 = vsel %vm1557_vm2, %v5127_v57, %v3592_v48  ;;  %v5132_v61 = vld [vmem:[#allocation32_spill] sm:$0xff] }
 0x257   : > { %2242 = vmatmul.mubr.bf16.gmra.mrb[32].mxu1 %v1670_v33  ;;  %3214 = vmatprep.mubr.msk.bf16.mxu0 %vm3796_vm3, %v5108_v23  ;;  %v1618_v41 = vsel %vm1557_vm2, %v1066_v18, %v3586_v30  ;;  %v1619_v60 = vsel %vm1557_vm2, %v1067_v58, %v3587_v3  ;;  %v3600_v17 = vpop.permute.xlu1 %3599  ;;  %v1691_v62 = vpack.c.bf16 %v1646_v25, %v1645_v49  ;;  %v1069_v33 = vld [vmem:[#allocation2 + $0x73] sm:$0xff]  ;;  %v1146_v30 = vld [vmem:[#allocation2 + $0x86] sm:$0xff] }
 0x258   : > { %2249 = vmatprep.mubr.bf16.mxu1 %v1676_v37  ;;  %v3595_v11 = vpop.permute.xlu0 %3594  ;;  %v1685_v63 = vpack.c.bf16 %v1619_v60, %v1618_v41  ;;  %v3602_v5 = vunpack.i.h.bf16 %v3600_v17  ;;  %v3601_v40 = vunpack.i.l.bf16 %v3600_v17  ;;  %v1142_v37 = vld [vmem:[#allocation2 + $0x66] sm:$0xff] }
 0x259   : > { %v3597_v45 = vunpack.i.h.bf16 %v3595_v11  ;;  %v3596_v38 = vunpack.i.l.bf16 %v3595_v11  ;;  %v1687_v27 = vpack.c.bf16 %v1143_v13, %v1142_v37  ;;  %v1075_v17 = vld [vmem:[#allocation2 + $0xa3] sm:$0xff] }
 0x25a   : > { %v1647_v19 = vsel %vm1557_vm2, %v5128_v24, %v3601_v40  ;;  %v1648_v0 = vsel %vm1557_vm2, %v5129_v36, %v3602_v5  ;;  %v5134_v40 = vld [vmem:[#allocation34_spill] sm:$0xff]  ;;  %v5135_v13 = vld [vmem:[#allocation36_spill] sm:$0xff] }
 0x25b   : > { %v1620_v32 = vsel %vm1557_vm2, %v1068_v12, %v3596_v38  ;;  %v1621_v1 = vsel %vm1557_vm2, %v1069_v33, %v3597_v45  ;;  %v3610_v43 = vpop.permute.xlu1 %3609  ;;  %v1696_v29 = vpack.c.bf16 %v1648_v0, %v1647_v19  ;;  %v1148_v38 = vld [vmem:[#allocation2 + $0x96] sm:$0xff] }
 0x25c   : > { %v3605_v34 = vpop.permute.xlu0 %3604  ;;  %v1690_v46 = vpack.c.bf16 %v1621_v1, %v1620_v32  ;;  %v3611_v35 = vunpack.i.l.bf16 %v3610_v43 }
 0x25d   : > { %v3607_v47 = vunpack.i.h.bf16 %v3605_v34  ;;  %v3606_v6 = vunpack.i.l.bf16 %v3605_v34 }
 0x25e   : > { %3215 = vmatmul.mubr.msk.bf16.gmra.mrb[36].mxu0 %vm1557_vm2, %v1672_v14  ;;  %v1070_v14 = vld [vmem:[#allocation2 + $0x7b] sm:$0xff]  ;;  %v1649_v54 = vsel %vm1557_vm2, %v5130_v28, %v3611_v35  ;;  %v5136_v35 = vld [vmem:[#allocation37_spill] sm:$0xff] }
 0x25f   : > { %2250 = vmatmul.mubr.bf16.gmra.mrb[36].mxu1 %v1675_v15  ;;  %3218 = vmatprep.mubr.msk.bf16.mxu0 %vm3796_vm3, %v5108_v23  ;;  %v3612_v15 = vunpack.i.h.bf16 %v3610_v43  ;;  %v1622_v51 = vsel %vm1557_vm2, %v1070_v14, %v3606_v6  ;;  %v1623_v44 = vsel %vm1557_vm2, %v1071_v16, %v3607_v47  ;;  %v3620_v26 = vpop.permute.xlu1 %3619  ;;  %v1077_v43 = vld [vmem:[#allocation2 + $0xb3] sm:$0xff]  ;;  %v1150_v6 = vld [vmem:[#allocation2 + $0xa6] sm:$0xff] }
 0x260   : > { %2257 = vmatprep.mubr.bf16.mxu1 %v1681_v7  ;;  %v1145_v7 = vld [vmem:[#allocation2 + $0x7e] sm:$0xff]  ;;  %v3615_v39 = vpop.permute.xlu0 %3614  ;;  %v1695_v55 = vpack.c.bf16 %v1623_v44, %v1622_v51  ;;  %v3621_v3 = vunpack.i.l.bf16 %v3620_v26 }
 0x261   : > { %v1650_v59 = vsel %vm1557_vm2, %v5131_v56, %v3612_v15  ;;  %v1692_v53 = vpack.c.bf16 %v1145_v7, %v1144_v31  ;;  %v3617_v50 = vunpack.i.h.bf16 %v3615_v39  ;;  %v3616_v8 = vunpack.i.l.bf16 %v3615_v39  ;;  %v5137_v7 = vld [vmem:[#allocation35_spill] sm:$0xff] }
 0x262   : > { %v1701_v2 = vpack.c.bf16 %v1650_v59, %v1649_v54  ;;  %v1651_v10 = vsel %vm1557_vm2, %v5132_v61, %v3621_v3  ;;  %v1155_v61 = vld [vmem:[#allocation2 + $0xce] sm:$0xff] }
 0x263   : > { %v1625_v58 = vsel %vm1557_vm2, %v1073_v9, %v3617_v50  ;;  %v3630_v11 = vpop.permute.xlu1 %3629  ;;  %v1106_v50 = vld [vmem:[#allocation2 + $0xd4] sm:$0xff] }
 0x264   : > { %v3625_v48 = vpop.permute.xlu0 %3624  ;;  %v3631_v45 = vunpack.i.l.bf16 %v3630_v11 }
 0x265   : > { %v3627_v49 = vunpack.i.h.bf16 %v3625_v48  ;;  %v3626_v57 = vunpack.i.l.bf16 %v3625_v48  ;;  %v1154_v48 = vld [vmem:[#allocation2 + $0xc6] sm:$0xff] }
 0x266   : > { %3219 = vmatmul.mubr.msk.bf16.gmra.mrb[40].mxu0 %vm1557_vm2, %v1677_v22  ;;  %v1072_v22 = vld [vmem:[#allocation2 + $0x8b] sm:$0xff]  ;;  %v1653_v37 = vsel %vm1557_vm2, %v5134_v40, %v3631_v45 }
 0x267   : > { %2258 = vmatmul.mubr.bf16.gmra.mrb[40].mxu1 %v1680_v52  ;;  %3222 = vmatprep.mubr.msk.bf16.mxu0 %vm3796_vm3, %v5108_v23  ;;  %v3622_v52 = vunpack.i.h.bf16 %v3620_v26  ;;  %v1624_v18 = vsel %vm1557_vm2, %v1072_v22, %v3616_v8  ;;  %v1627_v33 = vsel %vm1557_vm2, %v1075_v17, %v3627_v49  ;;  %v3640_v34 = vpop.permute.xlu1 %3639  ;;  %v1079_v26 = vld [vmem:[#allocation2 + $0xc3] sm:$0xff]  ;;  %v1152_v8 = vld [vmem:[#allocation2 + $0xb6] sm:$0xff] }
 0x268   : > { %2265 = vmatprep.mubr.bf16.mxu1 %v1686_v42  ;;  %v1147_v42 = vld [vmem:[#allocation2 + $0x8e] sm:$0xff]  ;;  %v1700_v20 = vpack.c.bf16 %v1625_v58, %v1624_v18  ;;  %v3635_v5 = vpop.permute.xlu0 %3634  ;;  %v3641_v47 = vunpack.i.l.bf16 %v3640_v34 }
 0x269   : > { %v1652_v41 = vsel %vm1557_vm2, %v5133_v21, %v3622_v52  ;;  %v1697_v60 = vpack.c.bf16 %v1147_v42, %v1146_v30  ;;  %v3637_v19 = vunpack.i.h.bf16 %v3635_v5  ;;  %v3636_v36 = vunpack.i.l.bf16 %v3635_v5  ;;  %v1080_v58 = vld [vmem:[#allocation2 + $0xcb] sm:$0xff] }
 0x26a   : > { %v1706_v25 = vpack.c.bf16 %v1652_v41, %v1651_v10  ;;  %v1655_v31 = vsel %vm1557_vm2, %v5136_v35, %v3641_v47  ;;  %v1717_v21 = vpack.c.bf16 %v1155_v61, %v1154_v48 }
 0x26b   : > { %v1629_v16 = vsel %vm1557_vm2, %v1077_v43, %v3637_v19  ;;  %v3650_v39 = vpop.permute.xlu1 %3649  ;;  %v4795_v19 = vld [vmem:[%s3960_s29] ss:$0 sm:$0xff] }
 0x26c   : > { %v3645_v15 = vpop.permute.xlu0 %3644  ;;  %v3652_v42 = vunpack.i.h.bf16 %v3650_v39 }
 0x26d   : > { %v3647_v54 = vunpack.i.h.bf16 %v3645_v15  ;;  %v3646_v56 = vunpack.i.l.bf16 %v3645_v15 }
 0x26e   : > { %3223 = vmatmul.mubr.msk.bf16.gmra.mrb[44].mxu0 %vm1557_vm2, %v1682_v4  ;;  %v1074_v4 = vld [vmem:[#allocation2 + $0x9b] sm:$0xff]  ;;  %v1632_v10 = vsel %vm1557_vm2, %v1080_v58, %v3652_v42 }
 0x26f   : > { %2266 = vmatmul.mubr.bf16.gmra.mrb[44].mxu1 %v1685_v63  ;;  %3226 = vmatprep.mubr.msk.bf16.mxu0 %vm3796_vm3, %v5108_v23  ;;  %v3632_v63 = vunpack.i.h.bf16 %v3630_v11  ;;  %v1626_v12 = vsel %vm1557_vm2, %v1074_v4, %v3626_v57  ;;  %v1631_v9 = vsel %vm1557_vm2, %v1079_v26, %v3647_v54  ;;  %v1720_v41 = vpack.c.bf16 %v1632_v10, %v1632_v10 }
 0x270   : > { %2273 = vmatprep.mubr.bf16.mxu1 %v1691_v62  ;;  %v1149_v62 = vld [vmem:[#allocation2 + $0x9e] sm:$0xff]  ;;  %v1705_v24 = vpack.c.bf16 %v1627_v33, %v1626_v12 }
 0x271   : > { %v1654_v32 = vsel %vm1557_vm2, %v5135_v13, %v3632_v63  ;;  %v1702_v1 = vpack.c.bf16 %v1149_v62, %v1148_v38 }
 0x272   : > { %v1711_v0 = vpack.c.bf16 %v1654_v32, %v1653_v37 }
 0x276   : > { %3227 = vmatmul.mubr.msk.bf16.gmra.mrb[48].mxu0 %vm1557_vm2, %v1687_v27  ;;  %v1076_v27 = vld [vmem:[#allocation2 + $0xab] sm:$0xff] }
 0x277   : > { %2274 = vmatmul.mubr.bf16.gmra.mrb[48].mxu1 %v1690_v46  ;;  %3230 = vmatprep.mubr.msk.bf16.mxu0 %vm3796_vm3, %v5108_v23  ;;  %v3642_v46 = vunpack.i.h.bf16 %v3640_v34  ;;  %v1628_v14 = vsel %vm1557_vm2, %v1076_v27, %v3636_v36 }
 0x278   : > { %2281 = vmatprep.mubr.bf16.mxu1 %v1696_v29  ;;  %v1151_v29 = vld [vmem:[#allocation2 + $0xae] sm:$0xff]  ;;  %v1710_v28 = vpack.c.bf16 %v1629_v16, %v1628_v14 }
 0x279   : > { %v1656_v51 = vsel %vm1557_vm2, %v5137_v7, %v3642_v46  ;;  %v1707_v44 = vpack.c.bf16 %v1151_v29, %v1150_v6 }
 0x27a   : > { %v1716_v59 = vpack.c.bf16 %v1656_v51, %v1655_v31 }
 0x27e   : > { %3231 = vmatmul.mubr.msk.bf16.gmra.mrb[52].mxu0 %vm1557_vm2, %v1692_v53  ;;  %v1078_v53 = vld [vmem:[#allocation2 + $0xbb] sm:$0xff] }
 0x27f   : > { %2282 = vmatmul.mubr.bf16.gmra.mrb[52].mxu1 %v1695_v55  ;;  %3234 = vmatprep.mubr.msk.bf16.mxu0 %vm3796_vm3, %v5108_v23  ;;  %v3651_v55 = vunpack.i.l.bf16 %v3650_v39  ;;  %v1630_v22 = vsel %vm1557_vm2, %v1078_v53, %v3646_v56 }
 0x280   : > { %2289 = vmatprep.mubr.bf16.mxu1 %v1701_v2  ;;  %v1153_v2 = vld [vmem:[#allocation2 + $0xbe] sm:$0xff]  ;;  %v1715_v30 = vpack.c.bf16 %v1631_v9, %v1630_v22 }
 0x281   : > { %v1657_v52 = vsel %vm1557_vm2, %v1106_v50, %v3651_v55  ;;  %v1712_v3 = vpack.c.bf16 %v1153_v2, %v1152_v8 }
 0x282   : > { %v1721_v18 = vpack.c.bf16 %v1657_v52, %v1657_v52 }
 0x286   : > { %3235 = vmatmul.mubr.msk.bf16.gmra.mrb[56].mxu0 %vm1557_vm2, %v1697_v60  ;;  %v1156_v60 = vld [vmem:[#allocation2 + $0xd6] sm:$0xff] }
 0x287   : > { %2290 = vmatmul.mubr.bf16.gmra.mrb[56].mxu1 %v1700_v20  ;;  %3238 = vmatprep.mubr.msk.bf16.mxu0 %vm3796_vm3, %v5108_v23  ;;  %v1722_v11 = vpack.c.bf16 %v1156_v60, %v1156_v60 }
 0x288   : > { %2297 = vmatprep.mubr.bf16.mxu1 %v1706_v25 }
 0x28e   : > { %3239 = vmatmul.mubr.msk.bf16.gmra.mrb[60].mxu0 %vm1557_vm2, %v1702_v1 }
 0x28f   : > { %2298 = vmatmul.mubr.bf16.gmra.mrb[60].mxu1 %v1705_v24  ;;  %3242 = vmatprep.mubr.msk.bf16.mxu0 %vm3796_vm3, %v5108_v23 }
 0x290   : > { %2305 = vmatprep.mubr.bf16.mxu1 %v1711_v0 }
 0x296   : > { %3243 = vmatmul.mubr.msk.bf16.gmra.mrb[64].mxu0 %vm1557_vm2, %v1707_v44 }
 0x297   : > { %2306 = vmatmul.mubr.bf16.gmra.mrb[64].mxu1 %v1710_v28  ;;  %3246 = vmatprep.mubr.msk.bf16.mxu0 %vm3796_vm3, %v5108_v23 }
 0x298   : > { %2313 = vmatprep.mubr.bf16.mxu1 %v1716_v59 }
 0x29e   : > { %3247 = vmatmul.mubr.msk.bf16.gmra.mrb[68].mxu0 %vm1557_vm2, %v1712_v3 }
 0x29f   : > { %2314 = vmatmul.mubr.bf16.gmra.mrb[68].mxu1 %v1715_v30  ;;  %3250 = vmatprep.mubr.msk.bf16.mxu0 %vm3796_vm3, %v5108_v23 }
 0x2a0   : > { %2321 = vmatprep.mubr.bf16.mxu1 %v1721_v18 }
 0x2a6   : > { %3251 = vmatmul.mubr.msk.bf16.gmra.mrb[72].mxu0 %vm1557_vm2, %v1717_v21 }
 0x2a7   : > { %2322 = vmatmul.mubr.bf16.gmra.mrb[72].mxu1 %v1720_v41  ;;  %3254 = vmatprep.mubr.msk.bf16.mxu0 %vm3796_vm3, %v5108_v23 }
 0x2ae   : > { %3255 = vmatmul.mubr.msk.bf16.gmra.mrb[76].mxu0 %vm1557_vm2, %v1722_v11 }
 0x2e8   : > { %v3051_v20 = vpop.f32.mrb[0].mxu1 }
 0x2e9   : > { %v3009_v49 = vpop.f32.mrb[0].mxu0  ;;  %v3052_v57 = vpop.f32.mrb[1].mxu1 }
 0x2ea   : > { %v3010_v25 = vpop.f32.mrb[1].mxu0  ;;  %v4784_v4 = vadd.f32 %v3052_v57, %v3051_v20  ;;  %v3054_v17 = vpop.f32.mrb[2].mxu1 }
 0x2eb   : > { %v4786_v63 = vadd.f32 %v3010_v25, %v3009_v49  ;;  %v3012_v45 = vpop.f32.mrb[2].mxu0  ;;  %v3055_v38 = vpop.f32.mrb[3].mxu1 }
 0x2ec   : > { %v3013_v62 = vpop.f32.mrb[3].mxu0  ;;  %v4788_v12 = vadd.f32 %v3055_v38, %v3054_v17 }
 0x2ed   : > { %v4790_v23 = vadd.f32 %v3013_v62, %v3012_v45 }
 0x2f1   : > { %v3015_v33 = vpop.f32.mrb[4].mxu0 }
 0x2f2   : > { %v3016_v5 = vpop.f32.mrb[5].mxu0  ;;  %v3057_v40 = vpop.f32.mrb[4].mxu1 }
 0x2f3   : > { %v4792_v37 = vadd.f32 %v3016_v5, %v3015_v33  ;;  %v3018_v13 = vpop.f32.mrb[6].mxu0  ;;  %v3058_v32 = vpop.f32.mrb[5].mxu1 }
 0x2f4   : > { %v3059_v1 = vadd.f32 %v3058_v32, %v3057_v40  ;;  %v3019_v34 = vpop.f32.mrb[7].mxu0  ;;  %v3060_v24 = vpop.f32.mrb[6].mxu1 }
 0x2f5   : > { %v4797_v36 = vadd.f32 %v3019_v34, %v3018_v13  ;;  %v3061_v0 = vpop.f32.mrb[7].mxu1 }
 0x2f6   : > { %v4800_v27 = vadd.f32 %v3059_v1, %v4795_v19  ;;  %v3062_v43 = vadd.f32 %v3061_v0, %v3060_v24 }
 0x2f8   : > { %v4803_v46 = vadd.f32 %v3062_v43, %v4795_v19 }
 0x2f9   : > { %v3021_v47 = vpop.f32.mrb[8].mxu0 }
 0x2fa   : > { %v3022_v6 = vpop.f32.mrb[9].mxu0  ;;  %v3063_v29 = vpop.f32.mrb[8].mxu1 }
 0x2fb   : > { %v4805_v14 = vadd.f32 %v3022_v6, %v3021_v47  ;;  %v3024_v16 = vpop.f32.mrb[10].mxu0  ;;  %v3064_v15 = vpop.f32.mrb[9].mxu1 }
 0x2fc   : > { %v3065_v35 = vadd.f32 %v3064_v15, %v3063_v29  ;;  %v3025_v31 = vpop.f32.mrb[11].mxu0  ;;  %v3066_v7 = vpop.f32.mrb[10].mxu1 }
 0x2fd   : > { %v4807_v51 = vadd.f32 %v3025_v31, %v3024_v16  ;;  %v3067_v44 = vpop.f32.mrb[11].mxu1 }
 0x2fe   : > { %v4810_v39 = vadd.f32 %v3065_v35, %v4795_v19  ;;  %v3068_v28 = vadd.f32 %v3067_v44, %v3066_v7  ;;  %v2092_v35 = vadd.f32 %v4786_v63, %v4795_v19 }
 0x300   : > { %v4813_v54 = vadd.f32 %v3068_v28, %v4795_v19 }
 0x301   : > { %v3027_v56 = vpop.f32.mrb[12].mxu0 }
 0x302   : > { %v3028_v59 = vpop.f32.mrb[13].mxu0  ;;  %v3069_v53 = vpop.f32.mrb[12].mxu1 }
 0x303   : > { %v4815_v26 = vadd.f32 %v3028_v59, %v3027_v56  ;;  %v3030_v55 = vpop.f32.mrb[14].mxu0  ;;  %v3070_v50 = vpop.f32.mrb[13].mxu1  ;;  %v2095_v59 = vadd.f32 %v4790_v23, %v4795_v19  ;;  %v2103_v23 = vadd.f32 %v4797_v36, %v4795_v19  ;;  %v2108_v36 = vadd.f32 %v4805_v14, %v4795_v19 }
 0x304   : > { %v3071_v8 = vadd.f32 %v3070_v50, %v3069_v53  ;;  %v3031_v2 = vpop.f32.mrb[15].mxu0  ;;  %v3072_v22 = vpop.f32.mrb[14].mxu1 }
 0x305   : > { %v4817_v9 = vadd.f32 %v3031_v2, %v3030_v55  ;;  %v3073_v52 = vpop.f32.mrb[15].mxu1 }
 0x306   : > { %v4820_v3 = vadd.f32 %v3071_v8, %v4795_v19  ;;  %v3074_v30 = vadd.f32 %v3073_v52, %v3072_v22  ;;  %v2498_v8 = vpop.permute.xlu1 %2497  ;;  %v2493_v22 = vpop.permute.xlu0 %2492 }
 0x308   : > { %v4823_v42 = vadd.f32 %v3074_v30, %v4795_v19 }
 0x309   : > { %v3033_v18 = vpop.f32.mrb[16].mxu0 }
 0x30a   : > { %v3034_v58 = vpop.f32.mrb[17].mxu0  ;;  %v3075_v48 = vpop.f32.mrb[16].mxu1 }
 0x30b   : > { %v4825_v61 = vadd.f32 %v3034_v58, %v3033_v18  ;;  %v3036_v10 = vpop.f32.mrb[18].mxu0  ;;  %v3076_v21 = vpop.f32.mrb[17].mxu1 }
 0x30c   : > { %v3077_v41 = vadd.f32 %v3076_v21, %v3075_v48  ;;  %v3037_v60 = vpop.f32.mrb[19].mxu0  ;;  %v3078_v11 = vpop.f32.mrb[18].mxu1  ;;  %v2100_v48 = vadd.f32 %v4792_v37, %v4795_v19 }
 0x30d   : > { %v4827_v20 = vadd.f32 %v3037_v60, %v3036_v10  ;;  %v3079_v49 = vpop.f32.mrb[19].mxu1 }
 0x30e   : > { %v4830_v57 = vadd.f32 %v3077_v41, %v4795_v19  ;;  %v3080_v25 = vadd.f32 %v3079_v49, %v3078_v11 }
 0x310   : > { %v4833_v17 = vadd.f32 %v3080_v25, %v4795_v19 }
 0x311   : > { %v3039_v45 = vpop.f32.mrb[20].mxu0 }
 0x312   : > { %v3040_v38 = vpop.f32.mrb[21].mxu0  ;;  %v3081_v62 = vpop.f32.mrb[20].mxu1 }
 0x313   : > { %v4835_v33 = vadd.f32 %v3040_v38, %v3039_v45  ;;  %v3042_v5 = vpop.f32.mrb[22].mxu0  ;;  %v3082_v40 = vpop.f32.mrb[21].mxu1 }
 0x314   : > { %v3083_v13 = vadd.f32 %v3082_v40, %v3081_v62  ;;  %v3043_v32 = vpop.f32.mrb[23].mxu0  ;;  %v3084_v1 = vpop.f32.mrb[22].mxu1 }
 0x315   : > { %v4837_v34 = vadd.f32 %v3043_v32, %v3042_v5  ;;  %v3085_v24 = vpop.f32.mrb[23].mxu1 }
 0x316   : > { %v4840_v0 = vadd.f32 %v3083_v13, %v4795_v19  ;;  %v2503_v13 = vpop.permute.xlu1 %2502 }
 0x319   : > { %v3045_v43 = vpop.f32.mrb[24].mxu0 }
 0x31a   : > { %v3046_v47 = vpop.f32.mrb[25].mxu0  ;;  %v3103_v6 = vpop.f32.mrb[24].mxu1 }
 0x31b   : > { %v4842_v29 = vadd.f32 %v3046_v47, %v3045_v43  ;;  %v3048_v16 = vpop.f32.mrb[26].mxu0  ;;  %v3104_v15 = vpop.f32.mrb[25].mxu1 }
 0x31c   : > { %v3105_v31 = vadd.f32 %v3104_v15, %v3103_v6  ;;  %v3049_v7 = vpop.f32.mrb[27].mxu0  ;;  %v3106_v44 = vpop.f32.mrb[26].mxu1 }
 0x31d   : > { %v4846_v28 = vadd.f32 %v3049_v7, %v3048_v16  ;;  %v3107_v56 = vpop.f32.mrb[27].mxu1  ;;  %v2111_v7 = vadd.f32 %v4807_v51, %v4795_v19  ;;  %v2116_v51 = vadd.f32 %v4815_v26, %v4795_v19 }
 0x31e   : > { %v3108_v53 = vadd.f32 %v3107_v56, %v3106_v44  ;;  %v2228_v55 = vadd.f32 %v3105_v31, %v2092_v35  ;;  %v2508_v56 = vpop.permute.xlu0 %2507 }
 0x320   : > { %v2231_v50 = vadd.f32 %v3108_v53, %v2095_v59 }
 0x321   : > { %v2363_v2 = vpop.f32.mrb[28].mxu0 }
 0x322   : > { %v2364_v52 = vadd.f32 %v2363_v2, %v2228_v55  ;;  %v3109_v30 = vpop.f32.mrb[28].mxu1  ;;  %v3208_v18 = vpop.f32.mrb[29].mxu0 }
 0x323   : > { %v3110_v58 = vpop.f32.mrb[29].mxu1  ;;  %v2366_v63 = vpop.f32.mrb[30].mxu0 }
 0x324   : > { %v2465_v10 = vmax.f32 %v2364_v52, 0.0  ;;  %v3111_v21 = vadd.f32 %v3110_v58, %v3109_v30  ;;  %v2367_v41 = vadd.f32 %v2366_v63, %v2231_v50  ;;  %v3112_v60 = vpop.f32.mrb[30].mxu1  ;;  %v3209_v11 = vpop.f32.mrb[31].mxu0 }
 0x325   : > { %v3113_v49 = vpop.f32.mrb[31].mxu1  ;;  %v2513_v11 = vpop.permute.xlu1 %2512 }
 0x326   : > { %v2466_v25 = vmax.f32 %v2367_v41, 0.0  ;;  %v2615_v45 = vmul.f32 %v2493_v22, %v2465_v10  ;;  %v3114_v38 = vadd.f32 %v3113_v49, %v3112_v60  ;;  %v2236_v62 = vadd.f32 %v3111_v21, %v2100_v48 }
 0x327   : > { %v2119_v60 = vadd.f32 %v4817_v9, %v4795_v19  ;;  %v2124_v9 = vadd.f32 %v4825_v61, %v4795_v19 }
 0x328   : > { %v2616_v5 = vmul.f32 %v2498_v8, %v2466_v25  ;;  %2640 = vst.msk [vmem:[#allocation2 + $0xb] sm:$0xff] %vm1557_vm2, %v2615_v45  ;;  %v2239_v40 = vadd.f32 %v3114_v38, %v2103_v23 }
 0x329   : > { %v2371_v32 = vpop.f32.mrb[32].mxu0 }
 0x32a   : > { %2641 = vst.msk [vmem:[#allocation2 + $0x13] sm:$0xff] %vm1557_vm2, %v2616_v5  ;;  %v2372_v37 = vadd.f32 %v2371_v32, %v2236_v62  ;;  %v3115_v1 = vpop.f32.mrb[32].mxu1  ;;  %v3212_v24 = vpop.f32.mrb[33].mxu0 }
 0x32b   : > { %v3116_v43 = vpop.f32.mrb[33].mxu1  ;;  %v2374_v47 = vpop.f32.mrb[34].mxu0 }
 0x32c   : > { %v2467_v6 = vmax.f32 %v2372_v37, 0.0  ;;  %v3117_v16 = vadd.f32 %v3116_v43, %v3115_v1  ;;  %v2375_v15 = vadd.f32 %v2374_v47, %v2239_v40  ;;  %v3118_v35 = vpop.f32.mrb[34].mxu1  ;;  %v3213_v31 = vpop.f32.mrb[35].mxu0 }
 0x32d   : > { %v3119_v44 = vpop.f32.mrb[35].mxu1  ;;  %v2518_v62 = vpop.permute.xlu0 %2517 }
 0x32e   : > { %v2617_v59 = vmul.f32 %v2503_v13, %v2467_v6  ;;  %v2468_v53 = vmax.f32 %v2375_v15, 0.0  ;;  %v3120_v55 = vadd.f32 %v3119_v44, %v3118_v35  ;;  %v2244_v50 = vadd.f32 %v3117_v16, %v2108_v36  ;;  %v2523_v35 = vpop.permute.xlu1 %2522 }
 0x32f   : > { %v2127_v15 = vadd.f32 %v4827_v20, %v4795_v19  ;;  %v2132_v20 = vadd.f32 %v4835_v33, %v4795_v19 }
 0x330   : > { %2642 = vst.msk [vmem:[#allocation2 + $0x1b] sm:$0xff] %vm1557_vm2, %v2617_v59  ;;  %v2618_v8 = vmul.f32 %v2508_v56, %v2468_v53  ;;  %v2247_v2 = vadd.f32 %v3120_v55, %v2111_v7 }
 0x331   : > { %v2379_v22 = vpop.f32.mrb[36].mxu0  ;;  %v2528_v53 = vpop.permute.xlu0 %2527 }
 0x332   : > { %2643 = vst.msk [vmem:[#allocation2 + $0x23] sm:$0xff] %vm1557_vm2, %v2618_v8  ;;  %v2380_v14 = vadd.f32 %v2379_v22, %v2244_v50  ;;  %v3121_v52 = vpop.f32.mrb[36].mxu1  ;;  %v3216_v30 = vpop.f32.mrb[37].mxu0 }
 0x333   : > { %v3122_v18 = vpop.f32.mrb[37].mxu1  ;;  %v2382_v58 = vpop.f32.mrb[38].mxu0 }
 0x334   : > { %v2469_v63 = vmax.f32 %v2380_v14, 0.0  ;;  %v3123_v48 = vadd.f32 %v3122_v18, %v3121_v52  ;;  %v2383_v10 = vadd.f32 %v2382_v58, %v2247_v2  ;;  %v3124_v21 = vpop.f32.mrb[38].mxu1  ;;  %v3217_v41 = vpop.f32.mrb[39].mxu0 }
 0x335   : > { %v3125_v23 = vpop.f32.mrb[39].mxu1 }
 0x336   : > { %v2619_v49 = vmul.f32 %v2513_v11, %v2469_v63  ;;  %v2470_v25 = vmax.f32 %v2383_v10, 0.0  ;;  %v3126_v45 = vadd.f32 %v3125_v23, %v3124_v21  ;;  %v2252_v38 = vadd.f32 %v3123_v48, %v2116_v51  ;;  %v2533_v10 = vpop.permute.xlu1 %2532 }
 0x337   : > { %v2135_v48 = vadd.f32 %v4837_v34, %v4795_v19  ;;  %v2140_v34 = vadd.f32 %v4842_v29, %v4795_v19 }
 0x338   : > { %2644 = vst.msk [vmem:[#allocation2 + $0x2b] sm:$0xff] %vm1557_vm2, %v2619_v49  ;;  %v2620_v5 = vmul.f32 %v2518_v62, %v2470_v25  ;;  %v2255_v40 = vadd.f32 %v3126_v45, %v2119_v60  ;;  %v2538_v49 = vpop.permute.xlu0 %2537 }
 0x339   : > { %v2387_v26 = vpop.f32.mrb[40].mxu0 }
 0x33a   : > { %2645 = vst.msk [vmem:[#allocation2 + $0x33] sm:$0xff] %vm1557_vm2, %v2620_v5  ;;  %v2388_v13 = vadd.f32 %v2387_v26, %v2252_v38  ;;  %v3127_v32 = vpop.f32.mrb[40].mxu1  ;;  %v3220_v37 = vpop.f32.mrb[41].mxu0 }
 0x33b   : > { %v3128_v1 = vpop.f32.mrb[41].mxu1  ;;  %v2390_v24 = vpop.f32.mrb[42].mxu0 }
 0x33c   : > { %v2471_v43 = vmax.f32 %v2388_v13, 0.0  ;;  %v3129_v47 = vadd.f32 %v3128_v1, %v3127_v32  ;;  %v2391_v36 = vadd.f32 %v2390_v24, %v2255_v40  ;;  %v3130_v6 = vpop.f32.mrb[42].mxu1  ;;  %v3221_v16 = vpop.f32.mrb[43].mxu0 }
 0x33d   : > { %v3131_v31 = vpop.f32.mrb[43].mxu1 }
 0x33e   : > { %v2621_v7 = vmul.f32 %v2523_v35, %v2471_v43  ;;  %v2472_v44 = vmax.f32 %v2391_v36, 0.0  ;;  %v3132_v56 = vadd.f32 %v3131_v31, %v3130_v6  ;;  %v2260_v59 = vadd.f32 %v3129_v47, %v2124_v9  ;;  %v2543_v43 = vpop.permute.xlu1 %2542  ;;  %v2548_v35 = vpop.permute.xlu0 %2547 }
 0x33f   : > { %v2143_v9 = vadd.f32 %v4846_v28, %v4795_v19  ;;  %v2148_v28 = vadd.f32 %v4784_v4, %v4795_v19 }
 0x340   : > { %2646 = vst.msk [vmem:[#allocation2 + $0x3b] sm:$0xff] %vm1557_vm2, %v2621_v7  ;;  %v2622_v55 = vmul.f32 %v2528_v53, %v2472_v44  ;;  %v2263_v50 = vadd.f32 %v3132_v56, %v2127_v15 }
 0x341   : > { %v2395_v61 = vpop.f32.mrb[44].mxu0 }
 0x342   : > { %2647 = vst.msk [vmem:[#allocation2 + $0x43] sm:$0xff] %vm1557_vm2, %v2622_v55  ;;  %v2396_v8 = vadd.f32 %v2395_v61, %v2260_v59  ;;  %v3133_v2 = vpop.f32.mrb[44].mxu1  ;;  %v3224_v22 = vpop.f32.mrb[45].mxu0 }
 0x343   : > { %v3134_v14 = vpop.f32.mrb[45].mxu1  ;;  %v2398_v52 = vpop.f32.mrb[46].mxu0 }
 0x344   : > { %v2473_v30 = vmax.f32 %v2396_v8, 0.0  ;;  %v3135_v18 = vadd.f32 %v3134_v14, %v3133_v2  ;;  %v2399_v58 = vadd.f32 %v2398_v52, %v2263_v50  ;;  %v3136_v51 = vpop.f32.mrb[46].mxu1  ;;  %v3225_v63 = vpop.f32.mrb[47].mxu0  ;;  %v2151_v14 = vadd.f32 %v4788_v12, %v4795_v19 }
 0x345   : > { %v3137_v21 = vpop.f32.mrb[47].mxu1  ;;  %v2553_v52 = vpop.permute.xlu1 %2552 }
 0x346   : > { %v2623_v41 = vmul.f32 %v2533_v10, %v2473_v30  ;;  %v2474_v60 = vmax.f32 %v2399_v58, 0.0  ;;  %v3138_v11 = vadd.f32 %v3137_v21, %v3136_v51  ;;  %v2268_v23 = vadd.f32 %v3135_v18, %v2132_v20  ;;  %v2558_v63 = vpop.permute.xlu0 %2557 }
 0x348   : > { %2648 = vst.msk [vmem:[#allocation2 + $0x4b] sm:$0xff] %vm1557_vm2, %v2623_v41  ;;  %v2624_v25 = vmul.f32 %v2538_v49, %v2474_v60  ;;  %v2271_v45 = vadd.f32 %v3138_v11, %v2135_v48 }
 0x349   : > { %v2403_v33 = vpop.f32.mrb[48].mxu0 }
 0x34a   : > { %2649 = vst.msk [vmem:[#allocation2 + $0x53] sm:$0xff] %vm1557_vm2, %v2624_v25  ;;  %v2404_v38 = vadd.f32 %v2403_v33, %v2268_v23  ;;  %v3139_v62 = vpop.f32.mrb[48].mxu1  ;;  %v3228_v5 = vpop.f32.mrb[49].mxu0 }
 0x34b   : > { %v3140_v40 = vpop.f32.mrb[49].mxu1  ;;  %v2406_v26 = vpop.f32.mrb[50].mxu0 }
 0x34c   : > { %v2475_v13 = vmax.f32 %v2404_v38, 0.0  ;;  %v3141_v32 = vadd.f32 %v3140_v40, %v3139_v62  ;;  %v2407_v37 = vadd.f32 %v2406_v26, %v2271_v45  ;;  %v3142_v1 = vpop.f32.mrb[50].mxu1  ;;  %v3229_v24 = vpop.f32.mrb[51].mxu0 }
 0x34d   : > { %v3143_v47 = vpop.f32.mrb[51].mxu1  ;;  %v2563_v33 = vpop.permute.xlu1 %2562 }
 0x34e   : > { %v2625_v36 = vmul.f32 %v2543_v43, %v2475_v13  ;;  %v2476_v6 = vmax.f32 %v2407_v37, 0.0  ;;  %v3144_v16 = vadd.f32 %v3143_v47, %v3142_v1  ;;  %v2276_v15 = vadd.f32 %v3141_v32, %v2140_v34  ;;  %v2568_v34 = vpop.permute.xlu0 %2567 }
 0x350   : > { %2650 = vst.msk [vmem:[#allocation2 + $0x5b] sm:$0xff] %vm1557_vm2, %v2625_v36  ;;  %v2626_v31 = vmul.f32 %v2548_v35, %v2476_v6  ;;  %v2279_v7 = vadd.f32 %v3144_v16, %v2143_v9 }
 0x351   : > { %v2411_v29 = vpop.f32.mrb[52].mxu0 }
 0x352   : > { %2651 = vst.msk [vmem:[#allocation2 + $0x63] sm:$0xff] %vm1557_vm2, %v2626_v31  ;;  %v2412_v44 = vadd.f32 %v2411_v29, %v2276_v15  ;;  %v3145_v56 = vpop.f32.mrb[52].mxu1  ;;  %v3232_v59 = vpop.f32.mrb[53].mxu0 }
 0x353   : > { %v3146_v53 = vpop.f32.mrb[53].mxu1  ;;  %v2414_v55 = vpop.f32.mrb[54].mxu0 }
 0x354   : > { %v2477_v50 = vmax.f32 %v2412_v44, 0.0  ;;  %v3147_v61 = vadd.f32 %v3146_v53, %v3145_v56  ;;  %v2415_v8 = vadd.f32 %v2414_v55, %v2279_v7  ;;  %v3148_v2 = vpop.f32.mrb[54].mxu1  ;;  %v3233_v22 = vpop.f32.mrb[55].mxu0 }
 0x355   : > { %v3149_v20 = vpop.f32.mrb[55].mxu1  ;;  %v2578_v56 = vpop.permute.xlu0 %2577 }
 0x356   : > { %v2627_v30 = vmul.f32 %v2553_v52, %v2477_v50  ;;  %v2478_v18 = vmax.f32 %v2415_v8, 0.0  ;;  %v3150_v58 = vadd.f32 %v3149_v20, %v3148_v2  ;;  %v2284_v51 = vadd.f32 %v3147_v61, %v2148_v28 }
 0x358   : > { %2652 = vst.msk [vmem:[#allocation2 + $0x6b] sm:$0xff] %vm1557_vm2, %v2627_v30  ;;  %v2628_v48 = vmul.f32 %v2558_v63, %v2478_v18  ;;  %v2287_v10 = vadd.f32 %v3150_v58, %v2151_v14 }
 0x359   : > { %v2419_v4 = vpop.f32.mrb[56].mxu0 }
 0x35a   : > { %2653 = vst.msk [vmem:[#allocation2 + $0x73] sm:$0xff] %vm1557_vm2, %v2628_v48  ;;  %v2420_v21 = vadd.f32 %v2419_v4, %v2284_v51  ;;  %v3151_v41 = vpop.f32.mrb[56].mxu1  ;;  %v3236_v60 = vpop.f32.mrb[57].mxu0 }
 0x35b   : > { %v3152_v11 = vpop.f32.mrb[57].mxu1  ;;  %v2422_v23 = vpop.f32.mrb[58].mxu0 }
 0x35c   : > { %v2479_v12 = vmax.f32 %v2420_v21, 0.0  ;;  %v3153_v19 = vadd.f32 %v3152_v11, %v3151_v41  ;;  %v2423_v49 = vadd.f32 %v2422_v23, %v2287_v10  ;;  %v3154_v25 = vpop.f32.mrb[58].mxu1  ;;  %v3237_v45 = vpop.f32.mrb[59].mxu0 }
 0x35d   : > { %v3155_v38 = vpop.f32.mrb[59].mxu1  ;;  %v2588_v48 = vpop.permute.xlu0 %2587 }
 0x35e   : > { %v2629_v62 = vmul.f32 %v2563_v33, %v2479_v12  ;;  %v2480_v5 = vmax.f32 %v2423_v49, 0.0  ;;  %v3156_v40 = vadd.f32 %v3155_v38, %v3154_v25  ;;  %v2292_v26 = vadd.f32 %v3153_v19, %v4800_v27  ;;  %v2573_v27 = vpop.permute.xlu1 %2572 }
 0x360   : > { %2654 = vst.msk [vmem:[#allocation2 + $0x7b] sm:$0xff] %vm1557_vm2, %v2629_v62  ;;  %v2630_v13 = vmul.f32 %v2568_v34, %v2480_v5  ;;  %v2295_v32 = vadd.f32 %v3156_v40, %v4803_v46 }
 0x361   : > { %v2427_v37 = vpop.f32.mrb[60].mxu0 }
 0x362   : > { %2655 = vst.msk [vmem:[#allocation2 + $0x83] sm:$0xff] %vm1557_vm2, %v2630_v13  ;;  %v2428_v1 = vadd.f32 %v2427_v37, %v2292_v26  ;;  %v3157_v24 = vpop.f32.mrb[60].mxu1  ;;  %v3240_v9 = vpop.f32.mrb[61].mxu0 }
 0x363   : > { %v3158_v43 = vpop.f32.mrb[61].mxu1  ;;  %v2430_v47 = vpop.f32.mrb[62].mxu0 }
 0x364   : > { %v2481_v36 = vmax.f32 %v2428_v1, 0.0  ;;  %v3159_v6 = vadd.f32 %v3158_v43, %v3157_v24  ;;  %v2431_v16 = vadd.f32 %v2430_v47, %v2295_v32  ;;  %v3160_v15 = vpop.f32.mrb[62].mxu1  ;;  %v3241_v35 = vpop.f32.mrb[63].mxu0 }
 0x365   : > { %v3161_v31 = vpop.f32.mrb[63].mxu1  ;;  %v2598_v26 = vpop.permute.xlu0 %2597 }
 0x366   : > { %v2631_v7 = vmul.f32 %v2573_v27, %v2481_v36  ;;  %v2482_v29 = vmax.f32 %v2431_v16, 0.0  ;;  %v3162_v44 = vadd.f32 %v3161_v31, %v3160_v15  ;;  %v2300_v46 = vadd.f32 %v3159_v6, %v4810_v39  ;;  %v2583_v39 = vpop.permute.xlu1 %2582 }
 0x368   : > { %2656 = vst.msk [vmem:[#allocation2 + $0x8b] sm:$0xff] %vm1557_vm2, %v2631_v7  ;;  %v2632_v59 = vmul.f32 %v2578_v56, %v2482_v29  ;;  %v2303_v53 = vadd.f32 %v3162_v44, %v4813_v54 }
 0x369   : > { %v2435_v55 = vpop.f32.mrb[64].mxu0 }
 0x36a   : > { %2657 = vst.msk [vmem:[#allocation2 + $0x93] sm:$0xff] %vm1557_vm2, %v2632_v59  ;;  %v2436_v28 = vadd.f32 %v2435_v55, %v2300_v46  ;;  %v3163_v50 = vpop.f32.mrb[64].mxu1  ;;  %v3244_v61 = vpop.f32.mrb[65].mxu0 }
 0x36b   : > { %v3164_v8 = vpop.f32.mrb[65].mxu1  ;;  %v2438_v2 = vpop.f32.mrb[66].mxu0 }
 0x36c   : > { %v2483_v22 = vmax.f32 %v2436_v28, 0.0  ;;  %v3165_v14 = vadd.f32 %v3164_v8, %v3163_v50  ;;  %v2439_v52 = vadd.f32 %v2438_v2, %v2303_v53  ;;  %v3166_v20 = vpop.f32.mrb[66].mxu1  ;;  %v3245_v30 = vpop.f32.mrb[67].mxu0 }
 0x36d   : > { %v3167_v18 = vpop.f32.mrb[67].mxu1 }
 0x36e   : > { %v2633_v58 = vmul.f32 %v2583_v39, %v2483_v22  ;;  %v2484_v51 = vmax.f32 %v2439_v52, 0.0  ;;  %v3168_v63 = vadd.f32 %v3167_v18, %v3166_v20  ;;  %v2308_v54 = vadd.f32 %v3165_v14, %v4820_v3  ;;  %v2593_v3 = vpop.permute.xlu1 %2592 }
 0x370   : > { %2658 = vst.msk [vmem:[#allocation2 + $0x9b] sm:$0xff] %vm1557_vm2, %v2633_v58  ;;  %v2634_v10 = vmul.f32 %v2588_v48, %v2484_v51  ;;  %v2311_v4 = vadd.f32 %v3168_v63, %v4823_v42 }
 0x371   : > { %v2443_v21 = vpop.f32.mrb[68].mxu0 }
 0x372   : > { %2659 = vst.msk [vmem:[#allocation2 + $0xa3] sm:$0xff] %vm1557_vm2, %v2634_v10  ;;  %v2444_v41 = vadd.f32 %v2443_v21, %v2308_v54  ;;  %v3169_v60 = vpop.f32.mrb[68].mxu1  ;;  %v3248_v11 = vpop.f32.mrb[69].mxu0 }
 0x373   : > { %v3170_v23 = vpop.f32.mrb[69].mxu1  ;;  %v2446_v12 = vpop.f32.mrb[70].mxu0 }
 0x374   : > { %v2485_v19 = vmax.f32 %v2444_v41, 0.0  ;;  %v3171_v49 = vadd.f32 %v3170_v23, %v3169_v60  ;;  %v2447_v25 = vadd.f32 %v2446_v12, %v2311_v4  ;;  %v3172_v45 = vpop.f32.mrb[70].mxu1  ;;  %v3249_v33 = vpop.f32.mrb[71].mxu0 }
 0x375   : > { %v3173_v38 = vpop.f32.mrb[71].mxu1 }
 0x376   : > { %v2635_v62 = vmul.f32 %v2593_v3, %v2485_v19  ;;  %v2486_v5 = vmax.f32 %v2447_v25, 0.0  ;;  %v3174_v40 = vadd.f32 %v3173_v38, %v3172_v45  ;;  %v2316_v42 = vadd.f32 %v3171_v49, %v4830_v57  ;;  %v2603_v57 = vpop.permute.xlu1 %2602 }
 0x378   : > { %2660 = vst.msk [vmem:[#allocation2 + $0xab] sm:$0xff] %vm1557_vm2, %v2635_v62  ;;  %v2636_v34 = vmul.f32 %v2598_v26, %v2486_v5  ;;  %v2319_v13 = vadd.f32 %v3174_v40, %v4833_v17  ;;  %v2608_v17 = vpop.permute.xlu0 %2607 }
 0x379   : > { %v2451_v32 = vpop.f32.mrb[72].mxu0 }
 0x37a   : > { %2661 = vst.msk [vmem:[#allocation2 + $0xb3] sm:$0xff] %vm1557_vm2, %v2636_v34  ;;  %v2452_v37 = vadd.f32 %v2451_v32, %v2316_v42  ;;  %v3175_v1 = vpop.f32.mrb[72].mxu1  ;;  %v3252_v24 = vpop.f32.mrb[73].mxu0 }
 0x37b   : > { %v3176_v9 = vpop.f32.mrb[73].mxu1  ;;  %v2454_v43 = vpop.f32.mrb[74].mxu0 }
 0x37c   : > { %v2487_v47 = vmax.f32 %v2452_v37, 0.0  ;;  %v3177_v36 = vadd.f32 %v3176_v9, %v3175_v1  ;;  %v2455_v6 = vadd.f32 %v2454_v43, %v2319_v13  ;;  %v3178_v16 = vpop.f32.mrb[74].mxu1  ;;  %v3253_v15 = vpop.f32.mrb[75].mxu0 }
 0x37d   : > { %v3179_v35 = vpop.f32.mrb[75].mxu1  ;;  %v2613_v28 = vpop.permute.xlu1 %2612 }
 0x37e   : > { %v2637_v27 = vmul.f32 %v2603_v57, %v2487_v47  ;;  %v2488_v31 = vmax.f32 %v2455_v6, 0.0  ;;  %v2324_v7 = vadd.f32 %v3177_v36, %v4840_v0 }
 0x380   : > { %2662 = vst.msk [vmem:[#allocation2 + $0xbb] sm:$0xff] %vm1557_vm2, %v2637_v27  ;;  %v2638_v29 = vmul.f32 %v2608_v17, %v2488_v31 }
 0x381   : > { %v2459_v44 = vpop.f32.mrb[76].mxu0 }
 0x382   : > { %2663 = vst.msk [vmem:[#allocation2 + $0xc3] sm:$0xff] %vm1557_vm2, %v2638_v29  ;;  %v2460_v46 = vadd.f32 %v2459_v44, %v2324_v7  ;;  %v3256_v56 = vpop.f32.mrb[77].mxu0 }
 0x383   : > { %v2462_v59 = vpop.f32.mrb[78].mxu0 }
 0x384   : > { %v2489_v53 = vmax.f32 %v2460_v46, 0.0  ;;  %v3257_v55 = vpop.f32.mrb[79].mxu0 }
 0x386   : > { %v2639_v50 = vmul.f32 %v2613_v28, %v2489_v53 }
 0x388   : > { %2664 = vst.msk [vmem:[#allocation2 + $0xcb] sm:$0xff] %vm1557_vm2, %v2639_v50 }
 0x389 PF: > { %p2894_p10 = scmp.ne.s32.totalorder %s3851_s25, 3 }
 0x38a   : > { %v2669_v0 = vld [vmem:[#allocation2 + $0xb] sm:$0xff] (!%p2894_p10)  ;;  %vm2694_vm4 = vcmask (!%p2894_p10), 523264   ;;  %v2670_v61 = vld [vmem:[#allocation2 + $0x13] sm:$0xff] (!%p2894_p10)  ;;  %v2671_v8 = vld [vmem:[#allocation2 + $0x1b] sm:$0xff] (!%p2894_p10) }
 0x38b   : > { %2668 = sbr.rel (%p2894_p10) target bundleno = 920 (0x398), region = 64  ;;  %2695 = vst.msk [vmem:[%s5032_s6] sm:$0xff] (!%p2894_p10), %vm2694_vm4, %v2669_v0  ;;  %2696 = vst.msk [vmem:[%s5032_s6 + $0x8] sm:$0xff] (!%p2894_p10), %vm2694_vm4, %v2670_v61  ;;  %v2672_v2 = vld [vmem:[#allocation2 + $0x23] sm:$0xff] (!%p2894_p10)  ;;  %v2673_v22 = vld [vmem:[#allocation2 + $0x2b] sm:$0xff] (!%p2894_p10) }
 0x38c   : > { %2697 = vst.msk [vmem:[%s5032_s6 + $0x10] sm:$0xff] (!%p2894_p10), %vm2694_vm4, %v2671_v8  ;;  %v2674_v14 = vld [vmem:[#allocation2 + $0x33] sm:$0xff] (!%p2894_p10)  ;;  %2698 = vst.msk [vmem:[%s5032_s6 + $0x18] sm:$0xff] (!%p2894_p10), %vm2694_vm4, %v2672_v2  ;;  %v2675_v52 = vld [vmem:[#allocation2 + $0x3b] sm:$0xff] (!%p2894_p10) }
 0x38d   : > { %2699 = vst.msk [vmem:[%s5032_s6 + $0x20] sm:$0xff] (!%p2894_p10), %vm2694_vm4, %v2673_v22  ;;  %2700 = vst.msk [vmem:[%s5032_s6 + $0x28] sm:$0xff] (!%p2894_p10), %vm2694_vm4, %v2674_v14  ;;  %v2676_v20 = vld [vmem:[#allocation2 + $0x43] sm:$0xff] (!%p2894_p10)  ;;  %v2677_v30 = vld [vmem:[#allocation2 + $0x4b] sm:$0xff] (!%p2894_p10) }
 0x38e   : > { %2701 = vst.msk [vmem:[%s5032_s6 + $0x30] sm:$0xff] (!%p2894_p10), %vm2694_vm4, %v2675_v52  ;;  %2702 = vst.msk [vmem:[%s5032_s6 + $0x38] sm:$0xff] (!%p2894_p10), %vm2694_vm4, %v2676_v20  ;;  %v2678_v39 = vld [vmem:[#allocation2 + $0x53] sm:$0xff] (!%p2894_p10)  ;;  %v2679_v18 = vld [vmem:[#allocation2 + $0x5b] sm:$0xff] (!%p2894_p10) }
 0x38f   : > { %2703 = vst.msk [vmem:[%s5032_s6 + $0x40] sm:$0xff] (!%p2894_p10), %vm2694_vm4, %v2677_v30  ;;  %v2680_v58 = vld [vmem:[#allocation2 + $0x63] sm:$0xff] (!%p2894_p10)  ;;  %2704 = vst.msk [vmem:[%s5032_s6 + $0x48] sm:$0xff] (!%p2894_p10), %vm2694_vm4, %v2678_v39  ;;  %v2681_v51 = vld [vmem:[#allocation2 + $0x6b] sm:$0xff] (!%p2894_p10) }
 0x390   : > { %2705 = vst.msk [vmem:[%s5032_s6 + $0x50] sm:$0xff] (!%p2894_p10), %vm2694_vm4, %v2679_v18  ;;  %2706 = vst.msk [vmem:[%s5032_s6 + $0x58] sm:$0xff] (!%p2894_p10), %vm2694_vm4, %v2680_v58  ;;  %v2682_v63 = vld [vmem:[#allocation2 + $0x73] sm:$0xff] (!%p2894_p10)  ;;  %v2683_v54 = vld [vmem:[#allocation2 + $0x7b] sm:$0xff] (!%p2894_p10) }
 0x391   : > { %2707 = vst.msk [vmem:[%s5032_s6 + $0x60] sm:$0xff] (!%p2894_p10), %vm2694_vm4, %v2681_v51  ;;  %2708 = vst.msk [vmem:[%s5032_s6 + $0x68] sm:$0xff] (!%p2894_p10), %vm2694_vm4, %v2682_v63  ;;  %v2684_v48 = vld [vmem:[#allocation2 + $0x83] sm:$0xff] (!%p2894_p10)  ;;  %v2685_v10 = vld [vmem:[#allocation2 + $0x8b] sm:$0xff] (!%p2894_p10) }
 0x392   : > { %2709 = vst.msk [vmem:[%s5032_s6 + $0x70] sm:$0xff] %vm2694_vm4, %v2683_v54  ;;  %v2686_v4 = vld [vmem:[#allocation2 + $0x93] sm:$0xff]  ;;  %2710 = vst.msk [vmem:[%s5032_s6 + $0x78] sm:$0xff] %vm2694_vm4, %v2684_v48  ;;  %v2687_v21 = vld [vmem:[#allocation2 + $0x9b] sm:$0xff] }
 0x393   : > { %2711 = vst.msk [vmem:[%s5032_s6 + $0x80] sm:$0xff] %vm2694_vm4, %v2685_v10  ;;  %2712 = vst.msk [vmem:[%s5032_s6 + $0x88] sm:$0xff] %vm2694_vm4, %v2686_v4  ;;  %v2688_v41 = vld [vmem:[#allocation2 + $0xa3] sm:$0xff]  ;;  %v2689_v60 = vld [vmem:[#allocation2 + $0xab] sm:$0xff] }
 0x394   : > { %2713 = vst.msk [vmem:[%s5032_s6 + $0x90] sm:$0xff] %vm2694_vm4, %v2687_v21  ;;  %2714 = vst.msk [vmem:[%s5032_s6 + $0x98] sm:$0xff] %vm2694_vm4, %v2688_v41  ;;  %v2690_v11 = vld [vmem:[#allocation2 + $0xb3] sm:$0xff]  ;;  %v2691_v23 = vld [vmem:[#allocation2 + $0xbb] sm:$0xff] }
 0x395   : > { %2715 = vst.msk [vmem:[%s5032_s6 + $0xa0] sm:$0xff] %vm2694_vm4, %v2689_v60  ;;  %v2692_v12 = vld [vmem:[#allocation2 + $0xc3] sm:$0xff]  ;;  %2716 = vst.msk [vmem:[%s5032_s6 + $0xa8] sm:$0xff] %vm2694_vm4, %v2690_v11  ;;  %v2693_v19 = vld [vmem:[#allocation2 + $0xcb] sm:$0xff] }
 0x396   : > { %2717 = vst.msk [vmem:[%s5032_s6 + $0xb0] sm:$0xff] %vm2694_vm4, %v2691_v23  ;;  %2718 = vst.msk [vmem:[%s5032_s6 + $0xb8] sm:$0xff] %vm2694_vm4, %v2692_v12 }
 0x397   : > { %2719 = vst.msk [vmem:[%s5032_s6 + $0xc0] sm:$0xff] %vm2694_vm4, %v2693_v19 }
 0x398 PF: > { %p17_p11 = scmp.ge.s32.totalorder %s3871_s30, 6   ;;  %s5138_s21 = smov %s3779_s22 }
 0x399   : > { %s5139_s22 = smov %s3783_s23  ;;  %s5140_s23 = smov %s3915_s13 }
 0x39a   : > { %s5141_s24 = smov %s3871_s30  ;;  %19 = sbr.rel (!%p17_p11) target bundleno = 4 (0x4), region = 100 }
 0x3a1   :  { %2731 = vsyncpa [#allocation4], 1 }
 0x3a2   :  { %2733 = vsyncpa [#allocation4 + $0x1], 1 }
 0x3a3   :  { %2734 = vsyncpa [#allocation6], 1 }
 0x3a4   :  { %2736 = vsyncpa [#allocation6 + $0x1], 1 }

// kernel: sparse_second_forward.4
= control target key start
LH: loop header
LB: loop body
LE: loop exit
PB: predicated region body
PF: predicated region fallthrough
CT: control target
= control target key end

     0   :  { %11 = vsyncpa [#allocation4], 0  ;;  %s3321_s0 = inlined_call_operand.vmem [shape: bf16[72,256], index: 0, kind: input, shape index: {}]   ;;  %s3322_s1 = inlined_call_operand.vmem [shape: f32[72,1], index: 1, kind: input, shape index: {}]   ;;  %s3323_s2 = inlined_call_operand.hbm [shape: bf16[256,128], index: 2, kind: input, shape index: {}]   ;;  %s3324_s3 = inlined_call_operand.hbm [shape: f32[1,128], index: 3, kind: input, shape index: {}]   ;;  %s3325_s4 = inlined_call_operand.hbm [shape: bf16[5,1152,128], index: 4, kind: input, shape index: {}]   ;;  %s3326_s5 = inlined_call_operand.hbm [shape: f32[5,1,128], index: 5, kind: input, shape index: {}]   ;;  %s3327_s6 = inlined_call_operand.vmem [shape: f32[72,128], index: 6, kind: output, shape index: {}]  }
   0x1   :  { %12 = vsyncpa [#allocation6], 0  ;;  %s2741_s21 = smov 0   ;;  %s2743_s22 = smov 0  }
   0x2   :  { %s2745_s23 = smov 0   ;;  %s2747_s24 = smov 0  }
   0x3 LB: > { %s2760_s25 = sadd.s32 4294967295, %s2693_s24   ;;  %s115_s26 = sadd.s32 1, %s2689_s23  ;;  %s2693_s24 = sphi %s2747_s24, %s3357_s24   ;;  %s2689_s23 = sphi %s2745_s23, %s3356_s23   ;;  %s2685_s22 = sphi %s2743_s22, %s3355_s22   ;;  %s2681_s21 = sphi %s2741_s21, %s3354_s21  }
   0x4   : > { %p122_p1 = scmp.ne.s32.totalorder %s2689_s23, %s2685_s22  ;;  %p123_p2 = scmp.eq.s32.totalorder %s2693_s24, 0 }
   0x5   : > { %p128_p3 = scmp.ne.s32.totalorder %s2685_s22, %s2681_s21  ;;  %p3328_p4 = scmp.eq.s32.totalorder %s2760_s25, 0 }
   0x6   : > { %p1927_p5 = scmp.ge.s32.totalorder %s2693_s24, 1  ;;  %p2770_p6 = por %p123_p2, %p122_p1 }
   0x7   : > { %p192_p7 = scmp.lt.s32.totalorder %s2693_s24, 7  ;;  %p2777_p8 = por %p3328_p4, %p128_p3 }
   0x8   : > { %s2695_s30 = smov [#allocation3]   ;;  %p2385_p13 = scmp.lt.s32.totalorder %s2693_s24, 6 }
   0x9   : > { %s3336_s28 = scalar_select %p2777_p8, 1, 0 }
   0xa   : > { %p2782_p10 = pnand %p1927_p5, %p192_p7  ;;  %s210_s7 = sshll.u32 %s2695_s30, 4  ;;  %s211_s7 = int_to_ptr.vmem [resolvable:$true] %s210_s7 }
   0xb   : > { %s2796_s9 = sadd.s32 1, %s2693_s24   ;;  %p2801_p1 = pnand %p2385_p13, %p2770_p6 }
   0xc   : > { %s3337_s29 = scalar_select %p2782_p10, 1, 0 }
   0xd   : > { %p2369_p11 = pneg %p2782_p10  ;;  %s2535_s14 = scalar_lea.hbm %s3323_s2, 2048 }
   0xe   : > { %s3339_s11 = scalar_select %p2801_p1, 1, 0 }
   0xf   : > { %p2790_p12 = pnand %p2369_p11, %p3328_p4  ;;  %p2536_p2 = scmp.ne.s32.totalorder %s3323_s2, %s2535_s14 }
  0x10   : > { %p2542_p6 = scmp.lt.u32.totalorder %s2535_s14, %s3323_s2 }
  0x11   : > { %p3334_p3 = pneg %p2790_p12 }
  0x13   : > { %p2538_p5 = pnand %p3334_p3, %p2536_p2 }
  0x15   : > { %p2539_p7 = pneg %p2538_p5 }
  0x17   : > { %p2544_p11 = pnand %p2542_p6, %p2539_p7 }
  0x19   : > { %2547 = shalt.err (!%p2544_p11)
}
  0x1a   : > { %s2548_s19 = scalar_lea.vmem %s211_s7, 2048  ;;  %p2556_p0 = scmp.lt.s32.totalorder %s211_s7, %s211_s7 }
  0x1b   : > { %p2549_p13 = scmp.ne.s32.totalorder %s211_s7, %s2548_s19  ;;  %p2557_p8 = scmp.lt.s32.totalorder %s2548_s19, %s2548_s19 }
  0x1d   : > { %p2551_p9 = pnand %p2549_p13, %p3334_p3  ;;  %p2558_p10 = por %p2557_p8, %p2556_p0 }
  0x1f   : > { %p2552_p4 = pneg %p2551_p9 }
  0x21   : > { %p2559_p1 = pnand %p2558_p10, %p2552_p4 }
  0x23   : > { %2562 = shalt.err (!%p2559_p1)
}
  0x24   : > { %s3332_s20 = smov 64   ;;  %s3333_s21 = smov 4  }
  0x25   : > { %2372 = dma.hbm_to_vmem [thread:$0]  (!%p2790_p12), %s3323_s2, 2048, %s211_s7, [#allocation4], %s3332_s20, %s3332_s20, %s3333_s21  }
  0x26   : > { %s1924_s12 = sadd.s32 4294967295, %s2796_s9  ;;  %p3340_p0 = scmp.gt.s32.totalorder %s2760_s25, 0 }
  0x27   : > { %p110_p4 = scmp.gt.s32.totalorder %s1924_s12, 0  ;;  %s237_s14 = sand.u32 1, %s2689_s23  }
  0x28   : > { %s2834_s13 = scalar_select %p3340_p0, %s2760_s25, 0 }
  0x29   : > { %s3359_s12 = smov (!%p110_p4, %s1924_s12), 0  ;;  %s2354_s16 = smul.u32 576, %s237_s14 }
  0x2a   : > { %s2355_s15 = smul.u32 9216, %s2834_s13  ;;  %s112_s7 = ssub.s32 %s2834_s13, %s3359_s12 }
  0x2b   : > { %p113_p8 = scmp.eq.s32.totalorder %s112_s7, 0  ;;  %s239_s27 = scalar_lea.vmem [#allocation7], %s2354_s16 }
  0x2c   : > { %s2843_s19 = scalar_lea.hbm %s3325_s4, %s2355_s15  ;;  %s249_s30 = sshll.u32 %s239_s27, 4  ;;  %s2851_s30 = int_to_ptr.vmem [resolvable:$true] %s249_s30 }
  0x2d   : > { %s2698_s20 = smov [#allocation5]   ;;  %s3341_s17 = sand.u32 1, %s2693_s24  }
  0x2e   : > { %s224_s21 = sshll.u32 %s2698_s20, 4  ;;  %s2857_s15 = scalar_lea.sflag [#allocation4], %s3341_s17  ;;  %s2853_s21 = int_to_ptr.vmem [resolvable:$true] %s224_s21 }
  0x2f   : > { %s2849_s10 = scalar_select %p113_p8, %s2689_s23, %s115_s26  }
  0x30   : > { %s2563_s18 = scalar_lea.hbm %s2843_s19, 9216  ;;  %p3342_p10 = scmp.ne.s32.totalorder %s3339_s11, 0 }
  0x31   : > { %p2564_p9 = scmp.ne.s32.totalorder %s2843_s19, %s2563_s18  ;;  %s2568_s26 = scalar_lea.hbm %s3325_s4, 46080 }
  0x32   : > { %p2565_p1 = pneg %p3342_p10  ;;  %p2569_p7 = scmp.lt.u32.totalorder %s2843_s19, %s3325_s4 }
  0x33   : > { %p2570_p6 = scmp.lt.u32.totalorder %s2568_s26, %s2563_s18  ;;  %p2572_p13 = scmp.lt.u32.totalorder %s2563_s18, %s2843_s19 }
  0x34   : > { %p2566_p2 = pnand %p2565_p1, %p2564_p9 }
  0x35   : > { %p2571_p11 = por %p2570_p6, %p2569_p7 }
  0x36   : > { %p2567_p5 = pneg %p2566_p2 }
  0x37   : > { %p2573_p0 = por %p2572_p13, %p2571_p11 }
  0x39   : > { %p2574_p4 = pnand %p2573_p0, %p2567_p5 }
  0x3b   : > { %2577 = shalt.err (!%p2574_p4)
}
  0x3c   : > { %s2578_s24 = scalar_lea.vmem %s2851_s30, 9216  ;;  %s2699_s27 = smov [#allocation7]  }
  0x3d   : > { %p2579_p8 = scmp.ne.s32.totalorder %s2851_s30, %s2578_s24  ;;  %s2583_s17 = sshll.u32 %s2699_s27, 4  ;;  %s2584_s17 = int_to_ptr.vmem [resolvable:$false] %s2583_s17 }
  0x3e   : > { %s2585_s12 = scalar_lea.vmem %s2584_s17, 18432  ;;  %p2586_p3 = scmp.lt.s32.totalorder %s2851_s30, %s2584_s17 }
  0x3f   : > { %p2581_p9 = pnand %p2579_p8, %p2565_p1  ;;  %p2587_p7 = scmp.lt.s32.totalorder %s2585_s12, %s2578_s24 }
  0x41   : > { %p2582_p2 = pneg %p2581_p9  ;;  %p2588_p6 = por %p2587_p7, %p2586_p3 }
  0x43   : > { %p2589_p11 = pnand %p2588_p6, %p2582_p2 }
  0x45   : > { %2592 = shalt.err (!%p2589_p11)
}
  0x46   : > { %s3343_s18 = smov 4   ;;  %s3344_s20 = smov 64  }
  0x47   : > { %2379 = dma.hbm_to_vmem [thread:$0]  (!%p3342_p10), %s2843_s19, 9216, %s2851_s30, %s2857_s15, %s3344_s20, %s3344_s20, %s3343_s18  }
  0x48   : > { %s2593_s7 = scalar_lea.hbm %s3324_s3, 16  ;;  %p3345_p5 = pneg %p2790_p12 }
  0x49   : > { %p2594_p3 = scmp.ne.s32.totalorder %s3324_s3, %s2593_s7  ;;  %p2600_p4 = scmp.lt.u32.totalorder %s2593_s7, %s3324_s3 }
  0x4b   : > { %p2596_p13 = pnand %p2594_p3, %p3345_p5 }
  0x4d   : > { %p2597_p0 = pneg %p2596_p13 }
  0x4f   : > { %p2602_p8 = pnand %p2600_p4, %p2597_p0 }
  0x51   : > { %2605 = shalt.err (!%p2602_p8)
}
  0x52   : > { %s2606_s19 = scalar_lea.vmem %s2853_s21, 16  ;;  %p3346_p2 = pmov %p3345_p5 }
  0x53   : > { %p2607_p9 = scmp.ne.s32.totalorder %s2853_s21, %s2606_s19  ;;  %s2613_s30 = scalar_lea.vmem %s2853_s21, 32 }
  0x54   : > { %p2614_p11 = scmp.lt.s32.totalorder %s2853_s21, %s2853_s21  ;;  %p2615_p3 = scmp.lt.s32.totalorder %s2613_s30, %s2606_s19 }
  0x55   : > { %p2609_p7 = pnand %p2607_p9, %p3346_p2 }
  0x56   : > { %p2616_p5 = por %p2615_p3, %p2614_p11 }
  0x57   : > { %p2610_p6 = pneg %p2609_p7 }
  0x59   : > { %p2617_p13 = pnand %p2616_p5, %p2610_p6 }
  0x5b   : > { %2620 = shalt.err (!%p2617_p13)
}
  0x5c   : > { %2375 = dma.hbm_to_vmem [thread:$0]  (!%p2790_p12), %s3324_s3, 16, %s2853_s21, [#allocation6]  }
  0x5d   : > { %s1934_s26 = sshll.u32 %s2834_s13, 4  ;;  %s262_s8 = scalar_lea.vmem [#allocation8], %s237_s14 }
  0x5e   : > { %s2918_s27 = scalar_lea.hbm %s3326_s5, %s1934_s26  ;;  %s272_s17 = sshll.u32 %s262_s8, 4  ;;  %s273_s17 = int_to_ptr.vmem [resolvable:$true] %s272_s17 }
  0x5f   : > { %s2621_s24 = scalar_lea.hbm %s2918_s27, 16  ;;  %s2626_s12 = scalar_lea.hbm %s3326_s5, 80 }
  0x60   : > { %p2622_p0 = scmp.ne.s32.totalorder %s2918_s27, %s2621_s24  ;;  %p2627_p8 = scmp.lt.u32.totalorder %s2918_s27, %s3326_s5 }
  0x61   : > { %p2628_p9 = scmp.lt.u32.totalorder %s2626_s12, %s2621_s24  ;;  %p2630_p7 = scmp.lt.u32.totalorder %s2621_s24, %s2918_s27 }
  0x62   : > { %p2624_p4 = pnand %p2622_p0, %p2565_p1 }
  0x63   : > { %p2629_p2 = por %p2628_p9, %p2627_p8 }
  0x64   : > { %p2625_p12 = pneg %p2624_p4 }
  0x65   : > { %p2631_p6 = por %p2630_p7, %p2629_p2 }
  0x67   : > { %p2632_p11 = pnand %p2631_p6, %p2625_p12 }
  0x69   : > { %2635 = shalt.err (!%p2632_p11)
}
  0x6a   : > { %s2636_s14 = scalar_lea.vmem %s273_s17, 16  ;;  %s2700_s18 = smov [#allocation8]  }
  0x6b   : > { %p2637_p3 = scmp.ne.s32.totalorder %s273_s17, %s2636_s14  ;;  %s2641_s20 = sshll.u32 %s2700_s18, 4  ;;  %s2642_s20 = int_to_ptr.vmem [resolvable:$false] %s2641_s20 }
  0x6c   : > { %s2643_s26 = scalar_lea.vmem %s2642_s20, 32  ;;  %p2644_p0 = scmp.lt.s32.totalorder %s273_s17, %s2642_s20 }
  0x6d   : > { %p2639_p5 = pnand %p2637_p3, %p2565_p1  ;;  %p2645_p4 = scmp.lt.s32.totalorder %s2643_s26, %s2636_s14 }
  0x6f   : > { %p2640_p13 = pneg %p2639_p5  ;;  %p2646_p8 = por %p2645_p4, %p2644_p0 }
  0x71   : > { %p2647_p9 = pnand %p2646_p8, %p2640_p13 }
  0x73   : > { %2650 = shalt.err (!%p2647_p9)
}
  0x74   : > { %2382 = dma.hbm_to_vmem [thread:$0]  (!%p3342_p10), %s2918_s27, 16, %s273_s17, %s2857_s15  }
  0x75   : > { %p3347_p12 = scmp.ne.s32.totalorder %s3337_s29, 0 }
  0x76   : > { %p3348_p1 = scmp.eq.s32.totalorder (!%p3347_p12), %s2760_s25, 0 }
  0x77   : > { %281 = sbr.rel (%p3347_p12) target bundleno = 772 (0x304), region = 44 }
  0x7e   : > { %2668 = dma.done.wait (%p3348_p1), [#allocation4], 2048   ;;  %p3349_p2 = pmov %p3348_p1 }
  0x7f   : > { %p3350_p7 = pmov %p3348_p1 }
  0x80   : > { %2670 = vsyncadd (%p3349_p2), [#allocation4], 4294965248 }
  0x81   : > { %2672 = dma.done.wait (%p3350_p7), [#allocation6], 16   ;;  %p3351_p6 = pmov %p3348_p1 }
  0x82   : > { %s291_s11 = sand.u32 1, %s2760_s25   ;;  %s293_s15 = sand.u32 1, %s2685_s22  }
  0x83   : > { %2674 = vsyncadd (%p3351_p6), [#allocation6], 4294967280  ;;  %s2356_s16 = smul.u32 576, %s293_s15  ;;  %s292_s29 = scalar_lea.sflag [#allocation4], %s291_s11 }
  0x84   : > { %p3352_p10 = scmp.ne.s32.totalorder %s3336_s28, 0 }
  0x85   : > { %s2954_s7 = scalar_lea.vmem [#allocation7], %s2356_s16 }
  0x86   : > { %2676 = dma.done.wait (%p3352_p10), %s292_s29, 9232  }
  0x87   : > { %2678 = vsyncadd (%p3352_p10), %s292_s29, 4294958064  ;;  %v2963_v0 = vld [vmem:[%s3322_s1] sm:$0xff]  ;;  %v2968_v1 = vld [vmem:[%s3322_s1 + $0x8] sm:$0xff]  ;;  %s3005_s8 = scalar_lea.vmem [#allocation8], %s293_s15  ;;  %p3353_p11 = scmp.ne.s32.totalorder %s2760_s25, 0 }
  0x88   : > { %v2973_v2 = vld [vmem:[%s3322_s1 + $0x10] sm:$0xff]  ;;  %v2978_v3 = vld [vmem:[%s3322_s1 + $0x18] sm:$0xff]  ;;  %v2983_v4 = vld [vmem:[%s3322_s1 + $0x20] sm:$0xff]  ;;  %v2701_v10 = vmov (!%p3353_p11), 0.0   ;;  %v2702_v15 = vmov (!%p3353_p11), 0  }
  0x89   : > { %v2988_v5 = vld [vmem:[%s3322_s1 + $0x28] sm:$0xff]  ;;  %v2993_v6 = vld [vmem:[%s3322_s1 + $0x30] sm:$0xff]  ;;  %v2998_v7 = vld [vmem:[%s3322_s1 + $0x38] sm:$0xff]  ;;  %350 = sbr.rel (%p3353_p11) target bundleno = 411 (0x19b), region = 64  ;;  %351 = vst [vmem:[#allocation2] sm:$0x7f] (!%p3353_p11), %v2701_v10  ;;  %2429 = vset.pattern.permute.xlu0 (!%p3353_p11), %v2702_v15  ;;  %2430 = vset.pattern.permute.xlu1 (!%p3353_p11), %v2702_v15 }
  0x8a   : > { %v3003_v8 = vld [vmem:[%s3322_s1 + $0x40] sm:$0xff]  ;;  %v2431_v9 = vld [vmem:[#allocation3 + $0x40] sm:$0xff] (!%p3353_p11)   ;;  %352 = vst [vmem:[#allocation2 + $0x4f] sm:$0x7f] (!%p3353_p11), %v2701_v10  ;;  %v2435_v14 = vld [vmem:[#allocation3 + $0x50] sm:$0xff] (!%p3353_p11)   ;;  %627 = vperm.xlu0 (!%p3353_p11), %2429, %v2963_v0   ;;  %637 = vperm.xlu1 (!%p3353_p11), %2430, %v2973_v2  }
  0x8b   : > { %v2432_v11 = vld [vmem:[#allocation3] sm:$0xff] (!%p3353_p11)   ;;  %2043 = vmatprep.subr.bf16.mxu0 (!%p3353_p11), %v2431_v9  ;;  %2322 = vmatprep.subr.bf16.mxu1 (!%p3353_p11), %v2431_v9  ;;  %v2433_v12 = vld [vmem:[#allocation3 + $0x48] sm:$0xff] (!%p3353_p11)   ;;  %v2436_v16 = vld [vmem:[#allocation3 + $0x10] sm:$0xff] (!%p3353_p11)  }
  0x8c   : > { %2044 = vmatpush3.bf16.msra.mxu0 (!%p3353_p11), %v2432_v11  ;;  %2330 = vmatpush3.bf16.msra.mxu1 (!%p3353_p11), %v2432_v11  ;;  %v2434_v13 = vld [vmem:[#allocation3 + $0x8] sm:$0xff] (!%p3353_p11)   ;;  %v2437_v17 = vld [vmem:[#allocation3 + $0x58] sm:$0xff] (!%p3353_p11)   ;;  %v2439_v19 = vld [vmem:[#allocation3 + $0x60] sm:$0xff] (!%p3353_p11)  }
  0x8d   : > { %2045 = vmatprep.subr.bf16.mxu0 (!%p3353_p11), %v2433_v12  ;;  %2323 = vmatprep.subr.bf16.mxu1 (!%p3353_p11), %v2433_v12  ;;  %v2438_v18 = vld [vmem:[#allocation3 + $0x18] sm:$0xff] (!%p3353_p11)   ;;  %v2440_v20 = vld [vmem:[#allocation3 + $0x20] sm:$0xff] (!%p3353_p11)   ;;  %v2441_v21 = vld [vmem:[#allocation3 + $0x68] sm:$0xff] (!%p3353_p11)  }
  0x8e   : > { %632 = vperm.xlu0 (!%p3353_p11), %2429, %v2968_v1   ;;  %642 = vperm.xlu1 (!%p3353_p11), %2430, %v2978_v3   ;;  %v2449_v22 = vld [vmem:[%s3321_s0 + $0x4] ss:$8 sps:$4 sm:$0xff] (!%p3353_p11)   ;;  %v2452_v23 = vld [vmem:[%s3321_s0 + $0x34] ss:$8 sps:$4 sm:$0xff] (!%p3353_p11)   ;;  %v2447_v30 = vld [vmem:[%s3321_s0] ss:$8 sps:$4 sm:$0xff] (!%p3353_p11)  }
  0x8f   : > { %v2442_v24 = vld [vmem:[#allocation3 + $0x28] sm:$0xff] (!%p3353_p11)   ;;  %v2443_v25 = vld [vmem:[#allocation3 + $0x70] sm:$0xff] (!%p3353_p11)   ;;  %576 = vmatprep.mubr.bf16.mxu0 (!%p3353_p11), %v2449_v22  ;;  %600 = vmatprep.mubr.bf16.mxu1 (!%p3353_p11), %v2452_v23  ;;  %v2445_v27 = vld [vmem:[#allocation3 + $0x78] sm:$0xff] (!%p3353_p11)  }
  0x90   : > { %2046 = vmatpush3.bf16.msra.mxu0 %v2434_v13  ;;  %2331 = vmatpush3.bf16.msra.mxu1 %v2434_v13  ;;  %v2444_v26 = vld [vmem:[#allocation3 + $0x30] sm:$0xff]   ;;  %v2446_v28 = vld [vmem:[#allocation3 + $0x38] sm:$0xff]   ;;  %v361_v29 = vld [vmem:[%s3321_s0 + $0x40] sm:$0xff] }
  0x91   : > { %2047 = vmatprep.subr.bf16.mxu0 %v2435_v14  ;;  %2324 = vmatprep.subr.bf16.mxu1 %v2435_v14  ;;  %v2450_v31 = vld [vmem:[%s3321_s0 + $0x30] ss:$8 sps:$4 sm:$0xff]   ;;  %v2453_v32 = vld [vmem:[%s3321_s0 + $0x14] ss:$8 sps:$4 sm:$0xff]   ;;  %v1949_v33 = vcombine.high %v361_v29, %v361_v29  ;;  %v1948_v35 = vcombine.low %v361_v29, %v361_v29  ;;  %v2458_v36 = vld [vmem:[%s3321_s0 + $0x24] ss:$8 sps:$4 sm:$0xff]  }
  0x92   : > { %647 = vperm.xlu0 %2429, %v2983_v4   ;;  %652 = vperm.xlu1 %2430, %v2988_v5   ;;  %v2456_v34 = vld [vmem:[%s3321_s0 + $0x10] ss:$8 sps:$4 sm:$0xff]   ;;  %v2460_v37 = vld [vmem:[%s3321_s0 + $0x20] ss:$8 sps:$4 sm:$0xff]  }
  0x93   : > { %v1939_v46 = vld [vmem:[#allocation5] ss:$0 sm:$0xff] }
  0x94   : > { %2048 = vmatpush3.bf16.msra.mxu0 %v2436_v16  ;;  %2332 = vmatpush3.bf16.msra.mxu1 %v2436_v16 }
  0x95   : > { %2049 = vmatprep.subr.bf16.mxu0 %v2437_v17  ;;  %2325 = vmatprep.subr.bf16.mxu1 %v2437_v17 }
  0x96   : > { %657 = vperm.xlu0 %2429, %v2993_v6   ;;  %662 = vperm.xlu1 %2430, %v2998_v7  }
  0x98   : > { %2050 = vmatpush3.bf16.msra.mxu0 %v2438_v18  ;;  %2333 = vmatpush3.bf16.msra.mxu1 %v2438_v18 }
  0x99   : > { %2051 = vmatprep.subr.bf16.mxu0 %v2439_v19  ;;  %2326 = vmatprep.subr.bf16.mxu1 %v2439_v19 }
  0x9a   : > { %667 = vperm.xlu0 %2429, %v3003_v8  }
  0x9c   : > { %2052 = vmatpush3.bf16.msra.mxu0 %v2440_v20  ;;  %2334 = vmatpush3.bf16.msra.mxu1 %v2440_v20 }
  0x9d   : > { %2053 = vmatprep.subr.bf16.mxu0 %v2441_v21  ;;  %2327 = vmatprep.subr.bf16.mxu1 %v2441_v21 }
  0xa0   : > { %2054 = vmatpush3.bf16.msra.mxu0 %v2442_v24  ;;  %2335 = vmatpush3.bf16.msra.mxu1 %v2442_v24 }
  0xa1   : > { %2055 = vmatprep.subr.bf16.mxu0 %v2443_v25  ;;  %2328 = vmatprep.subr.bf16.mxu1 %v2443_v25 }
  0xa4   : > { %2056 = vmatpush3.bf16.msra.mxu0 %v2444_v26  ;;  %2336 = vmatpush3.bf16.msra.mxu1 %v2444_v26 }
  0xa5   : > { %2057 = vmatprep.subr.bf16.mxu0 %v2445_v27  ;;  %2329 = vmatprep.subr.bf16.mxu1 %v2445_v27 }
  0xa8   : > { %2058 = vmatpush3.bf16.msra.mxu0 %v2446_v28  ;;  %2337 = vmatpush3.bf16.msra.mxu1 %v2446_v28 }
  0xab   : > { %577 = vmatmul.mubr.bf16.vlgmr.msra.gmra.mrb[0].mxu0 %v2447_v30  ;;  %601 = vmatmul.mubr.bf16.vlgmr.msra.gmra.mrb[0].mxu1 %v2450_v31 }
  0xac   : > { %584 = vmatprep.mubr.bf16.mxu0 %v2453_v32  ;;  %608 = vmatprep.mubr.bf16.mxu1 %v1949_v33 }
  0xb3   : > { %585 = vmatmul.mubr.bf16.gmra.mrb[4].mxu0 %v2456_v34  ;;  %609 = vmatmul.mubr.bf16.gmra.mrb[4].mxu1 %v1948_v35 }
  0xb4   : > { %592 = vmatprep.mubr.bf16.mxu0 %v2458_v36 }
  0xbb   : > { %593 = vmatmul.mubr.bf16.gmra.mrb[8].mxu0 %v2460_v37 }
 0x109   : > { %v628_v38 = vpop.permute.xlu0 %627  ;;  %v638_v39 = vpop.permute.xlu1 %637 }
 0x10d   : > { %v633_v40 = vpop.permute.xlu0 %632  ;;  %v643_v41 = vpop.permute.xlu1 %642 }
 0x111   : > { %v3045_v42 = vpop.permute.xlu0 %647  ;;  %v3047_v43 = vpop.permute.xlu1 %652 }
 0x115   : > { %v658_v63 = vpop.permute.xlu0 %657  ;;  %v663_v9 = vpop.permute.xlu1 %662 }
 0x119   : > { %v668_v32 = vpop.permute.xlu0 %667 }
 0x17e   : > { %v2059_v44 = vpop.f32.mrb[0].mxu0  ;;  %v2077_v45 = vpop.f32.mrb[0].mxu1 }
 0x17f   : > { %v2060_v47 = vpop.f32.mrb[1].mxu0  ;;  %v2078_v48 = vpop.f32.mrb[1].mxu1 }
 0x180   : > { %v2061_v49 = vadd.f32 %v2060_v47, %v2059_v44  ;;  %v2062_v50 = vpop.f32.mrb[2].mxu0  ;;  %v2079_v51 = vadd.f32 %v2078_v48, %v2077_v45  ;;  %v2080_v52 = vpop.f32.mrb[2].mxu1 }
 0x181   : > { %v2063_v53 = vpop.f32.mrb[3].mxu0  ;;  %v2081_v54 = vpop.f32.mrb[3].mxu1 }
 0x182   : > { %v579_v55 = vadd.f32 %v2061_v49, %v1939_v46  ;;  %v2064_v56 = vadd.f32 %v2063_v53, %v2062_v50  ;;  %v603_v57 = vadd.f32 %v2079_v51, %v1939_v46  ;;  %v2082_v58 = vadd.f32 %v2081_v54, %v2080_v52 }
 0x184   : > { %v616_v59 = vmax.f32 %v579_v55, 0.0  ;;  %v582_v60 = vadd.f32 %v2064_v56, %v1939_v46  ;;  %v622_v61 = vmax.f32 %v603_v57, 0.0  ;;  %v606_v62 = vadd.f32 %v2082_v58, %v1939_v46 }
 0x186   : > { %v670_v10 = vmul.f32 %v628_v38, %v616_v59  ;;  %v617_v11 = vmax.f32 %v582_v60, 0.0  ;;  %v676_v12 = vmul.f32 %v658_v63, %v622_v61  ;;  %v2065_v13 = vpop.f32.mrb[4].mxu0  ;;  %v2083_v14 = vpop.f32.mrb[4].mxu1  ;;  %v623_v15 = vmax.f32 %v606_v62, 0.0 }
 0x187   : > { %v2066_v16 = vpop.f32.mrb[5].mxu0  ;;  %v2084_v17 = vpop.f32.mrb[5].mxu1 }
 0x188   : > { %679 = vst [vmem:[#allocation2 + $0x7] sm:$0xff] %v670_v10  ;;  %v671_v18 = vmul.f32 %v633_v40, %v617_v11  ;;  %685 = vst [vmem:[#allocation2 + $0x37] sm:$0xff] %v676_v12  ;;  %v2067_v19 = vadd.f32 %v2066_v16, %v2065_v13  ;;  %v2085_v20 = vadd.f32 %v2084_v17, %v2083_v14  ;;  %v2068_v21 = vpop.f32.mrb[6].mxu0  ;;  %v2086_v23 = vpop.f32.mrb[6].mxu1 }
 0x189   : > { %v677_v22 = vmul.f32 %v663_v9, %v623_v15  ;;  %v2069_v24 = vpop.f32.mrb[7].mxu0  ;;  %v2087_v25 = vpop.f32.mrb[7].mxu1 }
 0x18a   : > { %680 = vst [vmem:[#allocation2 + $0xf] sm:$0xff] %v671_v18  ;;  %v587_v26 = vadd.f32 %v2067_v19, %v1939_v46  ;;  %v611_v27 = vadd.f32 %v2085_v20, %v1939_v46  ;;  %v2070_v28 = vadd.f32 %v2069_v24, %v2068_v21 }
 0x18b   : > { %686 = vst [vmem:[#allocation2 + $0x3f] sm:$0xff] %v677_v22 }
 0x18c   : > { %v618_v29 = vmax.f32 %v587_v26, 0.0  ;;  %v624_v30 = vmax.f32 %v611_v27, 0.0  ;;  %v590_v31 = vadd.f32 %v2070_v28, %v1939_v46 }
 0x18e   : > { %v672_v33 = vmul.f32 %v638_v39, %v618_v29  ;;  %v678_v34 = vmul.f32 %v668_v32, %v624_v30  ;;  %v619_v35 = vmax.f32 %v590_v31, 0.0  ;;  %v2071_v36 = vpop.f32.mrb[8].mxu0 }
 0x18f   : > { %v2072_v37 = vpop.f32.mrb[9].mxu0 }
 0x190   : > { %681 = vst [vmem:[#allocation2 + $0x17] sm:$0xff] %v672_v33  ;;  %687 = vst [vmem:[#allocation2 + $0x47] sm:$0xff] %v678_v34  ;;  %v673_v38 = vmul.f32 %v643_v41, %v619_v35  ;;  %v2073_v40 = vadd.f32 %v2072_v37, %v2071_v36  ;;  %v2074_v44 = vpop.f32.mrb[10].mxu0 }
 0x191   : > { %v2075_v45 = vpop.f32.mrb[11].mxu0 }
 0x192   : > { %682 = vst [vmem:[#allocation2 + $0x1f] sm:$0xff] %v673_v38  ;;  %v595_v47 = vadd.f32 %v2073_v40, %v1939_v46  ;;  %v2076_v48 = vadd.f32 %v2075_v45, %v2074_v44 }
 0x194   : > { %v620_v49 = vmax.f32 %v595_v47, 0.0  ;;  %v598_v50 = vadd.f32 %v2076_v48, %v1939_v46 }
 0x196   : > { %v674_v51 = vmul.f32 %v3045_v42, %v620_v49  ;;  %v621_v52 = vmax.f32 %v598_v50, 0.0 }
 0x198   : > { %683 = vst [vmem:[#allocation2 + $0x27] sm:$0xff] %v674_v51  ;;  %v675_v39 = vmul.f32 %v3047_v43, %v621_v52 }
 0x19a   : > { %684 = vst [vmem:[#allocation2 + $0x2f] sm:$0xff] %v675_v39 }
 0x19b PF: > { %p1966_p3 = scmp.le.s32.totalorder %s2760_s25, 0 }
 0x19c   : > { %v2463_v41 = vld [vmem:[%s2954_s7 + $0x40] sm:$0xff] (!%p1966_p3)   ;;  %v2467_v53 = vld [vmem:[%s2954_s7 + $0x48] sm:$0xff] (!%p1966_p3)   ;;  %v2471_v57 = vld [vmem:[%s2954_s7 + $0x50] sm:$0xff] (!%p1966_p3)   ;;  %v2703_v59 = vmov (!%p1966_p3), 0   ;;  %vm2705_vm0 = vmmov (!%p1966_p3), 0  }
 0x19d   : > { %691 = sbr.rel (%p1966_p3) target bundleno = 763 (0x2fb), region = 68  ;;  %v2464_v42 = vld [vmem:[%s2954_s7 + $0xc0] sm:$0xff] (!%p1966_p3)   ;;  %2089 = vmatprep.subr.bf16.mxu0 (!%p1966_p3), %v2463_v41  ;;  %v2468_v54 = vld [vmem:[%s2954_s7 + $0xc8] sm:$0xff] (!%p1966_p3)   ;;  %v2472_v58 = vld [vmem:[%s2954_s7 + $0xd0] sm:$0xff] (!%p1966_p3)   ;;  %2461 = vset.pattern.permute.xlu0 (!%p1966_p3), %v2703_v59 }
 0x19e   : > { %v2465_v46 = vld [vmem:[%s2954_s7] sm:$0xff] (!%p1966_p3)   ;;  %2135 = vmatprep.subr.bf16.mxu1 (!%p1966_p3), %v2464_v42  ;;  %v2469_v55 = vld [vmem:[%s2954_s7 + $0x8] sm:$0xff] (!%p1966_p3)   ;;  %v2473_v60 = vld [vmem:[%s2954_s7 + $0x10] sm:$0xff] (!%p1966_p3)   ;;  %1764 = vperm.xlu0 (!%p1966_p3), %2461, %v2963_v0  }
 0x19f   : > { %v2466_v43 = vld [vmem:[%s2954_s7 + $0x80] sm:$0xff] (!%p1966_p3)   ;;  %2090 = vmatpush3.bf16.msra.mxu0 (!%p1966_p3), %v2465_v46  ;;  %v2470_v56 = vld [vmem:[%s2954_s7 + $0x88] sm:$0xff] (!%p1966_p3)   ;;  %v2474_v61 = vld [vmem:[%s2954_s7 + $0x90] sm:$0xff] (!%p1966_p3)   ;;  %2462 = vset.pattern.permute.xlu1 (!%p1966_p3), %v2703_v59 }
 0x1a0   : > { %2136 = vmatpush3.bf16.msra.mxu1 (!%p1966_p3), %v2466_v43  ;;  %2091 = vmatprep.subr.bf16.mxu0 (!%p1966_p3), %v2467_v53  ;;  %v2475_v62 = vld [vmem:[%s2954_s7 + $0x58] sm:$0xff] (!%p1966_p3)   ;;  %v2479_v10 = vld [vmem:[%s2954_s7 + $0x60] sm:$0xff] (!%p1966_p3)   ;;  %v2484_v13 = vld [vmem:[%s2954_s7 + $0xe8] sm:$0xff] (!%p1966_p3)  }
 0x1a1   : > { %2137 = vmatprep.subr.bf16.mxu1 (!%p1966_p3), %v2468_v54  ;;  %1774 = vperm.xlu1 (!%p1966_p3), %2462, %v2973_v2   ;;  %v2476_v63 = vld [vmem:[%s2954_s7 + $0xd8] sm:$0xff] (!%p1966_p3)   ;;  %v2480_v11 = vld [vmem:[%s2954_s7 + $0xe0] sm:$0xff] (!%p1966_p3)   ;;  %v2486_v14 = vld [vmem:[%s2954_s7 + $0xa8] sm:$0xff] (!%p1966_p3)  }
 0x1a2   : > { %v2477_v9 = vld [vmem:[%s2954_s7 + $0x18] sm:$0xff] (!%p1966_p3)   ;;  %1769 = vperm.xlu0 (!%p1966_p3), %2461, %v2968_v1   ;;  %v2481_v2 = vld [vmem:[%s2954_s7 + $0x20] sm:$0xff] (!%p1966_p3)   ;;  %v2483_v1 = vld [vmem:[%s2954_s7 + $0x68] sm:$0xff] (!%p1966_p3)  }
 0x1a3   : > { %2092 = vmatpush3.bf16.msra.mxu0 (!%p1966_p3), %v2469_v55  ;;  %v2478_v0 = vld [vmem:[%s2954_s7 + $0x98] sm:$0xff] (!%p1966_p3)   ;;  %v2482_v12 = vld [vmem:[%s2954_s7 + $0xa0] sm:$0xff] (!%p1966_p3)   ;;  %v2488_v15 = vld [vmem:[%s2954_s7 + $0xf0] sm:$0xff] (!%p1966_p3)  }
 0x1a4   : > { %2138 = vmatpush3.bf16.msra.mxu1 %v2470_v56  ;;  %2093 = vmatprep.subr.bf16.mxu0 %v2471_v57  ;;  %v2490_v16 = vld [vmem:[%s2954_s7 + $0xb0] sm:$0xff]   ;;  %v2491_v17 = vld [vmem:[%s2954_s7 + $0x78] sm:$0xff]   ;;  %v701_v20 = vld [vmem:[#allocation2 + $0x1] sm:$0xff] }
 0x1a5   : > { %2139 = vmatprep.subr.bf16.mxu1 %v2472_v58  ;;  %1779 = vperm.xlu1 %2462, %v2978_v3   ;;  %v2485_v3 = vld [vmem:[%s2954_s7 + $0x28] sm:$0xff]   ;;  %v2493_v18 = vld [vmem:[%s2954_s7 + $0x38] sm:$0xff]   ;;  %v711_v28 = vld [vmem:[#allocation2 + $0xa] sm:$0xff] }
 0x1a6   : > { %1784 = vperm.xlu0 %2461, %v2983_v4   ;;  %v2487_v4 = vld [vmem:[%s2954_s7 + $0x70] sm:$0xff]   ;;  %v2494_v19 = vld [vmem:[%s2954_s7 + $0xb8] sm:$0xff]   ;;  %v692_v23 = vld [vmem:[#allocation2] sm:$0xff] }
 0x1a7   : > { %2094 = vmatpush3.bf16.msra.mxu0 %v2473_v60  ;;  %v719_v21 = vld [vmem:[#allocation2 + $0x6] sm:$0xff]  ;;  %v2495_v30 = vld [vmem:[%s2954_s7 + $0x140] sm:$0xff]   ;;  %v703_v34 = vld [vmem:[#allocation2 + $0x11] sm:$0xff] }
 0x1a8   : > { %2140 = vmatpush3.bf16.msra.mxu1 %v2474_v61  ;;  %2095 = vmatprep.subr.bf16.mxu0 %v2475_v62  ;;  %v3095_v24 = vld [vmem:[#allocation2 + $0x8] sm:$0xff]  ;;  %v2496_v31 = vld [vmem:[%s2954_s7 + $0x100] sm:$0xff]   ;;  %v3109_v44 = vld [vmem:[#allocation2 + $0x10] sm:$0xff] }
 0x1a9   : > { %2141 = vmatprep.subr.bf16.mxu1 %v2476_v63  ;;  %1789 = vperm.xlu1 %2462, %v2988_v5   ;;  %v2489_v5 = vld [vmem:[%s2954_s7 + $0x30] sm:$0xff]   ;;  %v765_v26 = vpack.c.bf16 %v3095_v24, %v692_v23  ;;  %v710_v27 = vld [vmem:[#allocation2 + $0x2] sm:$0xff]  ;;  %v704_v35 = vld [vmem:[#allocation2 + $0x19] sm:$0xff] }
 0x1aa   : > { %1794 = vperm.xlu0 %2461, %v2993_v6   ;;  %v2492_v6 = vld [vmem:[%s2954_s7 + $0xf8] sm:$0xff]   ;;  %v767_v29 = vpack.c.bf16 %v711_v28, %v710_v27  ;;  %v2497_v32 = vld [vmem:[%s2954_s7 + $0x148] sm:$0xff]   ;;  %v775_v38 = vpack.c.bf16 %v704_v35, %v703_v34  ;;  %v713_v49 = vld [vmem:[#allocation2 + $0x1a] sm:$0xff] }
 0x1ab   : > { %2096 = vmatpush3.bf16.msra.mxu0 %v2477_v9  ;;  %v2498_v33 = vld [vmem:[%s2954_s7 + $0x108] sm:$0xff]   ;;  %v3103_v36 = vld [vmem:[#allocation2 + $0x16] sm:$0xff]  ;;  %v2501_v39 = vld [vmem:[%s2954_s7 + $0x150] sm:$0xff]  }
 0x1ac   : > { %2142 = vmatpush3.bf16.msra.mxu1 %v2478_v0  ;;  %2097 = vmatprep.subr.bf16.mxu0 %v2479_v10  ;;  %v3105_v37 = vld [vmem:[#allocation2 + $0x1e] sm:$0xff]  ;;  %v712_v47 = vld [vmem:[#allocation2 + $0x12] sm:$0xff]  ;;  %v2502_v41 = vld [vmem:[%s2954_s7 + $0x110] sm:$0xff]  }
 0x1ad   : > { %2143 = vmatprep.subr.bf16.mxu1 %v2480_v11  ;;  %1799 = vperm.xlu1 %2462, %v2998_v7   ;;  %v702_v7 = vld [vmem:[#allocation2 + $0x9] sm:$0xff]  ;;  %v777_v40 = vpack.c.bf16 %v3105_v37, %v3103_v36  ;;  %v3111_v45 = vld [vmem:[#allocation2 + $0x18] sm:$0xff]  ;;  %v776_v50 = vpack.c.bf16 %v713_v49, %v712_v47  ;;  %v705_v43 = vld [vmem:[#allocation2 + $0x21] sm:$0xff] }
 0x1ae   : > { %1804 = vperm.xlu0 %2461, %v3003_v8   ;;  %v766_v22 = vpack.c.bf16 %v702_v7, %v701_v20  ;;  %v3093_v8 = vld [vmem:[#allocation2 + $0xe] sm:$0xff]  ;;  %v774_v48 = vpack.c.bf16 %v3111_v45, %v3109_v44  ;;  %v2499_v51 = vld [vmem:[%s2954_s7 + $0x1c0] sm:$0xff]   ;;  %v2503_v42 = vld [vmem:[%s2954_s7 + $0x1c8] sm:$0xff]  }
 0x1af   : > { %2098 = vmatpush3.bf16.msra.mxu0 %v2481_v2  ;;  %v768_v25 = vpack.c.bf16 %v3093_v8, %v719_v21  ;;  %v2500_v52 = vld [vmem:[%s2954_s7 + $0x180] sm:$0xff]   ;;  %v2504_v46 = vld [vmem:[%s2954_s7 + $0x188] sm:$0xff]   ;;  %v3123_v56 = vld [vmem:[#allocation2 + $0x2e] sm:$0xff] }
 0x1b0   : > { %2144 = vmatpush3.bf16.msra.mxu1 %v2482_v12  ;;  %2099 = vmatprep.subr.bf16.mxu0 %v2483_v1  ;;  %v706_v53 = vld [vmem:[#allocation2 + $0x29] sm:$0xff]  ;;  %v2505_v58 = vld [vmem:[%s2954_s7 + $0x158] sm:$0xff]   ;;  %v3128_v59 = vld [vmem:[#allocation2 + $0x20] sm:$0xff] }
 0x1b1   : > { %2145 = vmatprep.subr.bf16.mxu1 %v2484_v13  ;;  %1425 = vmatprep.mubr.bf16.mxu0 %v766_v22  ;;  %v784_v54 = vpack.c.bf16 %v706_v53, %v705_v43  ;;  %v3121_v55 = vld [vmem:[#allocation2 + $0x26] sm:$0xff]  ;;  %v2506_v0 = vld [vmem:[%s2954_s7 + $0x118] sm:$0xff]   ;;  %v2509_v2 = vld [vmem:[%s2954_s7 + $0x160] sm:$0xff]  }
 0x1b2   : > { %1497 = vmatprep.mubr.bf16.mxu1 %v768_v25  ;;  %v786_v57 = vpack.c.bf16 %v3123_v56, %v3121_v55  ;;  %v3130_v60 = vld [vmem:[#allocation2 + $0x28] sm:$0xff]  ;;  %v2510_v12 = vld [vmem:[%s2954_s7 + $0x1d8] sm:$0xff]   ;;  %v2511_v1 = vld [vmem:[%s2954_s7 + $0x120] sm:$0xff]  }
 0x1b3   : > { %2100 = vmatpush3.bf16.msra.mxu0 %v2485_v3  ;;  %v714_v61 = vld [vmem:[#allocation2 + $0x22] sm:$0xff]  ;;  %v715_v62 = vld [vmem:[#allocation2 + $0x2a] sm:$0xff]  ;;  %v783_v63 = vpack.c.bf16 %v3130_v60, %v3128_v59  ;;  %v2512_v13 = vld [vmem:[%s2954_s7 + $0x198] sm:$0xff]  }
 0x1b4   : > { %2146 = vmatpush3.bf16.msra.mxu1 %v2486_v14  ;;  %2101 = vmatprep.subr.bf16.mxu0 %v2487_v4  ;;  %v785_v9 = vpack.c.bf16 %v715_v62, %v714_v61  ;;  %v2507_v10 = vld [vmem:[%s2954_s7 + $0x1d0] sm:$0xff]   ;;  %v708_v14 = vld [vmem:[#allocation2 + $0x39] sm:$0xff]  ;;  %v2514_v22 = vld [vmem:[%s2954_s7 + $0x168] sm:$0xff]   ;;  %v779_v62 = vpack.c.bf16 %v3128_v59, %v3111_v45 }
 0x1b5   : > { %2147 = vmatprep.subr.bf16.mxu1 %v2488_v15  ;;  %v2508_v11 = vld [vmem:[%s2954_s7 + $0x190] sm:$0xff]   ;;  %v3141_v4 = vld [vmem:[#allocation2 + $0x36] sm:$0xff]  ;;  %v2516_v25 = vld [vmem:[%s2954_s7 + $0x128] sm:$0xff]  }
 0x1b6   : > { %v707_v3 = vld [vmem:[#allocation2 + $0x31] sm:$0xff]  ;;  %v717_v20 = vld [vmem:[#allocation2 + $0x3a] sm:$0xff]  ;;  %v2518_v27 = vld [vmem:[%s2954_s7 + $0x1a8] sm:$0xff]  }
 0x1b7   : > { %2102 = vmatpush3.bf16.msra.mxu0 %v2489_v5  ;;  %v793_v15 = vpack.c.bf16 %v708_v14, %v707_v3  ;;  %v3143_v5 = vld [vmem:[#allocation2 + $0x3e] sm:$0xff]  ;;  %v2519_v28 = vld [vmem:[%s2954_s7 + $0x170] sm:$0xff]   ;;  %v752_v59 = vld [vmem:[#allocation2 + $0x35] sm:$0xff] }
 0x1b8   : > { %2148 = vmatpush3.bf16.msra.mxu1 %v2490_v16  ;;  %2103 = vmatprep.subr.bf16.mxu0 %v2491_v17  ;;  %v3145_v16 = vld [vmem:[#allocation2 + $0x30] sm:$0xff]  ;;  %v3147_v17 = vld [vmem:[#allocation2 + $0x38] sm:$0xff]  ;;  %v3165_v34 = vld [vmem:[#allocation2 + $0x40] sm:$0xff] }
 0x1b9   : > { %2149 = vmatprep.subr.bf16.mxu1 %v2492_v6  ;;  %v795_v6 = vpack.c.bf16 %v3143_v5, %v3141_v4  ;;  %v2513_v21 = vld [vmem:[%s2954_s7 + $0x1e0] sm:$0xff]   ;;  %v718_v35 = vld [vmem:[#allocation2 + $0x42] sm:$0xff]  ;;  %v2522_v49 = vld [vmem:[%s2954_s7 + $0x1b0] sm:$0xff]  }
 0x1ba   : > { %v2515_v23 = vld [vmem:[%s2954_s7 + $0x1a0] sm:$0xff]   ;;  %v803_v47 = vpack.c.bf16 %v718_v35, %v718_v35  ;;  %v729_v43 = vld [vmem:[#allocation2 + $0xf] sm:$0xff] }
 0x1bb   : > { %2104 = vmatpush3.bf16.msra.mxu0 %v2493_v18  ;;  %v792_v18 = vpack.c.bf16 %v3147_v17, %v3145_v16  ;;  %v738_v53 = vld [vmem:[#allocation2 + $0xc] sm:$0xff]  ;;  %v2527_v61 = vld [vmem:[%s2954_s7 + $0x200] sm:$0xff]  }
 0x1bc   : > { %2150 = vmatpush3.bf16.msra.mxu1 %v2494_v19  ;;  %2181 = vmatprep.subr.bf16.mxu0 %v2495_v30  ;;  %v716_v19 = vld [vmem:[#allocation2 + $0x32] sm:$0xff]  ;;  %v2529_v14 = vld [vmem:[%s2954_s7 + $0x210] sm:$0xff]  }
 0x1bd   : > { %2227 = vmatprep.subr.bf16.mxu1 %v2499_v51  ;;  %v794_v7 = vpack.c.bf16 %v717_v20, %v716_v19  ;;  %v2524_v51 = vld [vmem:[%s2954_s7 + $0x138] sm:$0xff]   ;;  %v737_v35 = vld [vmem:[#allocation2 + $0x48] sm:$0xff] }
 0x1be   : > { %1426 = vmatmul.mubr.bf16.vlgmr.msra.gmra.mrb[0].mxu0 %v765_v26  ;;  %v2517_v26 = vld [vmem:[%s2954_s7 + $0x1e8] sm:$0xff]   ;;  %v751_v45 = vld [vmem:[#allocation2 + $0x2d] sm:$0xff] }
 0x1bf   : > { %1498 = vmatmul.mubr.bf16.vlgmr.msra.gmra.mrb[0].mxu1 %v767_v29  ;;  %2182 = vmatpush3.bf16.msra.mxu0 %v2496_v31  ;;  %v709_v29 = vld [vmem:[#allocation2 + $0x41] sm:$0xff]  ;;  %v733_v19 = vld [vmem:[#allocation2 + $0x2f] sm:$0xff] }
 0x1c0   : > { %2183 = vmatprep.subr.bf16.mxu0 %v2497_v32  ;;  %1433 = vmatprep.mubr.bf16.mxu0 %v775_v38  ;;  %v802_v30 = vpack.c.bf16 %v709_v29, %v709_v29  ;;  %v3160_v31 = vld [vmem:[#allocation2 + $0x46] sm:$0xff]  ;;  %v770_v38 = vpack.c.bf16 %v3109_v44, %v3095_v24  ;;  %v2525_v24 = vld [vmem:[%s2954_s7 + $0x1f8] sm:$0xff]  }
 0x1c1   : > { %1505 = vmatprep.mubr.bf16.mxu1 %v777_v40  ;;  %2228 = vmatpush3.bf16.msra.mxu1 %v2500_v52  ;;  %v804_v32 = vpack.c.bf16 %v3160_v31, %v3160_v31  ;;  %v801_v40 = vpack.c.bf16 %v3165_v34, %v3165_v34  ;;  %v2526_v44 = vld [vmem:[%s2954_s7 + $0x1b8] sm:$0xff]   ;;  %v735_v29 = vld [vmem:[#allocation2 + $0x3f] sm:$0xff] }
 0x1c2   : > { %2229 = vmatprep.subr.bf16.mxu1 %v2503_v42  ;;  %v747_v52 = vld [vmem:[#allocation2 + $0xd] sm:$0xff]  ;;  %v2704_v42 = vmov 0.0  }
 0x1c3   : > { %2184 = vmatpush3.bf16.msra.mxu0 %v2498_v33  ;;  %v2520_v33 = vld [vmem:[%s2954_s7 + $0x130] sm:$0xff]   ;;  %v2530_v20 = vld [vmem:[%s2954_s7 + $0x218] sm:$0xff]  }
 0x1c4   : > { %2185 = vmatprep.subr.bf16.mxu0 %v2501_v39  ;;  %v748_v39 = vld [vmem:[#allocation2 + $0x15] sm:$0xff] }
 0x1c5   : > { %2230 = vmatpush3.bf16.msra.mxu1 %v2504_v46  ;;  %v772_v46 = vpack.c.bf16 %v748_v39, %v747_v52  ;;  %v773_v52 = vpack.c.bf16 %v3103_v36, %v3093_v8  ;;  %v800_v39 = vpack.c.bf16 %v3160_v31, %v3143_v5  ;;  %v791_v8 = vpack.c.bf16 %v3141_v4, %v3123_v56  ;;  %v3221_v5 = vld [vmem:[%s3005_s8] ss:$0 sm:$0xff] }
 0x1c6   : > { %1434 = vmatmul.mubr.bf16.gmra.mrb[4].mxu0 %v774_v48  ;;  %2231 = vmatprep.subr.bf16.mxu1 %v2507_v10  ;;  %v2521_v48 = vld [vmem:[%s2954_s7 + $0x1f0] sm:$0xff]  }
 0x1c7   : > { %1506 = vmatmul.mubr.bf16.gmra.mrb[4].mxu1 %v776_v50  ;;  %2186 = vmatpush3.bf16.msra.mxu0 %v2502_v41  ;;  %v2523_v50 = vld [vmem:[%s2954_s7 + $0x178] sm:$0xff]   ;;  %v728_v41 = vld [vmem:[#allocation2 + $0x7] sm:$0xff] }
 0x1c8   : > { %1441 = vmatprep.mubr.bf16.mxu0 %v784_v54  ;;  %1513 = vmatprep.mubr.bf16.mxu1 %v786_v57  ;;  %v739_v54 = vld [vmem:[#allocation2 + $0x14] sm:$0xff]  ;;  %v769_v57 = vpack.c.bf16 %v729_v43, %v728_v41 }
 0x1c9   : > { %2187 = vmatprep.subr.bf16.mxu0 %v2505_v58  ;;  %2232 = vmatpush3.bf16.msra.mxu1 %v2508_v11  ;;  %v771_v58 = vpack.c.bf16 %v739_v54, %v738_v53  ;;  %v730_v11 = vld [vmem:[#allocation2 + $0x17] sm:$0xff]  ;;  %v764_v41 = vld [vmem:[#allocation2 + $0x4e] sm:$0xff] }
 0x1ca   : > { %2233 = vmatprep.subr.bf16.mxu1 %v2510_v12  ;;  %v740_v12 = vld [vmem:[#allocation2 + $0x1c] sm:$0xff]  ;;  %v809_v43 = vpack.c.bf16 %v764_v41, %v764_v41 }
 0x1cb   : > { %2188 = vmatpush3.bf16.msra.mxu0 %v2506_v0  ;;  %v750_v0 = vld [vmem:[#allocation2 + $0x25] sm:$0xff] }
 0x1cc   : > { %2189 = vmatprep.subr.bf16.mxu0 %v2509_v2  ;;  %v731_v2 = vld [vmem:[#allocation2 + $0x1f] sm:$0xff] }
 0x1cd   : > { %2234 = vmatpush3.bf16.msra.mxu1 %v2512_v13  ;;  %v778_v13 = vpack.c.bf16 %v731_v2, %v730_v11 }
 0x1ce   : > { %1442 = vmatmul.mubr.bf16.gmra.mrb[8].mxu0 %v783_v63  ;;  %2235 = vmatprep.subr.bf16.mxu1 %v2513_v21  ;;  %v2528_v63 = vld [vmem:[%s2954_s7 + $0x208] sm:$0xff]   ;;  %v743_v21 = vld [vmem:[#allocation2 + $0x34] sm:$0xff] }
 0x1cf   : > { %1514 = vmatmul.mubr.bf16.gmra.mrb[8].mxu1 %v785_v9  ;;  %2190 = vmatpush3.bf16.msra.mxu0 %v2511_v1  ;;  %v749_v9 = vld [vmem:[#allocation2 + $0x1d] sm:$0xff] }
 0x1d0   : > { %1449 = vmatprep.mubr.bf16.mxu0 %v793_v15  ;;  %1521 = vmatprep.mubr.bf16.mxu1 %v795_v6  ;;  %v781_v10 = vpack.c.bf16 %v750_v0, %v749_v9  ;;  %v741_v1 = vld [vmem:[#allocation2 + $0x24] sm:$0xff]  ;;  %v788_v15 = vpack.c.bf16 %v3145_v16, %v3130_v60  ;;  %v790_v6 = vpack.c.bf16 %v752_v59, %v751_v45 }
 0x1d1   : > { %2191 = vmatprep.subr.bf16.mxu0 %v2514_v22  ;;  %2236 = vmatpush3.bf16.msra.mxu1 %v2515_v23  ;;  %v780_v3 = vpack.c.bf16 %v741_v1, %v740_v12  ;;  %v753_v22 = vld [vmem:[#allocation2 + $0x3d] sm:$0xff]  ;;  %v754_v60 = vld [vmem:[#allocation2 + $0x45] sm:$0xff] }
 0x1d2   : > { %2237 = vmatprep.subr.bf16.mxu1 %v2517_v26  ;;  %v797_v26 = vpack.c.bf16 %v3165_v34, %v3147_v17  ;;  %v755_v17 = vld [vmem:[#allocation2 + $0x4d] sm:$0xff] }
 0x1d3   : > { %2192 = vmatpush3.bf16.msra.mxu0 %v2516_v25  ;;  %v2531_v25 = vld [vmem:[%s2954_s7 + $0x220] sm:$0xff]  }
 0x1d4   : > { %2193 = vmatprep.subr.bf16.mxu0 %v2519_v28  ;;  %v734_v28 = vld [vmem:[#allocation2 + $0x37] sm:$0xff] }
 0x1d5   : > { %2238 = vmatpush3.bf16.msra.mxu1 %v2518_v27  ;;  %v799_v27 = vpack.c.bf16 %v754_v60, %v753_v22  ;;  %v796_v34 = vpack.c.bf16 %v735_v29, %v734_v28 }
 0x1d6   : > { %1450 = vmatmul.mubr.bf16.gmra.mrb[12].mxu0 %v792_v18  ;;  %2239 = vmatprep.subr.bf16.mxu1 %v2521_v48  ;;  %v732_v18 = vld [vmem:[#allocation2 + $0x27] sm:$0xff] }
 0x1d7   : > { %1522 = vmatmul.mubr.bf16.gmra.mrb[12].mxu1 %v794_v7  ;;  %1457 = vmatprep.mubr.bf16.mxu0 %v802_v30  ;;  %v742_v7 = vld [vmem:[#allocation2 + $0x2c] sm:$0xff]  ;;  %v787_v16 = vpack.c.bf16 %v733_v19, %v732_v18  ;;  %v2532_v30 = vld [vmem:[%s2954_s7 + $0x228] sm:$0xff]  }
 0x1d8   : > { %1529 = vmatprep.mubr.bf16.mxu1 %v804_v32  ;;  %2194 = vmatpush3.bf16.msra.mxu0 %v2520_v33  ;;  %v789_v23 = vpack.c.bf16 %v743_v21, %v742_v7  ;;  %v744_v32 = vld [vmem:[#allocation2 + $0x3c] sm:$0xff]  ;;  %v745_v33 = vld [vmem:[#allocation2 + $0x44] sm:$0xff] }
 0x1d9   : > { %2240 = vmatpush3.bf16.msra.mxu1 %v2522_v49  ;;  %2195 = vmatprep.subr.bf16.mxu0 %v2523_v50  ;;  %v2533_v48 = vld [vmem:[%s2954_s7 + $0x230] sm:$0xff]  }
 0x1da   : > { %2241 = vmatprep.subr.bf16.mxu1 %v2525_v24  ;;  %v736_v49 = vld [vmem:[#allocation2 + $0x47] sm:$0xff] }
 0x1db   : > { %v746_v50 = vld [vmem:[#allocation2 + $0x4c] sm:$0xff]  ;;  %v805_v24 = vpack.c.bf16 %v736_v49, %v736_v49 }
 0x1dc   : > { %2196 = vmatpush3.bf16.msra.mxu0 %v2524_v51  ;;  %v2534_v51 = vld [vmem:[%s2954_s7 + $0x238] sm:$0xff]  }
 0x1dd   : > { %2286 = vmatprep.subr.bf16.mxu0 %v2704_v42  ;;  %2242 = vmatpush3.bf16.msra.mxu1 %v2526_v44  ;;  %v807_v44 = vpack.c.bf16 %v746_v50, %v746_v50 }
 0x1de   : > { %1458 = vmatmul.mubr.bf16.gmra.mrb[16].mxu0 %v801_v40  ;;  %2338 = vmatprep.subr.bf16.mxu1 %v2704_v42  ;;  %v806_v40 = vpack.c.bf16 %v737_v35, %v737_v35 }
 0x1df   : > { %1530 = vmatmul.mubr.bf16.gmra.mrb[16].mxu1 %v803_v47  ;;  %1569 = vmatprep.mubr.bf16.mxu0 %v770_v38  ;;  %v798_v38 = vpack.c.bf16 %v745_v33, %v744_v32  ;;  %v808_v47 = vpack.c.bf16 %v755_v17, %v755_v17 }
 0x1e0   : > { %1641 = vmatprep.mubr.bf16.mxu1 %v772_v46  ;;  %v782_v46 = vpack.c.bf16 %v3121_v55, %v3105_v37 }
 0x1e6   : > { %1570 = vmatmul.mubr.bf16.vlgmr.msra.gmra.mrb[20].mxu0 %v769_v57 }
 0x1e7   : > { %1642 = vmatmul.mubr.bf16.vlgmr.msra.gmra.mrb[20].mxu1 %v771_v58  ;;  %2287 = vmatpush3.bf16.msra.mxu0 %v2527_v61 }
 0x1e8   : > { %2288 = vmatprep.subr.bf16.mxu0 %v2704_v42  ;;  %1577 = vmatprep.mubr.bf16.mxu0 %v779_v62 }
 0x1e9   : > { %1649 = vmatprep.mubr.bf16.mxu1 %v781_v10  ;;  %2346 = vmatpush3.bf16.msra.mxu1 %v2527_v61 }
 0x1ea   : > { %2339 = vmatprep.subr.bf16.mxu1 %v2704_v42 }
 0x1eb   : > { %2289 = vmatpush3.bf16.msra.mxu0 %v2528_v63 }
 0x1ec   : > { %2290 = vmatprep.subr.bf16.mxu0 %v2704_v42 }
 0x1ed   : > { %2347 = vmatpush3.bf16.msra.mxu1 %v2528_v63 }
 0x1ee   : > { %1578 = vmatmul.mubr.bf16.gmra.mrb[24].mxu0 %v778_v13  ;;  %2340 = vmatprep.subr.bf16.mxu1 %v2704_v42 }
 0x1ef   : > { %1650 = vmatmul.mubr.bf16.gmra.mrb[24].mxu1 %v780_v3  ;;  %2291 = vmatpush3.bf16.msra.mxu0 %v2529_v14 }
 0x1f0   : > { %1585 = vmatprep.mubr.bf16.mxu0 %v788_v15  ;;  %1657 = vmatprep.mubr.bf16.mxu1 %v790_v6 }
 0x1f1   : > { %2292 = vmatprep.subr.bf16.mxu0 %v2704_v42  ;;  %2348 = vmatpush3.bf16.msra.mxu1 %v2529_v14 }
 0x1f2   : > { %2341 = vmatprep.subr.bf16.mxu1 %v2704_v42 }
 0x1f3   : > { %2293 = vmatpush3.bf16.msra.mxu0 %v2530_v20 }
 0x1f4   : > { %2294 = vmatprep.subr.bf16.mxu0 %v2704_v42 }
 0x1f5   : > { %2349 = vmatpush3.bf16.msra.mxu1 %v2530_v20 }
 0x1f6   : > { %1586 = vmatmul.mubr.bf16.gmra.mrb[28].mxu0 %v787_v16  ;;  %2342 = vmatprep.subr.bf16.mxu1 %v2704_v42 }
 0x1f7   : > { %1658 = vmatmul.mubr.bf16.gmra.mrb[28].mxu1 %v789_v23  ;;  %2295 = vmatpush3.bf16.msra.mxu0 %v2531_v25 }
 0x1f8   : > { %1593 = vmatprep.mubr.bf16.mxu0 %v797_v26  ;;  %1665 = vmatprep.mubr.bf16.mxu1 %v799_v27 }
 0x1f9   : > { %2350 = vmatpush3.bf16.msra.mxu1 %v2531_v25  ;;  %2296 = vmatprep.subr.bf16.mxu0 %v2704_v42 }
 0x1fa   : > { %2343 = vmatprep.subr.bf16.mxu1 %v2704_v42 }
 0x1fb   : > { %2297 = vmatpush3.bf16.msra.mxu0 %v2532_v30 }
 0x1fc   : > { %2298 = vmatprep.subr.bf16.mxu0 %v2704_v42 }
 0x1fd   : > { %2351 = vmatpush3.bf16.msra.mxu1 %v2532_v30 }
 0x1fe   : > { %1594 = vmatmul.mubr.bf16.gmra.mrb[32].mxu0 %v796_v34  ;;  %2344 = vmatprep.subr.bf16.mxu1 %v2704_v42 }
 0x1ff   : > { %1666 = vmatmul.mubr.bf16.gmra.mrb[32].mxu1 %v798_v38  ;;  %1601 = vmatprep.mubr.bf16.mxu0 %v806_v40 }
 0x200   : > { %1673 = vmatprep.mubr.bf16.mxu1 %v808_v47  ;;  %2299 = vmatpush3.bf16.msra.mxu0 %v2533_v48 }
 0x201   : > { %2352 = vmatpush3.bf16.msra.mxu1 %v2533_v48  ;;  %2300 = vmatprep.subr.bf16.mxu0 %v2704_v42 }
 0x202   : > { %2345 = vmatprep.subr.bf16.mxu1 %v2704_v42 }
 0x204   : > { %2301 = vmatpush3.bf16.msra.mxu0 %v2534_v51 }
 0x205   : > { %2353 = vmatpush3.bf16.msra.mxu1 %v2534_v51 }
 0x206   : > { %1602 = vmatmul.mubr.bf16.gmra.mrb[36].mxu0 %v805_v24 }
 0x207   : > { %1674 = vmatmul.mubr.bf16.gmra.mrb[36].mxu1 %v807_v44  ;;  %2302 = vmatprep.mubr.msk.bf16.mxu0 %vm2705_vm0, %v2704_v42 }
 0x208   : > { %2314 = vmatprep.mubr.msk.bf16.mxu1 %vm2705_vm0, %v2704_v42 }
 0x20e   : > { %2303 = vmatmul.mubr.bf16.vlgmr.msra.gmra.mrb[40].mxu0 %v773_v52 }
 0x20f   : > { %2315 = vmatmul.mubr.bf16.vlgmr.msra.gmra.mrb[40].mxu1 %v800_v39  ;;  %2306 = vmatprep.mubr.msk.bf16.mxu0 %vm2705_vm0, %v2704_v42 }
 0x210   : > { %2318 = vmatprep.mubr.msk.bf16.mxu1 %vm2705_vm0, %v2704_v42 }
 0x216   : > { %2307 = vmatmul.mubr.bf16.gmra.mrb[44].mxu0 %v782_v46 }
 0x217   : > { %2319 = vmatmul.mubr.bf16.gmra.mrb[44].mxu1 %v809_v43  ;;  %2310 = vmatprep.mubr.msk.bf16.mxu0 %vm2705_vm0, %v2704_v42 }
 0x21e   : > { %2311 = vmatmul.mubr.bf16.gmra.mrb[48].mxu0 %v791_v8 }
 0x291   : > { %v2105_v36 = vpop.f32.mrb[0].mxu0 }
 0x292   : > { %v2106_v31 = vpop.f32.mrb[1].mxu0  ;;  %v2151_v53 = vpop.f32.mrb[0].mxu1 }
 0x293   : > { %v2107_v54 = vadd.f32 %v2106_v31, %v2105_v36  ;;  %v2108_v57 = vpop.f32.mrb[2].mxu0  ;;  %v2152_v58 = vpop.f32.mrb[1].mxu1 }
 0x294   : > { %v2109_v61 = vpop.f32.mrb[3].mxu0  ;;  %v2153_v62 = vadd.f32 %v2152_v58, %v2151_v53  ;;  %v2154_v37 = vpop.f32.mrb[2].mxu1 }
 0x295   : > { %v1428_v55 = vadd.f32 %v2107_v54, %v3221_v5  ;;  %v2110_v63 = vadd.f32 %v2109_v61, %v2108_v57  ;;  %v2155_v9 = vpop.f32.mrb[3].mxu1 }
 0x296   : > { %v2156_v42 = vadd.f32 %v2155_v9, %v2154_v37 }
 0x297   : > { %v1431_v0 = vadd.f32 %v2110_v63, %v3221_v5  ;;  %v3225_v56 = vadd.f32 %v2153_v62, %v1428_v55 }
 0x299   : > { %v3227_v4 = vadd.f32 %v2156_v42, %v1431_v0  ;;  %v2111_v10 = vpop.f32.mrb[4].mxu0 }
 0x29a   : > { %v2112_v11 = vpop.f32.mrb[5].mxu0  ;;  %v2157_v2 = vpop.f32.mrb[4].mxu1 }
 0x29b   : > { %v2113_v12 = vadd.f32 %v2112_v11, %v2111_v10  ;;  %v2114_v1 = vpop.f32.mrb[6].mxu0  ;;  %v2158_v45 = vpop.f32.mrb[5].mxu1 }
 0x29c   : > { %v2115_v59 = vpop.f32.mrb[7].mxu0  ;;  %v2159_v13 = vadd.f32 %v2158_v45, %v2157_v2  ;;  %v2160_v3 = vpop.f32.mrb[6].mxu1 }
 0x29d   : > { %v1436_v14 = vadd.f32 %v2113_v12, %v3221_v5  ;;  %v2116_v15 = vadd.f32 %v2115_v59, %v2114_v1  ;;  %v2161_v6 = vpop.f32.mrb[7].mxu1 }
 0x29e   : > { %v2162_v18 = vadd.f32 %v2161_v6, %v2160_v3 }
 0x29f   : > { %v1439_v19 = vadd.f32 %v2116_v15, %v3221_v5  ;;  %v3231_v20 = vadd.f32 %v2159_v13, %v1436_v14 }
 0x2a1   : > { %v3233_v7 = vadd.f32 %v2162_v18, %v1439_v19  ;;  %v2117_v21 = vpop.f32.mrb[8].mxu0 }
 0x2a2   : > { %v2163_v22 = vpop.f32.mrb[8].mxu1  ;;  %v2118_v60 = vpop.f32.mrb[9].mxu0 }
 0x2a3   : > { %v2164_v16 = vpop.f32.mrb[9].mxu1  ;;  %v2119_v23 = vadd.f32 %v2118_v60, %v2117_v21  ;;  %v2120_v25 = vpop.f32.mrb[10].mxu0 }
 0x2a4   : > { %v2165_v26 = vadd.f32 %v2164_v16, %v2163_v22  ;;  %v2166_v27 = vpop.f32.mrb[10].mxu1  ;;  %v2121_v28 = vpop.f32.mrb[11].mxu0 }
 0x2a5   : > { %v2167_v29 = vpop.f32.mrb[11].mxu1  ;;  %v1444_v30 = vadd.f32 %v2119_v23, %v3221_v5  ;;  %v2122_v32 = vadd.f32 %v2121_v28, %v2120_v25 }
 0x2a6   : > { %v2168_v33 = vadd.f32 %v2167_v29, %v2166_v27 }
 0x2a7   : > { %v1447_v35 = vadd.f32 %v2122_v32, %v3221_v5  ;;  %v3237_v17 = vadd.f32 %v2165_v26, %v1444_v30 }
 0x2a9   : > { %v3239_v34 = vadd.f32 %v2168_v33, %v1447_v35  ;;  %v2123_v38 = vpop.f32.mrb[12].mxu0 }
 0x2aa   : > { %v2124_v40 = vpop.f32.mrb[13].mxu0  ;;  %v2169_v47 = vpop.f32.mrb[12].mxu1 }
 0x2ab   : > { %v2125_v48 = vadd.f32 %v2124_v40, %v2123_v38  ;;  %v2126_v49 = vpop.f32.mrb[14].mxu0  ;;  %v2170_v50 = vpop.f32.mrb[13].mxu1 }
 0x2ac   : > { %v2127_v51 = vpop.f32.mrb[15].mxu0  ;;  %v2171_v24 = vadd.f32 %v2170_v50, %v2169_v47  ;;  %v2172_v44 = vpop.f32.mrb[14].mxu1 }
 0x2ad   : > { %v1452_v52 = vadd.f32 %v2125_v48, %v3221_v5  ;;  %v2128_v39 = vadd.f32 %v2127_v51, %v2126_v49  ;;  %v2173_v41 = vpop.f32.mrb[15].mxu1 }
 0x2ae   : > { %v2174_v46 = vadd.f32 %v2173_v41, %v2172_v44 }
 0x2af   : > { %v1455_v43 = vadd.f32 %v2128_v39, %v3221_v5  ;;  %v3243_v8 = vadd.f32 %v2171_v24, %v1452_v52 }
 0x2b1   : > { %v3245_v36 = vadd.f32 %v2174_v46, %v1455_v43  ;;  %v2129_v31 = vpop.f32.mrb[16].mxu0  ;;  %v1765_v43 = vpop.permute.xlu0 %1764 }
 0x2b2   : > { %v2175_v53 = vpop.f32.mrb[16].mxu1  ;;  %v2130_v54 = vpop.f32.mrb[17].mxu0 }
 0x2b3   : > { %v2176_v57 = vpop.f32.mrb[17].mxu1  ;;  %v2131_v58 = vadd.f32 %v2130_v54, %v2129_v31  ;;  %v2132_v61 = vpop.f32.mrb[18].mxu0 }
 0x2b4   : > { %v2177_v62 = vadd.f32 %v2176_v57, %v2175_v53  ;;  %v2178_v37 = vpop.f32.mrb[18].mxu1  ;;  %v2133_v55 = vpop.f32.mrb[19].mxu0 }
 0x2b5   : > { %v2179_v63 = vpop.f32.mrb[19].mxu1  ;;  %v1460_v9 = vadd.f32 %v2131_v58, %v3221_v5  ;;  %v3266_v53 = vpop.permute.xlu1 %1774 }
 0x2b7   : > { %v3248_v42 = vadd.f32 %v2177_v62, %v1460_v9 }
 0x2b9   : > { %v2197_v0 = vpop.f32.mrb[20].mxu0 }
 0x2ba   : > { %v2198_v10 = vpop.f32.mrb[21].mxu0  ;;  %v2243_v11 = vpop.f32.mrb[20].mxu1 }
 0x2bb   : > { %v2199_v2 = vadd.f32 %v2198_v10, %v2197_v0  ;;  %v2200_v12 = vpop.f32.mrb[22].mxu0  ;;  %v2244_v1 = vpop.f32.mrb[21].mxu1 }
 0x2bc   : > { %v2201_v45 = vpop.f32.mrb[23].mxu0  ;;  %v2245_v59 = vadd.f32 %v2244_v1, %v2243_v11  ;;  %v2246_v13 = vpop.f32.mrb[22].mxu1 }
 0x2bd   : > { %v1572_v3 = vadd.f32 %v2199_v2, %v3225_v56  ;;  %v2202_v14 = vadd.f32 %v2201_v45, %v2200_v12  ;;  %v2247_v15 = vpop.f32.mrb[23].mxu1  ;;  %v1770_v12 = vpop.permute.xlu0 %1769 }
 0x2be   : > { %v2248_v6 = vadd.f32 %v2247_v15, %v2246_v13  ;;  %v1780_v45 = vpop.permute.xlu1 %1779 }
 0x2bf   : > { %v1575_v18 = vadd.f32 %v2202_v14, %v3227_v4  ;;  %v3252_v19 = vadd.f32 %v2245_v59, %v1572_v3 }
 0x2c1   : > { %v2203_v5 = vpop.f32.mrb[24].mxu0  ;;  %v3254_v21 = vadd.f32 %v2248_v6, %v1575_v18 }
 0x2c2   : > { %v2204_v22 = vpop.f32.mrb[25].mxu0  ;;  %v2249_v60 = vpop.f32.mrb[24].mxu1 }
 0x2c3   : > { %v2205_v16 = vadd.f32 %v2204_v22, %v2203_v5  ;;  %v2206_v23 = vpop.f32.mrb[26].mxu0  ;;  %v2250_v25 = vpop.f32.mrb[25].mxu1 }
 0x2c4   : > { %v2207_v26 = vpop.f32.mrb[27].mxu0  ;;  %v2251_v27 = vadd.f32 %v2250_v25, %v2249_v60  ;;  %v2252_v28 = vpop.f32.mrb[26].mxu1 }
 0x2c5   : > { %v1580_v56 = vadd.f32 %v2205_v16, %v3231_v20  ;;  %v2208_v29 = vadd.f32 %v2207_v26, %v2206_v23  ;;  %v2253_v30 = vpop.f32.mrb[27].mxu1  ;;  %v1785_v23 = vpop.permute.xlu0 %1784 }
 0x2c6   : > { %v2254_v32 = vadd.f32 %v2253_v30, %v2252_v28  ;;  %v1790_v25 = vpop.permute.xlu1 %1789 }
 0x2c7   : > { %v1583_v4 = vadd.f32 %v2208_v29, %v3233_v7  ;;  %v3258_v33 = vadd.f32 %v2251_v27, %v1580_v56 }
 0x2c9   : > { %v2209_v35 = vpop.f32.mrb[28].mxu0  ;;  %v3260_v38 = vadd.f32 %v2254_v32, %v1583_v4 }
 0x2ca   : > { %v2210_v40 = vpop.f32.mrb[29].mxu0  ;;  %v2255_v47 = vpop.f32.mrb[28].mxu1 }
 0x2cb   : > { %v2211_v48 = vadd.f32 %v2210_v40, %v2209_v35  ;;  %v2212_v49 = vpop.f32.mrb[30].mxu0  ;;  %v2256_v50 = vpop.f32.mrb[29].mxu1 }
 0x2cc   : > { %v2213_v51 = vpop.f32.mrb[31].mxu0  ;;  %v2257_v24 = vadd.f32 %v2256_v50, %v2255_v47  ;;  %v2258_v44 = vpop.f32.mrb[30].mxu1 }
 0x2cd   : > { %v1588_v20 = vadd.f32 %v2211_v48, %v3237_v17  ;;  %v2214_v52 = vadd.f32 %v2213_v51, %v2212_v49  ;;  %v2259_v39 = vpop.f32.mrb[31].mxu1  ;;  %v1795_v51 = vpop.permute.xlu0 %1794 }
 0x2ce   : > { %v2260_v41 = vadd.f32 %v2259_v39, %v2258_v44 }
 0x2cf   : > { %v1591_v7 = vadd.f32 %v2214_v52, %v3239_v34  ;;  %v3264_v46 = vadd.f32 %v2257_v24, %v1588_v20  ;;  %v1800_v24 = vpop.permute.xlu1 %1799 }
 0x2d1   : > { %v2215_v31 = vpop.f32.mrb[32].mxu0  ;;  %v3268_v54 = vadd.f32 %v2260_v41, %v1591_v7 }
 0x2d2   : > { %v2216_v57 = vpop.f32.mrb[33].mxu0  ;;  %v2261_v58 = vpop.f32.mrb[32].mxu1 }
 0x2d3   : > { %v2217_v61 = vadd.f32 %v2216_v57, %v2215_v31  ;;  %v2218_v62 = vpop.f32.mrb[34].mxu0  ;;  %v2262_v37 = vpop.f32.mrb[33].mxu1 }
 0x2d4   : > { %v2219_v55 = vpop.f32.mrb[35].mxu0  ;;  %v2263_v17 = vadd.f32 %v2262_v37, %v2261_v58  ;;  %v2264_v63 = vpop.f32.mrb[34].mxu1 }
 0x2d5   : > { %v1596_v9 = vadd.f32 %v2217_v61, %v3243_v8  ;;  %v2220_v0 = vadd.f32 %v2219_v55, %v2218_v62  ;;  %v2265_v34 = vpop.f32.mrb[35].mxu1 }
 0x2d6   : > { %v2266_v10 = vadd.f32 %v2265_v34, %v2264_v63  ;;  %v1805_v63 = vpop.permute.xlu0 %1804 }
 0x2d7   : > { %v1599_v11 = vadd.f32 %v2220_v0, %v3245_v36  ;;  %v1668_v2 = vadd.f32 %v2263_v17, %v1596_v9 }
 0x2d9   : > { %v2221_v1 = vpop.f32.mrb[36].mxu0  ;;  %v1671_v59 = vadd.f32 %v2266_v10, %v1599_v11 }
 0x2da   : > { %v2222_v13 = vpop.f32.mrb[37].mxu0  ;;  %v2267_v3 = vpop.f32.mrb[36].mxu1 }
 0x2db   : > { %v2223_v14 = vadd.f32 %v2222_v13, %v2221_v1  ;;  %v2224_v15 = vpop.f32.mrb[38].mxu0  ;;  %v2268_v6 = vpop.f32.mrb[37].mxu1 }
 0x2dc   : > { %v2225_v18 = vpop.f32.mrb[39].mxu0  ;;  %v2269_v5 = vadd.f32 %v2268_v6, %v2267_v3  ;;  %v2270_v22 = vpop.f32.mrb[38].mxu1 }
 0x2dd   : > { %v1604_v8 = vadd.f32 %v2223_v14, %v3248_v42  ;;  %v2271_v60 = vpop.f32.mrb[39].mxu1 }
 0x2df   : > { %v1676_v16 = vadd.f32 %v2269_v5, %v1604_v8 }
 0x2e1   : > { %v1715_v36 = vpop.f32.mrb[40].mxu0 }
 0x2e2   : > { %v1716_v26 = vadd.f32 %v1715_v36, %v3252_v19  ;;  %v1739_v27 = vpop.f32.mrb[40].mxu1  ;;  %v2304_v28 = vpop.f32.mrb[41].mxu0 }
 0x2e3   : > { %v1740_v56 = vadd.f32 %v1739_v27, %v1668_v2  ;;  %v2316_v29 = vpop.f32.mrb[41].mxu1  ;;  %v1718_v30 = vpop.f32.mrb[42].mxu0 }
 0x2e4   : > { %v1753_v32 = vmax.f32 %v1716_v26, 0.0  ;;  %v1719_v4 = vadd.f32 %v1718_v30, %v3254_v21  ;;  %v1742_v35 = vpop.f32.mrb[42].mxu1  ;;  %v2305_v40 = vpop.f32.mrb[43].mxu0 }
 0x2e5   : > { %v1759_v47 = vmax.f32 %v1740_v56, 0.0  ;;  %v1743_v48 = vadd.f32 %v1742_v35, %v1671_v59  ;;  %v2317_v42 = vpop.f32.mrb[43].mxu1 }
 0x2e6   : > { %v1807_v49 = vmul.f32 %v1765_v43, %v1753_v32  ;;  %v1754_v50 = vmax.f32 %v1719_v4, 0.0 }
 0x2e7   : > { %v1760_v44 = vmax.f32 %v1743_v48, 0.0  ;;  %v1813_v20 = vmul.f32 %v1795_v51, %v1759_v47 }
 0x2e8   : > { %1816 = vst [vmem:[#allocation2 + $0x7] sm:$0xff] %v1807_v49  ;;  %v1808_v19 = vmul.f32 %v1770_v12, %v1754_v50 }
 0x2e9   : > { %1822 = vst [vmem:[#allocation2 + $0x37] sm:$0xff] %v1813_v20  ;;  %v1814_v52 = vmul.f32 %v1800_v24, %v1760_v44  ;;  %v1723_v39 = vpop.f32.mrb[44].mxu0 }
 0x2ea   : > { %1817 = vst [vmem:[#allocation2 + $0xf] sm:$0xff] %v1808_v19  ;;  %v1724_v41 = vadd.f32 %v1723_v39, %v3258_v33  ;;  %v1747_v21 = vpop.f32.mrb[44].mxu1  ;;  %v2308_v7 = vpop.f32.mrb[45].mxu0 }
 0x2eb   : > { %1823 = vst [vmem:[#allocation2 + $0x3f] sm:$0xff] %v1814_v52  ;;  %v1748_v31 = vadd.f32 %v1747_v21, %v1676_v16  ;;  %v1726_v57 = vpop.f32.mrb[46].mxu0  ;;  %v2320_v58 = vpop.f32.mrb[45].mxu1 }
 0x2ec   : > { %v1755_v43 = vmax.f32 %v1724_v41, 0.0  ;;  %v1727_v61 = vadd.f32 %v1726_v57, %v3260_v38  ;;  %v2309_v62 = vpop.f32.mrb[47].mxu0  ;;  %v1750_v37 = vpop.f32.mrb[46].mxu1 }
 0x2ed   : > { %v1761_v55 = vmax.f32 %v1748_v31, 0.0  ;;  %v2321_v17 = vpop.f32.mrb[47].mxu1 }
 0x2ee   : > { %v1809_v9 = vmul.f32 %v3266_v53, %v1755_v43  ;;  %v1756_v0 = vmax.f32 %v1727_v61, 0.0 }
 0x2ef   : > { %v1815_v34 = vmul.f32 %v1805_v63, %v1761_v55 }
 0x2f0   : > { %1818 = vst [vmem:[#allocation2 + $0x17] sm:$0xff] %v1809_v9  ;;  %v1810_v33 = vmul.f32 %v1780_v45, %v1756_v0 }
 0x2f1   : > { %1824 = vst [vmem:[#allocation2 + $0x47] sm:$0xff] %v1815_v34  ;;  %v1731_v10 = vpop.f32.mrb[48].mxu0 }
 0x2f2   : > { %1819 = vst [vmem:[#allocation2 + $0x1f] sm:$0xff] %v1810_v33  ;;  %v1732_v11 = vadd.f32 %v1731_v10, %v3264_v46  ;;  %v2312_v2 = vpop.f32.mrb[49].mxu0 }
 0x2f3   : > { %v1734_v12 = vpop.f32.mrb[50].mxu0 }
 0x2f4   : > { %v1757_v1 = vmax.f32 %v1732_v11, 0.0  ;;  %v1735_v38 = vadd.f32 %v1734_v12, %v3268_v54  ;;  %v2313_v59 = vpop.f32.mrb[51].mxu0 }
 0x2f6   : > { %v1811_v13 = vmul.f32 %v1785_v23, %v1757_v1  ;;  %v1758_v3 = vmax.f32 %v1735_v38, 0.0 }
 0x2f8   : > { %1820 = vst [vmem:[#allocation2 + $0x27] sm:$0xff] %v1811_v13  ;;  %v1812_v14 = vmul.f32 %v1790_v25, %v1758_v3 }
 0x2fa   : > { %1821 = vst [vmem:[#allocation2 + $0x2f] sm:$0xff] %v1812_v14 }
 0x2fb PF: > { %p2040_p5 = scmp.ne.s32.totalorder %s2760_s25, 5 }
 0x2fc   : > { %v1829_v53 = vld [vmem:[#allocation2 + $0x7] sm:$0xff] (!%p2040_p5)  ;;  %v1830_v45 = vld [vmem:[#allocation2 + $0xf] sm:$0xff] (!%p2040_p5)  ;;  %v1831_v15 = vld [vmem:[#allocation2 + $0x17] sm:$0xff] (!%p2040_p5) }
 0x2fd   : > { %1828 = sbr.rel (%p2040_p5) target bundleno = 772 (0x304), region = 72  ;;  %1838 = vst [vmem:[%s3327_s6] sm:$0xff] (!%p2040_p5), %v1829_v53  ;;  %1839 = vst [vmem:[%s3327_s6 + $0x8] sm:$0xff] (!%p2040_p5), %v1830_v45  ;;  %v1832_v46 = vld [vmem:[#allocation2 + $0x1f] sm:$0xff] (!%p2040_p5)  ;;  %v1835_v18 = vld [vmem:[#allocation2 + $0x37] sm:$0xff] (!%p2040_p5) }
 0x2fe   : > { %1840 = vst [vmem:[%s3327_s6 + $0x10] sm:$0xff] (!%p2040_p5), %v1831_v15  ;;  %1841 = vst [vmem:[%s3327_s6 + $0x18] sm:$0xff] (!%p2040_p5), %v1832_v46  ;;  %v1836_v5 = vld [vmem:[#allocation2 + $0x3f] sm:$0xff] (!%p2040_p5)  ;;  %v1837_v22 = vld [vmem:[#allocation2 + $0x47] sm:$0xff] (!%p2040_p5) }
 0x2ff   : > { %v1833_v54 = vld [vmem:[#allocation2 + $0x27] sm:$0xff] (!%p2040_p5)  ;;  %1844 = vst [vmem:[%s3327_s6 + $0x30] sm:$0xff] (!%p2040_p5), %v1835_v18  ;;  %1845 = vst [vmem:[%s3327_s6 + $0x38] sm:$0xff] (!%p2040_p5), %v1836_v5 }
 0x300   : > { %1842 = vst [vmem:[%s3327_s6 + $0x20] sm:$0xff] (!%p2040_p5), %v1833_v54  ;;  %1846 = vst [vmem:[%s3327_s6 + $0x40] sm:$0xff] (!%p2040_p5), %v1837_v22 }
 0x301   : > { %v1834_v6 = vld [vmem:[#allocation2 + $0x2f] sm:$0xff] (!%p2040_p5) }
 0x302   : > { %1843 = vst [vmem:[%s3327_s6 + $0x28] sm:$0xff] (!%p2040_p5), %v1834_v6 }
 0x304 PF: > { %p15_p13 = scmp.ge.s32.totalorder %s2796_s9, 8   ;;  %s3354_s21 = smov %s2685_s22 }
 0x305   : > { %s3355_s22 = smov %s2689_s23  ;;  %s3356_s23 = smov %s2849_s10 }
 0x306   : > { %s3357_s24 = smov %s2796_s9  ;;  %17 = sbr.rel (!%p15_p13) target bundleno = 3 (0x3), region = 110 }
 0x30d   :  { %1858 = vsyncpa [#allocation4], 1 }
 0x30e   :  { %1860 = vsyncpa [#allocation4 + $0x1], 1 }
 0x30f   :  { %1861 = vsyncpa [#allocation6], 1 }

// kernel: sparse_second_forward.5
= control target key start
LH: loop header
LB: loop body
LE: loop exit
PB: predicated region body
PF: predicated region fallthrough
CT: control target
= control target key end

     0   :  { %s4738_s21 = smov 0   ;;  %s5540_s0 = inlined_call_operand.vmem [shape: bf16[32,512], index: 0, kind: input, shape index: {}]   ;;  %s5541_s1 = inlined_call_operand.vmem [shape: f32[32,1], index: 1, kind: input, shape index: {}]   ;;  %s5542_s2 = inlined_call_operand.vmem [shape: bf16[512,256], index: 2, kind: input, shape index: {}]   ;;  %s5543_s3 = inlined_call_operand.vmem [shape: f32[1,256], index: 3, kind: input, shape index: {}]   ;;  %s5544_s4 = inlined_call_operand.vmem [shape: bf16[5,2304,256], index: 4, kind: input, shape index: {}]   ;;  %s5545_s5 = inlined_call_operand.vmem [shape: f32[5,1,256], index: 5, kind: input, shape index: {}]   ;;  %s5546_s6 = inlined_call_operand.vmem [shape: f32[32,256], index: 6, kind: output, shape index: {}]  }
   0x1 LB: > { %s4744_s22 = sadd.s32 4294967295, %s4698_s21   ;;  %p3626_p0 = scmp.ge.s32.totalorder %s4698_s21, 1  ;;  %s4698_s21 = sphi %s4738_s21, %s16_s21  }
   0x2   : > { %p240_p1 = scmp.lt.s32.totalorder %s4698_s21, 7 }
   0x4   : > { %p241_p2 = pnand %p3626_p0, %p240_p1 }
   0x5   : > { %s3627_s23 = sadd.s32 (!%p241_p2), 4294967295, %s4744_s22  ;;  %v4752_v0 = vld [vmem:[%s5541_s1] sm:$0xff] (!%p241_p2)  ;;  %v4757_v1 = vld [vmem:[%s5541_s1 + $0x8] sm:$0xff] (!%p241_p2)  ;;  %v4762_v2 = vld [vmem:[%s5541_s1 + $0x10] sm:$0xff] (!%p241_p2)  ;;  %p3641_p5 = scmp.ne.s32.totalorder (!%p241_p2), %s4744_s22, 0 }
   0x6   : > { %244 = sbr.rel (%p241_p2) target bundleno = 877 (0x36d), region = 44  ;;  %p276_p3 = scmp.gt.s32.totalorder (!%p241_p2), %s3627_s23, 0  ;;  %v4767_v3 = vld [vmem:[%s5541_s1 + $0x18] sm:$0xff] (!%p241_p2) }
   0x7   : > { %p3628_p4 = scmp.lt.s32.totalorder (!%p241_p2), %s3627_s23, 4 }
   0xd   : > { %s5548_s23 = smov (!%p276_p3, %s3627_s23), 0  ;;  %303 = sbr.rel (%p3641_p5) target bundleno = 316 (0x13c), region = 48 }
   0xe   : > { %s5550_s23 = smov (!%p3628_p4, %s5548_s23), 4  ;;  %v4144_v4 = vld [vmem:[%s5542_s2 + $0x4] ss:$8 sps:$4 sm:$0xff] (!%p3641_p5)   ;;  %v4700_v5 = vmov (!%p3641_p5), 0.0   ;;  %v4701_v7 = vmov (!%p3641_p5), 0   ;;  %vm904_vm0 = vcmask (!%p3641_p5), 1044480  }
   0xf   : > { %s4130_s8 = smul.u32 2304, %s5550_s23  ;;  %s3640_s9 = sshll.u32 %s5550_s23, 1  ;;  %304 = vst [vmem:[#allocation2] sm:$0x1f] (!%p3641_p5), %v4700_v5  ;;  %305 = vst [vmem:[#allocation2 + $0x8] sm:$0x1f] (!%p3641_p5), %v4700_v5  ;;  %4142 = vset.pattern.permute.xlu0 (!%p3641_p5), %v4701_v7  ;;  %4143 = vset.pattern.permute.xlu1 (!%p3641_p5), %v4701_v7 }
  0x10   : > { %s4772_s12 = scalar_lea.vmem %s5545_s5, %s3640_s9  ;;  %306 = vst [vmem:[#allocation2 + $0x40] sm:$0xe0] (!%p3641_p5), %v4700_v5  ;;  %307 = vst [vmem:[#allocation2 + $0x48] sm:$0xe0] (!%p3641_p5), %v4700_v5  ;;  %v4146_v6 = vld [vmem:[%s5542_s2 + $0x104] ss:$8 sps:$4 sm:$0xff] (!%p3641_p5)   ;;  %754 = vmatprep.subr.bf16.mxu1 (!%p3641_p5), %v4144_v4  ;;  %870 = vperm.xlu0 (!%p3641_p5), %4142, %v4752_v0  }
  0x11   : > { %s4777_s15 = scalar_lea.vmem %s5544_s4, %s4130_s8  ;;  %308 = vst [vmem:[#allocation2 + $0x50] sm:$0x3] (!%p3641_p5), %v4700_v5  ;;  %309 = vst [vmem:[#allocation2 + $0x58] sm:$0x3] (!%p3641_p5), %v4700_v5  ;;  %v4148_v8 = vld [vmem:[%s5542_s2] ss:$8 sps:$4 sm:$0xff] (!%p3641_p5)   ;;  %807 = vmatprep.subr.bf16.mxu0 (!%p3641_p5), %v4146_v6  ;;  %880 = vperm.xlu1 (!%p3641_p5), %4143, %v4762_v2  }
  0x12   : > { %v4149_v9 = vld [vmem:[%s5542_s2 + $0x100] ss:$8 sps:$4 sm:$0xff] (!%p3641_p5)   ;;  %v4150_v10 = vld [vmem:[%s5542_s2 + $0x14] ss:$8 sps:$4 sm:$0xff] (!%p3641_p5)   ;;  %755 = vmatpush1.bf16.msra.mxu1 (!%p3641_p5), %v4148_v8  ;;  %v4154_v12 = vld [vmem:[%s5542_s2 + $0x10] ss:$8 sps:$4 sm:$0xff] (!%p3641_p5)  }
  0x13   : > { %808 = vmatpush1.bf16.msra.mxu0 (!%p3641_p5), %v4149_v9  ;;  %v4152_v11 = vld [vmem:[%s5542_s2 + $0x114] ss:$8 sps:$4 sm:$0xff] (!%p3641_p5)   ;;  %756 = vmatprep.subr.bf16.mxu1 (!%p3641_p5), %v4150_v10  ;;  %v4155_v13 = vld [vmem:[%s5542_s2 + $0x110] ss:$8 sps:$4 sm:$0xff] (!%p3641_p5)   ;;  %v4156_v14 = vld [vmem:[%s5542_s2 + $0x24] ss:$8 sps:$4 sm:$0xff] (!%p3641_p5)  }
  0x14   : > { %809 = vmatprep.subr.bf16.mxu0 %v4152_v11  ;;  %875 = vperm.xlu0 %4142, %v4757_v1   ;;  %v4158_v15 = vld [vmem:[%s5542_s2 + $0x124] ss:$8 sps:$4 sm:$0xff]   ;;  %v4160_v16 = vld [vmem:[%s5542_s2 + $0x20] ss:$8 sps:$4 sm:$0xff]   ;;  %v4162_v18 = vld [vmem:[%s5542_s2 + $0x34] ss:$8 sps:$4 sm:$0xff]  }
  0x15   : > { %v4161_v17 = vld [vmem:[%s5542_s2 + $0x120] ss:$8 sps:$4 sm:$0xff]   ;;  %885 = vperm.xlu1 %4143, %v4767_v3   ;;  %v4164_v19 = vld [vmem:[%s5542_s2 + $0x134] ss:$8 sps:$4 sm:$0xff]   ;;  %v4166_v20 = vld [vmem:[%s5542_s2 + $0x30] ss:$8 sps:$4 sm:$0xff]  }
  0x16   : > { %757 = vmatpush1.bf16.msra.mxu1 %v4154_v12  ;;  %v4167_v21 = vld [vmem:[%s5542_s2 + $0x130] ss:$8 sps:$4 sm:$0xff]   ;;  %v4168_v22 = vld [vmem:[%s5542_s2 + $0x44] ss:$8 sps:$4 sm:$0xff]   ;;  %v4172_v24 = vld [vmem:[%s5542_s2 + $0x40] ss:$8 sps:$4 sm:$0xff]  }
  0x17   : > { %810 = vmatpush1.bf16.msra.mxu0 %v4155_v13  ;;  %758 = vmatprep.subr.bf16.mxu1 %v4156_v14  ;;  %v4170_v23 = vld [vmem:[%s5542_s2 + $0x144] ss:$8 sps:$4 sm:$0xff]   ;;  %v4173_v25 = vld [vmem:[%s5542_s2 + $0x140] ss:$8 sps:$4 sm:$0xff]   ;;  %v4174_v26 = vld [vmem:[%s5542_s2 + $0x54] ss:$8 sps:$4 sm:$0xff]  }
  0x18   : > { %811 = vmatprep.subr.bf16.mxu0 %v4158_v15  ;;  %v4176_v27 = vld [vmem:[%s5542_s2 + $0x154] ss:$8 sps:$4 sm:$0xff]   ;;  %v4178_v28 = vld [vmem:[%s5542_s2 + $0x50] ss:$8 sps:$4 sm:$0xff]   ;;  %v4180_v30 = vld [vmem:[%s5542_s2 + $0x64] ss:$8 sps:$4 sm:$0xff]  }
  0x19   : > { %v4179_v29 = vld [vmem:[%s5542_s2 + $0x150] ss:$8 sps:$4 sm:$0xff]   ;;  %v4182_v31 = vld [vmem:[%s5542_s2 + $0x164] ss:$8 sps:$4 sm:$0xff]   ;;  %v4184_v32 = vld [vmem:[%s5542_s2 + $0x60] ss:$8 sps:$4 sm:$0xff]  }
  0x1a   : > { %759 = vmatpush1.bf16.msra.mxu1 %v4160_v16  ;;  %v4185_v33 = vld [vmem:[%s5542_s2 + $0x160] ss:$8 sps:$4 sm:$0xff]   ;;  %v4186_v34 = vld [vmem:[%s5542_s2 + $0x74] ss:$8 sps:$4 sm:$0xff]   ;;  %v4190_v36 = vld [vmem:[%s5542_s2 + $0x70] ss:$8 sps:$4 sm:$0xff]  }
  0x1b   : > { %812 = vmatpush1.bf16.msra.mxu0 %v4161_v17  ;;  %760 = vmatprep.subr.bf16.mxu1 %v4162_v18  ;;  %v4188_v35 = vld [vmem:[%s5542_s2 + $0x174] ss:$8 sps:$4 sm:$0xff]   ;;  %v4191_v37 = vld [vmem:[%s5542_s2 + $0x170] ss:$8 sps:$4 sm:$0xff]   ;;  %v4192_v38 = vld [vmem:[%s5542_s2 + $0x84] ss:$8 sps:$4 sm:$0xff]   ;;  %v384_v18 = vlaneseq }
  0x1c   : > { %813 = vmatprep.subr.bf16.mxu0 %v4164_v19  ;;  %v4194_v39 = vld [vmem:[%s5542_s2 + $0x184] ss:$8 sps:$4 sm:$0xff]   ;;  %v4196_v40 = vld [vmem:[%s5542_s2 + $0x80] ss:$8 sps:$4 sm:$0xff]   ;;  %v4198_v42 = vld [vmem:[%s5542_s2 + $0x94] ss:$8 sps:$4 sm:$0xff]  }
  0x1d   : > { %v4197_v41 = vld [vmem:[%s5542_s2 + $0x180] ss:$8 sps:$4 sm:$0xff]   ;;  %v4200_v43 = vld [vmem:[%s5542_s2 + $0x194] ss:$8 sps:$4 sm:$0xff]   ;;  %v4202_v44 = vld [vmem:[%s5542_s2 + $0x90] ss:$8 sps:$4 sm:$0xff]  }
  0x1e   : > { %761 = vmatpush1.bf16.msra.mxu1 %v4166_v20  ;;  %v4203_v45 = vld [vmem:[%s5542_s2 + $0x190] ss:$8 sps:$4 sm:$0xff]   ;;  %v4204_v46 = vld [vmem:[%s5542_s2 + $0xa4] ss:$8 sps:$4 sm:$0xff]   ;;  %v4208_v48 = vld [vmem:[%s5542_s2 + $0xa0] ss:$8 sps:$4 sm:$0xff]  }
  0x1f   : > { %814 = vmatpush1.bf16.msra.mxu0 %v4167_v21  ;;  %762 = vmatprep.subr.bf16.mxu1 %v4168_v22  ;;  %v4206_v47 = vld [vmem:[%s5542_s2 + $0x1a4] ss:$8 sps:$4 sm:$0xff]   ;;  %v4209_v49 = vld [vmem:[%s5542_s2 + $0x1a0] ss:$8 sps:$4 sm:$0xff]   ;;  %v4210_v50 = vld [vmem:[%s5542_s2 + $0xb4] ss:$8 sps:$4 sm:$0xff]  }
  0x20   : > { %815 = vmatprep.subr.bf16.mxu0 %v4170_v23  ;;  %v4212_v51 = vld [vmem:[%s5542_s2 + $0x1b4] ss:$8 sps:$4 sm:$0xff]   ;;  %v4214_v52 = vld [vmem:[%s5542_s2 + $0xb0] ss:$8 sps:$4 sm:$0xff]   ;;  %v4216_v54 = vld [vmem:[%s5542_s2 + $0xc4] ss:$8 sps:$4 sm:$0xff]  }
  0x21   : > { %v4215_v53 = vld [vmem:[%s5542_s2 + $0x1b0] ss:$8 sps:$4 sm:$0xff]   ;;  %v4242_v55 = vld [vmem:[%s5540_s0 + $0x4] ss:$16 sps:$4 sm:$0xff]   ;;  %v4245_v57 = vld [vmem:[%s5540_s0 + $0xc] ss:$16 sps:$4 sm:$0xff]  }
  0x22   : > { %763 = vmatpush1.bf16.msra.mxu1 %v4172_v24  ;;  %v4218_v56 = vld [vmem:[%s5542_s2 + $0x1c4] ss:$8 sps:$4 sm:$0xff]   ;;  %786 = vmatprep.mubr.bf16.mxu1 %v4242_v55  ;;  %v4220_v58 = vld [vmem:[%s5542_s2 + $0xc0] ss:$8 sps:$4 sm:$0xff]   ;;  %v4222_v60 = vld [vmem:[%s5542_s2 + $0xd4] ss:$8 sps:$4 sm:$0xff]  }
  0x23   : > { %816 = vmatpush1.bf16.msra.mxu0 %v4173_v25  ;;  %764 = vmatprep.subr.bf16.mxu1 %v4174_v26  ;;  %v4221_v59 = vld [vmem:[%s5542_s2 + $0x1c0] ss:$8 sps:$4 sm:$0xff]   ;;  %v4224_v61 = vld [vmem:[%s5542_s2 + $0x1d4] ss:$8 sps:$4 sm:$0xff]   ;;  %v4226_v62 = vld [vmem:[%s5542_s2 + $0xd0] ss:$8 sps:$4 sm:$0xff]  }
  0x24   : > { %817 = vmatprep.subr.bf16.mxu0 %v4176_v27  ;;  %839 = vmatprep.mubr.bf16.mxu0 %v4245_v57  ;;  %v4227_v63 = vld [vmem:[%s5542_s2 + $0x1d0] ss:$8 sps:$4 sm:$0xff]   ;;  %v4228_v4 = vld [vmem:[%s5542_s2 + $0xe4] ss:$8 sps:$4 sm:$0xff]   ;;  %v4232_v6 = vld [vmem:[%s5542_s2 + $0xe0] ss:$8 sps:$4 sm:$0xff]  }
  0x25   : > { %v4230_v5 = vld [vmem:[%s5542_s2 + $0x1e4] ss:$8 sps:$4 sm:$0xff]   ;;  %v4233_v7 = vld [vmem:[%s5542_s2 + $0x1e0] ss:$8 sps:$4 sm:$0xff]   ;;  %v4234_v8 = vld [vmem:[%s5542_s2 + $0xf4] ss:$8 sps:$4 sm:$0xff]  }
  0x26   : > { %765 = vmatpush1.bf16.msra.mxu1 %v4178_v28  ;;  %v4236_v9 = vld [vmem:[%s5542_s2 + $0x1f4] ss:$8 sps:$4 sm:$0xff]   ;;  %v4238_v10 = vld [vmem:[%s5542_s2 + $0xf0] ss:$8 sps:$4 sm:$0xff]   ;;  %v385_v19 = vshrl.u32 %v384_v18, 7 }
  0x27   : > { %818 = vmatpush1.bf16.msra.mxu0 %v4179_v29  ;;  %766 = vmatprep.subr.bf16.mxu1 %v4180_v30  ;;  %v4239_v11 = vld [vmem:[%s5542_s2 + $0x1f0] ss:$8 sps:$4 sm:$0xff]   ;;  %v4246_v14 = vld [vmem:[%s5540_s0 + $0x24] ss:$16 sps:$4 sm:$0xff]   ;;  %v4248_v15 = vld [vmem:[%s5540_s0 + $0x2c] ss:$16 sps:$4 sm:$0xff]  }
  0x28   : > { %819 = vmatprep.subr.bf16.mxu0 %v4182_v31  ;;  %v4240_v12 = vld [vmem:[%s5540_s0] ss:$16 sps:$4 sm:$0xff]   ;;  %v4243_v13 = vld [vmem:[%s5540_s0 + $0x8] ss:$16 sps:$4 sm:$0xff]   ;;  %v386_v20 = vsub.s32 0, %v385_v19  ;;  %v390_v22 = vsub.s32 1, %v385_v19 }
  0x29   : > { %v4250_v16 = vld [vmem:[%s5540_s0 + $0x20] ss:$16 sps:$4 sm:$0xff]   ;;  %v4251_v17 = vld [vmem:[%s5540_s0 + $0x28] ss:$16 sps:$4 sm:$0xff]  }
  0x2a   : > { %767 = vmatpush1.bf16.msra.mxu1 %v4184_v32  ;;  %v382_v21 = vld [vmem:[%s5543_s3] sm:$0x3] }
  0x2b   : > { %820 = vmatpush1.bf16.msra.mxu0 %v4185_v33  ;;  %768 = vmatprep.subr.bf16.mxu1 %v4186_v34  ;;  %v387_v23 = vrot.slane %v382_v21, %v386_v20  ;;  %v391_v24 = vrot.slane %v382_v21, %v390_v22 }
  0x2c   : > { %821 = vmatprep.subr.bf16.mxu0 %v4188_v35 }
  0x2e   : > { %769 = vmatpush1.bf16.msra.mxu1 %v4190_v36 }
  0x2f   : > { %822 = vmatpush1.bf16.msra.mxu0 %v4191_v37  ;;  %770 = vmatprep.subr.bf16.mxu1 %v4192_v38 }
  0x30   : > { %823 = vmatprep.subr.bf16.mxu0 %v4194_v39 }
  0x32   : > { %771 = vmatpush1.bf16.msra.mxu1 %v4196_v40 }
  0x33   : > { %824 = vmatpush1.bf16.msra.mxu0 %v4197_v41  ;;  %772 = vmatprep.subr.bf16.mxu1 %v4198_v42 }
  0x34   : > { %825 = vmatprep.subr.bf16.mxu0 %v4200_v43 }
  0x36   : > { %773 = vmatpush1.bf16.msra.mxu1 %v4202_v44 }
  0x37   : > { %826 = vmatpush1.bf16.msra.mxu0 %v4203_v45  ;;  %774 = vmatprep.subr.bf16.mxu1 %v4204_v46 }
  0x38   : > { %827 = vmatprep.subr.bf16.mxu0 %v4206_v47 }
  0x3a   : > { %775 = vmatpush1.bf16.msra.mxu1 %v4208_v48 }
  0x3b   : > { %828 = vmatpush1.bf16.msra.mxu0 %v4209_v49  ;;  %776 = vmatprep.subr.bf16.mxu1 %v4210_v50 }
  0x3c   : > { %829 = vmatprep.subr.bf16.mxu0 %v4212_v51 }
  0x3e   : > { %777 = vmatpush1.bf16.msra.mxu1 %v4214_v52 }
  0x3f   : > { %830 = vmatpush1.bf16.msra.mxu0 %v4215_v53  ;;  %778 = vmatprep.subr.bf16.mxu1 %v4216_v54 }
  0x40   : > { %831 = vmatprep.subr.bf16.mxu0 %v4218_v56 }
  0x42   : > { %779 = vmatpush1.bf16.msra.mxu1 %v4220_v58 }
  0x43   : > { %832 = vmatpush1.bf16.msra.mxu0 %v4221_v59  ;;  %780 = vmatprep.subr.bf16.mxu1 %v4222_v60 }
  0x44   : > { %833 = vmatprep.subr.bf16.mxu0 %v4224_v61 }
  0x46   : > { %781 = vmatpush1.bf16.msra.mxu1 %v4226_v62 }
  0x47   : > { %834 = vmatpush1.bf16.msra.mxu0 %v4227_v63  ;;  %782 = vmatprep.subr.bf16.mxu1 %v4228_v4 }
  0x48   : > { %835 = vmatprep.subr.bf16.mxu0 %v4230_v5 }
  0x4a   : > { %783 = vmatpush1.bf16.msra.mxu1 %v4232_v6 }
  0x4b   : > { %836 = vmatpush1.bf16.msra.mxu0 %v4233_v7  ;;  %784 = vmatprep.subr.bf16.mxu1 %v4234_v8 }
  0x4c   : > { %837 = vmatprep.subr.bf16.mxu0 %v4236_v9 }
  0x4e   : > { %785 = vmatpush1.bf16.msra.mxu1 %v4238_v10 }
  0x4f   : > { %838 = vmatpush1.bf16.msra.mxu0 %v4239_v11 }
  0x51   : > { %787 = vmatmul.mubr.bf16.vlgmr.msra.gmra.mrb[0].mxu1 %v4240_v12 }
  0x52   : > { %840 = vmatmul.mubr.bf16.vlgmr.msra.gmra.mrb[0].mxu0 %v4243_v13  ;;  %796 = vmatprep.mubr.bf16.mxu1 %v4246_v14 }
  0x53   : > { %849 = vmatprep.mubr.bf16.mxu0 %v4248_v15 }
  0x59   : > { %797 = vmatmul.mubr.bf16.gmra.mrb[4].mxu1 %v4250_v16 }
  0x5a   : > { %850 = vmatmul.mubr.bf16.gmra.mrb[4].mxu0 %v4251_v17 }
  0x8f   : > { %v871_v25 = vpop.permute.xlu0 %870 }
  0x90   : > { %v881_v47 = vpop.permute.xlu1 %880 }
  0x93   : > { %v876_v44 = vpop.permute.xlu0 %875 }
  0x94   : > { %v886_v20 = vpop.permute.xlu1 %885 }
 0x124   : > { %v788_v26 = vpop.f32.mrb[0].mxu1 }
 0x125   : > { %v841_v27 = vpop.f32.mrb[0].mxu0  ;;  %v789_v28 = vadd.f32 %v788_v26, %v387_v23  ;;  %v790_v29 = vpop.f32.mrb[1].mxu1 }
 0x126   : > { %v843_v30 = vpop.f32.mrb[1].mxu0  ;;  %v791_v31 = vadd.f32 %v790_v29, %v391_v24  ;;  %v792_v32 = vpop.f32.mrb[2].mxu1 }
 0x127   : > { %v845_v33 = vpop.f32.mrb[2].mxu0  ;;  %v842_v34 = vadd.f32 %v841_v27, %v789_v28  ;;  %v793_v35 = vadd.f32 %v792_v32, %v387_v23  ;;  %v794_v36 = vpop.f32.mrb[3].mxu1 }
 0x128   : > { %v847_v37 = vpop.f32.mrb[3].mxu0  ;;  %v844_v38 = vadd.f32 %v843_v30, %v791_v31  ;;  %v795_v39 = vadd.f32 %v794_v36, %v391_v24 }
 0x129   : > { %v860_v40 = vmax.f32 %v842_v34, 0.0  ;;  %v846_v41 = vadd.f32 %v845_v33, %v793_v35 }
 0x12a   : > { %v861_v42 = vmax.f32 %v844_v38, 0.0  ;;  %v848_v43 = vadd.f32 %v847_v37, %v795_v39 }
 0x12b   : > { %v862_v45 = vmax.f32 %v846_v41, 0.0  ;;  %v888_v46 = vmul.f32 %v871_v25, %v860_v40 }
 0x12c   : > { %v863_v48 = vmax.f32 %v848_v43, 0.0  ;;  %v889_v49 = vmul.f32 %v871_v25, %v861_v42  ;;  %v798_v50 = vpop.f32.mrb[4].mxu1 }
 0x12d   : > { %v851_v51 = vpop.f32.mrb[4].mxu0  ;;  %v905_v52 = vrot.slane %v888_v46, 3  ;;  %v890_v53 = vmul.f32 %v876_v44, %v862_v45  ;;  %v799_v54 = vadd.f32 %v798_v50, %v387_v23  ;;  %v800_v55 = vpop.f32.mrb[5].mxu1 }
 0x12e   : > { %v853_v56 = vpop.f32.mrb[5].mxu0  ;;  %v906_v57 = vrot.slane %v889_v49, 3  ;;  %v891_v58 = vmul.f32 %v876_v44, %v863_v48  ;;  %v801_v59 = vadd.f32 %v800_v55, %v391_v24  ;;  %v802_v60 = vpop.f32.mrb[6].mxu1 }
 0x12f   : > { %v855_v61 = vpop.f32.mrb[6].mxu0  ;;  %929 = vst [vmem:[#allocation2] sm:$0xe0] %v905_v52  ;;  %v907_v62 = vrot.slane %v890_v53, 3  ;;  %v852_v63 = vadd.f32 %v851_v51, %v799_v54  ;;  %v803_v4 = vadd.f32 %v802_v60, %v387_v23  ;;  %v804_v5 = vpop.f32.mrb[7].mxu1 }
 0x130   : > { %v857_v6 = vpop.f32.mrb[7].mxu0  ;;  %930 = vst [vmem:[#allocation2 + $0x8] sm:$0xe0] %v906_v57  ;;  %v909_v7 = vrot.slane %v891_v58, 3  ;;  %v854_v8 = vadd.f32 %v853_v56, %v801_v59  ;;  %v805_v9 = vadd.f32 %v804_v5, %v391_v24 }
 0x131   : > { %v908_v10 = vsel %vm904_vm0, %v905_v52, %v907_v62  ;;  %v864_v11 = vmax.f32 %v852_v63, 0.0  ;;  %v856_v12 = vadd.f32 %v855_v61, %v803_v4 }
 0x132   : > { %v910_v13 = vsel %vm904_vm0, %v906_v57, %v909_v7  ;;  %931 = vst [vmem:[#allocation2 + $0x10] sm:$0xff] %v908_v10  ;;  %v865_v14 = vmax.f32 %v854_v8, 0.0  ;;  %v858_v15 = vadd.f32 %v857_v6, %v805_v9 }
 0x133   : > { %932 = vst [vmem:[#allocation2 + $0x18] sm:$0xff] %v910_v13  ;;  %v892_v16 = vmul.f32 %v881_v47, %v864_v11  ;;  %v866_v17 = vmax.f32 %v856_v12, 0.0 }
 0x134   : > { %v893_v18 = vmul.f32 %v881_v47, %v865_v14  ;;  %v867_v19 = vmax.f32 %v858_v15, 0.0 }
 0x135   : > { %v911_v21 = vrot.slane %v892_v16, 3  ;;  %v894_v22 = vmul.f32 %v886_v20, %v866_v17 }
 0x136   : > { %v913_v23 = vrot.slane %v893_v18, 3  ;;  %v895_v25 = vmul.f32 %v886_v20, %v867_v19 }
 0x137   : > { %v912_v24 = vsel %vm904_vm0, %v907_v62, %v911_v21  ;;  %v915_v26 = vrot.slane %v894_v22, 3 }
 0x138   : > { %933 = vst [vmem:[#allocation2 + $0x20] sm:$0xff] %v912_v24  ;;  %v914_v27 = vsel %vm904_vm0, %v909_v7, %v913_v23  ;;  %v917_v28 = vrot.slane %v895_v25, 3 }
 0x139   : > { %934 = vst [vmem:[#allocation2 + $0x28] sm:$0xff] %v914_v27  ;;  %v916_v29 = vsel %vm904_vm0, %v911_v21, %v915_v26  ;;  %937 = vst [vmem:[#allocation2 + $0x40] sm:$0x1f] %v915_v26 }
 0x13a   : > { %v918_v30 = vsel %vm904_vm0, %v913_v23, %v917_v28  ;;  %935 = vst [vmem:[#allocation2 + $0x30] sm:$0xff] %v916_v29  ;;  %938 = vst [vmem:[#allocation2 + $0x48] sm:$0x1f] %v917_v28 }
 0x13b   : > { %936 = vst [vmem:[#allocation2 + $0x38] sm:$0xff] %v918_v30 }
 0x13c PF: > { %p3714_p6 = scmp.le.s32.totalorder %s4744_s22, 0 }
 0x13d   : > { %v4254_v31 = vld [vmem:[%s4777_s15 + $0x4] ss:$8 sps:$4 sm:$0xff] (!%p3714_p6)   ;;  %v4258_v33 = vld [vmem:[%s4777_s15] ss:$8 sps:$4 sm:$0xff] (!%p3714_p6)   ;;  %v4260_v35 = vld [vmem:[%s4777_s15 + $0x14] ss:$8 sps:$4 sm:$0xff] (!%p3714_p6)  }
 0x13e   : > { %942 = sbr.rel (%p3714_p6) target bundleno = 865 (0x361), region = 52  ;;  %v4256_v32 = vld [vmem:[%s4777_s15 + $0x404] ss:$8 sps:$4 sm:$0xff] (!%p3714_p6)   ;;  %2964 = vmatprep.subr.bf16.mxu1 (!%p3714_p6), %v4254_v31  ;;  %v4259_v34 = vld [vmem:[%s4777_s15 + $0x400] ss:$8 sps:$4 sm:$0xff] (!%p3714_p6)   ;;  %v5058_v20 = vld [vmem:[#allocation2 + $0x18] sm:$0xff] (!%p3714_p6) }
 0x13f   : > { %3176 = vmatprep.subr.bf16.mxu0 (!%p3714_p6), %v4256_v32  ;;  %2965 = vmatpush1.bf16.msra.mxu1 (!%p3714_p6), %v4258_v33  ;;  %v4262_v36 = vld [vmem:[%s4777_s15 + $0x414] ss:$8 sps:$4 sm:$0xff] (!%p3714_p6)   ;;  %v4264_v37 = vld [vmem:[%s4777_s15 + $0x10] ss:$8 sps:$4 sm:$0xff] (!%p3714_p6)   ;;  %v4266_v39 = vld [vmem:[%s4777_s15 + $0x24] ss:$8 sps:$4 sm:$0xff] (!%p3714_p6)  }
 0x140   : > { %3177 = vmatpush1.bf16.msra.mxu0 (!%p3714_p6), %v4259_v34  ;;  %2966 = vmatprep.subr.bf16.mxu1 (!%p3714_p6), %v4260_v35  ;;  %v4265_v38 = vld [vmem:[%s4777_s15 + $0x410] ss:$8 sps:$4 sm:$0xff] (!%p3714_p6)   ;;  %v4268_v40 = vld [vmem:[%s4777_s15 + $0x424] ss:$8 sps:$4 sm:$0xff] (!%p3714_p6)   ;;  %v4270_v41 = vld [vmem:[%s4777_s15 + $0x20] ss:$8 sps:$4 sm:$0xff] (!%p3714_p6)  }
 0x141   : > { %3178 = vmatprep.subr.bf16.mxu0 (!%p3714_p6), %v4262_v36  ;;  %v4271_v42 = vld [vmem:[%s4777_s15 + $0x420] ss:$8 sps:$4 sm:$0xff] (!%p3714_p6)   ;;  %v4272_v43 = vld [vmem:[%s4777_s15 + $0x34] ss:$8 sps:$4 sm:$0xff] (!%p3714_p6)   ;;  %v4276_v45 = vld [vmem:[%s4777_s15 + $0x30] ss:$8 sps:$4 sm:$0xff] (!%p3714_p6)  }
 0x142   : > { %v4274_v44 = vld [vmem:[%s4777_s15 + $0x434] ss:$8 sps:$4 sm:$0xff] (!%p3714_p6)   ;;  %v4277_v46 = vld [vmem:[%s4777_s15 + $0x430] ss:$8 sps:$4 sm:$0xff] (!%p3714_p6)   ;;  %v4278_v47 = vld [vmem:[%s4777_s15 + $0x44] ss:$8 sps:$4 sm:$0xff] (!%p3714_p6)  }
 0x143   : > { %2967 = vmatpush1.bf16.msra.mxu1 (!%p3714_p6), %v4264_v37  ;;  %v4280_v48 = vld [vmem:[%s4777_s15 + $0x444] ss:$8 sps:$4 sm:$0xff] (!%p3714_p6)   ;;  %v4282_v49 = vld [vmem:[%s4777_s15 + $0x40] ss:$8 sps:$4 sm:$0xff] (!%p3714_p6)   ;;  %v4284_v51 = vld [vmem:[%s4777_s15 + $0x54] ss:$8 sps:$4 sm:$0xff] (!%p3714_p6)  }
 0x144   : > { %3179 = vmatpush1.bf16.msra.mxu0 (!%p3714_p6), %v4265_v38  ;;  %2968 = vmatprep.subr.bf16.mxu1 (!%p3714_p6), %v4266_v39  ;;  %v4283_v50 = vld [vmem:[%s4777_s15 + $0x440] ss:$8 sps:$4 sm:$0xff] (!%p3714_p6)   ;;  %v4286_v52 = vld [vmem:[%s4777_s15 + $0x454] ss:$8 sps:$4 sm:$0xff] (!%p3714_p6)   ;;  %v4288_v53 = vld [vmem:[%s4777_s15 + $0x50] ss:$8 sps:$4 sm:$0xff] (!%p3714_p6)  }
 0x145   : > { %3180 = vmatprep.subr.bf16.mxu0 %v4268_v40  ;;  %v4289_v54 = vld [vmem:[%s4777_s15 + $0x450] ss:$8 sps:$4 sm:$0xff]   ;;  %v4290_v55 = vld [vmem:[%s4777_s15 + $0x64] ss:$8 sps:$4 sm:$0xff]   ;;  %v4294_v57 = vld [vmem:[%s4777_s15 + $0x60] ss:$8 sps:$4 sm:$0xff]  }
 0x146   : > { %v4292_v56 = vld [vmem:[%s4777_s15 + $0x464] ss:$8 sps:$4 sm:$0xff]   ;;  %v4295_v58 = vld [vmem:[%s4777_s15 + $0x460] ss:$8 sps:$4 sm:$0xff]   ;;  %v4296_v59 = vld [vmem:[%s4777_s15 + $0x74] ss:$8 sps:$4 sm:$0xff]  }
 0x147   : > { %2969 = vmatpush1.bf16.msra.mxu1 %v4270_v41  ;;  %v4298_v60 = vld [vmem:[%s4777_s15 + $0x474] ss:$8 sps:$4 sm:$0xff]   ;;  %v4300_v61 = vld [vmem:[%s4777_s15 + $0x70] ss:$8 sps:$4 sm:$0xff]   ;;  %v4302_v63 = vld [vmem:[%s4777_s15 + $0x84] ss:$8 sps:$4 sm:$0xff]  }
 0x148   : > { %3181 = vmatpush1.bf16.msra.mxu0 %v4271_v42  ;;  %2970 = vmatprep.subr.bf16.mxu1 %v4272_v43  ;;  %v4301_v62 = vld [vmem:[%s4777_s15 + $0x470] ss:$8 sps:$4 sm:$0xff]   ;;  %v4304_v4 = vld [vmem:[%s4777_s15 + $0x484] ss:$8 sps:$4 sm:$0xff]   ;;  %v4306_v5 = vld [vmem:[%s4777_s15 + $0x80] ss:$8 sps:$4 sm:$0xff]  }
 0x149   : > { %3182 = vmatprep.subr.bf16.mxu0 %v4274_v44  ;;  %v4307_v6 = vld [vmem:[%s4777_s15 + $0x480] ss:$8 sps:$4 sm:$0xff]   ;;  %v4308_v7 = vld [vmem:[%s4777_s15 + $0x94] ss:$8 sps:$4 sm:$0xff]   ;;  %v4312_v9 = vld [vmem:[%s4777_s15 + $0x90] ss:$8 sps:$4 sm:$0xff]  }
 0x14a   : > { %v4310_v8 = vld [vmem:[%s4777_s15 + $0x494] ss:$8 sps:$4 sm:$0xff]   ;;  %v4313_v10 = vld [vmem:[%s4777_s15 + $0x490] ss:$8 sps:$4 sm:$0xff]   ;;  %v4314_v11 = vld [vmem:[%s4777_s15 + $0xa4] ss:$8 sps:$4 sm:$0xff]  }
 0x14b   : > { %2971 = vmatpush1.bf16.msra.mxu1 %v4276_v45  ;;  %v4316_v12 = vld [vmem:[%s4777_s15 + $0x4a4] ss:$8 sps:$4 sm:$0xff]   ;;  %v4318_v13 = vld [vmem:[%s4777_s15 + $0xa0] ss:$8 sps:$4 sm:$0xff]   ;;  %v4320_v15 = vld [vmem:[%s4777_s15 + $0xb4] ss:$8 sps:$4 sm:$0xff]  }
 0x14c   : > { %3183 = vmatpush1.bf16.msra.mxu0 %v4277_v46  ;;  %2972 = vmatprep.subr.bf16.mxu1 %v4278_v47  ;;  %v4319_v14 = vld [vmem:[%s4777_s15 + $0x4a0] ss:$8 sps:$4 sm:$0xff]   ;;  %v4322_v16 = vld [vmem:[%s4777_s15 + $0x4b4] ss:$8 sps:$4 sm:$0xff]   ;;  %v4324_v17 = vld [vmem:[%s4777_s15 + $0xb0] ss:$8 sps:$4 sm:$0xff]  }
 0x14d   : > { %3184 = vmatprep.subr.bf16.mxu0 %v4280_v48  ;;  %v4325_v18 = vld [vmem:[%s4777_s15 + $0x4b0] ss:$8 sps:$4 sm:$0xff]   ;;  %v944_v19 = vld [vmem:[#allocation2 + $0x8] sm:$0xff]  ;;  %vm1084_vm1 = vcmask 1042432   ;;  %v1089_v24 = vrot.slane %v5058_v20, 5  ;;  %v5081_v41 = vld [vmem:[#allocation2 + $0x20] sm:$0xff] }
 0x14e   : > { %v4326_v21 = vld [vmem:[%s4777_s15 + $0xc4] ss:$8 sps:$4 sm:$0xff]   ;;  %v1189_v23 = vpack.c.bf16 %v5058_v20, %v944_v19  ;;  %v4330_v29 = vld [vmem:[%s4777_s15 + $0xc0] ss:$8 sps:$4 sm:$0xff]   ;;  %v4332_v32 = vld [vmem:[%s4777_s15 + $0xd4] ss:$8 sps:$4 sm:$0xff]  }
 0x14f   : > { %2973 = vmatpush1.bf16.msra.mxu1 %v4282_v49  ;;  %v4328_v22 = vld [vmem:[%s4777_s15 + $0x4c4] ss:$8 sps:$4 sm:$0xff]   ;;  %v4331_v30 = vld [vmem:[%s4777_s15 + $0x4c0] ss:$8 sps:$4 sm:$0xff]   ;;  %v4334_v34 = vld [vmem:[%s4777_s15 + $0x4d4] ss:$8 sps:$4 sm:$0xff]  }
 0x150   : > { %3185 = vmatpush1.bf16.msra.mxu0 %v4283_v50  ;;  %2974 = vmatprep.subr.bf16.mxu1 %v4284_v51  ;;  %v5063_v25 = vld [vmem:[#allocation2 + $0x28] sm:$0xff]  ;;  %v4336_v36 = vld [vmem:[%s4777_s15 + $0xd0] ss:$8 sps:$4 sm:$0xff]   ;;  %v963_v42 = vld [vmem:[#allocation2] sm:$0xe0]  ;;  %v1091_v48 = vrot.slane %v5081_v41, 5 }
 0x151   : > { %3186 = vmatprep.subr.bf16.mxu0 %v4286_v52  ;;  %v964_v26 = vld [vmem:[#allocation2 + $0x8] sm:$0xe0]  ;;  %v1093_v27 = vrot.slane %v5063_v25, 5  ;;  %2996 = vmatprep.mubr.bf16.mxu1 %v1189_v23  ;;  %v4337_v37 = vld [vmem:[%s4777_s15 + $0x4d0] ss:$8 sps:$4 sm:$0xff]   ;;  %v1085_v46 = vrot.slane %v963_v42, 5 }
 0x152   : > { %v1088_v28 = vrot.slane %v964_v26, 5  ;;  %v4338_v38 = vld [vmem:[%s4777_s15 + $0xe4] ss:$8 sps:$4 sm:$0xff]   ;;  %v5079_v40 = vld [vmem:[#allocation2 + $0x10] sm:$0xff]  ;;  %v4342_v43 = vld [vmem:[%s4777_s15 + $0xe0] ss:$8 sps:$4 sm:$0xff]  }
 0x153   : > { %2975 = vmatpush1.bf16.msra.mxu1 %v4288_v53  ;;  %v1094_v31 = vsel %vm1084_vm1, %v1089_v24, %v1093_v27  ;;  %v4340_v39 = vld [vmem:[%s4777_s15 + $0x4e4] ss:$8 sps:$4 sm:$0xff]   ;;  %v4343_v44 = vld [vmem:[%s4777_s15 + $0x4e0] ss:$8 sps:$4 sm:$0xff]   ;;  %v4344_v45 = vld [vmem:[%s4777_s15 + $0xf4] ss:$8 sps:$4 sm:$0xff]  }
 0x154   : > { %3187 = vmatpush1.bf16.msra.mxu0 %v4289_v54  ;;  %2976 = vmatprep.subr.bf16.mxu1 %v4290_v55  ;;  %v1090_v33 = vsel %vm1084_vm1, %v1088_v28, %v1089_v24  ;;  %v1086_v47 = vrot.slane %v5079_v40, 5  ;;  %v4346_v49 = vld [vmem:[%s4777_s15 + $0x4f4] ss:$8 sps:$4 sm:$0xff]   ;;  %v4348_v50 = vld [vmem:[%s4777_s15 + $0xf0] ss:$8 sps:$4 sm:$0xff]   ;;  %v943_v53 = vld [vmem:[#allocation2] sm:$0xff] }
 0x155   : > { %3188 = vmatprep.subr.bf16.mxu0 %v4292_v56  ;;  %v1197_v35 = vpack.c.bf16 %v1094_v31, %v1090_v33  ;;  %v4349_v51 = vld [vmem:[%s4777_s15 + $0x4f0] ss:$8 sps:$4 sm:$0xff]   ;;  %v4352_v52 = vld [vmem:[%s4777_s15 + $0x104] ss:$8 sps:$4 sm:$0xff]   ;;  %vm991_vm2 = vcmask 1046528   ;;  %v996_v28 = vrot.slane %v5058_v20, 1 }
 0x156   : > { %v1087_v54 = vsel %vm1084_vm1, %v1085_v46, %v1086_v47  ;;  %v1092_v55 = vsel %vm1084_vm1, %v1086_v47, %v1091_v48  ;;  %v4355_v56 = vld [vmem:[%s4777_s15 + $0x504] ss:$8 sps:$4 sm:$0xff]   ;;  %v5118_v19 = vld [vmem:[#allocation2 + $0x38] sm:$0xff]  ;;  %v5131_v33 = vld [vmem:[#allocation2 + $0x30] sm:$0xff]  ;;  %v1124_v46 = vrot.slane %v5063_v25, 6  ;;  %vm1115_vm3 = vcmask 1041408  }
 0x157   : > { %2977 = vmatpush1.bf16.msra.mxu1 %v4294_v57  ;;  %3208 = vmatprep.mubr.bf16.mxu0 %v1197_v35  ;;  %v4350_v57 = vld [vmem:[%s4777_s15 + $0x100] ss:$8 sps:$4 sm:$0xff]   ;;  %v1097_v23 = vrot.slane %v5118_v19, 5  ;;  %v4383_v24 = vld [vmem:[%s4777_s15 + $0x550] ss:$8 sps:$4 sm:$0xff]   ;;  %v5134_v35 = vrot.slane %v5063_v25, 1 }
 0x158   : > { %3189 = vmatpush1.bf16.msra.mxu0 %v4295_v58  ;;  %2978 = vmatprep.subr.bf16.mxu1 %v4296_v59  ;;  %v4353_v58 = vld [vmem:[%s4777_s15 + $0x500] ss:$8 sps:$4 sm:$0xff]   ;;  %v1188_v59 = vpack.c.bf16 %v5079_v40, %v943_v53  ;;  %v1095_v42 = vrot.slane %v5131_v33, 5  ;;  %v4397_v47 = vld [vmem:[%s4777_s15 + $0x574] ss:$8 sps:$4 sm:$0xff]   ;;  %vm1022_vm4 = vcmask 1045504  }
 0x159   : > { %3190 = vmatprep.subr.bf16.mxu0 %v4298_v60  ;;  %v1196_v60 = vpack.c.bf16 %v1092_v55, %v1087_v54  ;;  %v966_v26 = vld [vmem:[#allocation2 + $0x48] sm:$0x1f]  ;;  %v1098_v31 = vsel %vm1084_vm1, %v1093_v27, %v1097_v23  ;;  %v1001_v54 = vsel %vm991_vm2, %v996_v28, %v5134_v35  ;;  %v968_v55 = vld [vmem:[#allocation2 + $0x8] sm:$0xc0]  ;;  %vm1053_vm5 = vcmask 1043456  }
 0x15a   : > { %vm3485_vm6 = vcmask 1044480  }
 0x15b   : > { %2979 = vmatpush1.bf16.msra.mxu1 %v4300_v61  ;;  %v4358_v61 = vld [vmem:[%s4777_s15 + $0x114] ss:$8 sps:$4 sm:$0xff]  }
 0x15c   : > { %3191 = vmatpush1.bf16.msra.mxu0 %v4301_v62  ;;  %2980 = vmatprep.subr.bf16.mxu1 %v4302_v63  ;;  %v4361_v62 = vld [vmem:[%s4777_s15 + $0x514] ss:$8 sps:$4 sm:$0xff]   ;;  %v4356_v63 = vld [vmem:[%s4777_s15 + $0x110] ss:$8 sps:$4 sm:$0xff]  }
 0x15d   : > { %3192 = vmatprep.subr.bf16.mxu0 %v4304_v4  ;;  %v4359_v4 = vld [vmem:[%s4777_s15 + $0x510] ss:$8 sps:$4 sm:$0xff]  }
 0x15f   : > { %2981 = vmatpush1.bf16.msra.mxu1 %v4306_v5  ;;  %v4364_v5 = vld [vmem:[%s4777_s15 + $0x124] ss:$8 sps:$4 sm:$0xff]  }
 0x160   : > { %3193 = vmatpush1.bf16.msra.mxu0 %v4307_v6  ;;  %2982 = vmatprep.subr.bf16.mxu1 %v4308_v7  ;;  %v4367_v6 = vld [vmem:[%s4777_s15 + $0x524] ss:$8 sps:$4 sm:$0xff]   ;;  %v4362_v7 = vld [vmem:[%s4777_s15 + $0x120] ss:$8 sps:$4 sm:$0xff]  }
 0x161   : > { %3194 = vmatprep.subr.bf16.mxu0 %v4310_v8  ;;  %v4365_v8 = vld [vmem:[%s4777_s15 + $0x520] ss:$8 sps:$4 sm:$0xff]  }
 0x163   : > { %2983 = vmatpush1.bf16.msra.mxu1 %v4312_v9  ;;  %v4370_v9 = vld [vmem:[%s4777_s15 + $0x134] ss:$8 sps:$4 sm:$0xff]  }
 0x164   : > { %3195 = vmatpush1.bf16.msra.mxu0 %v4313_v10  ;;  %2984 = vmatprep.subr.bf16.mxu1 %v4314_v11  ;;  %v4373_v10 = vld [vmem:[%s4777_s15 + $0x534] ss:$8 sps:$4 sm:$0xff]   ;;  %v4368_v11 = vld [vmem:[%s4777_s15 + $0x130] ss:$8 sps:$4 sm:$0xff]  }
 0x165   : > { %3196 = vmatprep.subr.bf16.mxu0 %v4316_v12  ;;  %v4371_v12 = vld [vmem:[%s4777_s15 + $0x530] ss:$8 sps:$4 sm:$0xff]  }
 0x167   : > { %2985 = vmatpush1.bf16.msra.mxu1 %v4318_v13  ;;  %v4376_v13 = vld [vmem:[%s4777_s15 + $0x144] ss:$8 sps:$4 sm:$0xff]  }
 0x168   : > { %3197 = vmatpush1.bf16.msra.mxu0 %v4319_v14  ;;  %2986 = vmatprep.subr.bf16.mxu1 %v4320_v15  ;;  %v4379_v14 = vld [vmem:[%s4777_s15 + $0x544] ss:$8 sps:$4 sm:$0xff]   ;;  %v4374_v15 = vld [vmem:[%s4777_s15 + $0x140] ss:$8 sps:$4 sm:$0xff]  }
 0x169   : > { %3198 = vmatprep.subr.bf16.mxu0 %v4322_v16  ;;  %v4377_v16 = vld [vmem:[%s4777_s15 + $0x540] ss:$8 sps:$4 sm:$0xff]  }
 0x16b   : > { %2987 = vmatpush1.bf16.msra.mxu1 %v4324_v17  ;;  %v4382_v17 = vld [vmem:[%s4777_s15 + $0x154] ss:$8 sps:$4 sm:$0xff]  }
 0x16c   : > { %3199 = vmatpush1.bf16.msra.mxu0 %v4325_v18  ;;  %2988 = vmatprep.subr.bf16.mxu1 %v4326_v21  ;;  %v4385_v18 = vld [vmem:[%s4777_s15 + $0x554] ss:$8 sps:$4 sm:$0xff]   ;;  %v4380_v21 = vld [vmem:[%s4777_s15 + $0x150] ss:$8 sps:$4 sm:$0xff]  }
 0x16d   : > { %3200 = vmatprep.subr.bf16.mxu0 %v4328_v22  ;;  %v1207_v22 = vpack.c.bf16 %v5118_v19, %v5063_v25 }
 0x16f   : > { %2989 = vmatpush1.bf16.msra.mxu1 %v4330_v29  ;;  %v4388_v29 = vld [vmem:[%s4777_s15 + $0x164] ss:$8 sps:$4 sm:$0xff]  }
 0x170   : > { %3201 = vmatpush1.bf16.msra.mxu0 %v4331_v30  ;;  %2990 = vmatprep.subr.bf16.mxu1 %v4332_v32  ;;  %v4391_v30 = vld [vmem:[%s4777_s15 + $0x564] ss:$8 sps:$4 sm:$0xff]   ;;  %v1101_v32 = vrot.slane %v966_v26, 5  ;;  %v4430_v26 = vld [vmem:[%s4777_s15 + $0x1d4] ss:$8 sps:$4 sm:$0xff]  }
 0x171   : > { %3202 = vmatprep.subr.bf16.mxu0 %v4334_v34  ;;  %v965_v34 = vld [vmem:[#allocation2 + $0x40] sm:$0x1f] }
 0x172   : > { %v1099_v27 = vrot.slane %v965_v34, 5  ;;  %v951_v34 = vld [vmem:[#allocation2] sm:$0xfe] }
 0x173   : > { %2991 = vmatpush1.bf16.msra.mxu1 %v4336_v36  ;;  %v1120_v36 = vrot.slane %v5058_v20, 6 }
 0x174   : > { %3203 = vmatpush1.bf16.msra.mxu0 %v4337_v37  ;;  %2992 = vmatprep.subr.bf16.mxu1 %v4338_v38  ;;  %v4386_v37 = vld [vmem:[%s4777_s15 + $0x160] ss:$8 sps:$4 sm:$0xff]   ;;  %v1102_v38 = vsel %vm1084_vm1, %v1097_v23, %v1101_v32  ;;  %v4439_v32 = vld [vmem:[%s4777_s15 + $0x5e4] ss:$8 sps:$4 sm:$0xff]  }
 0x175   : > { %3204 = vmatprep.subr.bf16.mxu0 %v4340_v39  ;;  %v1206_v39 = vpack.c.bf16 %v5131_v33, %v5081_v41  ;;  %v4422_v23 = vld [vmem:[%s4777_s15 + $0x1c0] ss:$8 sps:$4 sm:$0xff]  }
 0x177   : > { %2993 = vmatpush1.bf16.msra.mxu1 %v4342_v43  ;;  %v4389_v43 = vld [vmem:[%s4777_s15 + $0x560] ss:$8 sps:$4 sm:$0xff]  }
 0x178   : > { %3205 = vmatpush1.bf16.msra.mxu0 %v4343_v44  ;;  %2994 = vmatprep.subr.bf16.mxu1 %v4344_v45  ;;  %v4394_v44 = vld [vmem:[%s4777_s15 + $0x174] ss:$8 sps:$4 sm:$0xff]   ;;  %v1215_v45 = vpack.c.bf16 %v1102_v38, %v1098_v31  ;;  %v4436_v31 = vld [vmem:[%s4777_s15 + $0x1e4] ss:$8 sps:$4 sm:$0xff]   ;;  %v5187_v38 = vrot.slane %v5081_v41, 1 }
 0x179   : > { %3206 = vmatprep.subr.bf16.mxu0 %v4346_v49  ;;  %v1096_v49 = vsel %vm1084_vm1, %v1091_v48, %v1095_v42 }
 0x17b   : > { %2995 = vmatpush1.bf16.msra.mxu1 %v4348_v50  ;;  %v1100_v50 = vsel %vm1084_vm1, %v1095_v42, %v1099_v27  ;;  %v1117_v42 = vrot.slane %v5079_v40, 6  ;;  %v1122_v27 = vrot.slane %v5081_v41, 6 }
 0x17c   : > { %3207 = vmatpush1.bf16.msra.mxu0 %v4349_v51  ;;  %3017 = vmatprep.subr.bf16.mxu1 %v4352_v52  ;;  %v952_v51 = vld [vmem:[#allocation2 + $0x8] sm:$0xfe]  ;;  %v1214_v52 = vpack.c.bf16 %v1100_v50, %v1096_v49  ;;  %v4445_v49 = vld [vmem:[%s4777_s15 + $0x5f4] ss:$8 sps:$4 sm:$0xff]   ;;  %v4440_v50 = vld [vmem:[%s4777_s15 + $0x1f0] ss:$8 sps:$4 sm:$0xff]  }
 0x17d   : > { %3229 = vmatprep.subr.bf16.mxu0 %v4355_v56  ;;  %v995_v53 = vrot.slane %v952_v51, 1  ;;  %v4392_v56 = vld [vmem:[%s4777_s15 + $0x170] ss:$8 sps:$4 sm:$0xff]  }
 0x17e   : > { %2997 = vmatmul.mubr.bf16.vlgmr.msra.gmra.mrb[0].mxu1 %v1188_v59  ;;  %v1125_v59 = vsel %vm1115_vm3, %v1120_v36, %v1124_v46 }
 0x17f   : > { %3209 = vmatmul.mubr.bf16.vlgmr.msra.gmra.mrb[0].mxu0 %v1196_v60  ;;  %3018 = vmatpush1.bf16.msra.mxu1 %v4350_v57  ;;  %v4395_v57 = vld [vmem:[%s4777_s15 + $0x570] ss:$8 sps:$4 sm:$0xff]   ;;  %v997_v48 = vsel %vm991_vm2, %v995_v53, %v996_v28  ;;  %v4400_v60 = vld [vmem:[%s4777_s15 + $0x184] ss:$8 sps:$4 sm:$0xff]   ;;  %v4433_v28 = vld [vmem:[%s4777_s15 + $0x5d4] ss:$8 sps:$4 sm:$0xff]  }
 0x180   : > { %3230 = vmatpush1.bf16.msra.mxu0 %v4353_v58  ;;  %3019 = vmatprep.subr.bf16.mxu1 %v4358_v61  ;;  %v1119_v58 = vrot.slane %v968_v55, 6  ;;  %v4403_v61 = vld [vmem:[%s4777_s15 + $0x584] ss:$8 sps:$4 sm:$0xff]  }
 0x181   : > { %3231 = vmatprep.subr.bf16.mxu0 %v4361_v62  ;;  %3006 = vmatprep.mubr.bf16.mxu1 %v1207_v22  ;;  %v1191_v62 = vpack.c.bf16 %v1001_v54, %v997_v48  ;;  %v4427_v22 = vld [vmem:[%s4777_s15 + $0x5c4] ss:$8 sps:$4 sm:$0xff]   ;;  %v1123_v54 = vsel %vm1115_vm3, %v1117_v42, %v1122_v27  ;;  %v1027_v48 = vrot.slane %v5058_v20, 2 }
 0x182   : > { %3218 = vmatprep.mubr.bf16.mxu0 %v1215_v45  ;;  %v4448_v55 = vld [vmem:[%s4777_s15 + $0x204] ss:$8 sps:$4 sm:$0xff]  }
 0x183   : > { %3020 = vmatpush1.bf16.msra.mxu1 %v4356_v63  ;;  %v1121_v63 = vsel %vm1115_vm3, %v1119_v58, %v1120_v36  ;;  %v967_v36 = vld [vmem:[#allocation2] sm:$0xc0]  ;;  %v4446_v58 = vld [vmem:[%s4777_s15 + $0x200] ss:$8 sps:$4 sm:$0xff]  }
 0x184   : > { %3232 = vmatpush1.bf16.msra.mxu0 %v4359_v4  ;;  %3021 = vmatprep.subr.bf16.mxu1 %v4364_v5  ;;  %v4398_v4 = vld [vmem:[%s4777_s15 + $0x180] ss:$8 sps:$4 sm:$0xff]   ;;  %v1199_v5 = vpack.c.bf16 %v1125_v59, %v1121_v63  ;;  %v1116_v45 = vrot.slane %v967_v36, 6 }
 0x185   : > { %3233 = vmatprep.subr.bf16.mxu0 %v4367_v6  ;;  %v4401_v6 = vld [vmem:[%s4777_s15 + $0x580] ss:$8 sps:$4 sm:$0xff]  }
 0x186   : > { %3007 = vmatmul.mubr.bf16.gmra.mrb[4].mxu1 %v1206_v39  ;;  %v4434_v39 = vld [vmem:[%s4777_s15 + $0x1e0] ss:$8 sps:$4 sm:$0xff]   ;;  %v1118_v53 = vsel %vm1115_vm3, %v1116_v45, %v1117_v42 }
 0x187   : > { %3022 = vmatpush1.bf16.msra.mxu1 %v4362_v7  ;;  %3219 = vmatmul.mubr.bf16.gmra.mrb[4].mxu0 %v1214_v52  ;;  %v4406_v7 = vld [vmem:[%s4777_s15 + $0x194] ss:$8 sps:$4 sm:$0xff]   ;;  %v4449_v63 = vld [vmem:[%s4777_s15 + $0x600] ss:$8 sps:$4 sm:$0xff]  }
 0x188   : > { %3234 = vmatpush1.bf16.msra.mxu0 %v4365_v8  ;;  %3023 = vmatprep.subr.bf16.mxu1 %v4370_v9  ;;  %v4409_v8 = vld [vmem:[%s4777_s15 + $0x594] ss:$8 sps:$4 sm:$0xff]   ;;  %v4404_v9 = vld [vmem:[%s4777_s15 + $0x190] ss:$8 sps:$4 sm:$0xff]  }
 0x189   : > { %3235 = vmatprep.subr.bf16.mxu0 %v4373_v10  ;;  %3049 = vmatprep.mubr.bf16.mxu1 %v1191_v62  ;;  %v4407_v10 = vld [vmem:[%s4777_s15 + $0x590] ss:$8 sps:$4 sm:$0xff]   ;;  %v5213_v62 = vrot.slane %v5131_v33, 1 }
 0x18a   : > { %3261 = vmatprep.mubr.bf16.mxu0 %v1199_v5  ;;  %v1126_v5 = vrot.slane %v5131_v33, 6 }
 0x18b   : > { %3024 = vmatpush1.bf16.msra.mxu1 %v4368_v11  ;;  %v4412_v11 = vld [vmem:[%s4777_s15 + $0x1a4] ss:$8 sps:$4 sm:$0xff]  }
 0x18c   : > { %3236 = vmatpush1.bf16.msra.mxu0 %v4371_v12  ;;  %3025 = vmatprep.subr.bf16.mxu1 %v4376_v13  ;;  %v4415_v12 = vld [vmem:[%s4777_s15 + $0x5a4] ss:$8 sps:$4 sm:$0xff]   ;;  %v4410_v13 = vld [vmem:[%s4777_s15 + $0x1a0] ss:$8 sps:$4 sm:$0xff]  }
 0x18d   : > { %3237 = vmatprep.subr.bf16.mxu0 %v4379_v14  ;;  %v4413_v14 = vld [vmem:[%s4777_s15 + $0x5a0] ss:$8 sps:$4 sm:$0xff]  }
 0x18f   : > { %3026 = vmatpush1.bf16.msra.mxu1 %v4374_v15  ;;  %v4418_v15 = vld [vmem:[%s4777_s15 + $0x1b4] ss:$8 sps:$4 sm:$0xff]  }
 0x190   : > { %3238 = vmatpush1.bf16.msra.mxu0 %v4377_v16  ;;  %3027 = vmatprep.subr.bf16.mxu1 %v4382_v17  ;;  %v4421_v16 = vld [vmem:[%s4777_s15 + $0x5b4] ss:$8 sps:$4 sm:$0xff]   ;;  %v4416_v17 = vld [vmem:[%s4777_s15 + $0x1b0] ss:$8 sps:$4 sm:$0xff]  }
 0x191   : > { %3239 = vmatprep.subr.bf16.mxu0 %v4385_v18  ;;  %v4419_v18 = vld [vmem:[%s4777_s15 + $0x5b0] ss:$8 sps:$4 sm:$0xff]  }
 0x193   : > { %3028 = vmatpush1.bf16.msra.mxu1 %v4380_v21  ;;  %v4424_v21 = vld [vmem:[%s4777_s15 + $0x1c4] ss:$8 sps:$4 sm:$0xff]  }
 0x194   : > { %3240 = vmatpush1.bf16.msra.mxu0 %v4383_v24  ;;  %3029 = vmatprep.subr.bf16.mxu1 %v4388_v29  ;;  %v4425_v24 = vld [vmem:[%s4777_s15 + $0x5c0] ss:$8 sps:$4 sm:$0xff]   ;;  %v4428_v29 = vld [vmem:[%s4777_s15 + $0x1d0] ss:$8 sps:$4 sm:$0xff]  }
 0x195   : > { %3241 = vmatprep.subr.bf16.mxu0 %v4391_v30  ;;  %v4431_v30 = vld [vmem:[%s4777_s15 + $0x5d0] ss:$8 sps:$4 sm:$0xff]  }
 0x197   : > { %3030 = vmatpush1.bf16.msra.mxu1 %v4386_v37  ;;  %v993_v37 = vrot.slane %v5079_v40, 1  ;;  %v4443_v40 = vld [vmem:[%s4777_s15 + $0x5f0] ss:$8 sps:$4 sm:$0xff]  }
 0x198   : > { %3242 = vmatpush1.bf16.msra.mxu0 %v4389_v43  ;;  %3031 = vmatprep.subr.bf16.mxu1 %v4394_v44  ;;  %v4437_v43 = vld [vmem:[%s4777_s15 + $0x5e0] ss:$8 sps:$4 sm:$0xff]   ;;  %v992_v44 = vrot.slane %v951_v34, 1 }
 0x199   : > { %3243 = vmatprep.subr.bf16.mxu0 %v4397_v47  ;;  %v4442_v47 = vld [vmem:[%s4777_s15 + $0x1f4] ss:$8 sps:$4 sm:$0xff]   ;;  %v999_v51 = vsel %vm991_vm2, %v993_v37, %v5187_v38 }
 0x19a   : > { %v994_v52 = vsel %vm991_vm2, %v992_v44, %v993_v37  ;;  %v956_v37 = vld [vmem:[#allocation2 + $0x8] sm:$0xfc]  ;;  %v4469_v44 = vld [vmem:[%s4777_s15 + $0x634] ss:$8 sps:$4 sm:$0xff]  }
 0x19b   : > { %3032 = vmatpush1.bf16.msra.mxu1 %v4392_v56  ;;  %v4451_v56 = vld [vmem:[%s4777_s15 + $0x604] ss:$8 sps:$4 sm:$0xff]   ;;  %v1190_v59 = vpack.c.bf16 %v999_v51, %v994_v52  ;;  %v4467_v51 = vld [vmem:[%s4777_s15 + $0x630] ss:$8 sps:$4 sm:$0xff]  }
 0x19c   : > { %3244 = vmatpush1.bf16.msra.mxu0 %v4395_v57  ;;  %3033 = vmatprep.subr.bf16.mxu1 %v4400_v60  ;;  %v5207_v57 = vrot.slane %v5118_v19, 1  ;;  %v1198_v60 = vpack.c.bf16 %v1123_v54, %v1118_v53  ;;  %v4475_v52 = vld [vmem:[%s4777_s15 + $0x644] ss:$8 sps:$4 sm:$0xff]   ;;  %v4478_v53 = vld [vmem:[%s4777_s15 + $0x254] ss:$8 sps:$4 sm:$0xff]  }
 0x19d   : > { %3245 = vmatprep.subr.bf16.mxu0 %v4403_v61  ;;  %v1128_v61 = vrot.slane %v5118_v19, 6  ;;  %v4481_v54 = vld [vmem:[%s4777_s15 + $0x654] ss:$8 sps:$4 sm:$0xff]  }
 0x19f   : > { %3034 = vmatpush1.bf16.msra.mxu1 %v4398_v4  ;;  %v954_v4 = vld [vmem:[#allocation2 + $0x48] sm:$0x1] }
 0x1a0   : > { %3246 = vmatpush1.bf16.msra.mxu0 %v4401_v6  ;;  %3035 = vmatprep.subr.bf16.mxu1 %v4406_v7  ;;  %v4454_v6 = vld [vmem:[%s4777_s15 + $0x214] ss:$8 sps:$4 sm:$0xff]  }
 0x1a1   : > { %3247 = vmatprep.subr.bf16.mxu0 %v4409_v8  ;;  %v4457_v7 = vld [vmem:[%s4777_s15 + $0x614] ss:$8 sps:$4 sm:$0xff]   ;;  %v5222_v8 = vsel %vm991_vm2, %v5134_v35, %v5207_v57 }
 0x1a3   : > { %3036 = vmatpush1.bf16.msra.mxu1 %v4404_v9  ;;  %v1008_v9 = vrot.slane %v954_v4, 1  ;;  %v4488_v4 = vld [vmem:[%s4777_s15 + $0x270] ss:$8 sps:$4 sm:$0xff]  }
 0x1a4   : > { %3248 = vmatpush1.bf16.msra.mxu0 %v4407_v10  ;;  %3037 = vmatprep.subr.bf16.mxu1 %v4412_v11  ;;  %v970_v10 = vld [vmem:[#allocation2 + $0x48] sm:$0x3f]  ;;  %v5225_v11 = vrot.slane %v5063_v25, 2 }
 0x1a5   : > { %3249 = vmatprep.subr.bf16.mxu0 %v4415_v12  ;;  %v4452_v12 = vld [vmem:[%s4777_s15 + $0x210] ss:$8 sps:$4 sm:$0xff]  }
 0x1a7   : > { %3038 = vmatpush1.bf16.msra.mxu1 %v4410_v13  ;;  %v4455_v13 = vld [vmem:[%s4777_s15 + $0x610] ss:$8 sps:$4 sm:$0xff]  }
 0x1a8   : > { %3250 = vmatpush1.bf16.msra.mxu0 %v4413_v14  ;;  %3039 = vmatprep.subr.bf16.mxu1 %v4418_v15  ;;  %v1009_v14 = vsel %vm991_vm2, %v5207_v57, %v1008_v9  ;;  %v1129_v15 = vsel %vm1115_vm3, %v1124_v46, %v1128_v61  ;;  %v4494_v9 = vld [vmem:[%s4777_s15 + $0x280] ss:$8 sps:$4 sm:$0xff]  }
 0x1a9   : > { %3251 = vmatprep.subr.bf16.mxu0 %v4421_v16  ;;  %v1132_v16 = vrot.slane %v970_v10, 6  ;;  %v4497_v10 = vld [vmem:[%s4777_s15 + $0x680] ss:$8 sps:$4 sm:$0xff]  }
 0x1ab   : > { %3040 = vmatpush1.bf16.msra.mxu1 %v4416_v17  ;;  %v4460_v17 = vld [vmem:[%s4777_s15 + $0x224] ss:$8 sps:$4 sm:$0xff]   ;;  %v1133_v46 = vsel %vm1115_vm3, %v1128_v61, %v1132_v16  ;;  %v4490_v61 = vld [vmem:[%s4777_s15 + $0x274] ss:$8 sps:$4 sm:$0xff]  }
 0x1ac   : > { %3252 = vmatpush1.bf16.msra.mxu0 %v4419_v18  ;;  %3041 = vmatprep.subr.bf16.mxu1 %v4424_v21  ;;  %v1209_v18 = vpack.c.bf16 %v1009_v14, %v5222_v8  ;;  %v953_v21 = vld [vmem:[#allocation2 + $0x40] sm:$0x1]  ;;  %v4500_v14 = vld [vmem:[%s4777_s15 + $0x290] ss:$8 sps:$4 sm:$0xff]   ;;  %v4508_v16 = vld [vmem:[%s4777_s15 + $0x2a4] ss:$8 sps:$4 sm:$0xff]  }
 0x1ad   : > { %3253 = vmatprep.subr.bf16.mxu0 %v4427_v22  ;;  %v5239_v22 = vsel %vm991_vm2, %v5187_v38, %v5213_v62 }
 0x1af   : > { %3042 = vmatpush1.bf16.msra.mxu1 %v4422_v23  ;;  %v969_v23 = vld [vmem:[#allocation2 + $0x40] sm:$0x3f] }
 0x1b0   : > { %3254 = vmatpush1.bf16.msra.mxu0 %v4425_v24  ;;  %3043 = vmatprep.subr.bf16.mxu1 %v4430_v26  ;;  %v4463_v24 = vld [vmem:[%s4777_s15 + $0x624] ss:$8 sps:$4 sm:$0xff]   ;;  %v1006_v26 = vrot.slane %v953_v21, 1  ;;  %v4509_v21 = vld [vmem:[%s4777_s15 + $0x6a0] ss:$8 sps:$4 sm:$0xff]  }
 0x1b1   : > { %3255 = vmatprep.subr.bf16.mxu0 %v4433_v28  ;;  %v1127_v28 = vsel %vm1115_vm3, %v1122_v27, %v1126_v5  ;;  %v1026_v27 = vrot.slane %v956_v37, 2  ;;  %v4527_v37 = vld [vmem:[%s4777_s15 + $0x6d0] ss:$8 sps:$4 sm:$0xff]  }
 0x1b2   : > { %v1007_v34 = vsel %vm991_vm2, %v5213_v62, %v1006_v26  ;;  %v4515_v26 = vld [vmem:[%s4777_s15 + $0x6b0] ss:$8 sps:$4 sm:$0xff]  }
 0x1b3   : > { %3044 = vmatpush1.bf16.msra.mxu1 %v4428_v29  ;;  %v1130_v29 = vrot.slane %v969_v23, 6  ;;  %v1208_v41 = vpack.c.bf16 %v1007_v34, %v5239_v22  ;;  %v1028_v45 = vsel %vm1022_vm4, %v1026_v27, %v1027_v48  ;;  %v4514_v23 = vld [vmem:[%s4777_s15 + $0x2b4] ss:$8 sps:$4 sm:$0xff]   ;;  %v4530_v27 = vld [vmem:[%s4777_s15 + $0x2e0] ss:$8 sps:$4 sm:$0xff]  }
 0x1b4   : > { %3256 = vmatpush1.bf16.msra.mxu0 %v4431_v30  ;;  %3045 = vmatprep.subr.bf16.mxu1 %v4436_v31  ;;  %v1217_v30 = vpack.c.bf16 %v1133_v46, %v1129_v15  ;;  %v4458_v31 = vld [vmem:[%s4777_s15 + $0x220] ss:$8 sps:$4 sm:$0xff]   ;;  %v4503_v15 = vld [vmem:[%s4777_s15 + $0x690] ss:$8 sps:$4 sm:$0xff]   ;;  %v4529_v34 = vld [vmem:[%s4777_s15 + $0x6d4] ss:$8 sps:$4 sm:$0xff]  }
 0x1b5   : > { %3257 = vmatprep.subr.bf16.mxu0 %v4439_v32  ;;  %v4461_v32 = vld [vmem:[%s4777_s15 + $0x620] ss:$8 sps:$4 sm:$0xff]   ;;  %v1131_v36 = vsel %vm1115_vm3, %v1126_v5, %v1130_v29  ;;  %v4491_v5 = vld [vmem:[%s4777_s15 + $0x670] ss:$8 sps:$4 sm:$0xff]   ;;  %v4523_v29 = vld [vmem:[%s4777_s15 + $0x6c4] ss:$8 sps:$4 sm:$0xff]  }
 0x1b6   : > { %v1216_v42 = vpack.c.bf16 %v1131_v36, %v1127_v28  ;;  %v4512_v46 = vld [vmem:[%s4777_s15 + $0x2b0] ss:$8 sps:$4 sm:$0xff]   ;;  %v4520_v28 = vld [vmem:[%s4777_s15 + $0x2c4] ss:$8 sps:$4 sm:$0xff]  }
 0x1b7   : > { %3046 = vmatpush1.bf16.msra.mxu1 %v4434_v39  ;;  %v4466_v39 = vld [vmem:[%s4777_s15 + $0x234] ss:$8 sps:$4 sm:$0xff]   ;;  %v4524_v36 = vld [vmem:[%s4777_s15 + $0x2d0] ss:$8 sps:$4 sm:$0xff]  }
 0x1b8   : > { %3258 = vmatpush1.bf16.msra.mxu0 %v4437_v43  ;;  %3047 = vmatprep.subr.bf16.mxu1 %v4442_v47  ;;  %v1032_v43 = vsel %vm1022_vm4, %v1027_v48, %v5225_v11  ;;  %v1201_v47 = vpack.c.bf16 %v5063_v25, %v5058_v20  ;;  %v4470_v20 = vld [vmem:[%s4777_s15 + $0x240] ss:$8 sps:$4 sm:$0xff]   ;;  %v4484_v48 = vld [vmem:[%s4777_s15 + $0x264] ss:$8 sps:$4 sm:$0xff]  }
 0x1b9   : > { %3259 = vmatprep.subr.bf16.mxu0 %v4445_v49  ;;  %v4464_v49 = vld [vmem:[%s4777_s15 + $0x230] ss:$8 sps:$4 sm:$0xff]   ;;  %v4473_v25 = vld [vmem:[%s4777_s15 + $0x640] ss:$8 sps:$4 sm:$0xff]  }
 0x1bb   : > { %3048 = vmatpush1.bf16.msra.mxu1 %v4440_v50  ;;  %v1193_v50 = vpack.c.bf16 %v1032_v43, %v1028_v45  ;;  %v5304_v43 = vld [vmem:[#allocation2 + $0x10] sm:$0xff]  ;;  %v4533_v45 = vld [vmem:[%s4777_s15 + $0x6e0] ss:$8 sps:$4 sm:$0xff]  }
 0x1bc   : > { %3260 = vmatpush1.bf16.msra.mxu0 %v4443_v40  ;;  %3070 = vmatprep.subr.bf16.mxu1 %v4448_v55  ;;  %v4472_v40 = vld [vmem:[%s4777_s15 + $0x244] ss:$8 sps:$4 sm:$0xff]   ;;  %v4476_v55 = vld [vmem:[%s4777_s15 + $0x250] ss:$8 sps:$4 sm:$0xff]  }
 0x1bd   : > { %3282 = vmatprep.subr.bf16.mxu0 %v4451_v56  ;;  %v4479_v56 = vld [vmem:[%s4777_s15 + $0x650] ss:$8 sps:$4 sm:$0xff]  }
 0x1be   : > { %3050 = vmatmul.mubr.bf16.vlgmr.msra.gmra.mrb[0].mxu1 %v1190_v59  ;;  %v4482_v59 = vld [vmem:[%s4777_s15 + $0x260] ss:$8 sps:$4 sm:$0xff]  }
 0x1bf   : > { %3262 = vmatmul.mubr.bf16.vlgmr.msra.gmra.mrb[0].mxu0 %v1198_v60  ;;  %3071 = vmatpush1.bf16.msra.mxu1 %v4446_v58  ;;  %v4487_v58 = vld [vmem:[%s4777_s15 + $0x664] ss:$8 sps:$4 sm:$0xff]   ;;  %v4485_v60 = vld [vmem:[%s4777_s15 + $0x660] ss:$8 sps:$4 sm:$0xff]  }
 0x1c0   : > { %3283 = vmatpush1.bf16.msra.mxu0 %v4449_v63  ;;  %3072 = vmatprep.subr.bf16.mxu1 %v4454_v6  ;;  %v4493_v63 = vld [vmem:[%s4777_s15 + $0x674] ss:$8 sps:$4 sm:$0xff]   ;;  %v4496_v6 = vld [vmem:[%s4777_s15 + $0x284] ss:$8 sps:$4 sm:$0xff]  }
 0x1c1   : > { %3284 = vmatprep.subr.bf16.mxu0 %v4457_v7  ;;  %3059 = vmatprep.mubr.bf16.mxu1 %v1209_v18  ;;  %v4499_v7 = vld [vmem:[%s4777_s15 + $0x684] ss:$8 sps:$4 sm:$0xff]   ;;  %v4506_v18 = vld [vmem:[%s4777_s15 + $0x2a0] ss:$8 sps:$4 sm:$0xff]  }
 0x1c2   : > { %3271 = vmatprep.mubr.bf16.mxu0 %v1217_v30  ;;  %v4518_v30 = vld [vmem:[%s4777_s15 + $0x2c0] ss:$8 sps:$4 sm:$0xff]  }
 0x1c3   : > { %3073 = vmatpush1.bf16.msra.mxu1 %v4452_v12  ;;  %v4502_v12 = vld [vmem:[%s4777_s15 + $0x294] ss:$8 sps:$4 sm:$0xff]  }
 0x1c4   : > { %3285 = vmatpush1.bf16.msra.mxu0 %v4455_v13  ;;  %3074 = vmatprep.subr.bf16.mxu1 %v4460_v17  ;;  %v4505_v13 = vld [vmem:[%s4777_s15 + $0x694] ss:$8 sps:$4 sm:$0xff]   ;;  %v4511_v17 = vld [vmem:[%s4777_s15 + $0x6a4] ss:$8 sps:$4 sm:$0xff]  }
 0x1c5   : > { %3286 = vmatprep.subr.bf16.mxu0 %v4463_v24  ;;  %v4517_v24 = vld [vmem:[%s4777_s15 + $0x6b4] ss:$8 sps:$4 sm:$0xff]  }
 0x1c6   : > { %3060 = vmatmul.mubr.bf16.gmra.mrb[4].mxu1 %v1208_v41  ;;  %v4535_v41 = vld [vmem:[%s4777_s15 + $0x6e4] ss:$8 sps:$4 sm:$0xff]  }
 0x1c7   : > { %3272 = vmatmul.mubr.bf16.gmra.mrb[4].mxu0 %v1216_v42  ;;  %3075 = vmatpush1.bf16.msra.mxu1 %v4458_v31  ;;  %v4521_v31 = vld [vmem:[%s4777_s15 + $0x6c0] ss:$8 sps:$4 sm:$0xff]  }
 0x1c8   : > { %3287 = vmatpush1.bf16.msra.mxu0 %v4461_v32  ;;  %3076 = vmatprep.subr.bf16.mxu1 %v4466_v39  ;;  %v4526_v32 = vld [vmem:[%s4777_s15 + $0x2d4] ss:$8 sps:$4 sm:$0xff]   ;;  %v4532_v39 = vld [vmem:[%s4777_s15 + $0x2e4] ss:$8 sps:$4 sm:$0xff]  }
 0x1c9   : > { %3288 = vmatprep.subr.bf16.mxu0 %v4469_v44  ;;  %3102 = vmatprep.mubr.bf16.mxu1 %v1193_v50  ;;  %v955_v42 = vld [vmem:[#allocation2] sm:$0xfc]  ;;  %v1024_v44 = vrot.slane %v5304_v43, 2 }
 0x1ca   : > { %3314 = vmatprep.mubr.bf16.mxu0 %v1201_v47  ;;  %v1023_v47 = vrot.slane %v955_v42, 2 }
 0x1cb   : > { %3077 = vmatpush1.bf16.msra.mxu1 %v4464_v49  ;;  %v5308_v49 = vld [vmem:[#allocation2 + $0x20] sm:$0xff] }
 0x1cc   : > { %3289 = vmatpush1.bf16.msra.mxu0 %v4467_v51  ;;  %3078 = vmatprep.subr.bf16.mxu1 %v4472_v40  ;;  %v5311_v50 = vrot.slane %v5308_v49, 2  ;;  %v958_v51 = vld [vmem:[#allocation2 + $0x48] sm:$0x3]  ;;  %v4538_v40 = vld [vmem:[%s4777_s15 + $0x2f4] ss:$8 sps:$4 sm:$0xff]  }
 0x1cd   : > { %3290 = vmatprep.subr.bf16.mxu0 %v4475_v52  ;;  %v4541_v52 = vld [vmem:[%s4777_s15 + $0x6f4] ss:$8 sps:$4 sm:$0xff]  }
 0x1cf   : > { %3079 = vmatpush1.bf16.msra.mxu1 %v4470_v20  ;;  %v4536_v20 = vld [vmem:[%s4777_s15 + $0x2f0] ss:$8 sps:$4 sm:$0xff]  }
 0x1d0   : > { %3291 = vmatpush1.bf16.msra.mxu0 %v4473_v25  ;;  %3080 = vmatprep.subr.bf16.mxu1 %v4478_v53  ;;  %v5317_v25 = vrot.slane %v5118_v19, 2  ;;  %v1039_v53 = vrot.slane %v958_v51, 2 }
 0x1d1   : > { %3292 = vmatprep.subr.bf16.mxu0 %v4481_v54  ;;  %v4539_v54 = vld [vmem:[%s4777_s15 + $0x6f0] ss:$8 sps:$4 sm:$0xff]  }
 0x1d3   : > { %3081 = vmatpush1.bf16.msra.mxu1 %v4476_v55  ;;  %v1025_v55 = vsel %vm1022_vm4, %v1023_v47, %v1024_v44  ;;  %v4562_v47 = vld [vmem:[%s4777_s15 + $0x334] ss:$8 sps:$4 sm:$0xff]  }
 0x1d4   : > { %3293 = vmatpush1.bf16.msra.mxu0 %v4479_v56  ;;  %3082 = vmatprep.subr.bf16.mxu1 %v4484_v48  ;;  %v1030_v56 = vsel %vm1022_vm4, %v1024_v44, %v5311_v50  ;;  %v957_v48 = vld [vmem:[#allocation2 + $0x40] sm:$0x3] }
 0x1d5   : > { %3294 = vmatprep.subr.bf16.mxu0 %v4487_v58  ;;  %v4544_v58 = vld [vmem:[%s4777_s15 + $0x304] ss:$8 sps:$4 sm:$0xff]   ;;  %v4554_v44 = vld [vmem:[%s4777_s15 + $0x320] ss:$8 sps:$4 sm:$0xff]  }
 0x1d7   : > { %3083 = vmatpush1.bf16.msra.mxu1 %v4482_v59  ;;  %v4547_v59 = vld [vmem:[%s4777_s15 + $0x704] ss:$8 sps:$4 sm:$0xff]  }
 0x1d8   : > { %3295 = vmatpush1.bf16.msra.mxu0 %v4485_v60  ;;  %3084 = vmatprep.subr.bf16.mxu1 %v4490_v61  ;;  %v4542_v60 = vld [vmem:[%s4777_s15 + $0x300] ss:$8 sps:$4 sm:$0xff]  }
 0x1d9   : > { %3296 = vmatprep.subr.bf16.mxu0 %v4493_v63  ;;  %v4545_v61 = vld [vmem:[%s4777_s15 + $0x700] ss:$8 sps:$4 sm:$0xff]   ;;  %v1200_v63 = vpack.c.bf16 %v5308_v49, %v5304_v43 }
 0x1db   : > { %3085 = vmatpush1.bf16.msra.mxu1 %v4488_v4  ;;  %v5330_v4 = vrot.slane %v5131_v33, 2 }
 0x1dc   : > { %3297 = vmatpush1.bf16.msra.mxu0 %v4491_v5  ;;  %3086 = vmatprep.subr.bf16.mxu1 %v4496_v6  ;;  %v1192_v5 = vpack.c.bf16 %v1030_v56, %v1025_v55  ;;  %v5335_v6 = vsel %vm1022_vm4, %v5225_v11, %v5317_v25  ;;  %v4572_v55 = vld [vmem:[%s4777_s15 + $0x350] ss:$8 sps:$4 sm:$0xff]   ;;  %v4583_v56 = vld [vmem:[%s4777_s15 + $0x764] ss:$8 sps:$4 sm:$0xff]  }
 0x1dd   : > { %3298 = vmatprep.subr.bf16.mxu0 %v4499_v7  ;;  %v1040_v7 = vsel %vm1022_vm4, %v5317_v25, %v1039_v53  ;;  %v4571_v53 = vld [vmem:[%s4777_s15 + $0x744] ss:$8 sps:$4 sm:$0xff]  }
 0x1df   : > { %3087 = vmatpush1.bf16.msra.mxu1 %v4494_v9  ;;  %v5339_v9 = vld [vmem:[#allocation2 + $0x48] sm:$0xff] }
 0x1e0   : > { %3299 = vmatpush1.bf16.msra.mxu0 %v4497_v10  ;;  %3088 = vmatprep.subr.bf16.mxu1 %v4502_v12  ;;  %v1037_v10 = vrot.slane %v957_v48, 2  ;;  %v960_v12 = vld [vmem:[#allocation2 + $0x8] sm:$0xf0]  ;;  %v4578_v48 = vld [vmem:[%s4777_s15 + $0x360] ss:$8 sps:$4 sm:$0xff]  }
 0x1e1   : > { %3300 = vmatprep.subr.bf16.mxu0 %v4505_v13  ;;  %v974_v13 = vld [vmem:[#allocation2 + $0x18] sm:$0xfe] }
 0x1e3   : > { %3089 = vmatpush1.bf16.msra.mxu1 %v4500_v14  ;;  %v4550_v14 = vld [vmem:[%s4777_s15 + $0x314] ss:$8 sps:$4 sm:$0xff]  }
 0x1e4   : > { %3301 = vmatpush1.bf16.msra.mxu0 %v4503_v15  ;;  %3090 = vmatprep.subr.bf16.mxu1 %v4508_v16  ;;  %v4553_v15 = vld [vmem:[%s4777_s15 + $0x714] ss:$8 sps:$4 sm:$0xff]  }
 0x1e5   : > { %3302 = vmatprep.subr.bf16.mxu0 %v4511_v17  ;;  %v4688_v16 = vld [vmem:[#allocation2 + $0x18] sm:$0xff] }
 0x1e6   : > { %v1058_v17 = vrot.slane %v4688_v16, 4  ;;  %v4599_v16 = vld [vmem:[%s4777_s15 + $0x790] ss:$8 sps:$4 sm:$0xff]  }
 0x1e7   : > { %3091 = vmatpush1.bf16.msra.mxu1 %v4506_v18  ;;  %v1211_v18 = vpack.c.bf16 %v1040_v7, %v5335_v6  ;;  %v4595_v7 = vld [vmem:[%s4777_s15 + $0x784] ss:$8 sps:$4 sm:$0xff]  }
 0x1e8   : > { %3303 = vmatpush1.bf16.msra.mxu0 %v4509_v21  ;;  %3092 = vmatprep.subr.bf16.mxu1 %v4514_v23  ;;  %v1219_v21 = vpack.c.bf16 %v5339_v9, %v5118_v19  ;;  %v5346_v23 = vld [vmem:[#allocation2 + $0x28] sm:$0xff]  ;;  %v1150_v19 = vrot.slane %v974_v13, 1  ;;  %v4598_v13 = vld [vmem:[%s4777_s15 + $0x394] ss:$8 sps:$4 sm:$0xff]  }
 0x1e9   : > { %3304 = vmatprep.subr.bf16.mxu0 %v4517_v24  ;;  %v1062_v24 = vrot.slane %v5346_v23, 4 }
 0x1ea   : > { %v1151_v42 = vsel %vm991_vm2, %v1150_v19, %v5134_v35  ;;  %v4560_v35 = vld [vmem:[%s4777_s15 + $0x330] ss:$8 sps:$4 sm:$0xff]  }
 0x1eb   : > { %3093 = vmatpush1.bf16.msra.mxu1 %v4512_v46  ;;  %v4548_v46 = vld [vmem:[%s4777_s15 + $0x310] ss:$8 sps:$4 sm:$0xff]  }
 0x1ec   : > { %3305 = vmatpush1.bf16.msra.mxu0 %v4515_v26  ;;  %3094 = vmatprep.subr.bf16.mxu1 %v4520_v28  ;;  %v5353_v26 = vsel %vm1022_vm4, %v5311_v50, %v5330_v4  ;;  %v1038_v28 = vsel %vm1022_vm4, %v5330_v4, %v1037_v10  ;;  %v4590_v10 = vld [vmem:[%s4777_s15 + $0x380] ss:$8 sps:$4 sm:$0xff]   ;;  %v4608_v19 = vld [vmem:[%s4777_s15 + $0x3b0] ss:$8 sps:$4 sm:$0xff]  }
 0x1ed   : > { %3306 = vmatprep.subr.bf16.mxu0 %v4523_v29  ;;  %v1057_v29 = vrot.slane %v960_v12, 4  ;;  %v4593_v12 = vld [vmem:[%s4777_s15 + $0x780] ss:$8 sps:$4 sm:$0xff]  }
 0x1ef   : > { %3095 = vmatpush1.bf16.msra.mxu1 %v4518_v30  ;;  %v4551_v30 = vld [vmem:[%s4777_s15 + $0x710] ss:$8 sps:$4 sm:$0xff]  }
 0x1f0   : > { %3307 = vmatpush1.bf16.msra.mxu0 %v4521_v31  ;;  %3096 = vmatprep.subr.bf16.mxu1 %v4526_v32  ;;  %v5358_v31 = vld [vmem:[#allocation2 + $0x40] sm:$0xff] }
 0x1f1   : > { %3308 = vmatprep.subr.bf16.mxu0 %v4529_v34  ;;  %v4556_v32 = vld [vmem:[%s4777_s15 + $0x324] ss:$8 sps:$4 sm:$0xff]  }
 0x1f2   : > { %v4559_v34 = vld [vmem:[%s4777_s15 + $0x724] ss:$8 sps:$4 sm:$0xff]  }
 0x1f3   : > { %3097 = vmatpush1.bf16.msra.mxu1 %v4524_v36  ;;  %v1210_v36 = vpack.c.bf16 %v1038_v28, %v5353_v26  ;;  %v4610_v28 = vld [vmem:[%s4777_s15 + $0x3b4] ss:$8 sps:$4 sm:$0xff]  }
 0x1f4   : > { %3309 = vmatpush1.bf16.msra.mxu0 %v4527_v37  ;;  %3098 = vmatprep.subr.bf16.mxu1 %v4532_v39  ;;  %v1063_v37 = vsel %vm1053_vm5, %v1058_v17, %v1062_v24  ;;  %v1218_v39 = vpack.c.bf16 %v5358_v31, %v5131_v33  ;;  %v4565_v33 = vld [vmem:[%s4777_s15 + $0x734] ss:$8 sps:$4 sm:$0xff]  }
 0x1f5   : > { %3310 = vmatprep.subr.bf16.mxu0 %v4535_v41  ;;  %v1059_v41 = vsel %vm1053_vm5, %v1057_v29, %v1058_v17  ;;  %v4604_v17 = vld [vmem:[%s4777_s15 + $0x3a4] ss:$8 sps:$4 sm:$0xff]   ;;  %v4613_v29 = vld [vmem:[%s4777_s15 + $0x7b4] ss:$8 sps:$4 sm:$0xff]  }
 0x1f6   : > { %v1195_v51 = vpack.c.bf16 %v1063_v37, %v1059_v41  ;;  %v4617_v37 = vld [vmem:[%s4777_s15 + $0x7c0] ss:$8 sps:$4 sm:$0xff]   ;;  %v4625_v41 = vld [vmem:[%s4777_s15 + $0x7d4] ss:$8 sps:$4 sm:$0xff]  }
 0x1f7   : > { %3099 = vmatpush1.bf16.msra.mxu1 %v4530_v27  ;;  %v4702_v27 = vmov 0  }
 0x1f8   : > { %3311 = vmatpush1.bf16.msra.mxu0 %v4533_v45  ;;  %3100 = vmatprep.subr.bf16.mxu1 %v4538_v40  ;;  %v4557_v45 = vld [vmem:[%s4777_s15 + $0x720] ss:$8 sps:$4 sm:$0xff]   ;;  %v1203_v40 = vpack.c.bf16 %v5222_v8, %v1151_v42  ;;  %v4574_v8 = vld [vmem:[%s4777_s15 + $0x354] ss:$8 sps:$4 sm:$0xff]  }
 0x1f9   : > { %3312 = vmatprep.subr.bf16.mxu0 %v4541_v52  ;;  %4253 = vset.pattern.permute.xlu1 %v4702_v27  ;;  %v4563_v52 = vld [vmem:[%s4777_s15 + $0x730] ss:$8 sps:$4 sm:$0xff]  }
 0x1fa   : > { %4252 = vset.pattern.permute.xlu0 %v4702_v27  ;;  %3461 = vperm.xlu1 %4253, %v4762_v2   ;;  %v4569_v2 = vld [vmem:[%s4777_s15 + $0x740] ss:$8 sps:$4 sm:$0xff]   ;;  %v973_v42 = vld [vmem:[#allocation2 + $0x10] sm:$0xfe] }
 0x1fb   : > { %3101 = vmatpush1.bf16.msra.mxu1 %v4536_v20  ;;  %3451 = vperm.xlu0 %4252, %v4752_v0   ;;  %v4568_v20 = vld [vmem:[%s4777_s15 + $0x344] ss:$8 sps:$4 sm:$0xff]   ;;  %v4566_v0 = vld [vmem:[%s4777_s15 + $0x340] ss:$8 sps:$4 sm:$0xff]   ;;  %v4620_v27 = vld [vmem:[%s4777_s15 + $0x3d0] ss:$8 sps:$4 sm:$0xff]  }
 0x1fc   : > { %3313 = vmatpush1.bf16.msra.mxu0 %v4539_v54  ;;  %3123 = vmatprep.subr.bf16.mxu1 %v4544_v58  ;;  %v4577_v54 = vld [vmem:[%s4777_s15 + $0x754] ss:$8 sps:$4 sm:$0xff]   ;;  %v4581_v58 = vld [vmem:[%s4777_s15 + $0x760] ss:$8 sps:$4 sm:$0xff]  }
 0x1fd   : > { %3335 = vmatprep.subr.bf16.mxu0 %v4547_v59  ;;  %v4586_v59 = vld [vmem:[%s4777_s15 + $0x374] ss:$8 sps:$4 sm:$0xff]  }
 0x1fe   : > { %3103 = vmatmul.mubr.bf16.vlgmr.msra.gmra.mrb[0].mxu1 %v1192_v5  ;;  %3466 = vperm.xlu1 %4253, %v4767_v3   ;;  %v4575_v3 = vld [vmem:[%s4777_s15 + $0x750] ss:$8 sps:$4 sm:$0xff]   ;;  %v4592_v5 = vld [vmem:[%s4777_s15 + $0x384] ss:$8 sps:$4 sm:$0xff]  }
 0x1ff   : > { %3315 = vmatmul.mubr.bf16.vlgmr.msra.gmra.mrb[0].mxu0 %v1200_v63  ;;  %3124 = vmatpush1.bf16.msra.mxu1 %v4542_v60  ;;  %v4589_v60 = vld [vmem:[%s4777_s15 + $0x774] ss:$8 sps:$4 sm:$0xff]   ;;  %v4587_v63 = vld [vmem:[%s4777_s15 + $0x770] ss:$8 sps:$4 sm:$0xff]  }
 0x200   : > { %3336 = vmatpush1.bf16.msra.mxu0 %v4545_v61  ;;  %3125 = vmatprep.subr.bf16.mxu1 %v4550_v14  ;;  %v4584_v61 = vld [vmem:[%s4777_s15 + $0x370] ss:$8 sps:$4 sm:$0xff]   ;;  %v4601_v14 = vld [vmem:[%s4777_s15 + $0x794] ss:$8 sps:$4 sm:$0xff]  }
 0x201   : > { %3337 = vmatprep.subr.bf16.mxu0 %v4553_v15  ;;  %3112 = vmatprep.mubr.bf16.mxu1 %v1211_v18  ;;  %v4596_v15 = vld [vmem:[%s4777_s15 + $0x390] ss:$8 sps:$4 sm:$0xff]   ;;  %v4607_v18 = vld [vmem:[%s4777_s15 + $0x7a4] ss:$8 sps:$4 sm:$0xff]  }
 0x202   : > { %3324 = vmatprep.mubr.bf16.mxu0 %v1219_v21  ;;  %3456 = vperm.xlu0 %4252, %v4757_v1   ;;  %v4580_v1 = vld [vmem:[%s4777_s15 + $0x364] ss:$8 sps:$4 sm:$0xff]   ;;  %v4602_v21 = vld [vmem:[%s4777_s15 + $0x3a0] ss:$8 sps:$4 sm:$0xff]  }
 0x203   : > { %3126 = vmatpush1.bf16.msra.mxu1 %v4548_v46  ;;  %v4605_v46 = vld [vmem:[%s4777_s15 + $0x7a0] ss:$8 sps:$4 sm:$0xff]  }
 0x204   : > { %3338 = vmatpush1.bf16.msra.mxu0 %v4551_v30  ;;  %3127 = vmatprep.subr.bf16.mxu1 %v4556_v32  ;;  %v4611_v30 = vld [vmem:[%s4777_s15 + $0x7b0] ss:$8 sps:$4 sm:$0xff]   ;;  %v4616_v32 = vld [vmem:[%s4777_s15 + $0x3c4] ss:$8 sps:$4 sm:$0xff]  }
 0x205   : > { %3339 = vmatprep.subr.bf16.mxu0 %v4559_v34  ;;  %v4619_v34 = vld [vmem:[%s4777_s15 + $0x7c4] ss:$8 sps:$4 sm:$0xff]  }
 0x206   : > { %3113 = vmatmul.mubr.bf16.gmra.mrb[4].mxu1 %v1210_v36  ;;  %v4614_v36 = vld [vmem:[%s4777_s15 + $0x3c0] ss:$8 sps:$4 sm:$0xff]  }
 0x207   : > { %3325 = vmatmul.mubr.bf16.gmra.mrb[4].mxu0 %v1218_v39  ;;  %3128 = vmatpush1.bf16.msra.mxu1 %v4554_v44  ;;  %v4622_v39 = vld [vmem:[%s4777_s15 + $0x3d4] ss:$8 sps:$4 sm:$0xff]   ;;  %v4623_v44 = vld [vmem:[%s4777_s15 + $0x7d0] ss:$8 sps:$4 sm:$0xff]  }
 0x208   : > { %3340 = vmatpush1.bf16.msra.mxu0 %v4557_v45  ;;  %3129 = vmatprep.subr.bf16.mxu1 %v4562_v47  ;;  %v4628_v45 = vld [vmem:[%s4777_s15 + $0x3e4] ss:$8 sps:$4 sm:$0xff]  }
 0x209   : > { %3341 = vmatprep.subr.bf16.mxu0 %v4565_v33  ;;  %3155 = vmatprep.mubr.bf16.mxu1 %v1195_v51  ;;  %v4631_v47 = vld [vmem:[%s4777_s15 + $0x7e4] ss:$8 sps:$4 sm:$0xff]   ;;  %v1148_v51 = vrot.slane %v973_v42, 1 }
 0x20a   : > { %3367 = vmatprep.mubr.bf16.mxu0 %v1203_v40  ;;  %v959_v33 = vld [vmem:[#allocation2] sm:$0xf0]  ;;  %v4626_v40 = vld [vmem:[%s4777_s15 + $0x3e0] ss:$8 sps:$4 sm:$0xff]  }
 0x20b   : > { %3130 = vmatpush1.bf16.msra.mxu1 %v4560_v35  ;;  %v4629_v35 = vld [vmem:[%s4777_s15 + $0x7e0] ss:$8 sps:$4 sm:$0xff]  }
 0x20c   : > { %3342 = vmatpush1.bf16.msra.mxu0 %v4563_v52  ;;  %3131 = vmatprep.subr.bf16.mxu1 %v4568_v20  ;;  %v1055_v52 = vrot.slane %v5304_v43, 4  ;;  %v1054_v20 = vrot.slane %v959_v33, 4  ;;  %v1149_v43 = vsel %vm991_vm2, %v1148_v51, %v5187_v38 }
 0x20d   : > { %3343 = vmatprep.subr.bf16.mxu0 %v4571_v53  ;;  %v1060_v53 = vrot.slane %v5308_v49, 4  ;;  %v4632_v49 = vld [vmem:[%s4777_s15 + $0x3f0] ss:$8 sps:$4 sm:$0xff]  }
 0x20f   : > { %3132 = vmatpush1.bf16.msra.mxu1 %v4566_v0  ;;  %v962_v0 = vld [vmem:[#allocation2 + $0x48] sm:$0xf] }
 0x210   : > { %3344 = vmatpush1.bf16.msra.mxu0 %v4569_v2  ;;  %3133 = vmatprep.subr.bf16.mxu1 %v4574_v8  ;;  %v976_v2 = vld [vmem:[#allocation2 + $0x58] sm:$0x1]  ;;  %v4634_v8 = vld [vmem:[%s4777_s15 + $0x3f4] ss:$8 sps:$4 sm:$0xff]  }
 0x211   : > { %3345 = vmatprep.subr.bf16.mxu0 %v4577_v54  ;;  %v4637_v54 = vld [vmem:[%s4777_s15 + $0x7f4] ss:$8 sps:$4 sm:$0xff]  }
 0x213   : > { %3134 = vmatpush1.bf16.msra.mxu1 %v4572_v55  ;;  %v4690_v55 = vld [vmem:[#allocation2 + $0x38] sm:$0xff] }
 0x214   : > { %3346 = vmatpush1.bf16.msra.mxu0 %v4575_v3  ;;  %3135 = vmatprep.subr.bf16.mxu1 %v4580_v1  ;;  %v1066_v3 = vrot.slane %v4690_v55, 4  ;;  %v1154_v1 = vrot.slane %v5339_v9, 1  ;;  %v4665_v55 = vld [vmem:[%s4777_s15 + $0x890] ss:$8 sps:$4 sm:$0xff]  }
 0x215   : > { %3347 = vmatprep.subr.bf16.mxu0 %v4583_v56  ;;  %v1070_v56 = vrot.slane %v962_v0, 4  ;;  %v4659_v0 = vld [vmem:[%s4777_s15 + $0x870] ss:$8 sps:$4 sm:$0xff]  }
 0x216   : > { %v1067_v38 = vsel %vm1053_vm5, %v1062_v24, %v1066_v3  ;;  %v980_v24 = vld [vmem:[#allocation2 + $0x58] sm:$0x3] }
 0x217   : > { %3136 = vmatpush1.bf16.msra.mxu1 %v4578_v48  ;;  %v1158_v48 = vrot.slane %v976_v2, 1  ;;  %v4664_v2 = vld [vmem:[%s4777_s15 + $0x884] ss:$8 sps:$4 sm:$0xff]  }
 0x218   : > { %3348 = vmatpush1.bf16.msra.mxu0 %v4581_v58  ;;  %3137 = vmatprep.subr.bf16.mxu1 %v4586_v59  ;;  %v4635_v58 = vld [vmem:[%s4777_s15 + $0x7f0] ss:$8 sps:$4 sm:$0xff]   ;;  %v1056_v59 = vsel %vm1053_vm5, %v1054_v20, %v1055_v52  ;;  %v4656_v20 = vld [vmem:[%s4777_s15 + $0x860] ss:$8 sps:$4 sm:$0xff]  }
 0x219   : > { %3349 = vmatprep.subr.bf16.mxu0 %v4589_v60  ;;  %v1061_v60 = vsel %vm1053_vm5, %v1055_v52, %v1060_v53  ;;  %v4658_v52 = vld [vmem:[%s4777_s15 + $0x864] ss:$8 sps:$4 sm:$0xff]  }
 0x21b   : > { %3138 = vmatpush1.bf16.msra.mxu1 %v4584_v61  ;;  %v961_v61 = vld [vmem:[#allocation2 + $0x40] sm:$0xf] }
 0x21c   : > { %3350 = vmatpush1.bf16.msra.mxu0 %v4587_v63  ;;  %3139 = vmatprep.subr.bf16.mxu1 %v4592_v5  ;;  %v4640_v63 = vld [vmem:[%s4777_s15 + $0x804] ss:$8 sps:$4 sm:$0xff]   ;;  %v975_v5 = vld [vmem:[#allocation2 + $0x50] sm:$0x1] }
 0x21d   : > { %3351 = vmatprep.subr.bf16.mxu0 %v4595_v7  ;;  %v1202_v7 = vpack.c.bf16 %v5239_v22, %v1149_v43  ;;  %v1152_v22 = vrot.slane %v5358_v31, 1  ;;  %v1156_v23 = vrot.slane %v975_v5, 1  ;;  %v4673_v43 = vld [vmem:[%s4777_s15 + $0x8b4] ss:$8 sps:$4 sm:$0xff]  }
 0x21f   : > { %3140 = vmatpush1.bf16.msra.mxu1 %v4590_v10  ;;  %v1155_v10 = vsel %vm991_vm2, %v5207_v57, %v1154_v1  ;;  %v4643_v57 = vld [vmem:[%s4777_s15 + $0x814] ss:$8 sps:$4 sm:$0xff]  }
 0x220   : > { %3352 = vmatpush1.bf16.msra.mxu0 %v4593_v12  ;;  %3141 = vmatprep.subr.bf16.mxu1 %v4598_v13  ;;  %v4691_v12 = vld [vmem:[#allocation2 + $0x30] sm:$0xff] }
 0x221   : > { %3353 = vmatprep.subr.bf16.mxu0 %v4601_v14  ;;  %v1064_v13 = vrot.slane %v4691_v12, 4  ;;  %v1194_v14 = vpack.c.bf16 %v1061_v60, %v1056_v59  ;;  %v4677_v59 = vld [vmem:[%s4777_s15 + $0x8d0] ss:$8 sps:$4 sm:$0xff]   ;;  %v4685_v12 = vld [vmem:[%s4777_s15 + $0x8f4] ss:$8 sps:$4 sm:$0xff]  }
 0x222   : > { %v977_v60 = vld [vmem:[#allocation2 + $0x10] sm:$0xfc] }
 0x223   : > { %3142 = vmatpush1.bf16.msra.mxu1 %v4596_v15  ;;  %v4638_v15 = vld [vmem:[%s4777_s15 + $0x800] ss:$8 sps:$4 sm:$0xff]   ;;  %v1170_v5 = vrot.slane %v977_v60, 2 }
 0x224   : > { %3354 = vmatpush1.bf16.msra.mxu0 %v4599_v16  ;;  %3143 = vmatprep.subr.bf16.mxu1 %v4604_v17  ;;  %v1071_v16 = vsel %vm1053_vm5, %v1066_v3, %v1070_v56  ;;  %v1159_v17 = vsel %vm991_vm2, %v1154_v1, %v1158_v48  ;;  %v4670_v3 = vld [vmem:[%s4777_s15 + $0x8a4] ss:$8 sps:$4 sm:$0xff]   ;;  %v4668_v1 = vld [vmem:[%s4777_s15 + $0x8a0] ss:$8 sps:$4 sm:$0xff]   ;;  %v4671_v56 = vld [vmem:[%s4777_s15 + $0x8b0] ss:$8 sps:$4 sm:$0xff]  }
 0x225   : > { %3355 = vmatprep.subr.bf16.mxu0 %v4607_v18  ;;  %v1068_v18 = vrot.slane %v961_v61, 4  ;;  %v4676_v48 = vld [vmem:[%s4777_s15 + $0x8c4] ss:$8 sps:$4 sm:$0xff]  }
 0x226   : > { %v4682_v61 = vld [vmem:[%s4777_s15 + $0x8e4] ss:$8 sps:$4 sm:$0xff]  }
 0x227   : > { %3144 = vmatpush1.bf16.msra.mxu1 %v4602_v21  ;;  %v978_v21 = vld [vmem:[#allocation2 + $0x18] sm:$0xfc] }
 0x228   : > { %3356 = vmatpush1.bf16.msra.mxu0 %v4605_v46  ;;  %3145 = vmatprep.subr.bf16.mxu1 %v4610_v28  ;;  %v1213_v46 = vpack.c.bf16 %v1071_v16, %v1067_v38  ;;  %v1221_v28 = vpack.c.bf16 %v1159_v17, %v1155_v10  ;;  %v4680_v38 = vld [vmem:[%s4777_s15 + $0x8e0] ss:$8 sps:$4 sm:$0xff]  }
 0x229   : > { %3357 = vmatprep.subr.bf16.mxu0 %v4613_v29  ;;  %v1065_v29 = vsel %vm1053_vm5, %v1060_v53, %v1064_v13  ;;  %v4661_v53 = vld [vmem:[%s4777_s15 + $0x874] ss:$8 sps:$4 sm:$0xff]  }
 0x22b   : > { %3146 = vmatpush1.bf16.msra.mxu1 %v4608_v19  ;;  %v1069_v19 = vsel %vm1053_vm5, %v1064_v13, %v1068_v18  ;;  %v1171_v13 = vsel %vm1022_vm4, %v1170_v5, %v5311_v50  ;;  %v1514_v18 = vlaneseq }
 0x22c   : > { %3358 = vmatpush1.bf16.msra.mxu0 %v4611_v30  ;;  %3147 = vmatprep.subr.bf16.mxu1 %v4616_v32  ;;  %v1172_v30 = vrot.slane %v978_v21, 2  ;;  %v1176_v32 = vrot.slane %v5339_v9, 2  ;;  %v1212_v42 = vpack.c.bf16 %v1069_v19, %v1065_v29 }
 0x22d   : > { %3359 = vmatprep.subr.bf16.mxu0 %v4619_v34  ;;  %v1180_v34 = vrot.slane %v980_v24, 2  ;;  %v1515_v50 = vshrl.u32 %v1514_v18, 7 }
 0x22e   : > { %v1173_v9 = vsel %vm1022_vm4, %v1172_v30, %v5225_v11  ;;  %v4647_v11 = vld [vmem:[%s4777_s15 + $0x830] ss:$8 sps:$4 sm:$0xff]  }
 0x22f   : > { %3148 = vmatpush1.bf16.msra.mxu1 %v4614_v36  ;;  %v4641_v36 = vld [vmem:[%s4777_s15 + $0x810] ss:$8 sps:$4 sm:$0xff]   ;;  %v1205_v33 = vpack.c.bf16 %v5335_v6, %v1173_v9  ;;  %v4655_v6 = vld [vmem:[%s4777_s15 + $0x854] ss:$8 sps:$4 sm:$0xff]   ;;  %v1516_v24 = vsub.s32 0, %v1515_v50 }
 0x230   : > { %3360 = vmatpush1.bf16.msra.mxu0 %v4617_v37  ;;  %3149 = vmatprep.subr.bf16.mxu1 %v4622_v39  ;;  %v1153_v37 = vsel %vm991_vm2, %v5213_v62, %v1152_v22  ;;  %v1157_v39 = vsel %vm991_vm2, %v1152_v22, %v1156_v23  ;;  %v4644_v62 = vld [vmem:[%s4777_s15 + $0x820] ss:$8 sps:$4 sm:$0xff]  }
 0x231   : > { %3361 = vmatprep.subr.bf16.mxu0 %v4625_v41  ;;  %v4646_v41 = vld [vmem:[%s4777_s15 + $0x824] ss:$8 sps:$4 sm:$0xff]  }
 0x233   : > { %3150 = vmatpush1.bf16.msra.mxu1 %v4620_v27  ;;  %v1220_v27 = vpack.c.bf16 %v1157_v39, %v1153_v37 }
 0x234   : > { %3362 = vmatpush1.bf16.msra.mxu0 %v4623_v44  ;;  %3151 = vmatprep.subr.bf16.mxu1 %v4628_v45  ;;  %v1177_v44 = vsel %vm1022_vm4, %v5317_v25, %v1176_v32  ;;  %v1181_v45 = vsel %vm1022_vm4, %v1176_v32, %v1180_v34  ;;  %v4652_v25 = vld [vmem:[%s4777_s15 + $0x844] ss:$8 sps:$4 sm:$0xff]  }
 0x235   : > { %3363 = vmatprep.subr.bf16.mxu0 %v4631_v47  ;;  %v4649_v47 = vld [vmem:[%s4777_s15 + $0x834] ss:$8 sps:$4 sm:$0xff]   ;;  %v1223_v51 = vpack.c.bf16 %v1181_v45, %v1177_v44 }
 0x237   : > { %3152 = vmatpush1.bf16.msra.mxu1 %v4626_v40  ;;  %v4650_v40 = vld [vmem:[%s4777_s15 + $0x840] ss:$8 sps:$4 sm:$0xff]  }
 0x238   : > { %3364 = vmatpush1.bf16.msra.mxu0 %v4629_v35  ;;  %3153 = vmatprep.subr.bf16.mxu1 %v4634_v8  ;;  %v4653_v35 = vld [vmem:[%s4777_s15 + $0x850] ss:$8 sps:$4 sm:$0xff]   ;;  %v4662_v8 = vld [vmem:[%s4777_s15 + $0x880] ss:$8 sps:$4 sm:$0xff]  }
 0x239   : > { %3365 = vmatprep.subr.bf16.mxu0 %v4637_v54  ;;  %v4667_v54 = vld [vmem:[%s4777_s15 + $0x894] ss:$8 sps:$4 sm:$0xff]  }
 0x23b   : > { %3154 = vmatpush1.bf16.msra.mxu1 %v4632_v49  ;;  %v4674_v49 = vld [vmem:[%s4777_s15 + $0x8c0] ss:$8 sps:$4 sm:$0xff]  }
 0x23c   : > { %3366 = vmatpush1.bf16.msra.mxu0 %v4635_v58  ;;  %4026 = vmatprep.subr.bf16.mxu1 %v4640_v63  ;;  %v4679_v58 = vld [vmem:[%s4777_s15 + $0x8d4] ss:$8 sps:$4 sm:$0xff]  }
 0x23d   : > { %3388 = vmatprep.subr.bf16.mxu0 %v4640_v63  ;;  %v979_v63 = vld [vmem:[#allocation2 + $0x50] sm:$0x3] }
 0x23e   : > { %3156 = vmatmul.mubr.bf16.vlgmr.msra.gmra.mrb[0].mxu1 %v1194_v14  ;;  %v1178_v10 = vrot.slane %v979_v63, 2  ;;  %v4683_v14 = vld [vmem:[%s4777_s15 + $0x8f0] ss:$8 sps:$4 sm:$0xff]  }
 0x23f   : > { %3368 = vmatmul.mubr.bf16.vlgmr.msra.gmra.mrb[0].mxu0 %v1202_v7  ;;  %4042 = vmatpush1.bf16.msra.mxu1 %v4638_v15  ;;  %v1174_v7 = vrot.slane %v5358_v31, 2  ;;  %v1204_v31 = vpack.c.bf16 %v5353_v26, %v1171_v13 }
 0x240   : > { %3389 = vmatpush1.bf16.msra.mxu0 %v4638_v15  ;;  %4027 = vmatprep.subr.bf16.mxu1 %v4643_v57 }
 0x241   : > { %3390 = vmatprep.subr.bf16.mxu0 %v4643_v57  ;;  %3165 = vmatprep.mubr.bf16.mxu1 %v1213_v46  ;;  %v1175_v15 = vsel %vm1022_vm4, %v5330_v4, %v1174_v7  ;;  %v1179_v16 = vsel %vm1022_vm4, %v1174_v7, %v1178_v10  ;;  %v1512_v4 = vld [vmem:[%s4772_s12] sm:$0x3]  ;;  %v1520_v46 = vsub.s32 1, %v1515_v50 }
 0x242   : > { %3377 = vmatprep.mubr.bf16.mxu0 %v1221_v28  ;;  %v1222_v17 = vpack.c.bf16 %v1179_v16, %v1175_v15  ;;  %v1517_v28 = vrot.slane %v1512_v4, %v1516_v24 }
 0x243   : > { %4043 = vmatpush1.bf16.msra.mxu1 %v4641_v36  ;;  %v1521_v29 = vrot.slane %v1512_v4, %v1520_v46 }
 0x244   : > { %3391 = vmatpush1.bf16.msra.mxu0 %v4641_v36  ;;  %4028 = vmatprep.subr.bf16.mxu1 %v4646_v41 }
 0x245   : > { %3392 = vmatprep.subr.bf16.mxu0 %v4646_v41 }
 0x246   : > { %3166 = vmatmul.mubr.bf16.gmra.mrb[4].mxu1 %v1212_v42 }
 0x247   : > { %3378 = vmatmul.mubr.bf16.gmra.mrb[4].mxu0 %v1220_v27  ;;  %4044 = vmatpush1.bf16.msra.mxu1 %v4644_v62 }
 0x248   : > { %3393 = vmatpush1.bf16.msra.mxu0 %v4644_v62  ;;  %4029 = vmatprep.subr.bf16.mxu1 %v4649_v47 }
 0x249   : > { %3394 = vmatprep.subr.bf16.mxu0 %v4649_v47  ;;  %3420 = vmatprep.mubr.bf16.mxu0 %v1205_v33 }
 0x24a   : > { %3430 = vmatprep.mubr.bf16.mxu1 %v1223_v51 }
 0x24b   : > { %4045 = vmatpush1.bf16.msra.mxu1 %v4647_v11 }
 0x24c   : > { %3395 = vmatpush1.bf16.msra.mxu0 %v4647_v11  ;;  %4030 = vmatprep.subr.bf16.mxu1 %v4652_v25 }
 0x24d   : > { %3396 = vmatprep.subr.bf16.mxu0 %v4652_v25 }
 0x24f   : > { %4046 = vmatpush1.bf16.msra.mxu1 %v4650_v40 }
 0x250   : > { %3397 = vmatpush1.bf16.msra.mxu0 %v4650_v40  ;;  %4031 = vmatprep.subr.bf16.mxu1 %v4655_v6 }
 0x251   : > { %3398 = vmatprep.subr.bf16.mxu0 %v4655_v6 }
 0x253   : > { %4047 = vmatpush1.bf16.msra.mxu1 %v4653_v35 }
 0x254   : > { %3399 = vmatpush1.bf16.msra.mxu0 %v4653_v35  ;;  %4032 = vmatprep.subr.bf16.mxu1 %v4658_v52 }
 0x255   : > { %3400 = vmatprep.subr.bf16.mxu0 %v4658_v52 }
 0x257   : > { %4048 = vmatpush1.bf16.msra.mxu1 %v4656_v20 }
 0x258   : > { %3401 = vmatpush1.bf16.msra.mxu0 %v4656_v20  ;;  %4033 = vmatprep.subr.bf16.mxu1 %v4661_v53 }
 0x259   : > { %3402 = vmatprep.subr.bf16.mxu0 %v4661_v53 }
 0x25b   : > { %4049 = vmatpush1.bf16.msra.mxu1 %v4659_v0 }
 0x25c   : > { %3403 = vmatpush1.bf16.msra.mxu0 %v4659_v0  ;;  %4034 = vmatprep.subr.bf16.mxu1 %v4664_v2 }
 0x25d   : > { %3404 = vmatprep.subr.bf16.mxu0 %v4664_v2 }
 0x25f   : > { %4050 = vmatpush1.bf16.msra.mxu1 %v4662_v8 }
 0x260   : > { %3405 = vmatpush1.bf16.msra.mxu0 %v4662_v8  ;;  %4035 = vmatprep.subr.bf16.mxu1 %v4667_v54 }
 0x261   : > { %3406 = vmatprep.subr.bf16.mxu0 %v4667_v54 }
 0x263   : > { %4051 = vmatpush1.bf16.msra.mxu1 %v4665_v55 }
 0x264   : > { %3407 = vmatpush1.bf16.msra.mxu0 %v4665_v55  ;;  %4036 = vmatprep.subr.bf16.mxu1 %v4670_v3 }
 0x265   : > { %3408 = vmatprep.subr.bf16.mxu0 %v4670_v3 }
 0x267   : > { %4052 = vmatpush1.bf16.msra.mxu1 %v4668_v1 }
 0x268   : > { %3409 = vmatpush1.bf16.msra.mxu0 %v4668_v1  ;;  %4037 = vmatprep.subr.bf16.mxu1 %v4673_v43 }
 0x269   : > { %3410 = vmatprep.subr.bf16.mxu0 %v4673_v43 }
 0x26b   : > { %4053 = vmatpush1.bf16.msra.mxu1 %v4671_v56 }
 0x26c   : > { %3411 = vmatpush1.bf16.msra.mxu0 %v4671_v56  ;;  %4038 = vmatprep.subr.bf16.mxu1 %v4676_v48 }
 0x26d   : > { %3412 = vmatprep.subr.bf16.mxu0 %v4676_v48 }
 0x26f   : > { %4054 = vmatpush1.bf16.msra.mxu1 %v4674_v49 }
 0x270   : > { %3413 = vmatpush1.bf16.msra.mxu0 %v4674_v49  ;;  %4039 = vmatprep.subr.bf16.mxu1 %v4679_v58 }
 0x271   : > { %3414 = vmatprep.subr.bf16.mxu0 %v4679_v58 }
 0x273   : > { %4055 = vmatpush1.bf16.msra.mxu1 %v4677_v59 }
 0x274   : > { %3415 = vmatpush1.bf16.msra.mxu0 %v4677_v59  ;;  %4040 = vmatprep.subr.bf16.mxu1 %v4682_v61 }
 0x275   : > { %3416 = vmatprep.subr.bf16.mxu0 %v4682_v61 }
 0x277   : > { %4056 = vmatpush1.bf16.msra.mxu1 %v4680_v38 }
 0x278   : > { %3417 = vmatpush1.bf16.msra.mxu0 %v4680_v38  ;;  %4041 = vmatprep.subr.bf16.mxu1 %v4685_v12 }
 0x279   : > { %3418 = vmatprep.subr.bf16.mxu0 %v4685_v12  ;;  %v3462_v51 = vpop.permute.xlu1 %3461 }
 0x27a   : > { %v3452_v11 = vpop.permute.xlu0 %3451 }
 0x27b   : > { %4057 = vmatpush1.bf16.msra.mxu1 %v4683_v14 }
 0x27c   : > { %3419 = vmatpush1.bf16.msra.mxu0 %v4683_v14 }
 0x27d   : > { %v3467_v14 = vpop.permute.xlu1 %3466 }
 0x27e   : > { %3431 = vmatmul.mubr.bf16.vlgmr.msra.gmra.mrb[8].mxu1 %v1222_v17 }
 0x27f   : > { %3421 = vmatmul.mubr.bf16.vlgmr.msra.gmra.mrb[0].mxu0 %v1204_v31 }
 0x281   : > { %v3457_v15 = vpop.permute.xlu0 %3456 }
 0x311   : > { %v3157_v22 = vpop.f32.mrb[0].mxu1 }
 0x312   : > { %v3159_v23 = vpop.f32.mrb[1].mxu1  ;;  %v4058_v33 = vadd.f32 %v3157_v22, %v1517_v28 }
 0x313   : > { %v3161_v21 = vpop.f32.mrb[2].mxu1  ;;  %v4060_v25 = vadd.f32 %v3159_v23, %v1521_v29 }
 0x314   : > { %v3163_v57 = vpop.f32.mrb[3].mxu1  ;;  %v4062_v35 = vadd.f32 %v3161_v21, %v1517_v28 }
 0x315   : > { %v4064_v2 = vadd.f32 %v3163_v57, %v1521_v29 }
 0x319   : > { %v3167_v19 = vpop.f32.mrb[4].mxu1 }
 0x31a   : > { %v3379_v30 = vpop.f32.mrb[4].mxu0  ;;  %v4066_v32 = vadd.f32 %v3167_v19, %v1517_v28  ;;  %v3169_v26 = vpop.f32.mrb[5].mxu1 }
 0x31b   : > { %v3381_v34 = vpop.f32.mrb[5].mxu0  ;;  %v4069_v36 = vadd.f32 %v3169_v26, %v1521_v29  ;;  %v3171_v37 = vpop.f32.mrb[6].mxu1 }
 0x31c   : > { %v3383_v39 = vpop.f32.mrb[6].mxu0  ;;  %v4067_v41 = vadd.f32 %v4066_v32, %v3379_v30  ;;  %v4072_v42 = vadd.f32 %v3171_v37, %v1517_v28  ;;  %v3173_v27 = vpop.f32.mrb[7].mxu1 }
 0x31d   : > { %v3385_v9 = vpop.f32.mrb[7].mxu0  ;;  %v4070_v44 = vadd.f32 %v4069_v36, %v3381_v34  ;;  %v4075_v45 = vadd.f32 %v3173_v27, %v1521_v29 }
 0x31e   : > { %v4073_v62 = vadd.f32 %v4072_v42, %v3383_v39 }
 0x31f   : > { %v4076_v47 = vadd.f32 %v4075_v45, %v3385_v9 }
 0x351   : > { %v3432_v6 = vpop.f32.mrb[8].mxu1 }
 0x352   : > { %v3422_v40 = vpop.f32.mrb[0].mxu0  ;;  %v4068_v20 = vadd.f32 %v4067_v41, %v3432_v6  ;;  %v3434_v0 = vpop.f32.mrb[9].mxu1 }
 0x353   : > { %v4059_v52 = vadd.f32 %v4058_v33, %v3422_v40  ;;  %v3424_v53 = vpop.f32.mrb[1].mxu0  ;;  %v4071_v54 = vadd.f32 %v4070_v44, %v3434_v0  ;;  %v3436_v3 = vpop.f32.mrb[10].mxu1 }
 0x354   : > { %v4061_v8 = vadd.f32 %v4060_v25, %v3424_v53  ;;  %v3426_v55 = vpop.f32.mrb[2].mxu0  ;;  %v3445_v43 = vmax.f32 %v4068_v20, 0.0  ;;  %v4074_v48 = vadd.f32 %v4073_v62, %v3436_v3  ;;  %v3438_v58 = vpop.f32.mrb[11].mxu1 }
 0x355   : > { %v3441_v1 = vmax.f32 %v4059_v52, 0.0  ;;  %v4063_v56 = vadd.f32 %v4062_v35, %v3426_v55  ;;  %v3428_v49 = vpop.f32.mrb[3].mxu0  ;;  %v3446_v60 = vmax.f32 %v4071_v54, 0.0  ;;  %v4077_v63 = vadd.f32 %v4076_v47, %v3438_v58 }
 0x356   : > { %v3442_v59 = vmax.f32 %v4061_v8, 0.0  ;;  %v4065_v61 = vadd.f32 %v4064_v2, %v3428_v49  ;;  %v3473_v7 = vmul.f32 %v3462_v51, %v3445_v43  ;;  %v3447_v10 = vmax.f32 %v4074_v48, 0.0 }
 0x357   : > { %v3469_v5 = vmul.f32 %v3452_v11, %v3441_v1  ;;  %v3443_v38 = vmax.f32 %v4063_v56, 0.0  ;;  %v3474_v13 = vmul.f32 %v3462_v51, %v3446_v60  ;;  %v3448_v31 = vmax.f32 %v4077_v63, 0.0 }
 0x358   : > { %v3470_v12 = vmul.f32 %v3452_v11, %v3442_v59  ;;  %v3444_v16 = vmax.f32 %v4065_v61, 0.0  ;;  %v3475_v18 = vmul.f32 %v3467_v14, %v3447_v10  ;;  %v3492_v24 = vrot.slane %v3473_v7, 3 }
 0x359   : > { %v3486_v17 = vrot.slane %v3469_v5, 3  ;;  %v3471_v50 = vmul.f32 %v3457_v15, %v3443_v38  ;;  %v3476_v21 = vmul.f32 %v3467_v14, %v3448_v31  ;;  %v3494_v46 = vrot.slane %v3474_v13, 3 }
 0x35a   : > { %v3487_v22 = vrot.slane %v3470_v12, 3  ;;  %v3472_v23 = vmul.f32 %v3457_v15, %v3444_v16  ;;  %v3496_v57 = vrot.slane %v3475_v18, 3 }
 0x35b   : > { %3510 = vst [vmem:[#allocation2] sm:$0xe0] %v3486_v17  ;;  %v3488_v4 = vrot.slane %v3471_v50, 3  ;;  %v3498_v29 = vrot.slane %v3476_v21, 3 }
 0x35c   : > { %3511 = vst [vmem:[#allocation2 + $0x8] sm:$0xe0] %v3487_v22  ;;  %v3490_v28 = vrot.slane %v3472_v23, 3  ;;  %v3497_v19 = vsel %vm3485_vm6, %v3492_v24, %v3496_v57  ;;  %3518 = vst [vmem:[#allocation2 + $0x40] sm:$0x1f] %v3496_v57 }
 0x35d   : > { %v3489_v30 = vsel %vm3485_vm6, %v3486_v17, %v3488_v4  ;;  %v3493_v32 = vsel %vm3485_vm6, %v3488_v4, %v3492_v24  ;;  %3516 = vst [vmem:[#allocation2 + $0x30] sm:$0xff] %v3497_v19  ;;  %v3499_v36 = vsel %vm3485_vm6, %v3494_v46, %v3498_v29  ;;  %3519 = vst [vmem:[#allocation2 + $0x48] sm:$0x1f] %v3498_v29 }
 0x35e   : > { %3512 = vst [vmem:[#allocation2 + $0x10] sm:$0xff] %v3489_v30  ;;  %3514 = vst [vmem:[#allocation2 + $0x20] sm:$0xff] %v3493_v32  ;;  %v3491_v26 = vsel %vm3485_vm6, %v3487_v22, %v3490_v28  ;;  %v3495_v34 = vsel %vm3485_vm6, %v3490_v28, %v3494_v46 }
 0x35f   : > { %3513 = vst [vmem:[#allocation2 + $0x18] sm:$0xff] %v3491_v26  ;;  %3515 = vst [vmem:[#allocation2 + $0x28] sm:$0xff] %v3495_v34 }
 0x360   : > { %3517 = vst [vmem:[#allocation2 + $0x38] sm:$0xff] %v3499_v36 }
 0x361 PF: > { %p4003_p7 = scmp.ne.s32.totalorder %s4744_s22, 5 }
 0x362   : > { %v3524_v37 = vld [vmem:[#allocation2] sm:$0xe0] (!%p4003_p7)  ;;  %vm3544_vm7 = vcmask (!%p4003_p7), 1042432  }
 0x363   : > { %3523 = sbr.rel (%p4003_p7) target bundleno = 877 (0x36d), region = 56  ;;  %v3525_v41 = vld [vmem:[#allocation2 + $0x8] sm:$0xe0] (!%p4003_p7)  ;;  %v3545_v42 = vrot.slane (!%p4003_p7), %v3524_v37, 5  ;;  %v3532_v52 = vld [vmem:[#allocation2 + $0x40] sm:$0x1f] (!%p4003_p7) }
 0x364   : > { %v3548_v44 = vrot.slane (!%p4003_p7), %v3525_v41, 5  ;;  %v3530_v11 = vld [vmem:[#allocation2 + $0x30] sm:$0xff] (!%p4003_p7)  ;;  %v3533_v20 = vld [vmem:[#allocation2 + $0x48] sm:$0x1f] (!%p4003_p7)  ;;  %v3559_v8 = vrot.slane (!%p4003_p7), %v3532_v52, 5 }
 0x365   : > { %v3526_v39 = vld [vmem:[#allocation2 + $0x10] sm:$0xff] (!%p4003_p7)  ;;  %v3528_v45 = vld [vmem:[#allocation2 + $0x20] sm:$0xff] (!%p4003_p7)  ;;  %v3555_v6 = vrot.slane (!%p4003_p7), %v3530_v11, 5  ;;  %v3561_v3 = vrot.slane (!%p4003_p7), %v3533_v20, 5 }
 0x366   : > { %v3546_v27 = vrot.slane (!%p4003_p7), %v3526_v39, 5  ;;  %v3527_v9 = vld [vmem:[#allocation2 + $0x18] sm:$0xff] (!%p4003_p7)  ;;  %v3529_v62 = vld [vmem:[#allocation2 + $0x28] sm:$0xff] (!%p4003_p7)  ;;  %v3551_v33 = vrot.slane (!%p4003_p7), %v3528_v45, 5 }
 0x367   : > { %v3549_v47 = vrot.slane (!%p4003_p7), %v3527_v9, 5  ;;  %v3553_v51 = vrot.slane (!%p4003_p7), %v3529_v62, 5  ;;  %v3531_v25 = vld [vmem:[#allocation2 + $0x38] sm:$0xff] (!%p4003_p7)  ;;  %v3560_v1 = vsel (!%p4003_p7), %vm3544_vm7, %v3555_v6, %v3559_v8 }
 0x368   : > { %v3547_v40 = vsel (!%p4003_p7), %vm3544_vm7, %v3545_v42, %v3546_v27  ;;  %v3557_v35 = vrot.slane (!%p4003_p7), %v3531_v25, 5  ;;  %v3552_v0 = vsel (!%p4003_p7), %vm3544_vm7, %v3546_v27, %v3551_v33  ;;  %v3556_v54 = vsel (!%p4003_p7), %vm3544_vm7, %v3551_v33, %v3555_v6  ;;  %3577 = vst [vmem:[%s5546_s6 + $0x30] sm:$0xff] (!%p4003_p7), %v3560_v1 }
 0x369   : > { %3571 = vst [vmem:[%s5546_s6] sm:$0xff] (!%p4003_p7), %v3547_v40  ;;  %v3550_v53 = vsel (!%p4003_p7), %vm3544_vm7, %v3548_v44, %v3549_v47  ;;  %v3554_v2 = vsel (!%p4003_p7), %vm3544_vm7, %v3549_v47, %v3553_v51  ;;  %3573 = vst [vmem:[%s5546_s6 + $0x10] sm:$0xff] (!%p4003_p7), %v3552_v0 }
 0x36a   : > { %3572 = vst [vmem:[%s5546_s6 + $0x8] sm:$0xff] %v3550_v53  ;;  %3574 = vst [vmem:[%s5546_s6 + $0x18] sm:$0xff] %v3554_v2  ;;  %v3558_v55 = vsel %vm3544_vm7, %v3553_v51, %v3557_v35  ;;  %v3562_v43 = vsel %vm3544_vm7, %v3557_v35, %v3561_v3 }
 0x36b   : > { %3575 = vst [vmem:[%s5546_s6 + $0x20] sm:$0xff] %v3556_v54  ;;  %3576 = vst [vmem:[%s5546_s6 + $0x28] sm:$0xff] %v3558_v55 }
 0x36c   : > { %3578 = vst [vmem:[%s5546_s6 + $0x38] sm:$0xff] %v3562_v43 }
 0x36d PF: > { %s16_s21 = sadd.s32 1, %s4698_s21  }
 0x36e   : > { %p13_p8 = scmp.ge.s32.totalorder %s16_s21, 8  }
 0x370   :  { %15 = sbr.rel (!%p13_p8) target bundleno = 1 (0x1), region = 85 }

</bundles_post_ra>
